<compile_context>
chip_gen: v6e
topology: v6e:2x2x1
jax: 0.10.0
libtpu: 0.0.40
codegen_flags: <defaults>
</compile_context>

<pallas_src>
import functools

import jax
import jax.numpy as jnp
from jax.experimental import pallas as pl
from jax.experimental.pallas import tpu as pltpu

IN_FEATURES = 28 * 28      # 784
HIDDEN = 1200
OUT_FEATURES = 10

K_PAD = 1024               # 784  -> 1024 (256-aligned K for fc1)
H_PAD = 1280               # 1200 -> 1280 (256-aligned K/N for fc1/fc2/fc3)
OUT_PAD = 128              # 10   -> 128  (lane-dense output stores)


def _round_up(x, m):
    return ((x + m - 1) // m) * m


def _teacher_mlp_kernel(x_ref, w1_ref, b1_ref, w2_ref, b2_ref, w3_ref, b3_ref,
                        o_ref):
    # x tile: (TB, K_PAD) bf16, weights bf16 [in, out], biases f32 (1, N).
    x = x_ref[...]

    # fc1 + bias + ReLU (f32 accumulate)
    h1 = jnp.dot(x, w1_ref[...], preferred_element_type=jnp.float32)
    h1 = jnp.maximum(h1 + b1_ref[...], 0.0)
    # dropout(p=0.5, training=False) -> identity

    # fc2 + bias + ReLU
    h2 = jnp.dot(h1.astype(jnp.bfloat16), w2_ref[...],
                 preferred_element_type=jnp.float32)
    h2 = jnp.maximum(h2 + b2_ref[...], 0.0)
    # dropout(p=0.5, training=False) -> identity

    # fc3 (logits, no activation) -- lane-dense (TB, 128) store, padded cols are 0.
    out = jnp.dot(h2.astype(jnp.bfloat16), w3_ref[...],
                  preferred_element_type=jnp.float32)
    o_ref[...] = (out + b3_ref[...]).astype(o_ref.dtype)


def _pad_params(params):
    """Zero-pad weights/biases to (K_PAD,H_PAD)/(H_PAD,H_PAD)/(H_PAD,OUT_PAD).

    Zero padding is exact: padded input features are 0, padded hidden units get
    0 weight + 0 bias -> relu(0)=0, and padded logit columns are 0 (sliced off).
    """
    w1, b1, w2, b2, w3, b3 = params
    w1p = jnp.pad(w1.astype(jnp.bfloat16),
                  ((0, K_PAD - w1.shape[0]), (0, H_PAD - w1.shape[1])))
    w2p = jnp.pad(w2.astype(jnp.bfloat16),
                  ((0, H_PAD - w2.shape[0]), (0, H_PAD - w2.shape[1])))
    w3p = jnp.pad(w3.astype(jnp.bfloat16),
                  ((0, H_PAD - w3.shape[0]), (0, OUT_PAD - w3.shape[1])))
    b1p = jnp.pad(b1.astype(jnp.float32).reshape(1, -1),
                  ((0, 0), (0, H_PAD - b1.size)))
    b2p = jnp.pad(b2.astype(jnp.float32).reshape(1, -1),
                  ((0, 0), (0, H_PAD - b2.size)))
    b3p = jnp.pad(b3.astype(jnp.float32).reshape(1, -1),
                  ((0, 0), (0, OUT_PAD - b3.size)))
    return w1p, b1p, w2p, b2p, w3p, b3p


@functools.partial(jax.jit, static_argnames=("tb",))
def teacher_net_forward(x, params, *, tb=256):
    """x: any shape with trailing elements = 784 per example (e.g. [B,1,28,28])."""
    x2d = x.reshape(-1, IN_FEATURES).astype(jnp.float32)
    B = x2d.shape[0]

    # Batch tile: multiple of 8 (sublanes); pad B up to a multiple of TB.
    TB = min(tb, _round_up(B, 8))
    B_pad = _round_up(B, TB)

    x_pad = jnp.pad(x2d, ((0, B_pad - B), (0, K_PAD - IN_FEATURES)))
    x_bf = x_pad.astype(jnp.bfloat16)

    w1p, b1p, w2p, b2p, w3p, b3p = _pad_params(params)

    grid = (B_pad // TB,)

    def const_spec(shape):
        return pl.BlockSpec(shape, lambda i: tuple(0 for _ in shape))

    # VMEM budget: double-buffered weights + streamed x/out tiles + f32 hidden
    # activations, with a few MiB of headroom, capped at 48 MiB (v7x-safe).
    weight_bytes = (w1p.size + w2p.size + w3p.size) * 2 \
                 + (b1p.size + b2p.size + b3p.size) * 4
    tile_bytes = 2 * (TB * K_PAD * 2 + TB * OUT_PAD * 4)
    act_bytes = 2 * TB * H_PAD * 4
    vmem_limit = min(48 * 1024 * 1024,
                     2 * weight_bytes + tile_bytes + 2 * act_bytes + (8 << 20))

    flops = 2 * B_pad * (K_PAD * H_PAD + H_PAD * H_PAD + H_PAD * OUT_PAD)
    bytes_accessed = (x_bf.size * 2 + weight_bytes + B_pad * OUT_PAD * 4)

    out = pl.pallas_call(
        _teacher_mlp_kernel,
        out_shape=jax.ShapeDtypeStruct((B_pad, OUT_PAD), jnp.float32),
        grid=grid,
        in_specs=[
            pl.BlockSpec((TB, K_PAD), lambda i: (i, 0)),   # x: streamed per tile
            const_spec(w1p.shape), const_spec(b1p.shape),  # weights: resident
            const_spec(w2p.shape), const_spec(b2p.shape),
            const_spec(w3p.shape), const_spec(b3p.shape),
        ],
        out_specs=pl.BlockSpec((TB, OUT_PAD), lambda i: (i, 0)),
        compiler_params=pltpu.CompilerParams(
            dimension_semantics=("parallel",),
            vmem_limit_bytes=int(vmem_limit),
        ),
        cost_estimate=pl.CostEstimate(
            flops=flops, transcendentals=0, bytes_accessed=bytes_accessed),
    )(x_bf, w1p, b1p, w2p, b2p, w3p, b3p)

    return out[:B, :OUT_FEATURES]


def init_params(key):
    """Deterministic synthetic parameters with the teacherNet shapes.

    Weights are stored [in, out] (transpose of PyTorch nn.Linear.weight)."""
    k1, k2, k3, k4, k5, k6 = jax.random.split(key, 6)

    def lin(kw, kb, fan_in, fan_out):
        bound = 1.0 / jnp.sqrt(fan_in)
        w = jax.random.uniform(kw, (fan_in, fan_out), jnp.float32, -bound, bound)
        b = jax.random.uniform(kb, (1, fan_out), jnp.float32, -bound, bound)
        return w, b

    w1, b1 = lin(k1, k2, IN_FEATURES, HIDDEN)
    w2, b2 = lin(k3, k4, HIDDEN, HIDDEN)
    w3, b3 = lin(k5, k6, HIDDEN, OUT_FEATURES)
    return (w1, b1, w2, b2, w3, b3)


def _reference_forward(x, params):
    w1, b1, w2, b2, w3, b3 = params
    h = x.reshape(-1, IN_FEATURES).astype(jnp.float32)
    h = jnp.maximum(h @ w1 + b1, 0.0)
    h = jnp.maximum(h @ w2 + b2, 0.0)
    return h @ w3 + b3


if __name__ == "__main__":
    key = jax.random.PRNGKey(0)
    k_param, k_x = jax.random.split(key)
    params = init_params(k_param)

    # small MNIST-like batch, NCHW as in PyTorch: [B, 1, 28, 28]
    x = jax.random.normal(k_x, (2, 1, 28, 28), dtype=jnp.float32)

    out = teacher_net_forward(x, params)
    out = jax.block_until_ready(out)

    ref = _reference_forward(x, params)
    assert out.shape == (2, 10)
    # bf16 matmul inputs (f32 accumulation) -> loosened tolerance vs fp32 reference.
    assert jnp.allclose(out, ref, atol=5e-2, rtol=5e-2), (
        float(jnp.max(jnp.abs(out - ref))))

    print("KERNEL_OK")
</pallas_src>

<mosaic_0001>
module attributes {stable_mosaic.version = 11 : i64} {
  func.func @_teacher_mlp_kernel(%arg0: i32, %arg1: memref<8x1024xbf16, #tpu.memory_space<vmem>>, %arg2: memref<1024x1280xbf16, #tpu.memory_space<vmem>>, %arg3: memref<1x1280xf32, #tpu.memory_space<vmem>>, %arg4: memref<1280x1280xbf16, #tpu.memory_space<vmem>>, %arg5: memref<1x1280xf32, #tpu.memory_space<vmem>>, %arg6: memref<1280x128xbf16, #tpu.memory_space<vmem>>, %arg7: memref<1x128xf32, #tpu.memory_space<vmem>>, %arg8: memref<8x128xf32, #tpu.memory_space<vmem>>) attributes {dimension_semantics = [#tpu.dimension_semantics<parallel>], iteration_bounds = array<i64: 1>, scalar_prefetch = 0 : i64, scratch_operands = 0 : i64, tpu.core_type = #tpu.core_type<tc>, window_params = [{transform_indices = @transform_0, window_bounds = array<i64: 8, 1024>}, {pipeline_mode = #tpu.pipeline_mode<synchronous>, transform_indices = @transform_1, window_bounds = array<i64: 1024, 1280>}, {pipeline_mode = #tpu.pipeline_mode<synchronous>, transform_indices = @transform_2, window_bounds = array<i64: 1, 1280>}, {pipeline_mode = #tpu.pipeline_mode<synchronous>, transform_indices = @transform_3, window_bounds = array<i64: 1280, 1280>}, {pipeline_mode = #tpu.pipeline_mode<synchronous>, transform_indices = @transform_4, window_bounds = array<i64: 1, 1280>}, {pipeline_mode = #tpu.pipeline_mode<synchronous>, transform_indices = @transform_5, window_bounds = array<i64: 1280, 128>}, {pipeline_mode = #tpu.pipeline_mode<synchronous>, transform_indices = @transform_6, window_bounds = array<i64: 1, 128>}, {transform_indices = @transform_7, window_bounds = array<i64: 8, 128>}]} {
    %c0 = arith.constant 0 : index
    %c0_0 = arith.constant 0 : index
    %0 = vector.load %arg1[%c0, %c0_0] : memref<8x1024xbf16, #tpu.memory_space<vmem>>, vector<8x1024xbf16>
    %c0_1 = arith.constant 0 : index
    %c0_2 = arith.constant 0 : index
    %1 = vector.load %arg2[%c0_1, %c0_2] : memref<1024x1280xbf16, #tpu.memory_space<vmem>>, vector<1024x1280xbf16>
    %cst = arith.constant dense<0.000000e+00> : vector<8x1280xf32>
    %2 = tpu.matmul %0, %1, %cst {dimension_numbers = #tpu.dot_dimension_numbers<[1], [0], [0], [1], [0, 0, 1, 1], [], []>} : vector<8x1024xbf16>, vector<1024x1280xbf16>, vector<8x1280xf32> -> vector<8x1280xf32>
    %c0_3 = arith.constant 0 : index
    %c0_4 = arith.constant 0 : index
    %3 = vector.load %arg3[%c0_3, %c0_4] : memref<1x1280xf32, #tpu.memory_space<vmem>>, vector<1x1280xf32>
    %4 = vector.broadcast %3 : vector<1x1280xf32> to vector<8x1280xf32>
    %5 = arith.addf %2, %4 : vector<8x1280xf32>
    %cst_5 = arith.constant 0.000000e+00 : f32
    %6 = vector.broadcast %cst_5 : f32 to vector<8x1280xf32>
    %7 = arith.maximumf %5, %6 : vector<8x1280xf32>
    %8 = arith.truncf %7 : vector<8x1280xf32> to vector<8x1280xbf16>
    %c0_6 = arith.constant 0 : index
    %c0_7 = arith.constant 0 : index
    %9 = vector.load %arg4[%c0_6, %c0_7] : memref<1280x1280xbf16, #tpu.memory_space<vmem>>, vector<1280x1280xbf16>
    %cst_8 = arith.constant dense<0.000000e+00> : vector<8x1280xf32>
    %10 = tpu.matmul %8, %9, %cst_8 {dimension_numbers = #tpu.dot_dimension_numbers<[1], [0], [0], [1], [0, 0, 1, 1], [], []>} : vector<8x1280xbf16>, vector<1280x1280xbf16>, vector<8x1280xf32> -> vector<8x1280xf32>
    %c0_9 = arith.constant 0 : index
    %c0_10 = arith.constant 0 : index
    %11 = vector.load %arg5[%c0_9, %c0_10] : memref<1x1280xf32, #tpu.memory_space<vmem>>, vector<1x1280xf32>
    %12 = vector.broadcast %11 : vector<1x1280xf32> to vector<8x1280xf32>
    %13 = arith.addf %10, %12 : vector<8x1280xf32>
    %cst_11 = arith.constant 0.000000e+00 : f32
    %14 = vector.broadcast %cst_11 : f32 to vector<8x1280xf32>
    %15 = arith.maximumf %13, %14 : vector<8x1280xf32>
    %16 = arith.truncf %15 : vector<8x1280xf32> to vector<8x1280xbf16>
    %c0_12 = arith.constant 0 : index
    %c0_13 = arith.constant 0 : index
    %17 = vector.load %arg6[%c0_12, %c0_13] : memref<1280x128xbf16, #tpu.memory_space<vmem>>, vector<1280x128xbf16>
    %cst_14 = arith.constant dense<0.000000e+00> : vector<8x128xf32>
    %18 = tpu.matmul %16, %17, %cst_14 {dimension_numbers = #tpu.dot_dimension_numbers<[1], [0], [0], [1], [0, 0, 1, 1], [], []>} : vector<8x1280xbf16>, vector<1280x128xbf16>, vector<8x128xf32> -> vector<8x128xf32>
    %c0_15 = arith.constant 0 : index
    %c0_16 = arith.constant 0 : index
    %19 = vector.load %arg7[%c0_15, %c0_16] : memref<1x128xf32, #tpu.memory_space<vmem>>, vector<1x128xf32>
    %20 = vector.broadcast %19 : vector<1x128xf32> to vector<8x128xf32>
    %21 = arith.addf %18, %20 : vector<8x128xf32>
    %c0_17 = arith.constant 0 : index
    %c0_18 = arith.constant 0 : index
    %22 = vector.load %arg8[%c0_17, %c0_18] : memref<8x128xf32, #tpu.memory_space<vmem>>, vector<8x128xf32>
    tpu.vector_store %arg8[%c0_17, %c0_18], %21 {strides = array<i32>} : memref<8x128xf32, #tpu.memory_space<vmem>>, vector<8x128xf32>,
    return
  }
  func.func @transform_0(%arg0: i32) -> (i32, i32) {
    %c0_i32 = arith.constant 0 : i32
    %c0_i32_0 = arith.constant 0 : i32
    return %arg0, %c0_i32 : i32, i32
  }
  func.func @transform_1(%arg0: i32) -> (i32, i32) {
    %c0_i32 = arith.constant 0 : i32
    %c0_i32_0 = arith.constant 0 : i32
    %c0_i32_1 = arith.constant 0 : i32
    return %c0_i32, %c0_i32_0 : i32, i32
  }
  func.func @transform_2(%arg0: i32) -> (i32, i32) {
    %c0_i32 = arith.constant 0 : i32
    %c0_i32_0 = arith.constant 0 : i32
    %c0_i32_1 = arith.constant 0 : i32
    return %c0_i32, %c0_i32_0 : i32, i32
  }
  func.func @transform_3(%arg0: i32) -> (i32, i32) {
    %c0_i32 = arith.constant 0 : i32
    %c0_i32_0 = arith.constant 0 : i32
    %c0_i32_1 = arith.constant 0 : i32
    return %c0_i32, %c0_i32_0 : i32, i32
  }
  func.func @transform_4(%arg0: i32) -> (i32, i32) {
    %c0_i32 = arith.constant 0 : i32
    %c0_i32_0 = arith.constant 0 : i32
    %c0_i32_1 = arith.constant 0 : i32
    return %c0_i32, %c0_i32_0 : i32, i32
  }
  func.func @transform_5(%arg0: i32) -> (i32, i32) {
    %c0_i32 = arith.constant 0 : i32
    %c0_i32_0 = arith.constant 0 : i32
    %c0_i32_1 = arith.constant 0 : i32
    return %c0_i32, %c0_i32_0 : i32, i32
  }
  func.func @transform_6(%arg0: i32) -> (i32, i32) {
    %c0_i32 = arith.constant 0 : i32
    %c0_i32_0 = arith.constant 0 : i32
    %c0_i32_1 = arith.constant 0 : i32
    return %c0_i32, %c0_i32_0 : i32, i32
  }
  func.func @transform_7(%arg0: i32) -> (i32, i32) {
    %c0_i32 = arith.constant 0 : i32
    %c0_i32_0 = arith.constant 0 : i32
    return %arg0, %c0_i32 : i32, i32
  }
}

</mosaic_0001>

<bundles_post_ra>
// kernel: teacher_net_forward.1
= control target key start
LH: loop header
LB: loop body
LE: loop exit
PB: predicated region body
PF: predicated region fallthrough
CT: control target
= control target key end

     0   :  { %s20409_s1 = inlined_call_operand.vmem [shape: bf16[1024,1280], index: 1, kind: input, shape index: {}]   ;;  %s20410_s0 = inlined_call_operand.vmem [shape: bf16[8,1024], index: 0, kind: input, shape index: {}]   ;;  %s20411_s2 = inlined_call_operand.vmem [shape: f32[1,1280], index: 2, kind: input, shape index: {}]   ;;  %s20412_s3 = inlined_call_operand.vmem [shape: bf16[1280,1280], index: 3, kind: input, shape index: {}]   ;;  %s20413_s4 = inlined_call_operand.vmem [shape: f32[1,1280], index: 4, kind: input, shape index: {}]   ;;  %s20414_s5 = inlined_call_operand.vmem [shape: bf16[1280,128], index: 5, kind: input, shape index: {}]   ;;  %s20415_s6 = inlined_call_operand.vmem [shape: f32[1,128], index: 6, kind: input, shape index: {}]   ;;  %s20416_s7 = inlined_call_operand.vmem [shape: f32[8,128], index: 7, kind: output, shape index: {}]  }
   0x1   :  { %v13183_v0 = vld [vmem:[%s20409_s1 + $0x234] ss:$40 sps:$4 sm:$0xff]   ;;  %v13187_v2 = vld [vmem:[%s20409_s1 + $0x230] ss:$40 sps:$4 sm:$0xff]   ;;  %v13189_v4 = vld [vmem:[%s20409_s1 + $0x1e4] ss:$40 sps:$4 sm:$0xff]  }
   0x2   :  { %v13185_v1 = vld [vmem:[%s20409_s1 + $0x734] ss:$40 sps:$4 sm:$0xff]   ;;  %3953 = vmatprep.subr.bf16.mxu0 %v13183_v0  ;;  %v13188_v3 = vld [vmem:[%s20409_s1 + $0x730] ss:$40 sps:$4 sm:$0xff]   ;;  %v13191_v5 = vld [vmem:[%s20409_s1 + $0x6e4] ss:$40 sps:$4 sm:$0xff]  }
   0x3   :  { %3994 = vmatprep.subr.bf16.mxu1 %v13185_v1  ;;  %3954 = vmatpush1.bf16.msra.mxu0 %v13187_v2  ;;  %v13193_v6 = vld [vmem:[%s20409_s1 + $0x1e0] ss:$40 sps:$4 sm:$0xff]   ;;  %v13195_v8 = vld [vmem:[%s20409_s1 + $0x194] ss:$40 sps:$4 sm:$0xff]   ;;  %v13199_v10 = vld [vmem:[%s20409_s1 + $0x190] ss:$40 sps:$4 sm:$0xff]  }
   0x4   :  { %3995 = vmatpush1.bf16.msra.mxu1 %v13188_v3  ;;  %3955 = vmatprep.subr.bf16.mxu0 %v13189_v4  ;;  %v13194_v7 = vld [vmem:[%s20409_s1 + $0x6e0] ss:$40 sps:$4 sm:$0xff]   ;;  %v13197_v9 = vld [vmem:[%s20409_s1 + $0x694] ss:$40 sps:$4 sm:$0xff]   ;;  %v13200_v11 = vld [vmem:[%s20409_s1 + $0x690] ss:$40 sps:$4 sm:$0xff]  }
   0x5   :  { %3996 = vmatprep.subr.bf16.mxu1 %v13191_v5  ;;  %v13201_v12 = vld [vmem:[%s20409_s1 + $0x144] ss:$40 sps:$4 sm:$0xff]   ;;  %v13205_v14 = vld [vmem:[%s20409_s1 + $0x140] ss:$40 sps:$4 sm:$0xff]   ;;  %v13207_v16 = vld [vmem:[%s20409_s1 + $0xf4] ss:$40 sps:$4 sm:$0xff]  }
   0x6   :  { %v13203_v13 = vld [vmem:[%s20409_s1 + $0x644] ss:$40 sps:$4 sm:$0xff]   ;;  %v13206_v15 = vld [vmem:[%s20409_s1 + $0x640] ss:$40 sps:$4 sm:$0xff]   ;;  %v13209_v17 = vld [vmem:[%s20409_s1 + $0x5f4] ss:$40 sps:$4 sm:$0xff]  }
   0x7   :  { %3956 = vmatpush1.bf16.msra.mxu0 %v13193_v6  ;;  %v13211_v18 = vld [vmem:[%s20409_s1 + $0xf0] ss:$40 sps:$4 sm:$0xff]   ;;  %v13213_v20 = vld [vmem:[%s20409_s1 + $0xa4] ss:$40 sps:$4 sm:$0xff]   ;;  %v13217_v22 = vld [vmem:[%s20409_s1 + $0xa0] ss:$40 sps:$4 sm:$0xff]  }
   0x8   :  { %3997 = vmatpush1.bf16.msra.mxu1 %v13194_v7  ;;  %3957 = vmatprep.subr.bf16.mxu0 %v13195_v8  ;;  %v13212_v19 = vld [vmem:[%s20409_s1 + $0x5f0] ss:$40 sps:$4 sm:$0xff]   ;;  %v13215_v21 = vld [vmem:[%s20409_s1 + $0x5a4] ss:$40 sps:$4 sm:$0xff]   ;;  %v13218_v23 = vld [vmem:[%s20409_s1 + $0x5a0] ss:$40 sps:$4 sm:$0xff]  }
   0x9   :  { %3998 = vmatprep.subr.bf16.mxu1 %v13197_v9  ;;  %v13219_v24 = vld [vmem:[%s20409_s1 + $0x54] ss:$40 sps:$4 sm:$0xff]   ;;  %v13223_v26 = vld [vmem:[%s20409_s1 + $0x50] ss:$40 sps:$4 sm:$0xff]   ;;  %v13225_v28 = vld [vmem:[%s20409_s1 + $0x4] ss:$40 sps:$4 sm:$0xff]  }
   0xa   :  { %v13221_v25 = vld [vmem:[%s20409_s1 + $0x554] ss:$40 sps:$4 sm:$0xff]   ;;  %v13224_v27 = vld [vmem:[%s20409_s1 + $0x550] ss:$40 sps:$4 sm:$0xff]   ;;  %v13227_v29 = vld [vmem:[%s20409_s1 + $0x504] ss:$40 sps:$4 sm:$0xff]  }
   0xb   :  { %3958 = vmatpush1.bf16.msra.mxu0 %v13199_v10  ;;  %v13229_v30 = vld [vmem:[%s20409_s1] ss:$40 sps:$4 sm:$0xff]   ;;  %v13231_v32 = vld [vmem:[%s20409_s1 + $0x4b4] ss:$40 sps:$4 sm:$0xff]   ;;  %v13235_v34 = vld [vmem:[%s20409_s1 + $0x4b0] ss:$40 sps:$4 sm:$0xff]  }
   0xc   :  { %3999 = vmatpush1.bf16.msra.mxu1 %v13200_v11  ;;  %3959 = vmatprep.subr.bf16.mxu0 %v13201_v12  ;;  %v13230_v31 = vld [vmem:[%s20409_s1 + $0x500] ss:$40 sps:$4 sm:$0xff]   ;;  %v13233_v33 = vld [vmem:[%s20409_s1 + $0x9b4] ss:$40 sps:$4 sm:$0xff]   ;;  %v13236_v35 = vld [vmem:[%s20409_s1 + $0x9b0] ss:$40 sps:$4 sm:$0xff]  }
   0xd   :  { %4000 = vmatprep.subr.bf16.mxu1 %v13203_v13  ;;  %v13237_v36 = vld [vmem:[%s20409_s1 + $0x464] ss:$40 sps:$4 sm:$0xff]   ;;  %v13241_v38 = vld [vmem:[%s20409_s1 + $0x460] ss:$40 sps:$4 sm:$0xff]   ;;  %v13243_v40 = vld [vmem:[%s20409_s1 + $0x414] ss:$40 sps:$4 sm:$0xff]  }
   0xe   :  { %v13239_v37 = vld [vmem:[%s20409_s1 + $0x964] ss:$40 sps:$4 sm:$0xff]   ;;  %v13242_v39 = vld [vmem:[%s20409_s1 + $0x960] ss:$40 sps:$4 sm:$0xff]   ;;  %v13245_v41 = vld [vmem:[%s20409_s1 + $0x914] ss:$40 sps:$4 sm:$0xff]  }
   0xf   :  { %3960 = vmatpush1.bf16.msra.mxu0 %v13205_v14  ;;  %v13247_v42 = vld [vmem:[%s20409_s1 + $0x410] ss:$40 sps:$4 sm:$0xff]   ;;  %v13249_v44 = vld [vmem:[%s20409_s1 + $0x3c4] ss:$40 sps:$4 sm:$0xff]   ;;  %v13253_v49 = vld [vmem:[%s20409_s1 + $0x3c0] ss:$40 sps:$4 sm:$0xff]  }
  0x10   :  { %4001 = vmatpush1.bf16.msra.mxu1 %v13206_v15  ;;  %3961 = vmatprep.subr.bf16.mxu0 %v13207_v16  ;;  %v13248_v43 = vld [vmem:[%s20409_s1 + $0x910] ss:$40 sps:$4 sm:$0xff]   ;;  %v13251_v45 = vld [vmem:[%s20409_s1 + $0x8c4] ss:$40 sps:$4 sm:$0xff]   ;;  %v13254_v50 = vld [vmem:[%s20409_s1 + $0x8c0] ss:$40 sps:$4 sm:$0xff]  }
  0x11   :  { %4002 = vmatprep.subr.bf16.mxu1 %v13209_v17  ;;  %v27_v46 = vld [vmem:[%s20410_s0] sm:$0xff]  ;;  %v28_v48 = vld [vmem:[%s20410_s0 + $0x8] sm:$0xff]  ;;  %v13255_v52 = vld [vmem:[%s20409_s1 + $0x374] ss:$40 sps:$4 sm:$0xff]  }
  0x12   :  { %v15616_v47 = vcombine.high %v27_v46, %v27_v46  ;;  %v15627_v51 = vcombine.high %v28_v48, %v28_v48  ;;  %v13257_v53 = vld [vmem:[%s20409_s1 + $0x874] ss:$40 sps:$4 sm:$0xff]   ;;  %v13259_v54 = vld [vmem:[%s20409_s1 + $0x370] ss:$40 sps:$4 sm:$0xff]   ;;  %v13261_v56 = vld [vmem:[%s20409_s1 + $0x324] ss:$40 sps:$4 sm:$0xff]   ;;  %v15685_v6 = vcombine.low %v27_v46, %v27_v46  ;;  %v15687_v7 = vcombine.low %v28_v48, %v28_v48 }
  0x13   :  { %3962 = vmatpush1.bf16.msra.mxu0 %v13211_v18  ;;  %v13260_v55 = vld [vmem:[%s20409_s1 + $0x870] ss:$40 sps:$4 sm:$0xff]   ;;  %v13263_v57 = vld [vmem:[%s20409_s1 + $0x824] ss:$40 sps:$4 sm:$0xff]   ;;  %v13265_v58 = vld [vmem:[%s20409_s1 + $0x320] ss:$40 sps:$4 sm:$0xff]  }
  0x14   :  { %4003 = vmatpush1.bf16.msra.mxu1 %v13212_v19  ;;  %3963 = vmatprep.subr.bf16.mxu0 %v13213_v20  ;;  %v13266_v59 = vld [vmem:[%s20409_s1 + $0x820] ss:$40 sps:$4 sm:$0xff]   ;;  %v13267_v60 = vld [vmem:[%s20409_s1 + $0x2d4] ss:$40 sps:$4 sm:$0xff]   ;;  %v13271_v62 = vld [vmem:[%s20409_s1 + $0x2d0] ss:$40 sps:$4 sm:$0xff]  }
  0x15   :  { %4004 = vmatprep.subr.bf16.mxu1 %v13215_v21  ;;  %3985 = vmatprep.mubr.bf16.mxu0 %v15616_v47  ;;  %v13269_v61 = vld [vmem:[%s20409_s1 + $0x7d4] ss:$40 sps:$4 sm:$0xff]   ;;  %v13272_v63 = vld [vmem:[%s20409_s1 + $0x7d0] ss:$40 sps:$4 sm:$0xff]   ;;  %v13273_v0 = vld [vmem:[%s20409_s1 + $0x284] ss:$40 sps:$4 sm:$0xff]  }
  0x16   :  { %4026 = vmatprep.mubr.bf16.mxu1 %v15627_v51  ;;  %v13275_v1 = vld [vmem:[%s20409_s1 + $0x784] ss:$40 sps:$4 sm:$0xff]   ;;  %v13277_v2 = vld [vmem:[%s20409_s1 + $0x280] ss:$40 sps:$4 sm:$0xff]   ;;  %v13285_v4 = vld [vmem:[%s20409_s1 + $0xc34] ss:$40 sps:$4 sm:$0xff]  }
  0x17   :  { %3964 = vmatpush1.bf16.msra.mxu0 %v13217_v22  ;;  %v13278_v3 = vld [vmem:[%s20409_s1 + $0x780] ss:$40 sps:$4 sm:$0xff]   ;;  %v13288_v5 = vld [vmem:[%s20409_s1 + $0x1134] ss:$40 sps:$4 sm:$0xff]   ;;  %v13283_v8 = vld [vmem:[%s20409_s1 + $0xc30] ss:$40 sps:$4 sm:$0xff]  }
  0x18   :  { %4005 = vmatpush1.bf16.msra.mxu1 %v13218_v23  ;;  %3965 = vmatprep.subr.bf16.mxu0 %v13219_v24  ;;  %v13286_v9 = vld [vmem:[%s20409_s1 + $0x1130] ss:$40 sps:$4 sm:$0xff]   ;;  %v13291_v10 = vld [vmem:[%s20409_s1 + $0xbe4] ss:$40 sps:$4 sm:$0xff]   ;;  %v13289_v12 = vld [vmem:[%s20409_s1 + $0xbe0] ss:$40 sps:$4 sm:$0xff]  }
  0x19   :  { %4006 = vmatprep.subr.bf16.mxu1 %v13221_v25  ;;  %v13294_v11 = vld [vmem:[%s20409_s1 + $0x10e4] ss:$40 sps:$4 sm:$0xff]   ;;  %v13292_v13 = vld [vmem:[%s20409_s1 + $0x10e0] ss:$40 sps:$4 sm:$0xff]   ;;  %v13297_v14 = vld [vmem:[%s20409_s1 + $0xb94] ss:$40 sps:$4 sm:$0xff]  }
  0x1a   :  { %v13300_v15 = vld [vmem:[%s20409_s1 + $0x1094] ss:$40 sps:$4 sm:$0xff]   ;;  %v13295_v16 = vld [vmem:[%s20409_s1 + $0xb90] ss:$40 sps:$4 sm:$0xff]   ;;  %v13303_v18 = vld [vmem:[%s20409_s1 + $0xb44] ss:$40 sps:$4 sm:$0xff]  }
  0x1b   :  { %3966 = vmatpush1.bf16.msra.mxu0 %v13223_v26  ;;  %v13298_v17 = vld [vmem:[%s20409_s1 + $0x1090] ss:$40 sps:$4 sm:$0xff]   ;;  %v13306_v19 = vld [vmem:[%s20409_s1 + $0x1044] ss:$40 sps:$4 sm:$0xff]   ;;  %v13301_v20 = vld [vmem:[%s20409_s1 + $0xb40] ss:$40 sps:$4 sm:$0xff]  }
  0x1c   :  { %4007 = vmatpush1.bf16.msra.mxu1 %v13224_v27  ;;  %3967 = vmatprep.subr.bf16.mxu0 %v13225_v28  ;;  %v13304_v21 = vld [vmem:[%s20409_s1 + $0x1040] ss:$40 sps:$4 sm:$0xff]   ;;  %v13309_v22 = vld [vmem:[%s20409_s1 + $0xaf4] ss:$40 sps:$4 sm:$0xff]   ;;  %v13307_v24 = vld [vmem:[%s20409_s1 + $0xaf0] ss:$40 sps:$4 sm:$0xff]  }
  0x1d   :  { %4008 = vmatprep.subr.bf16.mxu1 %v13227_v29  ;;  %v13312_v23 = vld [vmem:[%s20409_s1 + $0xff4] ss:$40 sps:$4 sm:$0xff]   ;;  %v13310_v25 = vld [vmem:[%s20409_s1 + $0xff0] ss:$40 sps:$4 sm:$0xff]   ;;  %v13315_v26 = vld [vmem:[%s20409_s1 + $0xaa4] ss:$40 sps:$4 sm:$0xff]  }
  0x1e   :  { %v13318_v27 = vld [vmem:[%s20409_s1 + $0xfa4] ss:$40 sps:$4 sm:$0xff]   ;;  %v13313_v28 = vld [vmem:[%s20409_s1 + $0xaa0] ss:$40 sps:$4 sm:$0xff]  }
  0x1f   :  { %3968 = vmatpush1.bf16.msra.mxu0 %v13229_v30  ;;  %v13316_v29 = vld [vmem:[%s20409_s1 + $0xfa0] ss:$40 sps:$4 sm:$0xff]   ;;  %v13321_v30 = vld [vmem:[%s20409_s1 + $0xa54] ss:$40 sps:$4 sm:$0xff]   ;;  %v13339_v46 = vld [vmem:[%s20409_s1 + $0xe64] ss:$40 sps:$4 sm:$0xff]  }
  0x20   :  { %4009 = vmatpush1.bf16.msra.mxu1 %v13230_v31  ;;  %3969 = vmatprep.subr.bf16.mxu0 %v13231_v32  ;;  %v13324_v31 = vld [vmem:[%s20409_s1 + $0xf54] ss:$40 sps:$4 sm:$0xff]   ;;  %v13342_v48 = vld [vmem:[%s20409_s1 + $0x1364] ss:$40 sps:$4 sm:$0xff]  }
  0x21   :  { %4010 = vmatprep.subr.bf16.mxu1 %v13233_v33  ;;  %v15766_v32 = vld [vmem:[%s20410_s0 + $0x10] sm:$0xff]  ;;  %v15771_v33 = vld [vmem:[%s20410_s0 + $0x18] sm:$0xff] }
  0x23   :  { %3970 = vmatpush2.bf16.msra.mxu0 %v13235_v34  ;;  %v13319_v34 = vld [vmem:[%s20409_s1 + $0xa50] ss:$40 sps:$4 sm:$0xff]  }
  0x24   :  { %4011 = vmatpush2.bf16.msra.mxu1 %v13236_v35  ;;  %3971 = vmatprep.subr.bf16.mxu0 %v13237_v36  ;;  %v13322_v35 = vld [vmem:[%s20409_s1 + $0xf50] ss:$40 sps:$4 sm:$0xff]   ;;  %v15781_v36 = vcombine.high %v15766_v32, %v15766_v32 }
  0x25   :  { %4012 = vmatprep.subr.bf16.mxu1 %v13239_v37  ;;  %v15785_v37 = vcombine.high %v15771_v33, %v15771_v33 }
  0x27   :  { %3972 = vmatpush2.bf16.msra.mxu0 %v13241_v38  ;;  %v13327_v38 = vld [vmem:[%s20409_s1 + $0xa04] ss:$40 sps:$4 sm:$0xff]  }
  0x28   :  { %4013 = vmatpush2.bf16.msra.mxu1 %v13242_v39  ;;  %3973 = vmatprep.subr.bf16.mxu0 %v13243_v40  ;;  %v13330_v39 = vld [vmem:[%s20409_s1 + $0xf04] ss:$40 sps:$4 sm:$0xff]   ;;  %v13325_v40 = vld [vmem:[%s20409_s1 + $0xa00] ss:$40 sps:$4 sm:$0xff]  }
  0x29   :  { %4014 = vmatprep.subr.bf16.mxu1 %v13245_v41  ;;  %v13328_v41 = vld [vmem:[%s20409_s1 + $0xf00] ss:$40 sps:$4 sm:$0xff]  }
  0x2b   :  { %3974 = vmatpush2.bf16.msra.mxu0 %v13247_v42  ;;  %v13333_v42 = vld [vmem:[%s20409_s1 + $0xeb4] ss:$40 sps:$4 sm:$0xff]  }
  0x2c   :  { %4015 = vmatpush2.bf16.msra.mxu1 %v13248_v43  ;;  %3975 = vmatprep.subr.bf16.mxu0 %v13249_v44  ;;  %v13336_v43 = vld [vmem:[%s20409_s1 + $0x13b4] ss:$40 sps:$4 sm:$0xff]   ;;  %v13331_v44 = vld [vmem:[%s20409_s1 + $0xeb0] ss:$40 sps:$4 sm:$0xff]  }
  0x2d   :  { %4016 = vmatprep.subr.bf16.mxu1 %v13251_v45  ;;  %v13334_v45 = vld [vmem:[%s20409_s1 + $0x13b0] ss:$40 sps:$4 sm:$0xff]  }
  0x2f   :  { %3976 = vmatpush2.bf16.msra.mxu0 %v13253_v49  ;;  %v13337_v49 = vld [vmem:[%s20409_s1 + $0xe60] ss:$40 sps:$4 sm:$0xff]  }
  0x30   :  { %4017 = vmatpush2.bf16.msra.mxu1 %v13254_v50  ;;  %3977 = vmatprep.subr.bf16.mxu0 %v13255_v52  ;;  %v13340_v50 = vld [vmem:[%s20409_s1 + $0x1360] ss:$40 sps:$4 sm:$0xff]   ;;  %v13345_v52 = vld [vmem:[%s20409_s1 + $0xe14] ss:$40 sps:$4 sm:$0xff]  }
  0x31   :  { %4018 = vmatprep.subr.bf16.mxu1 %v13257_v53  ;;  %v13348_v53 = vld [vmem:[%s20409_s1 + $0x1314] ss:$40 sps:$4 sm:$0xff]  }
  0x33   :  { %3978 = vmatpush2.bf16.msra.mxu0 %v13259_v54  ;;  %v13343_v54 = vld [vmem:[%s20409_s1 + $0xe10] ss:$40 sps:$4 sm:$0xff]  }
  0x34   :  { %4019 = vmatpush2.bf16.msra.mxu1 %v13260_v55  ;;  %3979 = vmatprep.subr.bf16.mxu0 %v13261_v56  ;;  %v13346_v55 = vld [vmem:[%s20409_s1 + $0x1310] ss:$40 sps:$4 sm:$0xff]   ;;  %v13351_v56 = vld [vmem:[%s20409_s1 + $0xdc4] ss:$40 sps:$4 sm:$0xff]  }
  0x35   :  { %4020 = vmatprep.subr.bf16.mxu1 %v13263_v57  ;;  %v13354_v57 = vld [vmem:[%s20409_s1 + $0x12c4] ss:$40 sps:$4 sm:$0xff]  }
  0x37   :  { %3980 = vmatpush2.bf16.msra.mxu0 %v13265_v58  ;;  %v13349_v58 = vld [vmem:[%s20409_s1 + $0xdc0] ss:$40 sps:$4 sm:$0xff]  }
  0x38   :  { %4021 = vmatpush2.bf16.msra.mxu1 %v13266_v59  ;;  %3981 = vmatprep.subr.bf16.mxu0 %v13267_v60  ;;  %v13352_v59 = vld [vmem:[%s20409_s1 + $0x12c0] ss:$40 sps:$4 sm:$0xff]   ;;  %v13357_v60 = vld [vmem:[%s20409_s1 + $0xd74] ss:$40 sps:$4 sm:$0xff]  }
  0x39   :  { %4022 = vmatprep.subr.bf16.mxu1 %v13269_v61  ;;  %v13360_v61 = vld [vmem:[%s20409_s1 + $0x1274] ss:$40 sps:$4 sm:$0xff]  }
  0x3b   :  { %3982 = vmatpush2.bf16.msra.mxu0 %v13271_v62  ;;  %v13355_v62 = vld [vmem:[%s20409_s1 + $0xd70] ss:$40 sps:$4 sm:$0xff]  }
  0x3c   :  { %4023 = vmatpush2.bf16.msra.mxu1 %v13272_v63  ;;  %3983 = vmatprep.subr.bf16.mxu0 %v13273_v0  ;;  %v13358_v63 = vld [vmem:[%s20409_s1 + $0x1270] ss:$40 sps:$4 sm:$0xff]   ;;  %v13363_v0 = vld [vmem:[%s20409_s1 + $0xd24] ss:$40 sps:$4 sm:$0xff]  }
  0x3d   :  { %4024 = vmatprep.subr.bf16.mxu1 %v13275_v1  ;;  %v13366_v1 = vld [vmem:[%s20409_s1 + $0x1224] ss:$40 sps:$4 sm:$0xff]  }
  0x3f   :  { %3984 = vmatpush2.bf16.msra.mxu0 %v13277_v2  ;;  %v13361_v2 = vld [vmem:[%s20409_s1 + $0xd20] ss:$40 sps:$4 sm:$0xff]  }
  0x40   :  { %4025 = vmatpush2.bf16.msra.mxu1 %v13278_v3  ;;  %4035 = vmatprep.subr.bf16.mxu0 %v13285_v4  ;;  %v13364_v3 = vld [vmem:[%s20409_s1 + $0x1220] ss:$40 sps:$4 sm:$0xff]   ;;  %v13369_v4 = vld [vmem:[%s20409_s1 + $0xcd4] ss:$40 sps:$4 sm:$0xff]  }
  0x41   :  { %4076 = vmatprep.subr.bf16.mxu1 %v13288_v5  ;;  %v13372_v5 = vld [vmem:[%s20409_s1 + $0x11d4] ss:$40 sps:$4 sm:$0xff]  }
  0x42   :  { %3986 = vmatmul.mubr.bf16.vlgmr.msra.gmra.mxu0 %v15685_v6 }
  0x43   :  { %4027 = vmatmul.mubr.bf16.vlgmr.msra.gmra.mxu1 %v15687_v7  ;;  %4036 = vmatpush1.bf16.msra.mxu0 %v13283_v8  ;;  %v13367_v8 = vld [vmem:[%s20409_s1 + $0xcd0] ss:$40 sps:$4 sm:$0xff]  }
  0x44   :  { %4077 = vmatpush1.bf16.msra.mxu1 %v13286_v9  ;;  %4037 = vmatprep.subr.bf16.mxu0 %v13291_v10  ;;  %v13370_v9 = vld [vmem:[%s20409_s1 + $0x11d0] ss:$40 sps:$4 sm:$0xff]   ;;  %v13375_v10 = vld [vmem:[%s20409_s1 + $0xc84] ss:$40 sps:$4 sm:$0xff]  }
  0x45   :  { %4078 = vmatprep.subr.bf16.mxu1 %v13294_v11  ;;  %4067 = vmatprep.mubr.bf16.mxu0 %v15781_v36  ;;  %v13378_v11 = vld [vmem:[%s20409_s1 + $0x1184] ss:$40 sps:$4 sm:$0xff]  }
  0x46   :  { %4108 = vmatprep.mubr.bf16.mxu1 %v15785_v37 }
  0x47   :  { %4038 = vmatpush1.bf16.msra.mxu0 %v13289_v12  ;;  %v13373_v12 = vld [vmem:[%s20409_s1 + $0xc80] ss:$40 sps:$4 sm:$0xff]  }
  0x48   :  { %4079 = vmatpush1.bf16.msra.mxu1 %v13292_v13  ;;  %4039 = vmatprep.subr.bf16.mxu0 %v13297_v14  ;;  %v13376_v13 = vld [vmem:[%s20409_s1 + $0x1180] ss:$40 sps:$4 sm:$0xff]   ;;  %v13385_v14 = vld [vmem:[%s20409_s1 + $0x23c] ss:$40 sps:$4 sm:$0xff]  }
  0x49   :  { %4080 = vmatprep.subr.bf16.mxu1 %v13300_v15  ;;  %v13388_v15 = vld [vmem:[%s20409_s1 + $0x73c] ss:$40 sps:$4 sm:$0xff]  }
  0x4b   :  { %4040 = vmatpush1.bf16.msra.mxu0 %v13295_v16  ;;  %v15905_v16 = vcombine.low %v15766_v32, %v15766_v32  ;;  %v13409_v32 = vld [vmem:[%s20409_s1 + $0xfc] ss:$40 sps:$4 sm:$0xff]  }
  0x4c   :  { %4081 = vmatpush1.bf16.msra.mxu1 %v13298_v17  ;;  %4041 = vmatprep.subr.bf16.mxu0 %v13303_v18  ;;  %v15909_v17 = vcombine.low %v15771_v33, %v15771_v33  ;;  %v13383_v18 = vld [vmem:[%s20409_s1 + $0x238] ss:$40 sps:$4 sm:$0xff]   ;;  %v13412_v33 = vld [vmem:[%s20409_s1 + $0x5fc] ss:$40 sps:$4 sm:$0xff]  }
  0x4d   :  { %4082 = vmatprep.subr.bf16.mxu1 %v13306_v19  ;;  %v13386_v19 = vld [vmem:[%s20409_s1 + $0x738] ss:$40 sps:$4 sm:$0xff]  }
  0x4f   :  { %4042 = vmatpush1.bf16.msra.mxu0 %v13301_v20  ;;  %v13391_v20 = vld [vmem:[%s20409_s1 + $0x1ec] ss:$40 sps:$4 sm:$0xff]  }
  0x50   :  { %4083 = vmatpush1.bf16.msra.mxu1 %v13304_v21  ;;  %4043 = vmatprep.subr.bf16.mxu0 %v13309_v22  ;;  %v13394_v21 = vld [vmem:[%s20409_s1 + $0x6ec] ss:$40 sps:$4 sm:$0xff]   ;;  %v13389_v22 = vld [vmem:[%s20409_s1 + $0x1e8] ss:$40 sps:$4 sm:$0xff]  }
  0x51   :  { %4084 = vmatprep.subr.bf16.mxu1 %v13312_v23  ;;  %v13392_v23 = vld [vmem:[%s20409_s1 + $0x6e8] ss:$40 sps:$4 sm:$0xff]  }
  0x53   :  { %4044 = vmatpush1.bf16.msra.mxu0 %v13307_v24  ;;  %v13397_v24 = vld [vmem:[%s20409_s1 + $0x19c] ss:$40 sps:$4 sm:$0xff]  }
  0x54   :  { %4085 = vmatpush1.bf16.msra.mxu1 %v13310_v25  ;;  %4045 = vmatprep.subr.bf16.mxu0 %v13315_v26  ;;  %v13400_v25 = vld [vmem:[%s20409_s1 + $0x69c] ss:$40 sps:$4 sm:$0xff]   ;;  %v13395_v26 = vld [vmem:[%s20409_s1 + $0x198] ss:$40 sps:$4 sm:$0xff]  }
  0x55   :  { %4086 = vmatprep.subr.bf16.mxu1 %v13318_v27  ;;  %v13398_v27 = vld [vmem:[%s20409_s1 + $0x698] ss:$40 sps:$4 sm:$0xff]  }
  0x57   :  { %4046 = vmatpush1.bf16.msra.mxu0 %v13313_v28  ;;  %v13403_v28 = vld [vmem:[%s20409_s1 + $0x14c] ss:$40 sps:$4 sm:$0xff]  }
  0x58   :  { %4087 = vmatpush1.bf16.msra.mxu1 %v13316_v29  ;;  %4047 = vmatprep.subr.bf16.mxu0 %v13321_v30  ;;  %v13406_v29 = vld [vmem:[%s20409_s1 + $0x64c] ss:$40 sps:$4 sm:$0xff]   ;;  %v13401_v30 = vld [vmem:[%s20409_s1 + $0x148] ss:$40 sps:$4 sm:$0xff]  }
  0x59   :  { %4088 = vmatprep.subr.bf16.mxu1 %v13324_v31  ;;  %v13404_v31 = vld [vmem:[%s20409_s1 + $0x648] ss:$40 sps:$4 sm:$0xff]  }
  0x5b   :  { %4048 = vmatpush1.bf16.msra.mxu0 %v13319_v34  ;;  %v13407_v34 = vld [vmem:[%s20409_s1 + $0xf8] ss:$40 sps:$4 sm:$0xff]  }
  0x5c   :  { %4089 = vmatpush1.bf16.msra.mxu1 %v13322_v35  ;;  %4049 = vmatprep.subr.bf16.mxu0 %v13327_v38  ;;  %v13410_v35 = vld [vmem:[%s20409_s1 + $0x5f8] ss:$40 sps:$4 sm:$0xff]   ;;  %v13415_v38 = vld [vmem:[%s20409_s1 + $0xac] ss:$40 sps:$4 sm:$0xff]  }
  0x5d   :  { %4090 = vmatprep.subr.bf16.mxu1 %v13330_v39  ;;  %v13418_v39 = vld [vmem:[%s20409_s1 + $0x5ac] ss:$40 sps:$4 sm:$0xff]  }
  0x5f   :  { %4050 = vmatpush1.bf16.msra.mxu0 %v13325_v40  ;;  %v13413_v40 = vld [vmem:[%s20409_s1 + $0xa8] ss:$40 sps:$4 sm:$0xff]  }
  0x60   :  { %4091 = vmatpush1.bf16.msra.mxu1 %v13328_v41  ;;  %4051 = vmatprep.subr.bf16.mxu0 %v13333_v42  ;;  %v13416_v41 = vld [vmem:[%s20409_s1 + $0x5a8] ss:$40 sps:$4 sm:$0xff]   ;;  %v13421_v42 = vld [vmem:[%s20409_s1 + $0x5c] ss:$40 sps:$4 sm:$0xff]  }
  0x61   :  { %4092 = vmatprep.subr.bf16.mxu1 %v13336_v43  ;;  %v13424_v43 = vld [vmem:[%s20409_s1 + $0x55c] ss:$40 sps:$4 sm:$0xff]  }
  0x63   :  { %4052 = vmatpush2.bf16.msra.mxu0 %v13331_v44  ;;  %v13419_v44 = vld [vmem:[%s20409_s1 + $0x58] ss:$40 sps:$4 sm:$0xff]  }
  0x64   :  { %4093 = vmatpush2.bf16.msra.mxu1 %v13334_v45  ;;  %4053 = vmatprep.subr.bf16.mxu0 %v13339_v46  ;;  %v13422_v45 = vld [vmem:[%s20409_s1 + $0x558] ss:$40 sps:$4 sm:$0xff]   ;;  %v13427_v46 = vld [vmem:[%s20409_s1 + $0xc] ss:$40 sps:$4 sm:$0xff]  }
  0x65   :  { %4094 = vmatprep.subr.bf16.mxu1 %v13342_v48  ;;  %v13430_v48 = vld [vmem:[%s20409_s1 + $0x50c] ss:$40 sps:$4 sm:$0xff]  }
  0x67   :  { %4054 = vmatpush2.bf16.msra.mxu0 %v13337_v49  ;;  %v13425_v49 = vld [vmem:[%s20409_s1 + $0x8] ss:$40 sps:$4 sm:$0xff]  }
  0x68   :  { %4095 = vmatpush2.bf16.msra.mxu1 %v13340_v50  ;;  %4055 = vmatprep.subr.bf16.mxu0 %v13345_v52  ;;  %v13428_v50 = vld [vmem:[%s20409_s1 + $0x508] ss:$40 sps:$4 sm:$0xff]   ;;  %v13433_v52 = vld [vmem:[%s20409_s1 + $0x4bc] ss:$40 sps:$4 sm:$0xff]  }
  0x69   :  { %4096 = vmatprep.subr.bf16.mxu1 %v13348_v53  ;;  %v13436_v53 = vld [vmem:[%s20409_s1 + $0x9bc] ss:$40 sps:$4 sm:$0xff]  }
  0x6b   :  { %4056 = vmatpush2.bf16.msra.mxu0 %v13343_v54  ;;  %v13431_v54 = vld [vmem:[%s20409_s1 + $0x4b8] ss:$40 sps:$4 sm:$0xff]  }
  0x6c   :  { %4097 = vmatpush2.bf16.msra.mxu1 %v13346_v55  ;;  %4057 = vmatprep.subr.bf16.mxu0 %v13351_v56  ;;  %v13434_v55 = vld [vmem:[%s20409_s1 + $0x9b8] ss:$40 sps:$4 sm:$0xff]   ;;  %v13439_v56 = vld [vmem:[%s20409_s1 + $0x46c] ss:$40 sps:$4 sm:$0xff]  }
  0x6d   :  { %4098 = vmatprep.subr.bf16.mxu1 %v13354_v57  ;;  %v13442_v57 = vld [vmem:[%s20409_s1 + $0x96c] ss:$40 sps:$4 sm:$0xff]  }
  0x6f   :  { %4058 = vmatpush2.bf16.msra.mxu0 %v13349_v58  ;;  %v13437_v58 = vld [vmem:[%s20409_s1 + $0x468] ss:$40 sps:$4 sm:$0xff]  }
  0x70   :  { %4099 = vmatpush2.bf16.msra.mxu1 %v13352_v59  ;;  %4059 = vmatprep.subr.bf16.mxu0 %v13357_v60  ;;  %v13440_v59 = vld [vmem:[%s20409_s1 + $0x968] ss:$40 sps:$4 sm:$0xff]   ;;  %v13445_v60 = vld [vmem:[%s20409_s1 + $0x41c] ss:$40 sps:$4 sm:$0xff]  }
  0x71   :  { %4100 = vmatprep.subr.bf16.mxu1 %v13360_v61  ;;  %v13448_v61 = vld [vmem:[%s20409_s1 + $0x91c] ss:$40 sps:$4 sm:$0xff]  }
  0x73   :  { %4060 = vmatpush2.bf16.msra.mxu0 %v13355_v62  ;;  %v13443_v62 = vld [vmem:[%s20409_s1 + $0x418] ss:$40 sps:$4 sm:$0xff]  }
  0x74   :  { %4101 = vmatpush2.bf16.msra.mxu1 %v13358_v63  ;;  %4061 = vmatprep.subr.bf16.mxu0 %v13363_v0  ;;  %v13446_v63 = vld [vmem:[%s20409_s1 + $0x918] ss:$40 sps:$4 sm:$0xff]   ;;  %v13451_v0 = vld [vmem:[%s20409_s1 + $0x3cc] ss:$40 sps:$4 sm:$0xff]  }
  0x75   :  { %4102 = vmatprep.subr.bf16.mxu1 %v13366_v1  ;;  %v13454_v1 = vld [vmem:[%s20409_s1 + $0x8cc] ss:$40 sps:$4 sm:$0xff]  }
  0x77   :  { %4062 = vmatpush2.bf16.msra.mxu0 %v13361_v2  ;;  %v13449_v2 = vld [vmem:[%s20409_s1 + $0x3c8] ss:$40 sps:$4 sm:$0xff]  }
  0x78   :  { %4103 = vmatpush2.bf16.msra.mxu1 %v13364_v3  ;;  %4063 = vmatprep.subr.bf16.mxu0 %v13369_v4  ;;  %v13452_v3 = vld [vmem:[%s20409_s1 + $0x8c8] ss:$40 sps:$4 sm:$0xff]   ;;  %v13457_v4 = vld [vmem:[%s20409_s1 + $0x37c] ss:$40 sps:$4 sm:$0xff]  }
  0x79   :  { %4104 = vmatprep.subr.bf16.mxu1 %v13372_v5  ;;  %v13460_v5 = vld [vmem:[%s20409_s1 + $0x87c] ss:$40 sps:$4 sm:$0xff]  }
  0x7b   :  { %4064 = vmatpush2.bf16.msra.mxu0 %v13367_v8  ;;  %v13455_v8 = vld [vmem:[%s20409_s1 + $0x378] ss:$40 sps:$4 sm:$0xff]  }
  0x7c   :  { %4105 = vmatpush2.bf16.msra.mxu1 %v13370_v9  ;;  %4065 = vmatprep.subr.bf16.mxu0 %v13375_v10  ;;  %v13458_v9 = vld [vmem:[%s20409_s1 + $0x878] ss:$40 sps:$4 sm:$0xff]   ;;  %v13463_v10 = vld [vmem:[%s20409_s1 + $0x32c] ss:$40 sps:$4 sm:$0xff]  }
  0x7d   :  { %4106 = vmatprep.subr.bf16.mxu1 %v13378_v11  ;;  %v13466_v11 = vld [vmem:[%s20409_s1 + $0x82c] ss:$40 sps:$4 sm:$0xff]  }
  0x7f   :  { %4066 = vmatpush2.bf16.msra.mxu0 %v13373_v12  ;;  %v13461_v12 = vld [vmem:[%s20409_s1 + $0x328] ss:$40 sps:$4 sm:$0xff]  }
  0x80   :  { %4107 = vmatpush2.bf16.msra.mxu1 %v13376_v13  ;;  %4117 = vmatprep.subr.bf16.mxu0 %v13385_v14  ;;  %v13464_v13 = vld [vmem:[%s20409_s1 + $0x828] ss:$40 sps:$4 sm:$0xff]   ;;  %v13469_v14 = vld [vmem:[%s20409_s1 + $0x2dc] ss:$40 sps:$4 sm:$0xff]  }
  0x81   :  { %4158 = vmatprep.subr.bf16.mxu1 %v13388_v15  ;;  %v13472_v15 = vld [vmem:[%s20409_s1 + $0x7dc] ss:$40 sps:$4 sm:$0xff]  }
  0x82   :  { %4068 = vmatmul.mubr.bf16.vlgmr.msra.gmra.mxu0 %v15905_v16 }
  0x83   :  { %4109 = vmatmul.mubr.bf16.vlgmr.msra.gmra.mxu1 %v15909_v17  ;;  %4118 = vmatpush1.bf16.msra.mxu0 %v13383_v18  ;;  %v13467_v18 = vld [vmem:[%s20409_s1 + $0x2d8] ss:$40 sps:$4 sm:$0xff]  }
  0x84   :  { %4159 = vmatpush1.bf16.msra.mxu1 %v13386_v19  ;;  %4119 = vmatprep.subr.bf16.mxu0 %v13391_v20  ;;  %v13470_v19 = vld [vmem:[%s20409_s1 + $0x7d8] ss:$40 sps:$4 sm:$0xff]   ;;  %v13475_v20 = vld [vmem:[%s20409_s1 + $0x28c] ss:$40 sps:$4 sm:$0xff]  }
  0x85   :  { %4160 = vmatprep.subr.bf16.mxu1 %v13394_v21  ;;  %4149 = vmatprep.mubr.bf16.mxu0 %v15616_v47  ;;  %v13478_v21 = vld [vmem:[%s20409_s1 + $0x78c] ss:$40 sps:$4 sm:$0xff]  }
  0x86   :  { %4190 = vmatprep.mubr.bf16.mxu1 %v15627_v51 }
  0x87   :  { %4120 = vmatpush1.bf16.msra.mxu0 %v13389_v22  ;;  %v13473_v22 = vld [vmem:[%s20409_s1 + $0x288] ss:$40 sps:$4 sm:$0xff]  }
  0x88   :  { %4161 = vmatpush1.bf16.msra.mxu1 %v13392_v23  ;;  %4121 = vmatprep.subr.bf16.mxu0 %v13397_v24  ;;  %v13476_v23 = vld [vmem:[%s20409_s1 + $0x788] ss:$40 sps:$4 sm:$0xff]   ;;  %v13481_v24 = vld [vmem:[%s20409_s1 + $0xc3c] ss:$40 sps:$4 sm:$0xff]  }
  0x89   :  { %4162 = vmatprep.subr.bf16.mxu1 %v13400_v25  ;;  %v13484_v25 = vld [vmem:[%s20409_s1 + $0x113c] ss:$40 sps:$4 sm:$0xff]  }
  0x8b   :  { %4122 = vmatpush1.bf16.msra.mxu0 %v13395_v26  ;;  %v13479_v26 = vld [vmem:[%s20409_s1 + $0xc38] ss:$40 sps:$4 sm:$0xff]  }
  0x8c   :  { %4163 = vmatpush1.bf16.msra.mxu1 %v13398_v27  ;;  %4123 = vmatprep.subr.bf16.mxu0 %v13403_v28  ;;  %v13482_v27 = vld [vmem:[%s20409_s1 + $0x1138] ss:$40 sps:$4 sm:$0xff]   ;;  %v13487_v28 = vld [vmem:[%s20409_s1 + $0xbec] ss:$40 sps:$4 sm:$0xff]  }
  0x8d   :  { %4164 = vmatprep.subr.bf16.mxu1 %v13406_v29  ;;  %v13490_v29 = vld [vmem:[%s20409_s1 + $0x10ec] ss:$40 sps:$4 sm:$0xff]  }
  0x8f   :  { %4124 = vmatpush1.bf16.msra.mxu0 %v13401_v30  ;;  %v13485_v30 = vld [vmem:[%s20409_s1 + $0xbe8] ss:$40 sps:$4 sm:$0xff]  }
  0x90   :  { %4165 = vmatpush1.bf16.msra.mxu1 %v13404_v31  ;;  %4125 = vmatprep.subr.bf16.mxu0 %v13409_v32  ;;  %v13488_v31 = vld [vmem:[%s20409_s1 + $0x10e8] ss:$40 sps:$4 sm:$0xff]   ;;  %v13493_v32 = vld [vmem:[%s20409_s1 + $0xb9c] ss:$40 sps:$4 sm:$0xff]  }
  0x91   :  { %4166 = vmatprep.subr.bf16.mxu1 %v13412_v33  ;;  %v13496_v33 = vld [vmem:[%s20409_s1 + $0x109c] ss:$40 sps:$4 sm:$0xff]  }
  0x93   :  { %4126 = vmatpush1.bf16.msra.mxu0 %v13407_v34  ;;  %v13491_v34 = vld [vmem:[%s20409_s1 + $0xb98] ss:$40 sps:$4 sm:$0xff]  }
  0x94   :  { %4167 = vmatpush1.bf16.msra.mxu1 %v13410_v35  ;;  %4127 = vmatprep.subr.bf16.mxu0 %v13415_v38  ;;  %v13494_v35 = vld [vmem:[%s20409_s1 + $0x1098] ss:$40 sps:$4 sm:$0xff]   ;;  %v13499_v38 = vld [vmem:[%s20409_s1 + $0xb4c] ss:$40 sps:$4 sm:$0xff]  }
  0x95   :  { %4168 = vmatprep.subr.bf16.mxu1 %v13418_v39  ;;  %v13502_v39 = vld [vmem:[%s20409_s1 + $0x104c] ss:$40 sps:$4 sm:$0xff]  }
  0x97   :  { %4128 = vmatpush1.bf16.msra.mxu0 %v13413_v40  ;;  %v13497_v40 = vld [vmem:[%s20409_s1 + $0xb48] ss:$40 sps:$4 sm:$0xff]  }
  0x98   :  { %4169 = vmatpush1.bf16.msra.mxu1 %v13416_v41  ;;  %4129 = vmatprep.subr.bf16.mxu0 %v13421_v42  ;;  %v13500_v41 = vld [vmem:[%s20409_s1 + $0x1048] ss:$40 sps:$4 sm:$0xff]   ;;  %v13505_v42 = vld [vmem:[%s20409_s1 + $0xafc] ss:$40 sps:$4 sm:$0xff]  }
  0x99   :  { %4170 = vmatprep.subr.bf16.mxu1 %v13424_v43  ;;  %v13508_v43 = vld [vmem:[%s20409_s1 + $0xffc] ss:$40 sps:$4 sm:$0xff]  }
  0x9b   :  { %4130 = vmatpush1.bf16.msra.mxu0 %v13419_v44  ;;  %v13503_v44 = vld [vmem:[%s20409_s1 + $0xaf8] ss:$40 sps:$4 sm:$0xff]  }
  0x9c   :  { %4171 = vmatpush1.bf16.msra.mxu1 %v13422_v45  ;;  %4131 = vmatprep.subr.bf16.mxu0 %v13427_v46  ;;  %v13506_v45 = vld [vmem:[%s20409_s1 + $0xff8] ss:$40 sps:$4 sm:$0xff]   ;;  %v13511_v46 = vld [vmem:[%s20409_s1 + $0xaac] ss:$40 sps:$4 sm:$0xff]  }
  0x9d   :  { %4172 = vmatprep.subr.bf16.mxu1 %v13430_v48  ;;  %v13514_v48 = vld [vmem:[%s20409_s1 + $0xfac] ss:$40 sps:$4 sm:$0xff]  }
  0x9f   :  { %4132 = vmatpush1.bf16.msra.mxu0 %v13425_v49  ;;  %v13509_v49 = vld [vmem:[%s20409_s1 + $0xaa8] ss:$40 sps:$4 sm:$0xff]  }
  0xa0   :  { %4173 = vmatpush1.bf16.msra.mxu1 %v13428_v50  ;;  %4133 = vmatprep.subr.bf16.mxu0 %v13433_v52  ;;  %v13512_v50 = vld [vmem:[%s20409_s1 + $0xfa8] ss:$40 sps:$4 sm:$0xff]   ;;  %v13517_v52 = vld [vmem:[%s20409_s1 + $0xa5c] ss:$40 sps:$4 sm:$0xff]  }
  0xa1   :  { %4174 = vmatprep.subr.bf16.mxu1 %v13436_v53  ;;  %v13520_v53 = vld [vmem:[%s20409_s1 + $0xf5c] ss:$40 sps:$4 sm:$0xff]  }
  0xa3   :  { %4134 = vmatpush2.bf16.msra.mxu0 %v13431_v54  ;;  %v13515_v54 = vld [vmem:[%s20409_s1 + $0xa58] ss:$40 sps:$4 sm:$0xff]  }
  0xa4   :  { %4175 = vmatpush2.bf16.msra.mxu1 %v13434_v55  ;;  %4135 = vmatprep.subr.bf16.mxu0 %v13439_v56  ;;  %v13518_v55 = vld [vmem:[%s20409_s1 + $0xf58] ss:$40 sps:$4 sm:$0xff]   ;;  %v13523_v56 = vld [vmem:[%s20409_s1 + $0xa0c] ss:$40 sps:$4 sm:$0xff]  }
  0xa5   :  { %4176 = vmatprep.subr.bf16.mxu1 %v13442_v57  ;;  %v13526_v57 = vld [vmem:[%s20409_s1 + $0xf0c] ss:$40 sps:$4 sm:$0xff]  }
  0xa7   :  { %4136 = vmatpush2.bf16.msra.mxu0 %v13437_v58  ;;  %v13521_v58 = vld [vmem:[%s20409_s1 + $0xa08] ss:$40 sps:$4 sm:$0xff]  }
  0xa8   :  { %4177 = vmatpush2.bf16.msra.mxu1 %v13440_v59  ;;  %4137 = vmatprep.subr.bf16.mxu0 %v13445_v60  ;;  %v13524_v59 = vld [vmem:[%s20409_s1 + $0xf08] ss:$40 sps:$4 sm:$0xff]   ;;  %v13529_v60 = vld [vmem:[%s20409_s1 + $0xebc] ss:$40 sps:$4 sm:$0xff]  }
  0xa9   :  { %4178 = vmatprep.subr.bf16.mxu1 %v13448_v61  ;;  %v13532_v61 = vld [vmem:[%s20409_s1 + $0x13bc] ss:$40 sps:$4 sm:$0xff]  }
  0xab   :  { %4138 = vmatpush2.bf16.msra.mxu0 %v13443_v62  ;;  %v13527_v62 = vld [vmem:[%s20409_s1 + $0xeb8] ss:$40 sps:$4 sm:$0xff]  }
  0xac   :  { %4179 = vmatpush2.bf16.msra.mxu1 %v13446_v63  ;;  %4139 = vmatprep.subr.bf16.mxu0 %v13451_v0  ;;  %v13530_v63 = vld [vmem:[%s20409_s1 + $0x13b8] ss:$40 sps:$4 sm:$0xff]   ;;  %v13535_v0 = vld [vmem:[%s20409_s1 + $0xe6c] ss:$40 sps:$4 sm:$0xff]  }
  0xad   :  { %4180 = vmatprep.subr.bf16.mxu1 %v13454_v1  ;;  %v13538_v1 = vld [vmem:[%s20409_s1 + $0x136c] ss:$40 sps:$4 sm:$0xff]  }
  0xaf   :  { %4140 = vmatpush2.bf16.msra.mxu0 %v13449_v2  ;;  %v13533_v2 = vld [vmem:[%s20409_s1 + $0xe68] ss:$40 sps:$4 sm:$0xff]  }
  0xb0   :  { %4181 = vmatpush2.bf16.msra.mxu1 %v13452_v3  ;;  %4141 = vmatprep.subr.bf16.mxu0 %v13457_v4  ;;  %v13536_v3 = vld [vmem:[%s20409_s1 + $0x1368] ss:$40 sps:$4 sm:$0xff]   ;;  %v13541_v4 = vld [vmem:[%s20409_s1 + $0xe1c] ss:$40 sps:$4 sm:$0xff]  }
  0xb1   :  { %4182 = vmatprep.subr.bf16.mxu1 %v13460_v5  ;;  %v13544_v5 = vld [vmem:[%s20409_s1 + $0x131c] ss:$40 sps:$4 sm:$0xff]  }
  0xb3   :  { %4142 = vmatpush2.bf16.msra.mxu0 %v13455_v8  ;;  %v13539_v8 = vld [vmem:[%s20409_s1 + $0xe18] ss:$40 sps:$4 sm:$0xff]  }
  0xb4   :  { %4183 = vmatpush2.bf16.msra.mxu1 %v13458_v9  ;;  %4143 = vmatprep.subr.bf16.mxu0 %v13463_v10  ;;  %v13542_v9 = vld [vmem:[%s20409_s1 + $0x1318] ss:$40 sps:$4 sm:$0xff]   ;;  %v13547_v10 = vld [vmem:[%s20409_s1 + $0xdcc] ss:$40 sps:$4 sm:$0xff]  }
  0xb5   :  { %4184 = vmatprep.subr.bf16.mxu1 %v13466_v11  ;;  %v13550_v11 = vld [vmem:[%s20409_s1 + $0x12cc] ss:$40 sps:$4 sm:$0xff]  }
  0xb7   :  { %4144 = vmatpush2.bf16.msra.mxu0 %v13461_v12  ;;  %v13545_v12 = vld [vmem:[%s20409_s1 + $0xdc8] ss:$40 sps:$4 sm:$0xff]  }
  0xb8   :  { %4185 = vmatpush2.bf16.msra.mxu1 %v13464_v13  ;;  %4145 = vmatprep.subr.bf16.mxu0 %v13469_v14  ;;  %v13548_v13 = vld [vmem:[%s20409_s1 + $0x12c8] ss:$40 sps:$4 sm:$0xff]   ;;  %v13553_v14 = vld [vmem:[%s20409_s1 + $0xd7c] ss:$40 sps:$4 sm:$0xff]  }
  0xb9   :  { %4186 = vmatprep.subr.bf16.mxu1 %v13472_v15  ;;  %v13556_v15 = vld [vmem:[%s20409_s1 + $0x127c] ss:$40 sps:$4 sm:$0xff]  }
  0xbb   :  { %4146 = vmatpush2.bf16.msra.mxu0 %v13467_v18  ;;  %v13551_v18 = vld [vmem:[%s20409_s1 + $0xd78] ss:$40 sps:$4 sm:$0xff]  }
  0xbc   :  { %4187 = vmatpush2.bf16.msra.mxu1 %v13470_v19  ;;  %4147 = vmatprep.subr.bf16.mxu0 %v13475_v20  ;;  %v13554_v19 = vld [vmem:[%s20409_s1 + $0x1278] ss:$40 sps:$4 sm:$0xff]   ;;  %v13559_v20 = vld [vmem:[%s20409_s1 + $0xd2c] ss:$40 sps:$4 sm:$0xff]  }
  0xbd   :  { %4188 = vmatprep.subr.bf16.mxu1 %v13478_v21  ;;  %v13562_v21 = vld [vmem:[%s20409_s1 + $0x122c] ss:$40 sps:$4 sm:$0xff]  }
  0xbf   :  { %4148 = vmatpush2.bf16.msra.mxu0 %v13473_v22  ;;  %v13557_v22 = vld [vmem:[%s20409_s1 + $0xd28] ss:$40 sps:$4 sm:$0xff]  }
  0xc0   :  { %4189 = vmatpush2.bf16.msra.mxu1 %v13476_v23  ;;  %4199 = vmatprep.subr.bf16.mxu0 %v13481_v24  ;;  %v13560_v23 = vld [vmem:[%s20409_s1 + $0x1228] ss:$40 sps:$4 sm:$0xff]   ;;  %v675_v24 = vlaneseq }
  0xc1   :  { %4240 = vmatprep.subr.bf16.mxu1 %v13484_v25  ;;  %v13565_v25 = vld [vmem:[%s20409_s1 + $0xcdc] ss:$40 sps:$4 sm:$0xff]  }
  0xc2   :  { %4150 = vmatmul.mubr.bf16.vlgmr.msra.gmra.mxu0 %v15685_v6 }
  0xc3   :  { %4191 = vmatmul.mubr.bf16.vlgmr.msra.gmra.mxu1 %v15687_v7  ;;  %4200 = vmatpush1.bf16.msra.mxu0 %v13479_v26  ;;  %v13568_v26 = vld [vmem:[%s20409_s1 + $0x11dc] ss:$40 sps:$4 sm:$0xff]  }
  0xc4   :  { %4241 = vmatpush1.bf16.msra.mxu1 %v13482_v27  ;;  %4201 = vmatprep.subr.bf16.mxu0 %v13487_v28  ;;  %v13563_v27 = vld [vmem:[%s20409_s1 + $0xcd8] ss:$40 sps:$4 sm:$0xff]  }
  0xc5   :  { %4242 = vmatprep.subr.bf16.mxu1 %v13490_v29  ;;  %4231 = vmatprep.mubr.bf16.mxu0 %v15781_v36  ;;  %v13566_v28 = vld [vmem:[%s20409_s1 + $0x11d8] ss:$40 sps:$4 sm:$0xff]   ;;  %v16285_v29 = vshrl.u32 %v675_v24, 7  ;;  %v13622_v24 = vld [vmem:[%s20409_s1 + $0x514] ss:$40 sps:$4 sm:$0xff]  }
  0xc6   :  { %4272 = vmatprep.mubr.bf16.mxu1 %v15785_v37 }
  0xc7   :  { %4202 = vmatpush1.bf16.msra.mxu0 %v13485_v30  ;;  %v13571_v30 = vld [vmem:[%s20409_s1 + $0xc8c] ss:$40 sps:$4 sm:$0xff]  }
  0xc8   :  { %4243 = vmatpush1.bf16.msra.mxu1 %v13488_v31  ;;  %4203 = vmatprep.subr.bf16.mxu0 %v13493_v32  ;;  %v13574_v31 = vld [vmem:[%s20409_s1 + $0x118c] ss:$40 sps:$4 sm:$0xff]   ;;  %v13569_v32 = vld [vmem:[%s20409_s1 + $0xc88] ss:$40 sps:$4 sm:$0xff]  }
  0xc9   :  { %4244 = vmatprep.subr.bf16.mxu1 %v13496_v33  ;;  %v13572_v33 = vld [vmem:[%s20409_s1 + $0x1188] ss:$40 sps:$4 sm:$0xff]  }
  0xcb   :  { %4204 = vmatpush1.bf16.msra.mxu0 %v13491_v34  ;;  %v671_v34 = vld [vmem:[%s20411_s2] sm:$0xff] }
  0xcc   :  { %4245 = vmatpush1.bf16.msra.mxu1 %v13494_v35  ;;  %4205 = vmatprep.subr.bf16.mxu0 %v13499_v38  ;;  %v16303_v35 = vsub.s32 0, %v16285_v29  ;;  %v13577_v38 = vld [vmem:[%s20409_s1 + $0x244] ss:$40 sps:$4 sm:$0xff]  }
  0xcd   :  { %4246 = vmatprep.subr.bf16.mxu1 %v13502_v39  ;;  %v13580_v39 = vld [vmem:[%s20409_s1 + $0x744] ss:$40 sps:$4 sm:$0xff]  }
  0xcf   :  { %4206 = vmatpush1.bf16.msra.mxu0 %v13497_v40  ;;  %v16312_v40 = vsub.s32 1, %v16285_v29 }
  0xd0   :  { %4247 = vmatpush1.bf16.msra.mxu1 %v13500_v41  ;;  %4207 = vmatprep.subr.bf16.mxu0 %v13505_v42  ;;  %v13575_v41 = vld [vmem:[%s20409_s1 + $0x240] ss:$40 sps:$4 sm:$0xff]   ;;  %v678_v42 = vrot.slane %v671_v34, %v16303_v35 }
  0xd1   :  { %4248 = vmatprep.subr.bf16.mxu1 %v13508_v43  ;;  %v13578_v43 = vld [vmem:[%s20409_s1 + $0x740] ss:$40 sps:$4 sm:$0xff]  }
  0xd3   :  { %4208 = vmatpush1.bf16.msra.mxu0 %v13503_v44  ;;  %v13583_v44 = vld [vmem:[%s20409_s1 + $0x1f4] ss:$40 sps:$4 sm:$0xff]  }
  0xd4   :  { %4249 = vmatpush1.bf16.msra.mxu1 %v13506_v45  ;;  %4209 = vmatprep.subr.bf16.mxu0 %v13511_v46  ;;  %v13586_v45 = vld [vmem:[%s20409_s1 + $0x6f4] ss:$40 sps:$4 sm:$0xff]   ;;  %v682_v46 = vrot.slane %v671_v34, %v16312_v40  ;;  %v13629_v34 = vld [vmem:[%s20409_s1 + $0x470] ss:$40 sps:$4 sm:$0xff]  }
  0xd5   :  { %4250 = vmatprep.subr.bf16.mxu1 %v13514_v48  ;;  %v13581_v48 = vld [vmem:[%s20409_s1 + $0x1f0] ss:$40 sps:$4 sm:$0xff]  }
  0xd7   :  { %4210 = vmatpush1.bf16.msra.mxu0 %v13509_v49 }
  0xd8   :  { %4251 = vmatpush1.bf16.msra.mxu1 %v13512_v50  ;;  %4211 = vmatprep.subr.bf16.mxu0 %v13517_v52  ;;  %v13584_v52 = vld [vmem:[%s20409_s1 + $0x6f0] ss:$40 sps:$4 sm:$0xff]  }
  0xd9   :  { %4252 = vmatprep.subr.bf16.mxu1 %v13520_v53 }
  0xdb   :  { %4212 = vmatpush1.bf16.msra.mxu0 %v13515_v54  ;;  %v13589_v54 = vld [vmem:[%s20409_s1 + $0x1a4] ss:$40 sps:$4 sm:$0xff]  }
  0xdc   :  { %4253 = vmatpush1.bf16.msra.mxu1 %v13518_v55  ;;  %4213 = vmatprep.subr.bf16.mxu0 %v13523_v56 }
  0xdd   :  { %4254 = vmatprep.subr.bf16.mxu1 %v13526_v57  ;;  %v13592_v57 = vld [vmem:[%s20409_s1 + $0x6a4] ss:$40 sps:$4 sm:$0xff]  }
  0xdf   :  { %4214 = vmatpush1.bf16.msra.mxu0 %v13521_v58 }
  0xe0   :  { %4255 = vmatpush1.bf16.msra.mxu1 %v13524_v59  ;;  %4215 = vmatprep.subr.bf16.mxu0 %v13529_v60  ;;  %v13587_v60 = vld [vmem:[%s20409_s1 + $0x1a0] ss:$40 sps:$4 sm:$0xff]  }
  0xe1   :  { %4256 = vmatprep.subr.bf16.mxu1 %v13532_v61  ;;  %v13590_v61 = vld [vmem:[%s20409_s1 + $0x6a0] ss:$40 sps:$4 sm:$0xff]  }
  0xe3   :  { %4216 = vmatpush2.bf16.msra.mxu0 %v13527_v62 }
  0xe4   :  { %4257 = vmatpush2.bf16.msra.mxu1 %v13530_v63  ;;  %4217 = vmatprep.subr.bf16.mxu0 %v13535_v0 }
  0xe5   :  { %4258 = vmatprep.subr.bf16.mxu1 %v13538_v1 }
  0xe7   :  { %4218 = vmatpush2.bf16.msra.mxu0 %v13533_v2 }
  0xe8   :  { %4259 = vmatpush2.bf16.msra.mxu1 %v13536_v3  ;;  %4219 = vmatprep.subr.bf16.mxu0 %v13541_v4  ;;  %v13595_v3 = vld [vmem:[%s20409_s1 + $0x154] ss:$40 sps:$4 sm:$0xff]  }
  0xe9   :  { %4260 = vmatprep.subr.bf16.mxu1 %v13544_v5  ;;  %v13598_v4 = vld [vmem:[%s20409_s1 + $0x654] ss:$40 sps:$4 sm:$0xff]   ;;  %v13593_v5 = vld [vmem:[%s20409_s1 + $0x150] ss:$40 sps:$4 sm:$0xff]  }
  0xeb   :  { %4220 = vmatpush2.bf16.msra.mxu0 %v13539_v8  ;;  %v13596_v8 = vld [vmem:[%s20409_s1 + $0x650] ss:$40 sps:$4 sm:$0xff]  }
  0xec   :  { %4261 = vmatpush2.bf16.msra.mxu1 %v13542_v9  ;;  %4221 = vmatprep.subr.bf16.mxu0 %v13547_v10  ;;  %v13601_v9 = vld [vmem:[%s20409_s1 + $0x104] ss:$40 sps:$4 sm:$0xff]  }
  0xed   :  { %4262 = vmatprep.subr.bf16.mxu1 %v13550_v11  ;;  %v13604_v10 = vld [vmem:[%s20409_s1 + $0x604] ss:$40 sps:$4 sm:$0xff]   ;;  %v13599_v11 = vld [vmem:[%s20409_s1 + $0x100] ss:$40 sps:$4 sm:$0xff]  }
  0xef   :  { %4222 = vmatpush2.bf16.msra.mxu0 %v13545_v12  ;;  %v13602_v12 = vld [vmem:[%s20409_s1 + $0x600] ss:$40 sps:$4 sm:$0xff]  }
  0xf0   :  { %4263 = vmatpush2.bf16.msra.mxu1 %v13548_v13  ;;  %4223 = vmatprep.subr.bf16.mxu0 %v13553_v14  ;;  %v13607_v13 = vld [vmem:[%s20409_s1 + $0xb4] ss:$40 sps:$4 sm:$0xff]  }
  0xf1   :  { %4264 = vmatprep.subr.bf16.mxu1 %v13556_v15  ;;  %v13610_v14 = vld [vmem:[%s20409_s1 + $0x5b4] ss:$40 sps:$4 sm:$0xff]   ;;  %v13605_v15 = vld [vmem:[%s20409_s1 + $0xb0] ss:$40 sps:$4 sm:$0xff]  }
  0xf3   :  { %4224 = vmatpush2.bf16.msra.mxu0 %v13551_v18  ;;  %v13608_v18 = vld [vmem:[%s20409_s1 + $0x5b0] ss:$40 sps:$4 sm:$0xff]  }
  0xf4   :  { %4265 = vmatpush2.bf16.msra.mxu1 %v13554_v19  ;;  %4225 = vmatprep.subr.bf16.mxu0 %v13559_v20  ;;  %v13613_v19 = vld [vmem:[%s20409_s1 + $0x64] ss:$40 sps:$4 sm:$0xff]  }
  0xf5   :  { %4266 = vmatprep.subr.bf16.mxu1 %v13562_v21  ;;  %v13616_v20 = vld [vmem:[%s20409_s1 + $0x564] ss:$40 sps:$4 sm:$0xff]   ;;  %v13611_v21 = vld [vmem:[%s20409_s1 + $0x60] ss:$40 sps:$4 sm:$0xff]  }
  0xf7   :  { %4226 = vmatpush2.bf16.msra.mxu0 %v13557_v22  ;;  %v13614_v22 = vld [vmem:[%s20409_s1 + $0x560] ss:$40 sps:$4 sm:$0xff]  }
  0xf8   :  { %4267 = vmatpush2.bf16.msra.mxu1 %v13560_v23  ;;  %4227 = vmatprep.subr.bf16.mxu0 %v13565_v25  ;;  %v13619_v23 = vld [vmem:[%s20409_s1 + $0x14] ss:$40 sps:$4 sm:$0xff]   ;;  %v13617_v25 = vld [vmem:[%s20409_s1 + $0x10] ss:$40 sps:$4 sm:$0xff]  }
  0xf9   :  { %4268 = vmatprep.subr.bf16.mxu1 %v13568_v26  ;;  %v13620_v26 = vld [vmem:[%s20409_s1 + $0x510] ss:$40 sps:$4 sm:$0xff]  }
  0xfb   :  { %4228 = vmatpush2.bf16.msra.mxu0 %v13563_v27  ;;  %v13625_v27 = vld [vmem:[%s20409_s1 + $0x4c4] ss:$40 sps:$4 sm:$0xff]  }
  0xfc   :  { %4269 = vmatpush2.bf16.msra.mxu1 %v13566_v28  ;;  %4229 = vmatprep.subr.bf16.mxu0 %v13571_v30  ;;  %v13628_v28 = vld [vmem:[%s20409_s1 + $0x9c4] ss:$40 sps:$4 sm:$0xff]   ;;  %v13623_v30 = vld [vmem:[%s20409_s1 + $0x4c0] ss:$40 sps:$4 sm:$0xff]  }
  0xfd   :  { %4270 = vmatprep.subr.bf16.mxu1 %v13574_v31  ;;  %v13626_v31 = vld [vmem:[%s20409_s1 + $0x9c0] ss:$40 sps:$4 sm:$0xff]  }
  0xff   :  { %4230 = vmatpush2.bf16.msra.mxu0 %v13569_v32  ;;  %v13631_v32 = vld [vmem:[%s20409_s1 + $0x474] ss:$40 sps:$4 sm:$0xff]  }
 0x100   :  { %4271 = vmatpush2.bf16.msra.mxu1 %v13572_v33  ;;  %4281 = vmatprep.subr.bf16.mxu0 %v13577_v38  ;;  %v13634_v33 = vld [vmem:[%s20409_s1 + $0x974] ss:$40 sps:$4 sm:$0xff]   ;;  %v13632_v38 = vld [vmem:[%s20409_s1 + $0x970] ss:$40 sps:$4 sm:$0xff]  }
 0x101   :  { %4322 = vmatprep.subr.bf16.mxu1 %v13580_v39  ;;  %v13637_v39 = vld [vmem:[%s20409_s1 + $0x424] ss:$40 sps:$4 sm:$0xff]  }
 0x102   :  { %v3987_v49 = vpop.f32.mrf.mxu0  ;;  %4232 = vmatmul.mubr.bf16.vlgmr.msra.gmra.mxu0 %v15905_v16 }
 0x103   :  { %v4028_v50 = vpop.f32.mrf.mxu1  ;;  %4273 = vmatmul.mubr.bf16.vlgmr.msra.gmra.mxu1 %v15909_v17  ;;  %v3988_v53 = vadd.f32 %v3987_v49, %v678_v42  ;;  %4282 = vmatpush1.bf16.msra.mxu0 %v13575_v41  ;;  %v13640_v41 = vld [vmem:[%s20409_s1 + $0x924] ss:$40 sps:$4 sm:$0xff]   ;;  %v13635_v42 = vld [vmem:[%s20409_s1 + $0x420] ss:$40 sps:$4 sm:$0xff]  }
 0x104   :  { %4323 = vmatpush1.bf16.msra.mxu1 %v13578_v43  ;;  %v3989_v55 = vpop.f32.mrf.mxu0  ;;  %4283 = vmatprep.subr.bf16.mxu0 %v13583_v44  ;;  %v13638_v43 = vld [vmem:[%s20409_s1 + $0x920] ss:$40 sps:$4 sm:$0xff]   ;;  %v13643_v44 = vld [vmem:[%s20409_s1 + $0x3d4] ss:$40 sps:$4 sm:$0xff]   ;;  %v13649_v49 = vld [vmem:[%s20409_s1 + $0x384] ss:$40 sps:$4 sm:$0xff]  }
 0x105   :  { %v4030_v56 = vpop.f32.mrf.mxu1  ;;  %4324 = vmatprep.subr.bf16.mxu1 %v13586_v45  ;;  %v16342_v58 = vadd.f32 %v4028_v50, %v3988_v53  ;;  %v3990_v59 = vadd.f32 %v3989_v55, %v682_v46  ;;  %4313 = vmatprep.mubr.bf16.mxu0 %v15616_v47  ;;  %v13646_v45 = vld [vmem:[%s20409_s1 + $0x8d4] ss:$40 sps:$4 sm:$0xff]   ;;  %v13641_v46 = vld [vmem:[%s20409_s1 + $0x3d0] ss:$40 sps:$4 sm:$0xff]   ;;  %v13652_v50 = vld [vmem:[%s20409_s1 + $0x884] ss:$40 sps:$4 sm:$0xff]  }
 0x106   :  { %4354 = vmatprep.mubr.bf16.mxu1 %v15627_v51  ;;  %v3991_v62 = vpop.f32.mrf.mxu0  ;;  %v13650_v53 = vld [vmem:[%s20409_s1 + $0x880] ss:$40 sps:$4 sm:$0xff]   ;;  %v13658_v55 = vld [vmem:[%s20409_s1 + $0x834] ss:$40 sps:$4 sm:$0xff]  }
 0x107   :  { %v4032_v63 = vpop.f32.mrf.mxu1  ;;  %v16352_v0 = vadd.f32 %v4030_v56, %v3990_v59  ;;  %4284 = vmatpush1.bf16.msra.mxu0 %v13581_v48  ;;  %v13644_v48 = vld [vmem:[%s20409_s1 + $0x8d0] ss:$40 sps:$4 sm:$0xff]   ;;  %v13661_v59 = vld [vmem:[%s20409_s1 + $0x2e4] ss:$40 sps:$4 sm:$0xff]   ;;  %v13662_v62 = vld [vmem:[%s20409_s1 + $0x7e0] ss:$40 sps:$4 sm:$0xff]  }
 0x108   :  { %4325 = vmatpush1.bf16.msra.mxu1 %v13584_v52  ;;  %v3992_v1 = vpop.f32.mrf.mxu0  ;;  %4285 = vmatprep.subr.bf16.mxu0 %v13589_v54  ;;  %v13647_v52 = vld [vmem:[%s20409_s1 + $0x380] ss:$40 sps:$4 sm:$0xff]   ;;  %v13655_v54 = vld [vmem:[%s20409_s1 + $0x334] ss:$40 sps:$4 sm:$0xff]   ;;  %v13653_v56 = vld [vmem:[%s20409_s1 + $0x330] ss:$40 sps:$4 sm:$0xff]  }
 0x109   :  { %v4033_v2 = vpop.f32.mrf.mxu1  ;;  %4326 = vmatprep.subr.bf16.mxu1 %v13592_v57  ;;  %v13656_v57 = vld [vmem:[%s20409_s1 + $0x830] ss:$40 sps:$4 sm:$0xff]   ;;  %v13667_v63 = vld [vmem:[%s20409_s1 + $0x294] ss:$40 sps:$4 sm:$0xff]  }
 0x10a   :  { %v13670_v1 = vld [vmem:[%s20409_s1 + $0x794] ss:$40 sps:$4 sm:$0xff]   ;;  %v13665_v2 = vld [vmem:[%s20409_s1 + $0x290] ss:$40 sps:$4 sm:$0xff]  }
 0x10b   :  { %4286 = vmatpush1.bf16.msra.mxu0 %v13587_v60  ;;  %v13664_v60 = vld [vmem:[%s20409_s1 + $0x7e4] ss:$40 sps:$4 sm:$0xff]  }
 0x10c   :  { %4327 = vmatpush1.bf16.msra.mxu1 %v13590_v61  ;;  %4287 = vmatprep.subr.bf16.mxu0 %v13595_v3  ;;  %v13659_v61 = vld [vmem:[%s20409_s1 + $0x2e0] ss:$40 sps:$4 sm:$0xff]   ;;  %v13668_v3 = vld [vmem:[%s20409_s1 + $0x790] ss:$40 sps:$4 sm:$0xff]  }
 0x10d   :  { %4328 = vmatprep.subr.bf16.mxu1 %v13598_v4  ;;  %v13673_v4 = vld [vmem:[%s20409_s1 + $0xc44] ss:$40 sps:$4 sm:$0xff]  }
 0x10f   :  { %4288 = vmatpush1.bf16.msra.mxu0 %v13593_v5  ;;  %v13676_v5 = vld [vmem:[%s20409_s1 + $0x1144] ss:$40 sps:$4 sm:$0xff]  }
 0x110   :  { %4329 = vmatpush1.bf16.msra.mxu1 %v13596_v8  ;;  %4289 = vmatprep.subr.bf16.mxu0 %v13601_v9  ;;  %v13671_v8 = vld [vmem:[%s20409_s1 + $0xc40] ss:$40 sps:$4 sm:$0xff]  }
 0x111   :  { %4330 = vmatprep.subr.bf16.mxu1 %v13604_v10  ;;  %v13674_v9 = vld [vmem:[%s20409_s1 + $0x1140] ss:$40 sps:$4 sm:$0xff]   ;;  %v13679_v10 = vld [vmem:[%s20409_s1 + $0xbf4] ss:$40 sps:$4 sm:$0xff]  }
 0x113   :  { %4290 = vmatpush1.bf16.msra.mxu0 %v13599_v11  ;;  %v13682_v11 = vld [vmem:[%s20409_s1 + $0x10f4] ss:$40 sps:$4 sm:$0xff]  }
 0x114   :  { %4331 = vmatpush1.bf16.msra.mxu1 %v13602_v12  ;;  %4291 = vmatprep.subr.bf16.mxu0 %v13607_v13  ;;  %v13677_v12 = vld [vmem:[%s20409_s1 + $0xbf0] ss:$40 sps:$4 sm:$0xff]  }
 0x115   :  { %4332 = vmatprep.subr.bf16.mxu1 %v13610_v14  ;;  %v13680_v13 = vld [vmem:[%s20409_s1 + $0x10f0] ss:$40 sps:$4 sm:$0xff]  }
 0x117   :  { %4292 = vmatpush1.bf16.msra.mxu0 %v13605_v15 }
 0x118   :  { %4333 = vmatpush1.bf16.msra.mxu1 %v13608_v18  ;;  %4293 = vmatprep.subr.bf16.mxu0 %v13613_v19 }
 0x119   :  { %4334 = vmatprep.subr.bf16.mxu1 %v13616_v20 }
 0x11b   :  { %4294 = vmatpush1.bf16.msra.mxu0 %v13611_v21  ;;  %v13685_v21 = vld [vmem:[%s20409_s1 + $0xba4] ss:$40 sps:$4 sm:$0xff]  }
 0x11c   :  { %4335 = vmatpush1.bf16.msra.mxu1 %v13614_v22  ;;  %4295 = vmatprep.subr.bf16.mxu0 %v13619_v23  ;;  %v13688_v22 = vld [vmem:[%s20409_s1 + $0x10a4] ss:$40 sps:$4 sm:$0xff]  }
 0x11d   :  { %4336 = vmatprep.subr.bf16.mxu1 %v13622_v24 }
 0x11f   :  { %4296 = vmatpush1.bf16.msra.mxu0 %v13617_v25  ;;  %v13686_v25 = vld [vmem:[%s20409_s1 + $0x10a0] ss:$40 sps:$4 sm:$0xff]  }
 0x120   :  { %4337 = vmatpush1.bf16.msra.mxu1 %v13620_v26  ;;  %4297 = vmatprep.subr.bf16.mxu0 %v13625_v27 }
 0x121   :  { %4338 = vmatprep.subr.bf16.mxu1 %v13628_v28 }
 0x123   :  { %4298 = vmatpush2.bf16.msra.mxu0 %v13623_v30 }
 0x124   :  { %4339 = vmatpush2.bf16.msra.mxu1 %v13626_v31  ;;  %4299 = vmatprep.subr.bf16.mxu0 %v13631_v32  ;;  %v13691_v31 = vld [vmem:[%s20409_s1 + $0xb54] ss:$40 sps:$4 sm:$0xff]  }
 0x125   :  { %4340 = vmatprep.subr.bf16.mxu1 %v13634_v33  ;;  %v13694_v32 = vld [vmem:[%s20409_s1 + $0x1054] ss:$40 sps:$4 sm:$0xff]   ;;  %v13689_v33 = vld [vmem:[%s20409_s1 + $0xb50] ss:$40 sps:$4 sm:$0xff]  }
 0x127   :  { %4300 = vmatpush2.bf16.msra.mxu0 %v13629_v34  ;;  %v13692_v34 = vld [vmem:[%s20409_s1 + $0x1050] ss:$40 sps:$4 sm:$0xff]  }
 0x128   :  { %4341 = vmatpush2.bf16.msra.mxu1 %v13632_v38  ;;  %4301 = vmatprep.subr.bf16.mxu0 %v13637_v39  ;;  %v13697_v38 = vld [vmem:[%s20409_s1 + $0xb04] ss:$40 sps:$4 sm:$0xff]  }
 0x129   :  { %4342 = vmatprep.subr.bf16.mxu1 %v13640_v41  ;;  %v13700_v39 = vld [vmem:[%s20409_s1 + $0x1004] ss:$40 sps:$4 sm:$0xff]   ;;  %v13695_v41 = vld [vmem:[%s20409_s1 + $0xb00] ss:$40 sps:$4 sm:$0xff]  }
 0x12b   :  { %4302 = vmatpush2.bf16.msra.mxu0 %v13635_v42  ;;  %v13698_v42 = vld [vmem:[%s20409_s1 + $0x1000] ss:$40 sps:$4 sm:$0xff]  }
 0x12c   :  { %4343 = vmatpush2.bf16.msra.mxu1 %v13638_v43  ;;  %4303 = vmatprep.subr.bf16.mxu0 %v13643_v44  ;;  %v13703_v43 = vld [vmem:[%s20409_s1 + $0xab4] ss:$40 sps:$4 sm:$0xff]  }
 0x12d   :  { %4344 = vmatprep.subr.bf16.mxu1 %v13646_v45  ;;  %v13706_v44 = vld [vmem:[%s20409_s1 + $0xfb4] ss:$40 sps:$4 sm:$0xff]   ;;  %v13701_v45 = vld [vmem:[%s20409_s1 + $0xab0] ss:$40 sps:$4 sm:$0xff]  }
 0x12f   :  { %4304 = vmatpush2.bf16.msra.mxu0 %v13641_v46  ;;  %v13704_v46 = vld [vmem:[%s20409_s1 + $0xfb0] ss:$40 sps:$4 sm:$0xff]  }
 0x130   :  { %4345 = vmatpush2.bf16.msra.mxu1 %v13644_v48  ;;  %4305 = vmatprep.subr.bf16.mxu0 %v13649_v49  ;;  %v13709_v48 = vld [vmem:[%s20409_s1 + $0xa64] ss:$40 sps:$4 sm:$0xff]  }
 0x131   :  { %4346 = vmatprep.subr.bf16.mxu1 %v13652_v50  ;;  %v13712_v49 = vld [vmem:[%s20409_s1 + $0xf64] ss:$40 sps:$4 sm:$0xff]   ;;  %v13707_v50 = vld [vmem:[%s20409_s1 + $0xa60] ss:$40 sps:$4 sm:$0xff]  }
 0x133   :  { %4306 = vmatpush2.bf16.msra.mxu0 %v13647_v52  ;;  %v13710_v52 = vld [vmem:[%s20409_s1 + $0xf60] ss:$40 sps:$4 sm:$0xff]  }
 0x134   :  { %4347 = vmatpush2.bf16.msra.mxu1 %v13650_v53  ;;  %4307 = vmatprep.subr.bf16.mxu0 %v13655_v54  ;;  %v13715_v53 = vld [vmem:[%s20409_s1 + $0xa14] ss:$40 sps:$4 sm:$0xff]  }
 0x135   :  { %4348 = vmatprep.subr.bf16.mxu1 %v13658_v55  ;;  %v13718_v54 = vld [vmem:[%s20409_s1 + $0xf14] ss:$40 sps:$4 sm:$0xff]   ;;  %v13713_v55 = vld [vmem:[%s20409_s1 + $0xa10] ss:$40 sps:$4 sm:$0xff]  }
 0x137   :  { %4308 = vmatpush2.bf16.msra.mxu0 %v13653_v56  ;;  %v13716_v56 = vld [vmem:[%s20409_s1 + $0xf10] ss:$40 sps:$4 sm:$0xff]  }
 0x138   :  { %4349 = vmatpush2.bf16.msra.mxu1 %v13656_v57  ;;  %4309 = vmatprep.subr.bf16.mxu0 %v13661_v59  ;;  %v13721_v57 = vld [vmem:[%s20409_s1 + $0xec4] ss:$40 sps:$4 sm:$0xff]  }
 0x139   :  { %4350 = vmatprep.subr.bf16.mxu1 %v13664_v60  ;;  %v13724_v59 = vld [vmem:[%s20409_s1 + $0x13c4] ss:$40 sps:$4 sm:$0xff]   ;;  %v13719_v60 = vld [vmem:[%s20409_s1 + $0xec0] ss:$40 sps:$4 sm:$0xff]  }
 0x13b   :  { %4310 = vmatpush2.bf16.msra.mxu0 %v13659_v61  ;;  %v13722_v61 = vld [vmem:[%s20409_s1 + $0x13c0] ss:$40 sps:$4 sm:$0xff]  }
 0x13c   :  { %4351 = vmatpush2.bf16.msra.mxu1 %v13662_v62  ;;  %4311 = vmatprep.subr.bf16.mxu0 %v13667_v63  ;;  %v13727_v62 = vld [vmem:[%s20409_s1 + $0xe74] ss:$40 sps:$4 sm:$0xff]  }
 0x13d   :  { %4352 = vmatprep.subr.bf16.mxu1 %v13670_v1  ;;  %v13730_v63 = vld [vmem:[%s20409_s1 + $0x1374] ss:$40 sps:$4 sm:$0xff]   ;;  %v13725_v1 = vld [vmem:[%s20409_s1 + $0xe70] ss:$40 sps:$4 sm:$0xff]  }
 0x13f   :  { %4312 = vmatpush2.bf16.msra.mxu0 %v13665_v2  ;;  %v13728_v2 = vld [vmem:[%s20409_s1 + $0x1370] ss:$40 sps:$4 sm:$0xff]  }
 0x140   :  { %4353 = vmatpush2.bf16.msra.mxu1 %v13668_v3  ;;  %4363 = vmatprep.subr.bf16.mxu0 %v13673_v4  ;;  %v13733_v3 = vld [vmem:[%s20409_s1 + $0xe24] ss:$40 sps:$4 sm:$0xff]  }
 0x141   :  { %4404 = vmatprep.subr.bf16.mxu1 %v13676_v5  ;;  %v13736_v4 = vld [vmem:[%s20409_s1 + $0x1324] ss:$40 sps:$4 sm:$0xff]   ;;  %v13731_v5 = vld [vmem:[%s20409_s1 + $0xe20] ss:$40 sps:$4 sm:$0xff]  }
 0x142   :  { %v4069_v14 = vpop.f32.mrf.mxu0  ;;  %4314 = vmatmul.mubr.bf16.vlgmr.msra.gmra.mxu0 %v15685_v6 }
 0x143   :  { %v4110_v15 = vpop.f32.mrf.mxu1  ;;  %4355 = vmatmul.mubr.bf16.vlgmr.msra.gmra.mxu1 %v15687_v7  ;;  %v4070_v18 = vadd.f32 %v4069_v14, %v16342_v58  ;;  %4364 = vmatpush1.bf16.msra.mxu0 %v13671_v8  ;;  %v13683_v58 = vld [vmem:[%s20409_s1 + $0xba0] ss:$40 sps:$4 sm:$0xff]   ;;  %v13748_v14 = vld [vmem:[%s20409_s1 + $0x1284] ss:$40 sps:$4 sm:$0xff]  }
 0x144   :  { %4405 = vmatpush1.bf16.msra.mxu1 %v13674_v9  ;;  %v4071_v19 = vpop.f32.mrf.mxu0  ;;  %4365 = vmatprep.subr.bf16.mxu0 %v13679_v10  ;;  %v13734_v8 = vld [vmem:[%s20409_s1 + $0x1320] ss:$40 sps:$4 sm:$0xff]   ;;  %v13739_v9 = vld [vmem:[%s20409_s1 + $0xdd4] ss:$40 sps:$4 sm:$0xff]  }
 0x145   :  { %v4112_v20 = vpop.f32.mrf.mxu1  ;;  %4406 = vmatprep.subr.bf16.mxu1 %v13682_v11  ;;  %v16543_v23 = vadd.f32 %v4110_v15, %v4070_v18  ;;  %v4072_v24 = vadd.f32 %v4071_v19, %v16352_v0  ;;  %4395 = vmatprep.mubr.bf16.mxu0 %v15781_v36  ;;  %v13742_v10 = vld [vmem:[%s20409_s1 + $0x12d4] ss:$40 sps:$4 sm:$0xff]   ;;  %v13737_v11 = vld [vmem:[%s20409_s1 + $0xdd0] ss:$40 sps:$4 sm:$0xff]   ;;  %v13743_v15 = vld [vmem:[%s20409_s1 + $0xd80] ss:$40 sps:$4 sm:$0xff]  }
 0x146   :  { %4436 = vmatprep.mubr.bf16.mxu1 %v15785_v37  ;;  %v4073_v26 = vpop.f32.mrf.mxu0  ;;  %v13746_v18 = vld [vmem:[%s20409_s1 + $0x1280] ss:$40 sps:$4 sm:$0xff]   ;;  %v13751_v19 = vld [vmem:[%s20409_s1 + $0xd34] ss:$40 sps:$4 sm:$0xff]  }
 0x147   :  { %v4114_v27 = vpop.f32.mrf.mxu1  ;;  %v16554_v28 = vadd.f32 %v4112_v20, %v4072_v24  ;;  %4366 = vmatpush1.bf16.msra.mxu0 %v13677_v12  ;;  %v13740_v12 = vld [vmem:[%s20409_s1 + $0x12d0] ss:$40 sps:$4 sm:$0xff]   ;;  %v13754_v20 = vld [vmem:[%s20409_s1 + $0x1234] ss:$40 sps:$4 sm:$0xff]   ;;  %v13757_v24 = vld [vmem:[%s20409_s1 + $0xce4] ss:$40 sps:$4 sm:$0xff]  }
 0x148   :  { %4407 = vmatpush1.bf16.msra.mxu1 %v13680_v13  ;;  %v4074_v30 = vpop.f32.mrf.mxu0  ;;  %4367 = vmatprep.subr.bf16.mxu0 %v13685_v21  ;;  %v13745_v13 = vld [vmem:[%s20409_s1 + $0xd84] ss:$40 sps:$4 sm:$0xff]   ;;  %v13749_v21 = vld [vmem:[%s20409_s1 + $0xd30] ss:$40 sps:$4 sm:$0xff]   ;;  %v13758_v26 = vld [vmem:[%s20409_s1 + $0x11e0] ss:$40 sps:$4 sm:$0xff]  }
 0x149   :  { %v4115_v0 = vpop.f32.mrf.mxu1  ;;  %4408 = vmatprep.subr.bf16.mxu1 %v13688_v22  ;;  %v13752_v22 = vld [vmem:[%s20409_s1 + $0x1230] ss:$40 sps:$4 sm:$0xff]   ;;  %v13763_v27 = vld [vmem:[%s20409_s1 + $0xc94] ss:$40 sps:$4 sm:$0xff]  }
 0x14a   :  { %v13766_v30 = vld [vmem:[%s20409_s1 + $0x1194] ss:$40 sps:$4 sm:$0xff]   ;;  %v13761_v0 = vld [vmem:[%s20409_s1 + $0xc90] ss:$40 sps:$4 sm:$0xff]  }
 0x14b   :  { %4368 = vmatpush1.bf16.msra.mxu0 %v13683_v58  ;;  %v13760_v58 = vld [vmem:[%s20409_s1 + $0x11e4] ss:$40 sps:$4 sm:$0xff]  }
 0x14c   :  { %4409 = vmatpush1.bf16.msra.mxu1 %v13686_v25  ;;  %4369 = vmatprep.subr.bf16.mxu0 %v13691_v31  ;;  %v13755_v25 = vld [vmem:[%s20409_s1 + $0xce0] ss:$40 sps:$4 sm:$0xff]   ;;  %v13764_v31 = vld [vmem:[%s20409_s1 + $0x1190] ss:$40 sps:$4 sm:$0xff]  }
 0x14d   :  { %4410 = vmatprep.subr.bf16.mxu1 %v13694_v32  ;;  %v685_v32 = vsub.s32 2, %v16285_v29 }
 0x14f   :  { %4370 = vmatpush1.bf16.msra.mxu0 %v13689_v33  ;;  %v13769_v33 = vld [vmem:[%s20409_s1 + $0x24c] ss:$40 sps:$4 sm:$0xff]  }
 0x150   :  { %4411 = vmatpush1.bf16.msra.mxu1 %v13692_v34  ;;  %4371 = vmatprep.subr.bf16.mxu0 %v13697_v38  ;;  %v13772_v34 = vld [vmem:[%s20409_s1 + $0x74c] ss:$40 sps:$4 sm:$0xff]   ;;  %v13767_v38 = vld [vmem:[%s20409_s1 + $0x248] ss:$40 sps:$4 sm:$0xff]  }
 0x151   :  { %4412 = vmatprep.subr.bf16.mxu1 %v13700_v39  ;;  %v13770_v39 = vld [vmem:[%s20409_s1 + $0x748] ss:$40 sps:$4 sm:$0xff]  }
 0x153   :  { %4372 = vmatpush1.bf16.msra.mxu0 %v13695_v41  ;;  %v689_v41 = vsub.s32 3, %v16285_v29 }
 0x154   :  { %4413 = vmatpush1.bf16.msra.mxu1 %v13698_v42  ;;  %4373 = vmatprep.subr.bf16.mxu0 %v13703_v43  ;;  %v16729_v42 = vld [vmem:[%s20411_s2] sm:$0xff] }
 0x155   :  { %4414 = vmatprep.subr.bf16.mxu1 %v13706_v44  ;;  %v686_v43 = vrot.slane %v16729_v42, %v685_v32  ;;  %v13775_v44 = vld [vmem:[%s20409_s1 + $0x1fc] ss:$40 sps:$4 sm:$0xff]  }
 0x157   :  { %4374 = vmatpush1.bf16.msra.mxu0 %v13701_v45  ;;  %v13778_v45 = vld [vmem:[%s20409_s1 + $0x6fc] ss:$40 sps:$4 sm:$0xff]  }
 0x158   :  { %4415 = vmatpush1.bf16.msra.mxu1 %v13704_v46  ;;  %4375 = vmatprep.subr.bf16.mxu0 %v13709_v48  ;;  %v690_v46 = vrot.slane %v16729_v42, %v689_v41 }
 0x159   :  { %4416 = vmatprep.subr.bf16.mxu1 %v13712_v49 }
 0x15b   :  { %4376 = vmatpush1.bf16.msra.mxu0 %v13707_v50 }
 0x15c   :  { %4417 = vmatpush1.bf16.msra.mxu1 %v13710_v52  ;;  %4377 = vmatprep.subr.bf16.mxu0 %v13715_v53  ;;  %v13773_v52 = vld [vmem:[%s20409_s1 + $0x1f8] ss:$40 sps:$4 sm:$0xff]  }
 0x15d   :  { %4418 = vmatprep.subr.bf16.mxu1 %v13718_v54  ;;  %v13776_v53 = vld [vmem:[%s20409_s1 + $0x6f8] ss:$40 sps:$4 sm:$0xff]  }
 0x15f   :  { %4378 = vmatpush1.bf16.msra.mxu0 %v13713_v55 }
 0x160   :  { %4419 = vmatpush1.bf16.msra.mxu1 %v13716_v56  ;;  %4379 = vmatprep.subr.bf16.mxu0 %v13721_v57  ;;  %v13781_v56 = vld [vmem:[%s20409_s1 + $0x1ac] ss:$40 sps:$4 sm:$0xff]  }
 0x161   :  { %4420 = vmatprep.subr.bf16.mxu1 %v13724_v59  ;;  %v13784_v57 = vld [vmem:[%s20409_s1 + $0x6ac] ss:$40 sps:$4 sm:$0xff]  }
 0x163   :  { %4380 = vmatpush2.bf16.msra.mxu0 %v13719_v60 }
 0x164   :  { %4421 = vmatpush2.bf16.msra.mxu1 %v13722_v61  ;;  %4381 = vmatprep.subr.bf16.mxu0 %v13727_v62 }
 0x165   :  { %4422 = vmatprep.subr.bf16.mxu1 %v13730_v63 }
 0x167   :  { %4382 = vmatpush2.bf16.msra.mxu0 %v13725_v1  ;;  %v13779_v1 = vld [vmem:[%s20409_s1 + $0x1a8] ss:$40 sps:$4 sm:$0xff]  }
 0x168   :  { %4423 = vmatpush2.bf16.msra.mxu1 %v13728_v2  ;;  %4383 = vmatprep.subr.bf16.mxu0 %v13733_v3  ;;  %v13782_v2 = vld [vmem:[%s20409_s1 + $0x6a8] ss:$40 sps:$4 sm:$0xff]  }
 0x169   :  { %4424 = vmatprep.subr.bf16.mxu1 %v13736_v4 }
 0x16b   :  { %4384 = vmatpush2.bf16.msra.mxu0 %v13731_v5  ;;  %v13787_v5 = vld [vmem:[%s20409_s1 + $0x15c] ss:$40 sps:$4 sm:$0xff]  }
 0x16c   :  { %4425 = vmatpush2.bf16.msra.mxu1 %v13734_v8  ;;  %4385 = vmatprep.subr.bf16.mxu0 %v13739_v9  ;;  %v13790_v8 = vld [vmem:[%s20409_s1 + $0x65c] ss:$40 sps:$4 sm:$0xff]   ;;  %v13785_v9 = vld [vmem:[%s20409_s1 + $0x158] ss:$40 sps:$4 sm:$0xff]  }
 0x16d   :  { %4426 = vmatprep.subr.bf16.mxu1 %v13742_v10  ;;  %v13788_v10 = vld [vmem:[%s20409_s1 + $0x658] ss:$40 sps:$4 sm:$0xff]  }
 0x16f   :  { %4386 = vmatpush2.bf16.msra.mxu0 %v13737_v11  ;;  %v13793_v11 = vld [vmem:[%s20409_s1 + $0x10c] ss:$40 sps:$4 sm:$0xff]  }
 0x170   :  { %4427 = vmatpush2.bf16.msra.mxu1 %v13740_v12  ;;  %4387 = vmatprep.subr.bf16.mxu0 %v13745_v13  ;;  %v13796_v12 = vld [vmem:[%s20409_s1 + $0x60c] ss:$40 sps:$4 sm:$0xff]   ;;  %v13791_v13 = vld [vmem:[%s20409_s1 + $0x108] ss:$40 sps:$4 sm:$0xff]  }
 0x171   :  { %4428 = vmatprep.subr.bf16.mxu1 %v13748_v14  ;;  %v13794_v14 = vld [vmem:[%s20409_s1 + $0x608] ss:$40 sps:$4 sm:$0xff]  }
 0x173   :  { %4388 = vmatpush2.bf16.msra.mxu0 %v13743_v15  ;;  %v13799_v15 = vld [vmem:[%s20409_s1 + $0xbc] ss:$40 sps:$4 sm:$0xff]  }
 0x174   :  { %4429 = vmatpush2.bf16.msra.mxu1 %v13746_v18  ;;  %4389 = vmatprep.subr.bf16.mxu0 %v13751_v19  ;;  %v13802_v18 = vld [vmem:[%s20409_s1 + $0x5bc] ss:$40 sps:$4 sm:$0xff]   ;;  %v13797_v19 = vld [vmem:[%s20409_s1 + $0xb8] ss:$40 sps:$4 sm:$0xff]  }
 0x175   :  { %4430 = vmatprep.subr.bf16.mxu1 %v13754_v20  ;;  %v13800_v20 = vld [vmem:[%s20409_s1 + $0x5b8] ss:$40 sps:$4 sm:$0xff]  }
 0x177   :  { %4390 = vmatpush2.bf16.msra.mxu0 %v13749_v21  ;;  %v13805_v21 = vld [vmem:[%s20409_s1 + $0x6c] ss:$40 sps:$4 sm:$0xff]  }
 0x178   :  { %4431 = vmatpush2.bf16.msra.mxu1 %v13752_v22  ;;  %4391 = vmatprep.subr.bf16.mxu0 %v13757_v24  ;;  %v13808_v22 = vld [vmem:[%s20409_s1 + $0x56c] ss:$40 sps:$4 sm:$0xff]   ;;  %v13803_v24 = vld [vmem:[%s20409_s1 + $0x68] ss:$40 sps:$4 sm:$0xff]  }
 0x179   :  { %4432 = vmatprep.subr.bf16.mxu1 %v13760_v58  ;;  %v13806_v58 = vld [vmem:[%s20409_s1 + $0x568] ss:$40 sps:$4 sm:$0xff]  }
 0x17b   :  { %4392 = vmatpush2.bf16.msra.mxu0 %v13755_v25  ;;  %v13811_v25 = vld [vmem:[%s20409_s1 + $0x1c] ss:$40 sps:$4 sm:$0xff]  }
 0x17c   :  { %4433 = vmatpush2.bf16.msra.mxu1 %v13758_v26  ;;  %4393 = vmatprep.subr.bf16.mxu0 %v13763_v27  ;;  %v13814_v26 = vld [vmem:[%s20409_s1 + $0x51c] ss:$40 sps:$4 sm:$0xff]   ;;  %v13809_v27 = vld [vmem:[%s20409_s1 + $0x18] ss:$40 sps:$4 sm:$0xff]  }
 0x17d   :  { %4434 = vmatprep.subr.bf16.mxu1 %v13766_v30  ;;  %v13812_v30 = vld [vmem:[%s20409_s1 + $0x518] ss:$40 sps:$4 sm:$0xff]  }
 0x17f   :  { %4394 = vmatpush2.bf16.msra.mxu0 %v13761_v0  ;;  %v13817_v0 = vld [vmem:[%s20409_s1 + $0x4cc] ss:$40 sps:$4 sm:$0xff]  }
 0x180   :  { %4435 = vmatpush2.bf16.msra.mxu1 %v13764_v31  ;;  %4445 = vmatprep.subr.bf16.mxu0 %v13769_v33  ;;  %v13820_v31 = vld [vmem:[%s20409_s1 + $0x9cc] ss:$40 sps:$4 sm:$0xff]   ;;  %v13815_v33 = vld [vmem:[%s20409_s1 + $0x4c8] ss:$40 sps:$4 sm:$0xff]  }
 0x181   :  { %4486 = vmatprep.subr.bf16.mxu1 %v13772_v34  ;;  %v13818_v34 = vld [vmem:[%s20409_s1 + $0x9c8] ss:$40 sps:$4 sm:$0xff]  }
 0x182   :  { %v4151_v48 = vpop.f32.mrf.mxu0  ;;  %4396 = vmatmul.mubr.bf16.vlgmr.msra.gmra.mxu0 %v15905_v16 }
 0x183   :  { %v4192_v49 = vpop.f32.mrf.mxu1  ;;  %4437 = vmatmul.mubr.bf16.vlgmr.msra.gmra.mxu1 %v15909_v17  ;;  %v4152_v50 = vadd.f32 %v4151_v48, %v686_v43  ;;  %4446 = vmatpush1.bf16.msra.mxu0 %v13767_v38  ;;  %v13823_v38 = vld [vmem:[%s20409_s1 + $0x47c] ss:$40 sps:$4 sm:$0xff]   ;;  %v13821_v43 = vld [vmem:[%s20409_s1 + $0x478] ss:$40 sps:$4 sm:$0xff]   ;;  %v13827_v48 = vld [vmem:[%s20409_s1 + $0x428] ss:$40 sps:$4 sm:$0xff]  }
 0x184   :  { %4487 = vmatpush1.bf16.msra.mxu1 %v13770_v39  ;;  %v4153_v54 = vpop.f32.mrf.mxu0  ;;  %4447 = vmatprep.subr.bf16.mxu0 %v13775_v44  ;;  %v13826_v39 = vld [vmem:[%s20409_s1 + $0x97c] ss:$40 sps:$4 sm:$0xff]   ;;  %v13824_v44 = vld [vmem:[%s20409_s1 + $0x978] ss:$40 sps:$4 sm:$0xff]  }
 0x185   :  { %v4194_v55 = vpop.f32.mrf.mxu1  ;;  %4488 = vmatprep.subr.bf16.mxu1 %v13778_v45  ;;  %v16757_v59 = vadd.f32 %v4192_v49, %v4152_v50  ;;  %v4154_v60 = vadd.f32 %v4153_v54, %v690_v46  ;;  %4477 = vmatprep.mubr.bf16.mxu0 %v15616_v47  ;;  %v13829_v45 = vld [vmem:[%s20409_s1 + $0x42c] ss:$40 sps:$4 sm:$0xff]   ;;  %v13830_v49 = vld [vmem:[%s20409_s1 + $0x928] ss:$40 sps:$4 sm:$0xff]   ;;  %v13835_v50 = vld [vmem:[%s20409_s1 + $0x3dc] ss:$40 sps:$4 sm:$0xff]  }
 0x186   :  { %4518 = vmatprep.mubr.bf16.mxu1 %v15627_v51  ;;  %v4155_v61 = vpop.f32.mrf.mxu0  ;;  %v13832_v46 = vld [vmem:[%s20409_s1 + $0x92c] ss:$40 sps:$4 sm:$0xff]   ;;  %v13836_v54 = vld [vmem:[%s20409_s1 + $0x8d8] ss:$40 sps:$4 sm:$0xff]  }
 0x187   :  { %v4196_v62 = vpop.f32.mrf.mxu1  ;;  %v16761_v63 = vadd.f32 %v4194_v55, %v4154_v60  ;;  %4448 = vmatpush1.bf16.msra.mxu0 %v13773_v52  ;;  %v13838_v52 = vld [vmem:[%s20409_s1 + $0x8dc] ss:$40 sps:$4 sm:$0xff]   ;;  %v13841_v55 = vld [vmem:[%s20409_s1 + $0x38c] ss:$40 sps:$4 sm:$0xff]   ;;  %v13842_v60 = vld [vmem:[%s20409_s1 + $0x888] ss:$40 sps:$4 sm:$0xff]  }
 0x188   :  { %4489 = vmatpush1.bf16.msra.mxu1 %v13776_v53  ;;  %v4156_v3 = vpop.f32.mrf.mxu0  ;;  %4449 = vmatprep.subr.bf16.mxu0 %v13781_v56  ;;  %v13833_v53 = vld [vmem:[%s20409_s1 + $0x3d8] ss:$40 sps:$4 sm:$0xff]   ;;  %v13844_v56 = vld [vmem:[%s20409_s1 + $0x88c] ss:$40 sps:$4 sm:$0xff]   ;;  %v13847_v61 = vld [vmem:[%s20409_s1 + $0x33c] ss:$40 sps:$4 sm:$0xff]  }
 0x189   :  { %v4197_v4 = vpop.f32.mrf.mxu1  ;;  %4490 = vmatprep.subr.bf16.mxu1 %v13784_v57  ;;  %v13839_v57 = vld [vmem:[%s20409_s1 + $0x388] ss:$40 sps:$4 sm:$0xff]   ;;  %v13850_v62 = vld [vmem:[%s20409_s1 + $0x83c] ss:$40 sps:$4 sm:$0xff]   ;;  %v13853_v3 = vld [vmem:[%s20409_s1 + $0x2ec] ss:$40 sps:$4 sm:$0xff]  }
 0x18a   :  { %v13856_v4 = vld [vmem:[%s20409_s1 + $0x7ec] ss:$40 sps:$4 sm:$0xff]  }
 0x18b   :  { %4450 = vmatpush1.bf16.msra.mxu0 %v13779_v1  ;;  %v13845_v1 = vld [vmem:[%s20409_s1 + $0x338] ss:$40 sps:$4 sm:$0xff]  }
 0x18c   :  { %4491 = vmatpush1.bf16.msra.mxu1 %v13782_v2  ;;  %4451 = vmatprep.subr.bf16.mxu0 %v13787_v5  ;;  %v13848_v2 = vld [vmem:[%s20409_s1 + $0x838] ss:$40 sps:$4 sm:$0xff]   ;;  %v13851_v5 = vld [vmem:[%s20409_s1 + $0x2e8] ss:$40 sps:$4 sm:$0xff]  }
 0x18d   :  { %4492 = vmatprep.subr.bf16.mxu1 %v13790_v8  ;;  %v13854_v8 = vld [vmem:[%s20409_s1 + $0x7e8] ss:$40 sps:$4 sm:$0xff]  }
 0x18f   :  { %4452 = vmatpush1.bf16.msra.mxu0 %v13785_v9  ;;  %v13859_v9 = vld [vmem:[%s20409_s1 + $0x29c] ss:$40 sps:$4 sm:$0xff]  }
 0x190   :  { %4493 = vmatpush1.bf16.msra.mxu1 %v13788_v10  ;;  %4453 = vmatprep.subr.bf16.mxu0 %v13793_v11  ;;  %v13862_v10 = vld [vmem:[%s20409_s1 + $0x79c] ss:$40 sps:$4 sm:$0xff]   ;;  %v13857_v11 = vld [vmem:[%s20409_s1 + $0x298] ss:$40 sps:$4 sm:$0xff]  }
 0x191   :  { %4494 = vmatprep.subr.bf16.mxu1 %v13796_v12  ;;  %v13860_v12 = vld [vmem:[%s20409_s1 + $0x798] ss:$40 sps:$4 sm:$0xff]  }
 0x193   :  { %4454 = vmatpush1.bf16.msra.mxu0 %v13791_v13  ;;  %v13865_v13 = vld [vmem:[%s20409_s1 + $0xc4c] ss:$40 sps:$4 sm:$0xff]  }
 0x194   :  { %4495 = vmatpush1.bf16.msra.mxu1 %v13794_v14  ;;  %4455 = vmatprep.subr.bf16.mxu0 %v13799_v15  ;;  %v13868_v14 = vld [vmem:[%s20409_s1 + $0x114c] ss:$40 sps:$4 sm:$0xff]   ;;  %v13863_v15 = vld [vmem:[%s20409_s1 + $0xc48] ss:$40 sps:$4 sm:$0xff]  }
 0x195   :  { %4496 = vmatprep.subr.bf16.mxu1 %v13802_v18  ;;  %v13866_v18 = vld [vmem:[%s20409_s1 + $0x1148] ss:$40 sps:$4 sm:$0xff]  }
 0x197   :  { %4456 = vmatpush1.bf16.msra.mxu0 %v13797_v19  ;;  %v13871_v19 = vld [vmem:[%s20409_s1 + $0xbfc] ss:$40 sps:$4 sm:$0xff]  }
 0x198   :  { %4497 = vmatpush1.bf16.msra.mxu1 %v13800_v20  ;;  %4457 = vmatprep.subr.bf16.mxu0 %v13805_v21  ;;  %v13874_v20 = vld [vmem:[%s20409_s1 + $0x10fc] ss:$40 sps:$4 sm:$0xff]  }
 0x199   :  { %4498 = vmatprep.subr.bf16.mxu1 %v13808_v22 }
 0x19b   :  { %4458 = vmatpush1.bf16.msra.mxu0 %v13803_v24 }
 0x19c   :  { %4499 = vmatpush1.bf16.msra.mxu1 %v13806_v58  ;;  %4459 = vmatprep.subr.bf16.mxu0 %v13811_v25  ;;  %v13869_v58 = vld [vmem:[%s20409_s1 + $0xbf8] ss:$40 sps:$4 sm:$0xff]  }
 0x19d   :  { %4500 = vmatprep.subr.bf16.mxu1 %v13814_v26  ;;  %v13872_v25 = vld [vmem:[%s20409_s1 + $0x10f8] ss:$40 sps:$4 sm:$0xff]  }
 0x19f   :  { %4460 = vmatpush1.bf16.msra.mxu0 %v13809_v27 }
 0x1a0   :  { %4501 = vmatpush1.bf16.msra.mxu1 %v13812_v30  ;;  %4461 = vmatprep.subr.bf16.mxu0 %v13817_v0  ;;  %v13877_v30 = vld [vmem:[%s20409_s1 + $0xbac] ss:$40 sps:$4 sm:$0xff]  }
 0x1a1   :  { %4502 = vmatprep.subr.bf16.mxu1 %v13820_v31 }
 0x1a3   :  { %4462 = vmatpush2.bf16.msra.mxu0 %v13815_v33 }
 0x1a4   :  { %4503 = vmatpush2.bf16.msra.mxu1 %v13818_v34  ;;  %4463 = vmatprep.subr.bf16.mxu0 %v13823_v38 }
 0x1a5   :  { %4504 = vmatprep.subr.bf16.mxu1 %v13826_v39  ;;  %v13875_v39 = vld [vmem:[%s20409_s1 + $0xba8] ss:$40 sps:$4 sm:$0xff]  }
 0x1a7   :  { %4464 = vmatpush2.bf16.msra.mxu0 %v13821_v43  ;;  %v13878_v43 = vld [vmem:[%s20409_s1 + $0x10a8] ss:$40 sps:$4 sm:$0xff]  }
 0x1a8   :  { %4505 = vmatpush2.bf16.msra.mxu1 %v13824_v44  ;;  %4465 = vmatprep.subr.bf16.mxu0 %v13829_v45  ;;  %v13883_v45 = vld [vmem:[%s20409_s1 + $0xb5c] ss:$40 sps:$4 sm:$0xff]  }
 0x1a9   :  { %4506 = vmatprep.subr.bf16.mxu1 %v13832_v46  ;;  %v13886_v46 = vld [vmem:[%s20409_s1 + $0x105c] ss:$40 sps:$4 sm:$0xff]  }
 0x1ab   :  { %4466 = vmatpush2.bf16.msra.mxu0 %v13827_v48  ;;  %v13881_v48 = vld [vmem:[%s20409_s1 + $0xb58] ss:$40 sps:$4 sm:$0xff]  }
 0x1ac   :  { %4507 = vmatpush2.bf16.msra.mxu1 %v13830_v49  ;;  %4467 = vmatprep.subr.bf16.mxu0 %v13835_v50  ;;  %v13884_v49 = vld [vmem:[%s20409_s1 + $0x1058] ss:$40 sps:$4 sm:$0xff]   ;;  %v13889_v50 = vld [vmem:[%s20409_s1 + $0xb0c] ss:$40 sps:$4 sm:$0xff]  }
 0x1ad   :  { %4508 = vmatprep.subr.bf16.mxu1 %v13838_v52  ;;  %v13892_v52 = vld [vmem:[%s20409_s1 + $0x100c] ss:$40 sps:$4 sm:$0xff]  }
 0x1af   :  { %4468 = vmatpush2.bf16.msra.mxu0 %v13833_v53  ;;  %v13887_v53 = vld [vmem:[%s20409_s1 + $0xb08] ss:$40 sps:$4 sm:$0xff]  }
 0x1b0   :  { %4509 = vmatpush2.bf16.msra.mxu1 %v13836_v54  ;;  %4469 = vmatprep.subr.bf16.mxu0 %v13841_v55  ;;  %v13890_v54 = vld [vmem:[%s20409_s1 + $0x1008] ss:$40 sps:$4 sm:$0xff]   ;;  %v13895_v55 = vld [vmem:[%s20409_s1 + $0xabc] ss:$40 sps:$4 sm:$0xff]  }
 0x1b1   :  { %4510 = vmatprep.subr.bf16.mxu1 %v13844_v56  ;;  %v13898_v56 = vld [vmem:[%s20409_s1 + $0xfbc] ss:$40 sps:$4 sm:$0xff]  }
 0x1b3   :  { %4470 = vmatpush2.bf16.msra.mxu0 %v13839_v57  ;;  %v13893_v57 = vld [vmem:[%s20409_s1 + $0xab8] ss:$40 sps:$4 sm:$0xff]  }
 0x1b4   :  { %4511 = vmatpush2.bf16.msra.mxu1 %v13842_v60  ;;  %4471 = vmatprep.subr.bf16.mxu0 %v13847_v61  ;;  %v13896_v60 = vld [vmem:[%s20409_s1 + $0xfb8] ss:$40 sps:$4 sm:$0xff]   ;;  %v13901_v61 = vld [vmem:[%s20409_s1 + $0xa6c] ss:$40 sps:$4 sm:$0xff]  }
 0x1b5   :  { %4512 = vmatprep.subr.bf16.mxu1 %v13850_v62  ;;  %v13904_v62 = vld [vmem:[%s20409_s1 + $0xf6c] ss:$40 sps:$4 sm:$0xff]  }
 0x1b7   :  { %4472 = vmatpush2.bf16.msra.mxu0 %v13845_v1  ;;  %v13899_v1 = vld [vmem:[%s20409_s1 + $0xa68] ss:$40 sps:$4 sm:$0xff]  }
 0x1b8   :  { %4513 = vmatpush2.bf16.msra.mxu1 %v13848_v2  ;;  %4473 = vmatprep.subr.bf16.mxu0 %v13853_v3  ;;  %v13902_v2 = vld [vmem:[%s20409_s1 + $0xf68] ss:$40 sps:$4 sm:$0xff]   ;;  %v13907_v3 = vld [vmem:[%s20409_s1 + $0xa1c] ss:$40 sps:$4 sm:$0xff]  }
 0x1b9   :  { %4514 = vmatprep.subr.bf16.mxu1 %v13856_v4  ;;  %v13910_v4 = vld [vmem:[%s20409_s1 + $0xf1c] ss:$40 sps:$4 sm:$0xff]  }
 0x1bb   :  { %4474 = vmatpush2.bf16.msra.mxu0 %v13851_v5  ;;  %v13905_v5 = vld [vmem:[%s20409_s1 + $0xa18] ss:$40 sps:$4 sm:$0xff]  }
 0x1bc   :  { %4515 = vmatpush2.bf16.msra.mxu1 %v13854_v8  ;;  %4475 = vmatprep.subr.bf16.mxu0 %v13859_v9  ;;  %v13908_v8 = vld [vmem:[%s20409_s1 + $0xf18] ss:$40 sps:$4 sm:$0xff]   ;;  %v13913_v9 = vld [vmem:[%s20409_s1 + $0xecc] ss:$40 sps:$4 sm:$0xff]  }
 0x1bd   :  { %4516 = vmatprep.subr.bf16.mxu1 %v13862_v10  ;;  %v13916_v10 = vld [vmem:[%s20409_s1 + $0x13cc] ss:$40 sps:$4 sm:$0xff]  }
 0x1bf   :  { %4476 = vmatpush2.bf16.msra.mxu0 %v13857_v11  ;;  %v13911_v11 = vld [vmem:[%s20409_s1 + $0xec8] ss:$40 sps:$4 sm:$0xff]  }
 0x1c0   :  { %4517 = vmatpush2.bf16.msra.mxu1 %v13860_v12  ;;  %4527 = vmatprep.subr.bf16.mxu0 %v13865_v13  ;;  %v13914_v12 = vld [vmem:[%s20409_s1 + $0x13c8] ss:$40 sps:$4 sm:$0xff]   ;;  %v13919_v13 = vld [vmem:[%s20409_s1 + $0xe7c] ss:$40 sps:$4 sm:$0xff]  }
 0x1c1   :  { %4568 = vmatprep.subr.bf16.mxu1 %v13868_v14  ;;  %v13922_v14 = vld [vmem:[%s20409_s1 + $0x137c] ss:$40 sps:$4 sm:$0xff]  }
 0x1c2   :  { %v4233_v21 = vpop.f32.mrf.mxu0  ;;  %4478 = vmatmul.mubr.bf16.vlgmr.msra.gmra.mxu0 %v15685_v6 }
 0x1c3   :  { %v4274_v22 = vpop.f32.mrf.mxu1  ;;  %4519 = vmatmul.mubr.bf16.vlgmr.msra.gmra.mxu1 %v15687_v7  ;;  %v4234_v24 = vadd.f32 %v4233_v21, %v16757_v59  ;;  %4528 = vmatpush1.bf16.msra.mxu0 %v13863_v15  ;;  %v13880_v59 = vld [vmem:[%s20409_s1 + $0x10ac] ss:$40 sps:$4 sm:$0xff]   ;;  %v13917_v15 = vld [vmem:[%s20409_s1 + $0xe78] ss:$40 sps:$4 sm:$0xff]   ;;  %v13923_v21 = vld [vmem:[%s20409_s1 + $0xe28] ss:$40 sps:$4 sm:$0xff]  }
 0x1c4   :  { %4569 = vmatpush1.bf16.msra.mxu1 %v13866_v18  ;;  %v4235_v26 = vpop.f32.mrf.mxu0  ;;  %4529 = vmatprep.subr.bf16.mxu0 %v13871_v19  ;;  %v13920_v18 = vld [vmem:[%s20409_s1 + $0x1378] ss:$40 sps:$4 sm:$0xff]   ;;  %v13925_v19 = vld [vmem:[%s20409_s1 + $0xe2c] ss:$40 sps:$4 sm:$0xff]  }
 0x1c5   :  { %v4276_v27 = vpop.f32.mrf.mxu1  ;;  %4570 = vmatprep.subr.bf16.mxu1 %v13874_v20  ;;  %v16958_v0 = vadd.f32 %v4274_v22, %v4234_v24  ;;  %v4236_v31 = vadd.f32 %v4235_v26, %v16761_v63  ;;  %4559 = vmatprep.mubr.bf16.mxu0 %v15781_v36  ;;  %v13928_v20 = vld [vmem:[%s20409_s1 + $0x132c] ss:$40 sps:$4 sm:$0xff]   ;;  %v13926_v22 = vld [vmem:[%s20409_s1 + $0x1328] ss:$40 sps:$4 sm:$0xff]   ;;  %v13931_v24 = vld [vmem:[%s20409_s1 + $0xddc] ss:$40 sps:$4 sm:$0xff]  }
 0x1c6   :  { %4600 = vmatprep.mubr.bf16.mxu1 %v15785_v37  ;;  %v4237_v33 = vpop.f32.mrf.mxu0  ;;  %v13932_v26 = vld [vmem:[%s20409_s1 + $0x12d8] ss:$40 sps:$4 sm:$0xff]  }
 0x1c7   :  { %v4278_v34 = vpop.f32.mrf.mxu1  ;;  %v16963_v38 = vadd.f32 %v4276_v27, %v4236_v31  ;;  %4530 = vmatpush1.bf16.msra.mxu0 %v13869_v58  ;;  %v13934_v58 = vld [vmem:[%s20409_s1 + $0x12dc] ss:$40 sps:$4 sm:$0xff]   ;;  %v13937_v27 = vld [vmem:[%s20409_s1 + $0xd8c] ss:$40 sps:$4 sm:$0xff]   ;;  %v13938_v31 = vld [vmem:[%s20409_s1 + $0x1288] ss:$40 sps:$4 sm:$0xff]  }
 0x1c8   :  { %4571 = vmatpush1.bf16.msra.mxu1 %v13872_v25  ;;  %v4238_v44 = vpop.f32.mrf.mxu0  ;;  %4531 = vmatprep.subr.bf16.mxu0 %v13877_v30  ;;  %v13929_v25 = vld [vmem:[%s20409_s1 + $0xdd8] ss:$40 sps:$4 sm:$0xff]   ;;  %v13940_v30 = vld [vmem:[%s20409_s1 + $0x128c] ss:$40 sps:$4 sm:$0xff]   ;;  %v13943_v33 = vld [vmem:[%s20409_s1 + $0xd3c] ss:$40 sps:$4 sm:$0xff]  }
 0x1c9   :  { %v4279_v63 = vpop.f32.mrf.mxu1  ;;  %4572 = vmatprep.subr.bf16.mxu1 %v13880_v59  ;;  %v13935_v59 = vld [vmem:[%s20409_s1 + $0xd88] ss:$40 sps:$4 sm:$0xff]   ;;  %v13946_v34 = vld [vmem:[%s20409_s1 + $0x123c] ss:$40 sps:$4 sm:$0xff]   ;;  %v13949_v44 = vld [vmem:[%s20409_s1 + $0xcec] ss:$40 sps:$4 sm:$0xff]  }
 0x1ca   :  { %v13952_v63 = vld [vmem:[%s20409_s1 + $0x11ec] ss:$40 sps:$4 sm:$0xff]  }
 0x1cb   :  { %4532 = vmatpush1.bf16.msra.mxu0 %v13875_v39  ;;  %v13941_v39 = vld [vmem:[%s20409_s1 + $0xd38] ss:$40 sps:$4 sm:$0xff]  }
 0x1cc   :  { %4573 = vmatpush1.bf16.msra.mxu1 %v13878_v43  ;;  %4533 = vmatprep.subr.bf16.mxu0 %v13883_v45  ;;  %v13944_v43 = vld [vmem:[%s20409_s1 + $0x1238] ss:$40 sps:$4 sm:$0xff]   ;;  %v13947_v45 = vld [vmem:[%s20409_s1 + $0xce8] ss:$40 sps:$4 sm:$0xff]  }
 0x1cd   :  { %4574 = vmatprep.subr.bf16.mxu1 %v13886_v46  ;;  %v13950_v46 = vld [vmem:[%s20409_s1 + $0x11e8] ss:$40 sps:$4 sm:$0xff]  }
 0x1cf   :  { %4534 = vmatpush1.bf16.msra.mxu0 %v13881_v48  ;;  %v13955_v48 = vld [vmem:[%s20409_s1 + $0xc9c] ss:$40 sps:$4 sm:$0xff]  }
 0x1d0   :  { %4575 = vmatpush1.bf16.msra.mxu1 %v13884_v49  ;;  %4535 = vmatprep.subr.bf16.mxu0 %v13889_v50  ;;  %v13958_v49 = vld [vmem:[%s20409_s1 + $0x119c] ss:$40 sps:$4 sm:$0xff]   ;;  %v13953_v50 = vld [vmem:[%s20409_s1 + $0xc98] ss:$40 sps:$4 sm:$0xff]  }
 0x1d1   :  { %4576 = vmatprep.subr.bf16.mxu1 %v13892_v52  ;;  %v13956_v52 = vld [vmem:[%s20409_s1 + $0x1198] ss:$40 sps:$4 sm:$0xff]  }
 0x1d3   :  { %4536 = vmatpush1.bf16.msra.mxu0 %v13887_v53  ;;  %v693_v53 = vsub.s32 4, %v16285_v29 }
 0x1d4   :  { %4577 = vmatpush1.bf16.msra.mxu1 %v13890_v54  ;;  %4537 = vmatprep.subr.bf16.mxu0 %v13895_v55  ;;  %v13961_v54 = vld [vmem:[%s20409_s1 + $0x254] ss:$40 sps:$4 sm:$0xff]  }
 0x1d5   :  { %4578 = vmatprep.subr.bf16.mxu1 %v13898_v56  ;;  %v13964_v55 = vld [vmem:[%s20409_s1 + $0x754] ss:$40 sps:$4 sm:$0xff]   ;;  %v697_v56 = vsub.s32 5, %v16285_v29 }
 0x1d7   :  { %4538 = vmatpush1.bf16.msra.mxu0 %v13893_v57  ;;  %v694_v57 = vrot.slane %v16729_v42, %v693_v53 }
 0x1d8   :  { %4579 = vmatpush1.bf16.msra.mxu1 %v13896_v60  ;;  %4539 = vmatprep.subr.bf16.mxu0 %v13901_v61  ;;  %v13959_v60 = vld [vmem:[%s20409_s1 + $0x250] ss:$40 sps:$4 sm:$0xff]  }
 0x1d9   :  { %4580 = vmatprep.subr.bf16.mxu1 %v13904_v62  ;;  %v13962_v61 = vld [vmem:[%s20409_s1 + $0x750] ss:$40 sps:$4 sm:$0xff]   ;;  %v13967_v62 = vld [vmem:[%s20409_s1 + $0x204] ss:$40 sps:$4 sm:$0xff]  }
 0x1db   :  { %4540 = vmatpush1.bf16.msra.mxu0 %v13899_v1  ;;  %v13970_v1 = vld [vmem:[%s20409_s1 + $0x704] ss:$40 sps:$4 sm:$0xff]  }
 0x1dc   :  { %4581 = vmatpush1.bf16.msra.mxu1 %v13902_v2  ;;  %4541 = vmatprep.subr.bf16.mxu0 %v13907_v3  ;;  %v698_v2 = vrot.slane %v16729_v42, %v697_v56  ;;  %v13965_v3 = vld [vmem:[%s20409_s1 + $0x200] ss:$40 sps:$4 sm:$0xff]   ;;  %v13976_v42 = vld [vmem:[%s20409_s1 + $0x6b4] ss:$40 sps:$4 sm:$0xff]  }
 0x1dd   :  { %4582 = vmatprep.subr.bf16.mxu1 %v13910_v4  ;;  %v13968_v4 = vld [vmem:[%s20409_s1 + $0x700] ss:$40 sps:$4 sm:$0xff]  }
 0x1df   :  { %4542 = vmatpush1.bf16.msra.mxu0 %v13905_v5 }
 0x1e0   :  { %4583 = vmatpush1.bf16.msra.mxu1 %v13908_v8  ;;  %4543 = vmatprep.subr.bf16.mxu0 %v13913_v9  ;;  %v13973_v9 = vld [vmem:[%s20409_s1 + $0x1b4] ss:$40 sps:$4 sm:$0xff]  }
 0x1e1   :  { %4584 = vmatprep.subr.bf16.mxu1 %v13916_v10 }
 0x1e3   :  { %4544 = vmatpush2.bf16.msra.mxu0 %v13911_v11 }
 0x1e4   :  { %4585 = vmatpush2.bf16.msra.mxu1 %v13914_v12  ;;  %4545 = vmatprep.subr.bf16.mxu0 %v13919_v13 }
 0x1e5   :  { %4586 = vmatprep.subr.bf16.mxu1 %v13922_v14 }
 0x1e7   :  { %4546 = vmatpush2.bf16.msra.mxu0 %v13917_v15 }
 0x1e8   :  { %4587 = vmatpush2.bf16.msra.mxu1 %v13920_v18  ;;  %4547 = vmatprep.subr.bf16.mxu0 %v13925_v19  ;;  %v13971_v19 = vld [vmem:[%s20409_s1 + $0x1b0] ss:$40 sps:$4 sm:$0xff]  }
 0x1e9   :  { %4588 = vmatprep.subr.bf16.mxu1 %v13928_v20  ;;  %v13974_v20 = vld [vmem:[%s20409_s1 + $0x6b0] ss:$40 sps:$4 sm:$0xff]  }
 0x1eb   :  { %4548 = vmatpush2.bf16.msra.mxu0 %v13923_v21 }
 0x1ec   :  { %4589 = vmatpush2.bf16.msra.mxu1 %v13926_v22  ;;  %4549 = vmatprep.subr.bf16.mxu0 %v13931_v24 }
 0x1ed   :  { %4590 = vmatprep.subr.bf16.mxu1 %v13934_v58  ;;  %v13977_v58 = vld [vmem:[%s20409_s1 + $0x160] ss:$40 sps:$4 sm:$0xff]  }
 0x1ef   :  { %4550 = vmatpush2.bf16.msra.mxu0 %v13929_v25  ;;  %v13980_v25 = vld [vmem:[%s20409_s1 + $0x660] ss:$40 sps:$4 sm:$0xff]  }
 0x1f0   :  { %4591 = vmatpush2.bf16.msra.mxu1 %v13932_v26  ;;  %4551 = vmatprep.subr.bf16.mxu0 %v13937_v27  ;;  %v13985_v26 = vld [vmem:[%s20409_s1 + $0x114] ss:$40 sps:$4 sm:$0xff]  }
 0x1f1   :  { %4592 = vmatprep.subr.bf16.mxu1 %v13940_v30  ;;  %v13988_v27 = vld [vmem:[%s20409_s1 + $0x614] ss:$40 sps:$4 sm:$0xff]   ;;  %v13983_v30 = vld [vmem:[%s20409_s1 + $0x110] ss:$40 sps:$4 sm:$0xff]  }
 0x1f3   :  { %4552 = vmatpush2.bf16.msra.mxu0 %v13935_v59  ;;  %v13986_v59 = vld [vmem:[%s20409_s1 + $0x610] ss:$40 sps:$4 sm:$0xff]  }
 0x1f4   :  { %4593 = vmatpush2.bf16.msra.mxu1 %v13938_v31  ;;  %4553 = vmatprep.subr.bf16.mxu0 %v13943_v33  ;;  %v13991_v31 = vld [vmem:[%s20409_s1 + $0xc4] ss:$40 sps:$4 sm:$0xff]  }
 0x1f5   :  { %4594 = vmatprep.subr.bf16.mxu1 %v13946_v34  ;;  %v13994_v33 = vld [vmem:[%s20409_s1 + $0x5c4] ss:$40 sps:$4 sm:$0xff]   ;;  %v13989_v34 = vld [vmem:[%s20409_s1 + $0xc0] ss:$40 sps:$4 sm:$0xff]  }
 0x1f7   :  { %4554 = vmatpush2.bf16.msra.mxu0 %v13941_v39  ;;  %v13992_v39 = vld [vmem:[%s20409_s1 + $0x5c0] ss:$40 sps:$4 sm:$0xff]  }
 0x1f8   :  { %4595 = vmatpush2.bf16.msra.mxu1 %v13944_v43  ;;  %4555 = vmatprep.subr.bf16.mxu0 %v13949_v44  ;;  %v13997_v43 = vld [vmem:[%s20409_s1 + $0x74] ss:$40 sps:$4 sm:$0xff]  }
 0x1f9   :  { %4596 = vmatprep.subr.bf16.mxu1 %v13952_v63  ;;  %v14000_v44 = vld [vmem:[%s20409_s1 + $0x574] ss:$40 sps:$4 sm:$0xff]   ;;  %v13995_v63 = vld [vmem:[%s20409_s1 + $0x70] ss:$40 sps:$4 sm:$0xff]  }
 0x1fb   :  { %4556 = vmatpush2.bf16.msra.mxu0 %v13947_v45  ;;  %v13998_v45 = vld [vmem:[%s20409_s1 + $0x570] ss:$40 sps:$4 sm:$0xff]  }
 0x1fc   :  { %4597 = vmatpush2.bf16.msra.mxu1 %v13950_v46  ;;  %4557 = vmatprep.subr.bf16.mxu0 %v13955_v48  ;;  %v14003_v46 = vld [vmem:[%s20409_s1 + $0x24] ss:$40 sps:$4 sm:$0xff]  }
 0x1fd   :  { %4598 = vmatprep.subr.bf16.mxu1 %v13958_v49  ;;  %v14006_v48 = vld [vmem:[%s20409_s1 + $0x524] ss:$40 sps:$4 sm:$0xff]   ;;  %v14001_v49 = vld [vmem:[%s20409_s1 + $0x20] ss:$40 sps:$4 sm:$0xff]  }
 0x1ff   :  { %4558 = vmatpush2.bf16.msra.mxu0 %v13953_v50  ;;  %v14004_v50 = vld [vmem:[%s20409_s1 + $0x520] ss:$40 sps:$4 sm:$0xff]  }
 0x200   :  { %4599 = vmatpush2.bf16.msra.mxu1 %v13956_v52  ;;  %4609 = vmatprep.subr.bf16.mxu0 %v13961_v54  ;;  %v14009_v52 = vld [vmem:[%s20409_s1 + $0x4d4] ss:$40 sps:$4 sm:$0xff]  }
 0x201   :  { %4650 = vmatprep.subr.bf16.mxu1 %v13964_v55  ;;  %v14012_v54 = vld [vmem:[%s20409_s1 + $0x9d4] ss:$40 sps:$4 sm:$0xff]   ;;  %v14007_v55 = vld [vmem:[%s20409_s1 + $0x4d0] ss:$40 sps:$4 sm:$0xff]  }
 0x202   :  { %v4315_v5 = vpop.f32.mrf.mxu0  ;;  %4560 = vmatmul.mubr.bf16.vlgmr.msra.gmra.mxu0 %v15905_v16 }
 0x203   :  { %v4356_v8 = vpop.f32.mrf.mxu1  ;;  %4601 = vmatmul.mubr.bf16.vlgmr.msra.gmra.mxu1 %v15909_v17  ;;  %v4316_v10 = vadd.f32 %v4315_v5, %v694_v57  ;;  %4610 = vmatpush1.bf16.msra.mxu0 %v13959_v60  ;;  %v14010_v57 = vld [vmem:[%s20409_s1 + $0x9d0] ss:$40 sps:$4 sm:$0xff]   ;;  %v14015_v60 = vld [vmem:[%s20409_s1 + $0x484] ss:$40 sps:$4 sm:$0xff]  }
 0x204   :  { %4651 = vmatpush1.bf16.msra.mxu1 %v13962_v61  ;;  %v4317_v11 = vpop.f32.mrf.mxu0  ;;  %4611 = vmatprep.subr.bf16.mxu0 %v13967_v62  ;;  %v14018_v61 = vld [vmem:[%s20409_s1 + $0x984] ss:$40 sps:$4 sm:$0xff]   ;;  %v14013_v62 = vld [vmem:[%s20409_s1 + $0x480] ss:$40 sps:$4 sm:$0xff]   ;;  %v14022_v5 = vld [vmem:[%s20409_s1 + $0x930] ss:$40 sps:$4 sm:$0xff]  }
 0x205   :  { %v4358_v12 = vpop.f32.mrf.mxu1  ;;  %4652 = vmatprep.subr.bf16.mxu1 %v13970_v1  ;;  %v17167_v13 = vadd.f32 %v4356_v8, %v4316_v10  ;;  %v4318_v14 = vadd.f32 %v4317_v11, %v698_v2  ;;  %4641 = vmatprep.mubr.bf16.mxu0 %v15616_v47  ;;  %v13979_v47 = vld [vmem:[%s20409_s1 + $0x164] ss:$40 sps:$4 sm:$0xff]   ;;  %v14016_v1 = vld [vmem:[%s20409_s1 + $0x980] ss:$40 sps:$4 sm:$0xff]   ;;  %v14021_v2 = vld [vmem:[%s20409_s1 + $0x434] ss:$40 sps:$4 sm:$0xff]  }
 0x206   :  { %4682 = vmatprep.mubr.bf16.mxu1 %v15627_v51  ;;  %v4319_v15 = vpop.f32.mrf.mxu0  ;;  %v13982_v51 = vld [vmem:[%s20409_s1 + $0x664] ss:$40 sps:$4 sm:$0xff]   ;;  %v14028_v10 = vld [vmem:[%s20409_s1 + $0x8e0] ss:$40 sps:$4 sm:$0xff]   ;;  %v14033_v11 = vld [vmem:[%s20409_s1 + $0x394] ss:$40 sps:$4 sm:$0xff]  }
 0x207   :  { %v4360_v18 = vpop.f32.mrf.mxu1  ;;  %v17177_v21 = vadd.f32 %v4358_v12, %v4318_v14  ;;  %4612 = vmatpush1.bf16.msra.mxu0 %v13965_v3  ;;  %v14024_v3 = vld [vmem:[%s20409_s1 + $0x934] ss:$40 sps:$4 sm:$0xff]   ;;  %v14027_v8 = vld [vmem:[%s20409_s1 + $0x3e4] ss:$40 sps:$4 sm:$0xff]   ;;  %v14031_v14 = vld [vmem:[%s20409_s1 + $0x390] ss:$40 sps:$4 sm:$0xff]  }
 0x208   :  { %4653 = vmatpush1.bf16.msra.mxu1 %v13968_v4  ;;  %v4320_v22 = vpop.f32.mrf.mxu0  ;;  %4613 = vmatprep.subr.bf16.mxu0 %v13973_v9  ;;  %v14019_v4 = vld [vmem:[%s20409_s1 + $0x430] ss:$40 sps:$4 sm:$0xff]   ;;  %v14030_v9 = vld [vmem:[%s20409_s1 + $0x8e4] ss:$40 sps:$4 sm:$0xff]   ;;  %v14036_v12 = vld [vmem:[%s20409_s1 + $0x894] ss:$40 sps:$4 sm:$0xff]  }
 0x209   :  { %v4361_v24 = vpop.f32.mrf.mxu1  ;;  %4654 = vmatprep.subr.bf16.mxu1 %v13976_v42  ;;  %v14025_v42 = vld [vmem:[%s20409_s1 + $0x3e0] ss:$40 sps:$4 sm:$0xff]   ;;  %v14034_v15 = vld [vmem:[%s20409_s1 + $0x890] ss:$40 sps:$4 sm:$0xff]   ;;  %v14039_v18 = vld [vmem:[%s20409_s1 + $0x344] ss:$40 sps:$4 sm:$0xff]  }
 0x20a   :  { %v14040_v22 = vld [vmem:[%s20409_s1 + $0x840] ss:$40 sps:$4 sm:$0xff]   ;;  %v14045_v24 = vld [vmem:[%s20409_s1 + $0x2f4] ss:$40 sps:$4 sm:$0xff]  }
 0x20b   :  { %4614 = vmatpush1.bf16.msra.mxu0 %v13971_v19  ;;  %v14042_v19 = vld [vmem:[%s20409_s1 + $0x844] ss:$40 sps:$4 sm:$0xff]  }
 0x20c   :  { %4655 = vmatpush1.bf16.msra.mxu1 %v13974_v20  ;;  %4615 = vmatprep.subr.bf16.mxu0 %v13979_v47  ;;  %v14037_v20 = vld [vmem:[%s20409_s1 + $0x340] ss:$40 sps:$4 sm:$0xff]   ;;  %v14048_v47 = vld [vmem:[%s20409_s1 + $0x7f4] ss:$40 sps:$4 sm:$0xff]  }
 0x20d   :  { %4656 = vmatprep.subr.bf16.mxu1 %v13982_v51  ;;  %v14043_v51 = vld [vmem:[%s20409_s1 + $0x2f0] ss:$40 sps:$4 sm:$0xff]  }
 0x20f   :  { %4616 = vmatpush1.bf16.msra.mxu0 %v13977_v58  ;;  %v14046_v58 = vld [vmem:[%s20409_s1 + $0x7f0] ss:$40 sps:$4 sm:$0xff]  }
 0x210   :  { %4657 = vmatpush1.bf16.msra.mxu1 %v13980_v25  ;;  %4617 = vmatprep.subr.bf16.mxu0 %v13985_v26  ;;  %v14051_v25 = vld [vmem:[%s20409_s1 + $0x2a4] ss:$40 sps:$4 sm:$0xff]  }
 0x211   :  { %4658 = vmatprep.subr.bf16.mxu1 %v13988_v27  ;;  %v14054_v26 = vld [vmem:[%s20409_s1 + $0x7a4] ss:$40 sps:$4 sm:$0xff]   ;;  %v14049_v27 = vld [vmem:[%s20409_s1 + $0x2a0] ss:$40 sps:$4 sm:$0xff]  }
 0x213   :  { %4618 = vmatpush1.bf16.msra.mxu0 %v13983_v30  ;;  %v14052_v30 = vld [vmem:[%s20409_s1 + $0x7a0] ss:$40 sps:$4 sm:$0xff]  }
 0x214   :  { %4659 = vmatpush1.bf16.msra.mxu1 %v13986_v59  ;;  %4619 = vmatprep.subr.bf16.mxu0 %v13991_v31  ;;  %v14057_v59 = vld [vmem:[%s20409_s1 + $0xc54] ss:$40 sps:$4 sm:$0xff]  }
 0x215   :  { %4660 = vmatprep.subr.bf16.mxu1 %v13994_v33  ;;  %v14060_v31 = vld [vmem:[%s20409_s1 + $0x1154] ss:$40 sps:$4 sm:$0xff]   ;;  %v14055_v33 = vld [vmem:[%s20409_s1 + $0xc50] ss:$40 sps:$4 sm:$0xff]  }
 0x217   :  { %4620 = vmatpush1.bf16.msra.mxu0 %v13989_v34  ;;  %v14058_v34 = vld [vmem:[%s20409_s1 + $0x1150] ss:$40 sps:$4 sm:$0xff]  }
 0x218   :  { %4661 = vmatpush1.bf16.msra.mxu1 %v13992_v39  ;;  %4621 = vmatprep.subr.bf16.mxu0 %v13997_v43  ;;  %v14063_v39 = vld [vmem:[%s20409_s1 + $0xc04] ss:$40 sps:$4 sm:$0xff]  }
 0x219   :  { %4662 = vmatprep.subr.bf16.mxu1 %v14000_v44  ;;  %v14066_v43 = vld [vmem:[%s20409_s1 + $0x1104] ss:$40 sps:$4 sm:$0xff]   ;;  %v14061_v44 = vld [vmem:[%s20409_s1 + $0xc00] ss:$40 sps:$4 sm:$0xff]  }
 0x21b   :  { %4622 = vmatpush1.bf16.msra.mxu0 %v13995_v63  ;;  %v14064_v63 = vld [vmem:[%s20409_s1 + $0x1100] ss:$40 sps:$4 sm:$0xff]  }
 0x21c   :  { %4663 = vmatpush1.bf16.msra.mxu1 %v13998_v45  ;;  %4623 = vmatprep.subr.bf16.mxu0 %v14003_v46 }
 0x21d   :  { %4664 = vmatprep.subr.bf16.mxu1 %v14006_v48  ;;  %v14069_v48 = vld [vmem:[%s20409_s1 + $0xbb4] ss:$40 sps:$4 sm:$0xff]  }
 0x21f   :  { %4624 = vmatpush1.bf16.msra.mxu0 %v14001_v49  ;;  %v14072_v49 = vld [vmem:[%s20409_s1 + $0x10b4] ss:$40 sps:$4 sm:$0xff]  }
 0x220   :  { %4665 = vmatpush1.bf16.msra.mxu1 %v14004_v50  ;;  %4625 = vmatprep.subr.bf16.mxu0 %v14009_v52 }
 0x221   :  { %4666 = vmatprep.subr.bf16.mxu1 %v14012_v54 }
 0x223   :  { %4626 = vmatpush2.bf16.msra.mxu0 %v14007_v55 }
 0x224   :  { %4667 = vmatpush2.bf16.msra.mxu1 %v14010_v57  ;;  %4627 = vmatprep.subr.bf16.mxu0 %v14015_v60  ;;  %v14070_v57 = vld [vmem:[%s20409_s1 + $0x10b0] ss:$40 sps:$4 sm:$0xff]  }
 0x225   :  { %4668 = vmatprep.subr.bf16.mxu1 %v14018_v61  ;;  %v14075_v61 = vld [vmem:[%s20409_s1 + $0xb64] ss:$40 sps:$4 sm:$0xff]  }
 0x227   :  { %4628 = vmatpush2.bf16.msra.mxu0 %v14013_v62 }
 0x228   :  { %4669 = vmatpush2.bf16.msra.mxu1 %v14016_v1  ;;  %4629 = vmatprep.subr.bf16.mxu0 %v14021_v2 }
 0x229   :  { %4670 = vmatprep.subr.bf16.mxu1 %v14024_v3  ;;  %v14081_v3 = vld [vmem:[%s20409_s1 + $0xb14] ss:$40 sps:$4 sm:$0xff]  }
 0x22b   :  { %4630 = vmatpush2.bf16.msra.mxu0 %v14019_v4  ;;  %v14084_v4 = vld [vmem:[%s20409_s1 + $0x1014] ss:$40 sps:$4 sm:$0xff]  }
 0x22c   :  { %4671 = vmatpush2.bf16.msra.mxu1 %v14022_v5  ;;  %4631 = vmatprep.subr.bf16.mxu0 %v14027_v8  ;;  %v14079_v5 = vld [vmem:[%s20409_s1 + $0xb10] ss:$40 sps:$4 sm:$0xff]  }
 0x22d   :  { %4672 = vmatprep.subr.bf16.mxu1 %v14030_v9  ;;  %v14082_v8 = vld [vmem:[%s20409_s1 + $0x1010] ss:$40 sps:$4 sm:$0xff]   ;;  %v14087_v9 = vld [vmem:[%s20409_s1 + $0xac4] ss:$40 sps:$4 sm:$0xff]  }
 0x22f   :  { %4632 = vmatpush2.bf16.msra.mxu0 %v14025_v42  ;;  %v14090_v42 = vld [vmem:[%s20409_s1 + $0xfc4] ss:$40 sps:$4 sm:$0xff]  }
 0x230   :  { %4673 = vmatpush2.bf16.msra.mxu1 %v14028_v10  ;;  %4633 = vmatprep.subr.bf16.mxu0 %v14033_v11  ;;  %v14085_v10 = vld [vmem:[%s20409_s1 + $0xac0] ss:$40 sps:$4 sm:$0xff]  }
 0x231   :  { %4674 = vmatprep.subr.bf16.mxu1 %v14036_v12  ;;  %v14088_v11 = vld [vmem:[%s20409_s1 + $0xfc0] ss:$40 sps:$4 sm:$0xff]   ;;  %v14093_v12 = vld [vmem:[%s20409_s1 + $0xa74] ss:$40 sps:$4 sm:$0xff]  }
 0x233   :  { %4634 = vmatpush2.bf16.msra.mxu0 %v14031_v14  ;;  %v14096_v14 = vld [vmem:[%s20409_s1 + $0xf74] ss:$40 sps:$4 sm:$0xff]  }
 0x234   :  { %4675 = vmatpush2.bf16.msra.mxu1 %v14034_v15  ;;  %4635 = vmatprep.subr.bf16.mxu0 %v14039_v18  ;;  %v14091_v15 = vld [vmem:[%s20409_s1 + $0xa70] ss:$40 sps:$4 sm:$0xff]  }
 0x235   :  { %4676 = vmatprep.subr.bf16.mxu1 %v14042_v19  ;;  %v14094_v18 = vld [vmem:[%s20409_s1 + $0xf70] ss:$40 sps:$4 sm:$0xff]   ;;  %v14099_v19 = vld [vmem:[%s20409_s1 + $0xa24] ss:$40 sps:$4 sm:$0xff]  }
 0x237   :  { %4636 = vmatpush2.bf16.msra.mxu0 %v14037_v20  ;;  %v14102_v20 = vld [vmem:[%s20409_s1 + $0xf24] ss:$40 sps:$4 sm:$0xff]  }
 0x238   :  { %4677 = vmatpush2.bf16.msra.mxu1 %v14040_v22  ;;  %4637 = vmatprep.subr.bf16.mxu0 %v14045_v24  ;;  %v14097_v22 = vld [vmem:[%s20409_s1 + $0xa20] ss:$40 sps:$4 sm:$0xff]  }
 0x239   :  { %4678 = vmatprep.subr.bf16.mxu1 %v14048_v47  ;;  %v14100_v24 = vld [vmem:[%s20409_s1 + $0xf20] ss:$40 sps:$4 sm:$0xff]   ;;  %v14105_v47 = vld [vmem:[%s20409_s1 + $0xed4] ss:$40 sps:$4 sm:$0xff]  }
 0x23b   :  { %4638 = vmatpush2.bf16.msra.mxu0 %v14043_v51  ;;  %v14108_v51 = vld [vmem:[%s20409_s1 + $0x13d4] ss:$40 sps:$4 sm:$0xff]  }
 0x23c   :  { %4679 = vmatpush2.bf16.msra.mxu1 %v14046_v58  ;;  %4639 = vmatprep.subr.bf16.mxu0 %v14051_v25  ;;  %v14103_v58 = vld [vmem:[%s20409_s1 + $0xed0] ss:$40 sps:$4 sm:$0xff]  }
 0x23d   :  { %4680 = vmatprep.subr.bf16.mxu1 %v14054_v26  ;;  %v14106_v25 = vld [vmem:[%s20409_s1 + $0x13d0] ss:$40 sps:$4 sm:$0xff]   ;;  %v14111_v26 = vld [vmem:[%s20409_s1 + $0xe84] ss:$40 sps:$4 sm:$0xff]  }
 0x23f   :  { %4640 = vmatpush2.bf16.msra.mxu0 %v14049_v27  ;;  %v14114_v27 = vld [vmem:[%s20409_s1 + $0x1384] ss:$40 sps:$4 sm:$0xff]  }
 0x240   :  { %4681 = vmatpush2.bf16.msra.mxu1 %v14052_v30  ;;  %4691 = vmatprep.subr.bf16.mxu0 %v14057_v59  ;;  %v14109_v30 = vld [vmem:[%s20409_s1 + $0xe80] ss:$40 sps:$4 sm:$0xff]  }
 0x241   :  { %4732 = vmatprep.subr.bf16.mxu1 %v14060_v31  ;;  %v14112_v59 = vld [vmem:[%s20409_s1 + $0x1380] ss:$40 sps:$4 sm:$0xff]   ;;  %v14117_v31 = vld [vmem:[%s20409_s1 + $0xe34] ss:$40 sps:$4 sm:$0xff]  }
 0x242   :  { %v4397_v45 = vpop.f32.mrf.mxu0  ;;  %4642 = vmatmul.mubr.bf16.vlgmr.msra.gmra.mxu0 %v15685_v6 }
 0x243   :  { %v4438_v46 = vpop.f32.mrf.mxu1  ;;  %4683 = vmatmul.mubr.bf16.vlgmr.msra.gmra.mxu1 %v15687_v7  ;;  %v4398_v50 = vadd.f32 %v4397_v45, %v17167_v13  ;;  %4692 = vmatpush1.bf16.msra.mxu0 %v14055_v33  ;;  %v14067_v7 = vld [vmem:[%s20409_s1 + $0xbb0] ss:$40 sps:$4 sm:$0xff]   ;;  %v14120_v33 = vld [vmem:[%s20409_s1 + $0x1334] ss:$40 sps:$4 sm:$0xff]   ;;  %v14124_v45 = vld [vmem:[%s20409_s1 + $0x12e0] ss:$40 sps:$4 sm:$0xff]  }
 0x244   :  { %4733 = vmatpush1.bf16.msra.mxu1 %v14058_v34  ;;  %v4399_v52 = vpop.f32.mrf.mxu0  ;;  %4693 = vmatprep.subr.bf16.mxu0 %v14063_v39  ;;  %v14115_v34 = vld [vmem:[%s20409_s1 + $0xe30] ss:$40 sps:$4 sm:$0xff]  }
 0x245   :  { %v4440_v54 = vpop.f32.mrf.mxu1  ;;  %4734 = vmatprep.subr.bf16.mxu1 %v14066_v43  ;;  %v17368_v55 = vadd.f32 %v4438_v46, %v4398_v50  ;;  %v4400_v6 = vadd.f32 %v4399_v52, %v17177_v21  ;;  %4723 = vmatprep.mubr.bf16.mxu0 %v15781_v36  ;;  %v14078_v21 = vld [vmem:[%s20409_s1 + $0x1064] ss:$40 sps:$4 sm:$0xff]   ;;  %v14073_v36 = vld [vmem:[%s20409_s1 + $0xb60] ss:$40 sps:$4 sm:$0xff]   ;;  %v14118_v39 = vld [vmem:[%s20409_s1 + $0x1330] ss:$40 sps:$4 sm:$0xff]  }
 0x246   :  { %4764 = vmatprep.mubr.bf16.mxu1 %v15785_v37  ;;  %v4401_v13 = vpop.f32.mrf.mxu0  ;;  %v14076_v37 = vld [vmem:[%s20409_s1 + $0x1060] ss:$40 sps:$4 sm:$0xff]   ;;  %v14123_v43 = vld [vmem:[%s20409_s1 + $0xde4] ss:$40 sps:$4 sm:$0xff]   ;;  %v14129_v46 = vld [vmem:[%s20409_s1 + $0xd94] ss:$40 sps:$4 sm:$0xff]  }
 0x247   :  { %v4442_v60 = vpop.f32.mrf.mxu1  ;;  %v17385_v62 = vadd.f32 %v4440_v54, %v4400_v6  ;;  %4694 = vmatpush1.bf16.msra.mxu0 %v14061_v44  ;;  %v14126_v44 = vld [vmem:[%s20409_s1 + $0x12e4] ss:$40 sps:$4 sm:$0xff]   ;;  %v14130_v50 = vld [vmem:[%s20409_s1 + $0x1290] ss:$40 sps:$4 sm:$0xff]   ;;  %v14133_v6 = vld [vmem:[%s20409_s1 + $0xd40] ss:$40 sps:$4 sm:$0xff]  }
 0x248   :  { %4735 = vmatpush1.bf16.msra.mxu1 %v14064_v63  ;;  %v4402_v1 = vpop.f32.mrf.mxu0  ;;  %4695 = vmatprep.subr.bf16.mxu0 %v14069_v48  ;;  %v14121_v63 = vld [vmem:[%s20409_s1 + $0xde0] ss:$40 sps:$4 sm:$0xff]   ;;  %v14132_v48 = vld [vmem:[%s20409_s1 + $0x1294] ss:$40 sps:$4 sm:$0xff]   ;;  %v14135_v52 = vld [vmem:[%s20409_s1 + $0xd44] ss:$40 sps:$4 sm:$0xff]  }
 0x249   :  { %v4443_v2 = vpop.f32.mrf.mxu1  ;;  %4736 = vmatprep.subr.bf16.mxu1 %v14072_v49  ;;  %v14127_v49 = vld [vmem:[%s20409_s1 + $0xd90] ss:$40 sps:$4 sm:$0xff]   ;;  %v14138_v54 = vld [vmem:[%s20409_s1 + $0x1244] ss:$40 sps:$4 sm:$0xff]   ;;  %v14144_v13 = vld [vmem:[%s20409_s1 + $0x11f4] ss:$40 sps:$4 sm:$0xff]  }
 0x24a   :  { %v14139_v60 = vld [vmem:[%s20409_s1 + $0xcf0] ss:$40 sps:$4 sm:$0xff]   ;;  %v14150_v1 = vld [vmem:[%s20409_s1 + $0x11a4] ss:$40 sps:$4 sm:$0xff]   ;;  %v14145_v2 = vld [vmem:[%s20409_s1 + $0xca0] ss:$40 sps:$4 sm:$0xff]  }
 0x24b   :  { %4696 = vmatpush1.bf16.msra.mxu0 %v14067_v7  ;;  %v14136_v7 = vld [vmem:[%s20409_s1 + $0x1240] ss:$40 sps:$4 sm:$0xff]  }
 0x24c   :  { %4737 = vmatpush1.bf16.msra.mxu1 %v14070_v57  ;;  %4697 = vmatprep.subr.bf16.mxu0 %v14075_v61  ;;  %v14141_v57 = vld [vmem:[%s20409_s1 + $0xcf4] ss:$40 sps:$4 sm:$0xff]   ;;  %v14142_v61 = vld [vmem:[%s20409_s1 + $0x11f0] ss:$40 sps:$4 sm:$0xff]  }
 0x24d   :  { %4738 = vmatprep.subr.bf16.mxu1 %v14078_v21  ;;  %v14147_v21 = vld [vmem:[%s20409_s1 + $0xca4] ss:$40 sps:$4 sm:$0xff]  }
 0x24f   :  { %4698 = vmatpush1.bf16.msra.mxu0 %v14073_v36  ;;  %v14148_v36 = vld [vmem:[%s20409_s1 + $0x11a0] ss:$40 sps:$4 sm:$0xff]  }
 0x250   :  { %4739 = vmatpush1.bf16.msra.mxu1 %v14076_v37  ;;  %4699 = vmatprep.subr.bf16.mxu0 %v14081_v3  ;;  %v701_v37 = vsub.s32 6, %v16285_v29  ;;  %v14153_v3 = vld [vmem:[%s20412_s3 + $0x234] ss:$40 sps:$4 sm:$0xff]  }
 0x251   :  { %4740 = vmatprep.subr.bf16.mxu1 %v14084_v4  ;;  %v14156_v4 = vld [vmem:[%s20412_s3 + $0x734] ss:$40 sps:$4 sm:$0xff]  }
 0x253   :  { %4700 = vmatpush1.bf16.msra.mxu0 %v14079_v5  ;;  %v4774_v5 = vmax.f32 %v16554_v28, 0.0 }
 0x254   :  { %4741 = vmatpush1.bf16.msra.mxu1 %v14082_v8  ;;  %4701 = vmatprep.subr.bf16.mxu0 %v14087_v9  ;;  %v14151_v8 = vld [vmem:[%s20412_s3 + $0x230] ss:$40 sps:$4 sm:$0xff]   ;;  %v4776_v9 = vmax.f32 %v16963_v38, 0.0  ;;  %v14162_v38 = vld [vmem:[%s20412_s3 + $0x6e4] ss:$40 sps:$4 sm:$0xff]  }
 0x255   :  { %4742 = vmatprep.subr.bf16.mxu1 %v14090_v42  ;;  %v14154_v42 = vld [vmem:[%s20412_s3 + $0x730] ss:$40 sps:$4 sm:$0xff]  }
 0x257   :  { %4702 = vmatpush1.bf16.msra.mxu0 %v14085_v10  ;;  %v17555_v10 = vld [vmem:[%s20411_s2] sm:$0xff] }
 0x258   :  { %4743 = vmatpush1.bf16.msra.mxu1 %v14088_v11  ;;  %4703 = vmatprep.subr.bf16.mxu0 %v14093_v12  ;;  %v702_v28 = vrot.slane %v17555_v10, %v701_v37  ;;  %v14159_v11 = vld [vmem:[%s20412_s3 + $0x1e4] ss:$40 sps:$4 sm:$0xff]   ;;  %v17566_v12 = vpack.c.bf16 %v4774_v5, %v4774_v5 }
 0x259   :  { %4744 = vmatprep.subr.bf16.mxu1 %v14096_v14  ;;  %v14157_v14 = vld [vmem:[%s20412_s3 + $0x1e0] ss:$40 sps:$4 sm:$0xff]   ;;  %v14210_v5 = vld [vmem:[%s20412_s3 + $0x964] ss:$40 sps:$4 sm:$0xff]  }
 0x25b   :  { %4704 = vmatpush1.bf16.msra.mxu0 %v14091_v15  ;;  %v17571_v15 = vpack.c.bf16 %v4776_v9, %v4776_v9  ;;  %v14213_v9 = vld [vmem:[%s20412_s3 + $0x414] ss:$40 sps:$4 sm:$0xff]  }
 0x25c   :  { %4745 = vmatpush1.bf16.msra.mxu1 %v14094_v18  ;;  %4705 = vmatprep.subr.bf16.mxu0 %v14099_v19 }
 0x25d   :  { %4746 = vmatprep.subr.bf16.mxu1 %v14102_v20  ;;  %v14160_v20 = vld [vmem:[%s20412_s3 + $0x6e0] ss:$40 sps:$4 sm:$0xff]  }
 0x25f   :  { %4706 = vmatpush1.bf16.msra.mxu0 %v14097_v22  ;;  %v14165_v22 = vld [vmem:[%s20412_s3 + $0x194] ss:$40 sps:$4 sm:$0xff]  }
 0x260   :  { %4747 = vmatpush1.bf16.msra.mxu1 %v14100_v24  ;;  %4707 = vmatprep.subr.bf16.mxu0 %v14105_v47 }
 0x261   :  { %4748 = vmatprep.subr.bf16.mxu1 %v14108_v51  ;;  %v14163_v51 = vld [vmem:[%s20412_s3 + $0x190] ss:$40 sps:$4 sm:$0xff]  }
 0x263   :  { %4708 = vmatpush2.bf16.msra.mxu0 %v14103_v58  ;;  %v14168_v58 = vld [vmem:[%s20412_s3 + $0x694] ss:$40 sps:$4 sm:$0xff]  }
 0x264   :  { %4749 = vmatpush2.bf16.msra.mxu1 %v14106_v25  ;;  %4709 = vmatprep.subr.bf16.mxu0 %v14111_v26 }
 0x265   :  { %4750 = vmatprep.subr.bf16.mxu1 %v14114_v27  ;;  %v14166_v27 = vld [vmem:[%s20412_s3 + $0x690] ss:$40 sps:$4 sm:$0xff]  }
 0x267   :  { %4710 = vmatpush2.bf16.msra.mxu0 %v14109_v30 }
 0x268   :  { %4751 = vmatpush2.bf16.msra.mxu1 %v14112_v59  ;;  %4711 = vmatprep.subr.bf16.mxu0 %v14117_v31  ;;  %v14171_v31 = vld [vmem:[%s20412_s3 + $0x144] ss:$40 sps:$4 sm:$0xff]  }
 0x269   :  { %4752 = vmatprep.subr.bf16.mxu1 %v14120_v33  ;;  %v14174_v33 = vld [vmem:[%s20412_s3 + $0x644] ss:$40 sps:$4 sm:$0xff]  }
 0x26b   :  { %4712 = vmatpush2.bf16.msra.mxu0 %v14115_v34  ;;  %v14169_v34 = vld [vmem:[%s20412_s3 + $0x140] ss:$40 sps:$4 sm:$0xff]  }
 0x26c   :  { %4753 = vmatpush2.bf16.msra.mxu1 %v14118_v39  ;;  %4713 = vmatprep.subr.bf16.mxu0 %v14123_v43  ;;  %v14172_v39 = vld [vmem:[%s20412_s3 + $0x640] ss:$40 sps:$4 sm:$0xff]   ;;  %v14177_v43 = vld [vmem:[%s20412_s3 + $0xf4] ss:$40 sps:$4 sm:$0xff]  }
 0x26d   :  { %4754 = vmatprep.subr.bf16.mxu1 %v14126_v44  ;;  %v14175_v44 = vld [vmem:[%s20412_s3 + $0xf0] ss:$40 sps:$4 sm:$0xff]  }
 0x26f   :  { %4714 = vmatpush2.bf16.msra.mxu0 %v14121_v63  ;;  %v14180_v63 = vld [vmem:[%s20412_s3 + $0x5f4] ss:$40 sps:$4 sm:$0xff]  }
 0x270   :  { %4755 = vmatpush2.bf16.msra.mxu1 %v14124_v45  ;;  %4715 = vmatprep.subr.bf16.mxu0 %v14129_v46  ;;  %v14178_v45 = vld [vmem:[%s20412_s3 + $0x5f0] ss:$40 sps:$4 sm:$0xff]   ;;  %v14183_v46 = vld [vmem:[%s20412_s3 + $0xa4] ss:$40 sps:$4 sm:$0xff]  }
 0x271   :  { %4756 = vmatprep.subr.bf16.mxu1 %v14132_v48  ;;  %v14181_v48 = vld [vmem:[%s20412_s3 + $0xa0] ss:$40 sps:$4 sm:$0xff]  }
 0x273   :  { %4716 = vmatpush2.bf16.msra.mxu0 %v14127_v49  ;;  %v14186_v49 = vld [vmem:[%s20412_s3 + $0x5a4] ss:$40 sps:$4 sm:$0xff]  }
 0x274   :  { %4757 = vmatpush2.bf16.msra.mxu1 %v14130_v50  ;;  %4717 = vmatprep.subr.bf16.mxu0 %v14135_v52  ;;  %v14184_v50 = vld [vmem:[%s20412_s3 + $0x5a0] ss:$40 sps:$4 sm:$0xff]   ;;  %v14189_v52 = vld [vmem:[%s20412_s3 + $0x54] ss:$40 sps:$4 sm:$0xff]  }
 0x275   :  { %4758 = vmatprep.subr.bf16.mxu1 %v14138_v54  ;;  %v14187_v54 = vld [vmem:[%s20412_s3 + $0x50] ss:$40 sps:$4 sm:$0xff]  }
 0x277   :  { %4718 = vmatpush2.bf16.msra.mxu0 %v14133_v6  ;;  %v14192_v6 = vld [vmem:[%s20412_s3 + $0x554] ss:$40 sps:$4 sm:$0xff]  }
 0x278   :  { %4759 = vmatpush2.bf16.msra.mxu1 %v14136_v7  ;;  %4719 = vmatprep.subr.bf16.mxu0 %v14141_v57  ;;  %v14190_v7 = vld [vmem:[%s20412_s3 + $0x550] ss:$40 sps:$4 sm:$0xff]   ;;  %v14195_v57 = vld [vmem:[%s20412_s3 + $0x4] ss:$40 sps:$4 sm:$0xff]  }
 0x279   :  { %4760 = vmatprep.subr.bf16.mxu1 %v14144_v13  ;;  %v14193_v13 = vld [vmem:[%s20412_s3] ss:$40 sps:$4 sm:$0xff]  }
 0x27b   :  { %4720 = vmatpush2.bf16.msra.mxu0 %v14139_v60  ;;  %v14198_v60 = vld [vmem:[%s20412_s3 + $0x504] ss:$40 sps:$4 sm:$0xff]  }
 0x27c   :  { %4761 = vmatpush2.bf16.msra.mxu1 %v14142_v61  ;;  %4721 = vmatprep.subr.bf16.mxu0 %v14147_v21  ;;  %v14196_v61 = vld [vmem:[%s20412_s3 + $0x500] ss:$40 sps:$4 sm:$0xff]   ;;  %v14201_v21 = vld [vmem:[%s20412_s3 + $0x4b4] ss:$40 sps:$4 sm:$0xff]  }
 0x27d   :  { %4762 = vmatprep.subr.bf16.mxu1 %v14150_v1  ;;  %v14199_v1 = vld [vmem:[%s20412_s3 + $0x4b0] ss:$40 sps:$4 sm:$0xff]  }
 0x27f   :  { %4722 = vmatpush2.bf16.msra.mxu0 %v14145_v2  ;;  %v14204_v2 = vld [vmem:[%s20412_s3 + $0x9b4] ss:$40 sps:$4 sm:$0xff]  }
 0x280   :  { %4763 = vmatpush2.bf16.msra.mxu1 %v14148_v36  ;;  %9647 = vmatprep.subr.bf16.mxu0 %v14153_v3  ;;  %v14202_v36 = vld [vmem:[%s20412_s3 + $0x9b0] ss:$40 sps:$4 sm:$0xff]   ;;  %v14207_v3 = vld [vmem:[%s20412_s3 + $0x464] ss:$40 sps:$4 sm:$0xff]  }
 0x281   :  { %9688 = vmatprep.subr.bf16.mxu1 %v14156_v4  ;;  %v14205_v4 = vld [vmem:[%s20412_s3 + $0x460] ss:$40 sps:$4 sm:$0xff]  }
 0x282   :  { %v4479_v18 = vpop.f32.mrf.mxu0  ;;  %4724 = vmatmul.mubr.bf16.vlgmr.msra.gmra.mxu0 %v15905_v16 }
 0x283   :  { %v4520_v19 = vpop.f32.mrf.mxu1  ;;  %4765 = vmatmul.mubr.bf16.vlgmr.msra.gmra.mxu1 %v15909_v17  ;;  %v4480_v24 = vadd.f32 %v4479_v18, %v702_v28  ;;  %9648 = vmatpush1.bf16.msra.mxu0 %v14151_v8  ;;  %v14208_v8 = vld [vmem:[%s20412_s3 + $0x960] ss:$40 sps:$4 sm:$0xff]   ;;  %v14216_v28 = vld [vmem:[%s20412_s3 + $0x914] ss:$40 sps:$4 sm:$0xff]   ;;  %v14222_v18 = vld [vmem:[%s20412_s3 + $0x8c4] ss:$40 sps:$4 sm:$0xff]  }
 0x284   :  { %9679 = vmatprep.mubr.bf16.mxu0 %v17566_v12  ;;  %9689 = vmatpush1.bf16.msra.mxu1 %v14154_v42  ;;  %v17583_v47 = vpop.f32.mrf.mxu0  ;;  %v14211_v42 = vld [vmem:[%s20412_s3 + $0x410] ss:$40 sps:$4 sm:$0xff]  }
 0x285   :  { %9720 = vmatprep.mubr.bf16.mxu1 %v17571_v15  ;;  %v17585_v16 = vpop.f32.mrf.mxu1  ;;  %v17587_v17 = vadd.f32 %v4520_v19, %v4480_v24  ;;  %9649 = vmatprep.subr.bf16.mxu0 %v14159_v11  ;;  %v14214_v11 = vld [vmem:[%s20412_s3 + $0x910] ss:$40 sps:$4 sm:$0xff]   ;;  %v14220_v19 = vld [vmem:[%s20412_s3 + $0x8c0] ss:$40 sps:$4 sm:$0xff]   ;;  %v14228_v24 = vld [vmem:[%s20412_s3 + $0x874] ss:$40 sps:$4 sm:$0xff]  }
 0x286   :  { %9690 = vmatprep.subr.bf16.mxu1 %v14162_v38  ;;  %v4483_v25 = vpop.f32.mrf.mxu0  ;;  %v14219_v38 = vld [vmem:[%s20412_s3 + $0x3c4] ss:$40 sps:$4 sm:$0xff]  }
 0x287   :  { %v4524_v26 = vpop.f32.mrf.mxu1  ;;  %9650 = vmatpush1.bf16.msra.mxu0 %v14157_v14  ;;  %v14217_v14 = vld [vmem:[%s20412_s3 + $0x3c0] ss:$40 sps:$4 sm:$0xff]  }
 0x288   :  { %9691 = vmatpush1.bf16.msra.mxu1 %v14160_v20  ;;  %v4484_v30 = vpop.f32.mrf.mxu0  ;;  %9651 = vmatprep.subr.bf16.mxu0 %v14165_v22  ;;  %v14225_v20 = vld [vmem:[%s20412_s3 + $0x374] ss:$40 sps:$4 sm:$0xff]   ;;  %v14223_v22 = vld [vmem:[%s20412_s3 + $0x370] ss:$40 sps:$4 sm:$0xff]   ;;  %v14229_v25 = vld [vmem:[%s20412_s3 + $0x320] ss:$40 sps:$4 sm:$0xff]  }
 0x289   :  { %v4525_v59 = vpop.f32.mrf.mxu1  ;;  %9692 = vmatprep.subr.bf16.mxu1 %v14168_v58  ;;  %v14231_v58 = vld [vmem:[%s20412_s3 + $0x324] ss:$40 sps:$4 sm:$0xff]   ;;  %v14237_v30 = vld [vmem:[%s20412_s3 + $0x2d4] ss:$40 sps:$4 sm:$0xff]  }
 0x28a   :  { %v14234_v26 = vld [vmem:[%s20412_s3 + $0x824] ss:$40 sps:$4 sm:$0xff]   ;;  %v14235_v59 = vld [vmem:[%s20412_s3 + $0x2d0] ss:$40 sps:$4 sm:$0xff]  }
 0x28b   :  { %9652 = vmatpush1.bf16.msra.mxu0 %v14163_v51  ;;  %v14226_v51 = vld [vmem:[%s20412_s3 + $0x870] ss:$40 sps:$4 sm:$0xff]  }
 0x28c   :  { %9693 = vmatpush1.bf16.msra.mxu1 %v14166_v27  ;;  %9653 = vmatprep.subr.bf16.mxu0 %v14171_v31  ;;  %v14232_v27 = vld [vmem:[%s20412_s3 + $0x820] ss:$40 sps:$4 sm:$0xff]   ;;  %v14240_v31 = vld [vmem:[%s20412_s3 + $0x7d4] ss:$40 sps:$4 sm:$0xff]  }
 0x28d   :  { %9694 = vmatprep.subr.bf16.mxu1 %v14174_v33  ;;  %v705_v33 = vsub.s32 7, %v16285_v29  ;;  %v15317_v29 = vld [vmem:[%s20414_s5 + $0x58] sm:$0xff]  }
 0x28f   :  { %9654 = vmatpush1.bf16.msra.mxu0 %v14169_v34  ;;  %v14238_v34 = vld [vmem:[%s20412_s3 + $0x7d0] ss:$40 sps:$4 sm:$0xff]  }
 0x290   :  { %9695 = vmatpush1.bf16.msra.mxu1 %v14172_v39  ;;  %9655 = vmatprep.subr.bf16.mxu0 %v14177_v43  ;;  %v14243_v39 = vld [vmem:[%s20412_s3 + $0x284] ss:$40 sps:$4 sm:$0xff]   ;;  %v14241_v43 = vld [vmem:[%s20412_s3 + $0x280] ss:$40 sps:$4 sm:$0xff]  }
 0x291   :  { %9696 = vmatprep.subr.bf16.mxu1 %v14180_v63  ;;  %v4773_v63 = vmax.f32 %v16543_v23, 0.0  ;;  %v4775_v23 = vmax.f32 %v16958_v0, 0.0  ;;  %v14255_v0 = vld [vmem:[%s20412_s3 + $0xbe4] ss:$40 sps:$4 sm:$0xff]  }
 0x293   :  { %9656 = vmatpush1.bf16.msra.mxu0 %v14175_v44  ;;  %v14246_v44 = vld [vmem:[%s20412_s3 + $0x784] ss:$40 sps:$4 sm:$0xff]  }
 0x294   :  { %9697 = vmatpush1.bf16.msra.mxu1 %v14178_v45  ;;  %9657 = vmatprep.subr.bf16.mxu0 %v14183_v46  ;;  %v706_v45 = vrot.slane %v17555_v10, %v705_v33  ;;  %v14244_v46 = vld [vmem:[%s20412_s3 + $0x780] ss:$40 sps:$4 sm:$0xff]   ;;  %v14247_v10 = vld [vmem:[%s20412_s3 + $0xc30] ss:$40 sps:$4 sm:$0xff]  }
 0x295   :  { %9698 = vmatprep.subr.bf16.mxu1 %v14186_v49  ;;  %v14252_v49 = vld [vmem:[%s20412_s3 + $0x1134] ss:$40 sps:$4 sm:$0xff]  }
 0x297   :  { %9658 = vmatpush1.bf16.msra.mxu0 %v14181_v48  ;;  %v14249_v48 = vld [vmem:[%s20412_s3 + $0xc34] ss:$40 sps:$4 sm:$0xff]  }
 0x298   :  { %9699 = vmatpush1.bf16.msra.mxu1 %v14184_v50  ;;  %9659 = vmatprep.subr.bf16.mxu0 %v14189_v52  ;;  %v4778_v50 = vmax.f32 %v17385_v62, 0.0  ;;  %v14250_v52 = vld [vmem:[%s20412_s3 + $0x1130] ss:$40 sps:$4 sm:$0xff]   ;;  %v17782_v62 = vpack.c.bf16 %v4775_v23, %v4775_v23 }
 0x299   :  { %9700 = vmatprep.subr.bf16.mxu1 %v14192_v6  ;;  %v17774_v6 = vpack.c.bf16 %v4773_v63, %v4773_v63  ;;  %v14294_v63 = vld [vmem:[%s20412_s3 + $0xf04] ss:$40 sps:$4 sm:$0xff]   ;;  %v14295_v23 = vld [vmem:[%s20412_s3 + $0xeb0] ss:$40 sps:$4 sm:$0xff]  }
 0x29b   :  { %9660 = vmatpush1.bf16.msra.mxu0 %v14187_v54  ;;  %v4482_v54 = vadd.f32 %v17583_v47, %v706_v45  ;;  %v14253_v47 = vld [vmem:[%s20412_s3 + $0xbe0] ss:$40 sps:$4 sm:$0xff]  }
 0x29c   :  { %9701 = vmatpush1.bf16.msra.mxu1 %v14190_v7  ;;  %9661 = vmatprep.subr.bf16.mxu0 %v14195_v57  ;;  %v14258_v7 = vld [vmem:[%s20412_s3 + $0x10e4] ss:$40 sps:$4 sm:$0xff]   ;;  %v17787_v57 = vpack.c.bf16 %v4778_v50, %v4778_v50  ;;  %v14289_v45 = vld [vmem:[%s20412_s3 + $0xa00] ss:$40 sps:$4 sm:$0xff]  }
 0x29d   :  { %9702 = vmatprep.subr.bf16.mxu1 %v14198_v60  ;;  %v14303_v50 = vld [vmem:[%s20412_s3 + $0xe64] ss:$40 sps:$4 sm:$0xff]  }
 0x29f   :  { %9662 = vmatpush1.bf16.msra.mxu0 %v14193_v13 }
 0x2a0   :  { %9703 = vmatpush1.bf16.msra.mxu1 %v14196_v61  ;;  %9663 = vmatprep.subr.bf16.mxu0 %v14201_v21  ;;  %v14256_v61 = vld [vmem:[%s20412_s3 + $0x10e0] ss:$40 sps:$4 sm:$0xff]   ;;  %v4523_v21 = vadd.f32 %v17585_v16, %v4482_v54  ;;  %v14264_v16 = vld [vmem:[%s20412_s3 + $0x1094] ss:$40 sps:$4 sm:$0xff]  }
 0x2a1   :  { %9704 = vmatprep.subr.bf16.mxu1 %v14204_v2  ;;  %v14301_v54 = vld [vmem:[%s20412_s3 + $0xe60] ss:$40 sps:$4 sm:$0xff]  }
 0x2a3   :  { %9664 = vmatpush2.bf16.msra.mxu0 %v14199_v1 }
 0x2a4   :  { %9705 = vmatpush2.bf16.msra.mxu1 %v14202_v36  ;;  %9665 = vmatprep.subr.bf16.mxu0 %v14207_v3  ;;  %v14261_v36 = vld [vmem:[%s20412_s3 + $0xb94] ss:$40 sps:$4 sm:$0xff]  }
 0x2a5   :  { %9706 = vmatprep.subr.bf16.mxu1 %v14210_v5 }
 0x2a7   :  { %9666 = vmatpush2.bf16.msra.mxu0 %v14205_v4  ;;  %v14259_v4 = vld [vmem:[%s20412_s3 + $0xb90] ss:$40 sps:$4 sm:$0xff]  }
 0x2a8   :  { %9707 = vmatpush2.bf16.msra.mxu1 %v14208_v8  ;;  %9667 = vmatprep.subr.bf16.mxu0 %v14213_v9  ;;  %v14262_v9 = vld [vmem:[%s20412_s3 + $0x1090] ss:$40 sps:$4 sm:$0xff]  }
 0x2a9   :  { %9708 = vmatprep.subr.bf16.mxu1 %v14216_v28 }
 0x2ab   :  { %9668 = vmatpush2.bf16.msra.mxu0 %v14211_v42 }
 0x2ac   :  { %9709 = vmatpush2.bf16.msra.mxu1 %v14214_v11  ;;  %9669 = vmatprep.subr.bf16.mxu0 %v14219_v38  ;;  %v14267_v38 = vld [vmem:[%s20412_s3 + $0xb44] ss:$40 sps:$4 sm:$0xff]  }
 0x2ad   :  { %9710 = vmatprep.subr.bf16.mxu1 %v14222_v18  ;;  %v14265_v18 = vld [vmem:[%s20412_s3 + $0xb40] ss:$40 sps:$4 sm:$0xff]  }
 0x2af   :  { %9670 = vmatpush2.bf16.msra.mxu0 %v14217_v14 }
 0x2b0   :  { %9711 = vmatpush2.bf16.msra.mxu1 %v14220_v19  ;;  %9671 = vmatprep.subr.bf16.mxu0 %v14225_v20  ;;  %v14270_v19 = vld [vmem:[%s20412_s3 + $0x1044] ss:$40 sps:$4 sm:$0xff]   ;;  %v14268_v20 = vld [vmem:[%s20412_s3 + $0x1040] ss:$40 sps:$4 sm:$0xff]  }
 0x2b1   :  { %9712 = vmatprep.subr.bf16.mxu1 %v14228_v24  ;;  %v14273_v24 = vld [vmem:[%s20412_s3 + $0xaf4] ss:$40 sps:$4 sm:$0xff]  }
 0x2b3   :  { %9672 = vmatpush2.bf16.msra.mxu0 %v14223_v22 }
 0x2b4   :  { %9713 = vmatpush2.bf16.msra.mxu1 %v14226_v51  ;;  %9673 = vmatprep.subr.bf16.mxu0 %v14231_v58  ;;  %v14276_v51 = vld [vmem:[%s20412_s3 + $0xff4] ss:$40 sps:$4 sm:$0xff]   ;;  %v14271_v58 = vld [vmem:[%s20412_s3 + $0xaf0] ss:$40 sps:$4 sm:$0xff]  }
 0x2b5   :  { %9714 = vmatprep.subr.bf16.mxu1 %v14234_v26  ;;  %v14279_v26 = vld [vmem:[%s20412_s3 + $0xaa4] ss:$40 sps:$4 sm:$0xff]  }
 0x2b7   :  { %9674 = vmatpush2.bf16.msra.mxu0 %v14229_v25  ;;  %v14274_v25 = vld [vmem:[%s20412_s3 + $0xff0] ss:$40 sps:$4 sm:$0xff]  }
 0x2b8   :  { %9715 = vmatpush2.bf16.msra.mxu1 %v14232_v27  ;;  %9675 = vmatprep.subr.bf16.mxu0 %v14237_v30  ;;  %v14282_v27 = vld [vmem:[%s20412_s3 + $0xfa4] ss:$40 sps:$4 sm:$0xff]   ;;  %v14277_v30 = vld [vmem:[%s20412_s3 + $0xaa0] ss:$40 sps:$4 sm:$0xff]  }
 0x2b9   :  { %9716 = vmatprep.subr.bf16.mxu1 %v14240_v31  ;;  %v14285_v31 = vld [vmem:[%s20412_s3 + $0xa54] ss:$40 sps:$4 sm:$0xff]  }
 0x2bb   :  { %9676 = vmatpush2.bf16.msra.mxu0 %v14235_v59  ;;  %v14280_v59 = vld [vmem:[%s20412_s3 + $0xfa0] ss:$40 sps:$4 sm:$0xff]  }
 0x2bc   :  { %9717 = vmatpush2.bf16.msra.mxu1 %v14238_v34  ;;  %9677 = vmatprep.subr.bf16.mxu0 %v14243_v39  ;;  %v14288_v34 = vld [vmem:[%s20412_s3 + $0xf54] ss:$40 sps:$4 sm:$0xff]   ;;  %v14283_v39 = vld [vmem:[%s20412_s3 + $0xa50] ss:$40 sps:$4 sm:$0xff]  }
 0x2bd   :  { %9718 = vmatprep.subr.bf16.mxu1 %v14246_v44  ;;  %v14291_v44 = vld [vmem:[%s20412_s3 + $0xa04] ss:$40 sps:$4 sm:$0xff]  }
 0x2bf   :  { %9678 = vmatpush2.bf16.msra.mxu0 %v14241_v43  ;;  %v14286_v43 = vld [vmem:[%s20412_s3 + $0xf50] ss:$40 sps:$4 sm:$0xff]  }
 0x2c0   :  { %9719 = vmatpush2.bf16.msra.mxu1 %v14244_v46  ;;  %9729 = vmatprep.subr.bf16.mxu0 %v14249_v48  ;;  %v14292_v46 = vld [vmem:[%s20412_s3 + $0xf00] ss:$40 sps:$4 sm:$0xff]   ;;  %v14297_v48 = vld [vmem:[%s20412_s3 + $0xeb4] ss:$40 sps:$4 sm:$0xff]  }
 0x2c1   :  { %9770 = vmatprep.subr.bf16.mxu1 %v14252_v49  ;;  %v14300_v49 = vld [vmem:[%s20412_s3 + $0x13b4] ss:$40 sps:$4 sm:$0xff]  }
 0x2c2   :  { %v17789_v13 = vpop.f32.mrf.mxu0  ;;  %9680 = vmatmul.mubr.bf16.vlgmr.msra.gmra.mxu0 %v17774_v6 }
 0x2c3   :  { %v17791_v60 = vpop.f32.mrf.mxu1  ;;  %9721 = vmatmul.mubr.bf16.vlgmr.msra.gmra.mxu1 %v17782_v62  ;;  %9730 = vmatpush1.bf16.msra.mxu0 %v14247_v10  ;;  %v14298_v10 = vld [vmem:[%s20412_s3 + $0x13b0] ss:$40 sps:$4 sm:$0xff]  }
 0x2c4   :  { %9761 = vmatprep.mubr.bf16.mxu0 %v17787_v57  ;;  %9771 = vmatpush1.bf16.msra.mxu1 %v14250_v52  ;;  %v4563_v1 = vpop.f32.mrf.mxu0  ;;  %v14306_v52 = vld [vmem:[%s20412_s3 + $0x1364] ss:$40 sps:$4 sm:$0xff]  }
 0x2c5   :  { %v4604_v2 = vpop.f32.mrf.mxu1  ;;  %v4564_v3 = vadd.f32 %v4563_v1, %v4523_v21  ;;  %9731 = vmatprep.subr.bf16.mxu0 %v14255_v0  ;;  %9772 = vmatprep.subr.bf16.mxu1 %v14258_v7  ;;  %v14304_v0 = vld [vmem:[%s20412_s3 + $0x1360] ss:$40 sps:$4 sm:$0xff]   ;;  %v14309_v7 = vld [vmem:[%s20412_s3 + $0xe14] ss:$40 sps:$4 sm:$0xff]   ;;  %v14310_v21 = vld [vmem:[%s20412_s3 + $0x1310] ss:$40 sps:$4 sm:$0xff]  }
 0x2c6   :  { %v4565_v5 = vpop.f32.mrf.mxu0  ;;  %v14315_v1 = vld [vmem:[%s20412_s3 + $0xdc4] ss:$40 sps:$4 sm:$0xff]  }
 0x2c7   :  { %v4606_v8 = vpop.f32.mrf.mxu1  ;;  %v4605_v42 = vadd.f32 %v4604_v2, %v4564_v3  ;;  %9732 = vmatpush1.bf16.msra.mxu0 %v14253_v47  ;;  %v14312_v47 = vld [vmem:[%s20412_s3 + $0x1314] ss:$40 sps:$4 sm:$0xff]   ;;  %v14318_v2 = vld [vmem:[%s20412_s3 + $0x12c4] ss:$40 sps:$4 sm:$0xff]   ;;  %v14316_v3 = vld [vmem:[%s20412_s3 + $0x12c0] ss:$40 sps:$4 sm:$0xff]  }
 0x2c8   :  { %9773 = vmatpush1.bf16.msra.mxu1 %v14256_v61  ;;  %v4566_v28 = vpop.f32.mrf.mxu0  ;;  %9733 = vmatprep.subr.bf16.mxu0 %v14261_v36  ;;  %v14307_v61 = vld [vmem:[%s20412_s3 + $0xe10] ss:$40 sps:$4 sm:$0xff]   ;;  %v14313_v36 = vld [vmem:[%s20412_s3 + $0xdc0] ss:$40 sps:$4 sm:$0xff]  }
 0x2c9   :  { %v4607_v11 = vpop.f32.mrf.mxu1  ;;  %v4780_v14 = vmax.f32 %v4605_v42, 0.0  ;;  %9774 = vmatprep.subr.bf16.mxu1 %v14264_v16  ;;  %v14324_v16 = vld [vmem:[%s20412_s3 + $0x1274] ss:$40 sps:$4 sm:$0xff]   ;;  %v14319_v5 = vld [vmem:[%s20412_s3 + $0xd70] ss:$40 sps:$4 sm:$0xff]  }
 0x2ca   :  { %v14322_v8 = vld [vmem:[%s20412_s3 + $0x1270] ss:$40 sps:$4 sm:$0xff]   ;;  %v14330_v42 = vld [vmem:[%s20412_s3 + $0x1224] ss:$40 sps:$4 sm:$0xff]   ;;  %v14325_v28 = vld [vmem:[%s20412_s3 + $0xd20] ss:$40 sps:$4 sm:$0xff]  }
 0x2cb   :  { %v17824_v22 = vpack.c.bf16 %v4780_v14, %v4780_v14  ;;  %9734 = vmatpush1.bf16.msra.mxu0 %v14259_v4  ;;  %v14321_v4 = vld [vmem:[%s20412_s3 + $0xd74] ss:$40 sps:$4 sm:$0xff]   ;;  %v14328_v11 = vld [vmem:[%s20412_s3 + $0x1220] ss:$40 sps:$4 sm:$0xff]   ;;  %v4562_v14 = vadd.f32 %v17789_v13, %v17587_v17  ;;  %v14339_v17 = vld [vmem:[%s20412_s3 + $0xc84] ss:$40 sps:$4 sm:$0xff]  }
 0x2cc   :  { %9775 = vmatpush1.bf16.msra.mxu1 %v14262_v9  ;;  %9735 = vmatprep.subr.bf16.mxu0 %v14267_v38  ;;  %v14327_v9 = vld [vmem:[%s20412_s3 + $0xd24] ss:$40 sps:$4 sm:$0xff]   ;;  %v14333_v38 = vld [vmem:[%s20412_s3 + $0xcd4] ss:$40 sps:$4 sm:$0xff]  }
 0x2cd   :  { %9802 = vmatprep.mubr.bf16.mxu1 %v17824_v22  ;;  %9776 = vmatprep.subr.bf16.mxu1 %v14270_v19  ;;  %v14331_v19 = vld [vmem:[%s20412_s3 + $0xcd0] ss:$40 sps:$4 sm:$0xff]   ;;  %v4603_v13 = vadd.f32 %v17791_v60, %v4562_v14  ;;  %v14354_v60 = vld [vmem:[%s20412_s3 + $0x1634] ss:$40 sps:$4 sm:$0xff]   ;;  %v14396_v14 = vld [vmem:[%s20412_s3 + $0x1404] ss:$40 sps:$4 sm:$0xff]  }
 0x2cf   :  { %9736 = vmatpush1.bf16.msra.mxu0 %v14265_v18  ;;  %v14336_v18 = vld [vmem:[%s20412_s3 + $0x11d4] ss:$40 sps:$4 sm:$0xff]  }
 0x2d0   :  { %9777 = vmatpush1.bf16.msra.mxu1 %v14268_v20  ;;  %9737 = vmatprep.subr.bf16.mxu0 %v14273_v24  ;;  %v14334_v20 = vld [vmem:[%s20412_s3 + $0x11d0] ss:$40 sps:$4 sm:$0xff]   ;;  %v14342_v24 = vld [vmem:[%s20412_s3 + $0x1184] ss:$40 sps:$4 sm:$0xff]  }
 0x2d1   :  { %9778 = vmatprep.subr.bf16.mxu1 %v14276_v51  ;;  %v14337_v51 = vld [vmem:[%s20412_s3 + $0xc80] ss:$40 sps:$4 sm:$0xff]  }
 0x2d3   :  { %9738 = vmatpush1.bf16.msra.mxu0 %v14271_v58  ;;  %v4777_v58 = vmax.f32 %v17368_v55, 0.0  ;;  %v14352_v55 = vld [vmem:[%s20412_s3 + $0x1630] ss:$40 sps:$4 sm:$0xff]  }
 0x2d4   :  { %9779 = vmatpush1.bf16.msra.mxu1 %v14274_v25  ;;  %9739 = vmatprep.subr.bf16.mxu0 %v14279_v26  ;;  %v14340_v25 = vld [vmem:[%s20412_s3 + $0x1180] ss:$40 sps:$4 sm:$0xff]   ;;  %v4779_v26 = vmax.f32 %v4603_v13, 0.0  ;;  %v14387_v13 = vld [vmem:[%s20412_s3 + $0x4bc] ss:$40 sps:$4 sm:$0xff]  }
 0x2d5   :  { %9780 = vmatprep.subr.bf16.mxu1 %v14282_v27  ;;  %v14345_v27 = vld [vmem:[%s20412_s3 + $0x23c] ss:$40 sps:$4 sm:$0xff]  }
 0x2d7   :  { %9740 = vmatpush1.bf16.msra.mxu0 %v14277_v30  ;;  %v17984_v30 = vpack.c.bf16 %v4777_v58, %v4777_v58  ;;  %v14408_v58 = vld [vmem:[%s20412_s3 + $0x1864] ss:$40 sps:$4 sm:$0xff]  }
 0x2d8   :  { %9781 = vmatpush1.bf16.msra.mxu1 %v14280_v59  ;;  %9741 = vmatprep.subr.bf16.mxu0 %v14285_v31  ;;  %v14343_v59 = vld [vmem:[%s20412_s3 + $0x238] ss:$40 sps:$4 sm:$0xff]   ;;  %v17989_v31 = vpack.c.bf16 %v4779_v26, %v4779_v26  ;;  %v14391_v26 = vld [vmem:[%s20412_s3 + $0x468] ss:$40 sps:$4 sm:$0xff]  }
 0x2d9   :  { %9782 = vmatprep.subr.bf16.mxu1 %v14288_v34  ;;  %v14348_v34 = vld [vmem:[%s20412_s3 + $0x1ec] ss:$40 sps:$4 sm:$0xff]  }
 0x2db   :  { %9742 = vmatpush1.bf16.msra.mxu0 %v14283_v39  ;;  %v14360_v39 = vld [vmem:[%s20412_s3 + $0x15e4] ss:$40 sps:$4 sm:$0xff]  }
 0x2dc   :  { %9783 = vmatpush1.bf16.msra.mxu1 %v14286_v43  ;;  %9743 = vmatprep.subr.bf16.mxu0 %v14291_v44 }
 0x2dd   :  { %9784 = vmatprep.subr.bf16.mxu1 %v14294_v63  ;;  %v14346_v63 = vld [vmem:[%s20412_s3 + $0x1e8] ss:$40 sps:$4 sm:$0xff]  }
 0x2df   :  { %9744 = vmatpush1.bf16.msra.mxu0 %v14289_v45  ;;  %v14358_v45 = vld [vmem:[%s20412_s3 + $0x15e0] ss:$40 sps:$4 sm:$0xff]  }
 0x2e0   :  { %9785 = vmatpush1.bf16.msra.mxu1 %v14292_v46  ;;  %9745 = vmatprep.subr.bf16.mxu0 %v14297_v48 }
 0x2e1   :  { %9786 = vmatprep.subr.bf16.mxu1 %v14300_v49  ;;  %v14366_v49 = vld [vmem:[%s20412_s3 + $0x1594] ss:$40 sps:$4 sm:$0xff]  }
 0x2e3   :  { %9746 = vmatpush2.bf16.msra.mxu0 %v14295_v23  ;;  %v14351_v23 = vld [vmem:[%s20412_s3 + $0x19c] ss:$40 sps:$4 sm:$0xff]  }
 0x2e4   :  { %9787 = vmatpush2.bf16.msra.mxu1 %v14298_v10  ;;  %9747 = vmatprep.subr.bf16.mxu0 %v14303_v50 }
 0x2e5   :  { %9788 = vmatprep.subr.bf16.mxu1 %v14306_v52  ;;  %v14349_v52 = vld [vmem:[%s20412_s3 + $0x198] ss:$40 sps:$4 sm:$0xff]  }
 0x2e7   :  { %9748 = vmatpush2.bf16.msra.mxu0 %v14301_v54  ;;  %v14364_v54 = vld [vmem:[%s20412_s3 + $0x1590] ss:$40 sps:$4 sm:$0xff]  }
 0x2e8   :  { %9789 = vmatpush2.bf16.msra.mxu1 %v14304_v0  ;;  %9749 = vmatprep.subr.bf16.mxu0 %v14309_v7 }
 0x2e9   :  { %9790 = vmatprep.subr.bf16.mxu1 %v14312_v47  ;;  %v14372_v47 = vld [vmem:[%s20412_s3 + $0x1544] ss:$40 sps:$4 sm:$0xff]  }
 0x2eb   :  { %9750 = vmatpush2.bf16.msra.mxu0 %v14307_v61  ;;  %v14357_v61 = vld [vmem:[%s20412_s3 + $0x14c] ss:$40 sps:$4 sm:$0xff]  }
 0x2ec   :  { %9791 = vmatpush2.bf16.msra.mxu1 %v14310_v21  ;;  %9751 = vmatprep.subr.bf16.mxu0 %v14315_v1  ;;  %v14355_v21 = vld [vmem:[%s20412_s3 + $0x148] ss:$40 sps:$4 sm:$0xff]  }
 0x2ed   :  { %9792 = vmatprep.subr.bf16.mxu1 %v14318_v2  ;;  %v14370_v1 = vld [vmem:[%s20412_s3 + $0x1540] ss:$40 sps:$4 sm:$0xff]   ;;  %v14378_v2 = vld [vmem:[%s20412_s3 + $0x14f4] ss:$40 sps:$4 sm:$0xff]  }
 0x2ef   :  { %9752 = vmatpush2.bf16.msra.mxu0 %v14313_v36  ;;  %v14363_v36 = vld [vmem:[%s20412_s3 + $0xfc] ss:$40 sps:$4 sm:$0xff]  }
 0x2f0   :  { %9793 = vmatpush2.bf16.msra.mxu1 %v14316_v3  ;;  %9753 = vmatprep.subr.bf16.mxu0 %v14321_v4  ;;  %v14376_v3 = vld [vmem:[%s20412_s3 + $0x14f0] ss:$40 sps:$4 sm:$0xff]  }
 0x2f1   :  { %9794 = vmatprep.subr.bf16.mxu1 %v14324_v16  ;;  %v14361_v4 = vld [vmem:[%s20412_s3 + $0xf8] ss:$40 sps:$4 sm:$0xff]   ;;  %v14384_v16 = vld [vmem:[%s20412_s3 + $0x14a4] ss:$40 sps:$4 sm:$0xff]  }
 0x2f3   :  { %9754 = vmatpush2.bf16.msra.mxu0 %v14319_v5  ;;  %v14369_v5 = vld [vmem:[%s20412_s3 + $0xac] ss:$40 sps:$4 sm:$0xff]  }
 0x2f4   :  { %9795 = vmatpush2.bf16.msra.mxu1 %v14322_v8  ;;  %9755 = vmatprep.subr.bf16.mxu0 %v14327_v9  ;;  %v14382_v8 = vld [vmem:[%s20412_s3 + $0x14a0] ss:$40 sps:$4 sm:$0xff]  }
 0x2f5   :  { %9796 = vmatprep.subr.bf16.mxu1 %v14330_v42  ;;  %v14367_v9 = vld [vmem:[%s20412_s3 + $0xa8] ss:$40 sps:$4 sm:$0xff]   ;;  %v14390_v42 = vld [vmem:[%s20412_s3 + $0x1454] ss:$40 sps:$4 sm:$0xff]  }
 0x2f7   :  { %9756 = vmatpush2.bf16.msra.mxu0 %v14325_v28  ;;  %v14375_v28 = vld [vmem:[%s20412_s3 + $0x5c] ss:$40 sps:$4 sm:$0xff]  }
 0x2f8   :  { %9797 = vmatpush2.bf16.msra.mxu1 %v14328_v11  ;;  %9757 = vmatprep.subr.bf16.mxu0 %v14333_v38  ;;  %v14388_v11 = vld [vmem:[%s20412_s3 + $0x1450] ss:$40 sps:$4 sm:$0xff]  }
 0x2f9   :  { %9798 = vmatprep.subr.bf16.mxu1 %v14336_v18  ;;  %v14373_v38 = vld [vmem:[%s20412_s3 + $0x58] ss:$40 sps:$4 sm:$0xff]   ;;  %v14381_v18 = vld [vmem:[%s20412_s3 + $0xc] ss:$40 sps:$4 sm:$0xff]  }
 0x2fb   :  { %9758 = vmatpush2.bf16.msra.mxu0 %v14331_v19  ;;  %v14394_v19 = vld [vmem:[%s20412_s3 + $0x1400] ss:$40 sps:$4 sm:$0xff]  }
 0x2fc   :  { %9799 = vmatpush2.bf16.msra.mxu1 %v14334_v20  ;;  %9759 = vmatprep.subr.bf16.mxu0 %v14339_v17  ;;  %v14379_v20 = vld [vmem:[%s20412_s3 + $0x8] ss:$40 sps:$4 sm:$0xff]   ;;  %v14402_v17 = vld [vmem:[%s20412_s3 + $0x18b4] ss:$40 sps:$4 sm:$0xff]  }
 0x2fd   :  { %9800 = vmatprep.subr.bf16.mxu1 %v14342_v24  ;;  %v14400_v24 = vld [vmem:[%s20412_s3 + $0x18b0] ss:$40 sps:$4 sm:$0xff]  }
 0x2ff   :  { %9760 = vmatpush2.bf16.msra.mxu0 %v14337_v51  ;;  %v14385_v51 = vld [vmem:[%s20412_s3 + $0x4b8] ss:$40 sps:$4 sm:$0xff]  }
 0x300   :  { %9801 = vmatpush2.bf16.msra.mxu1 %v14340_v25  ;;  %9811 = vmatprep.subr.bf16.mxu0 %v14354_v60  ;;  %v14393_v25 = vld [vmem:[%s20412_s3 + $0x46c] ss:$40 sps:$4 sm:$0xff]   ;;  %v14406_v60 = vld [vmem:[%s20412_s3 + $0x1860] ss:$40 sps:$4 sm:$0xff]  }
 0x301   :  { %9852 = vmatprep.subr.bf16.mxu1 %v14345_v27  ;;  %v14414_v27 = vld [vmem:[%s20412_s3 + $0x1814] ss:$40 sps:$4 sm:$0xff]  }
 0x302   :  { %v17997_v43 = vpop.f32.mrf.mxu0  ;;  %9762 = vmatmul.mubr.bf16.vlgmr.msra.gmra.mxu0 %v17984_v30 }
 0x303   :  { %v17999_v44 = vpop.f32.mrf.mxu1  ;;  %9803 = vmatmul.mubr.bf16.vlgmr.msra.gmra.mxu1 %v17989_v31  ;;  %9812 = vmatpush1.bf16.msra.mxu0 %v14352_v55  ;;  %v14399_v55 = vld [vmem:[%s20412_s3 + $0x41c] ss:$40 sps:$4 sm:$0xff]  }
 0x304   :  { %9853 = vmatpush1.bf16.msra.mxu1 %v14343_v59  ;;  %9884 = vmatprep.mubr.bf16.mxu1 %v17566_v12  ;;  %v18010_v46 = vpop.f32.mrf.mxu0  ;;  %v14412_v59 = vld [vmem:[%s20412_s3 + $0x1810] ss:$40 sps:$4 sm:$0xff]  }
 0x305   :  { %v18012_v48 = vpop.f32.mrf.mxu1  ;;  %9854 = vmatprep.subr.bf16.mxu1 %v14348_v34  ;;  %9813 = vmatprep.subr.bf16.mxu0 %v14360_v39  ;;  %v14397_v34 = vld [vmem:[%s20412_s3 + $0x418] ss:$40 sps:$4 sm:$0xff]   ;;  %v14420_v39 = vld [vmem:[%s20412_s3 + $0x17c4] ss:$40 sps:$4 sm:$0xff]  }
 0x306   :  { %v4647_v10 = vpop.f32.mrf.mxu0 }
 0x307   :  { %v4688_v50 = vpop.f32.mrf.mxu1  ;;  %9814 = vmatpush1.bf16.msra.mxu0 %v14358_v45  ;;  %v14418_v45 = vld [vmem:[%s20412_s3 + $0x17c0] ss:$40 sps:$4 sm:$0xff]   ;;  %v14411_v10 = vld [vmem:[%s20412_s3 + $0x37c] ss:$40 sps:$4 sm:$0xff]  }
 0x308   :  { %9855 = vmatpush1.bf16.msra.mxu1 %v14346_v63  ;;  %v4648_v0 = vpop.f32.mrf.mxu0  ;;  %9815 = vmatprep.subr.bf16.mxu0 %v14366_v49  ;;  %v14405_v63 = vld [vmem:[%s20412_s3 + $0x3cc] ss:$40 sps:$4 sm:$0xff]   ;;  %v14403_v49 = vld [vmem:[%s20412_s3 + $0x3c8] ss:$40 sps:$4 sm:$0xff]  }
 0x309   :  { %v4689_v7 = vpop.f32.mrf.mxu1  ;;  %9856 = vmatprep.subr.bf16.mxu1 %v14351_v23  ;;  %v14426_v23 = vld [vmem:[%s20412_s3 + $0x1774] ss:$40 sps:$4 sm:$0xff]   ;;  %v14424_v50 = vld [vmem:[%s20412_s3 + $0x1770] ss:$40 sps:$4 sm:$0xff]  }
 0x30a   :  { %v14417_v0 = vld [vmem:[%s20412_s3 + $0x32c] ss:$40 sps:$4 sm:$0xff]   ;;  %v14430_v7 = vld [vmem:[%s20412_s3 + $0x1720] ss:$40 sps:$4 sm:$0xff]  }
 0x30b   :  { %9816 = vmatpush1.bf16.msra.mxu0 %v14364_v54  ;;  %v14432_v54 = vld [vmem:[%s20412_s3 + $0x1724] ss:$40 sps:$4 sm:$0xff]  }
 0x30c   :  { %9857 = vmatpush1.bf16.msra.mxu1 %v14349_v52  ;;  %9817 = vmatprep.subr.bf16.mxu0 %v14372_v47  ;;  %v14409_v52 = vld [vmem:[%s20412_s3 + $0x378] ss:$40 sps:$4 sm:$0xff]   ;;  %v672_v47 = vld [vmem:[%s20411_s2 + $0x8] sm:$0x3] }
 0x30d   :  { %9858 = vmatprep.subr.bf16.mxu1 %v14357_v61  ;;  %v14415_v61 = vld [vmem:[%s20412_s3 + $0x328] ss:$40 sps:$4 sm:$0xff]  }
 0x30f   :  { %9818 = vmatpush1.bf16.msra.mxu0 %v14370_v1  ;;  %v14423_v1 = vld [vmem:[%s20412_s3 + $0x2dc] ss:$40 sps:$4 sm:$0xff]  }
 0x310   :  { %9859 = vmatpush1.bf16.msra.mxu1 %v14355_v21  ;;  %9819 = vmatprep.subr.bf16.mxu0 %v14378_v2  ;;  %v14438_v21 = vld [vmem:[%s20412_s3 + $0x16d4] ss:$40 sps:$4 sm:$0xff]   ;;  %v14436_v2 = vld [vmem:[%s20412_s3 + $0x16d0] ss:$40 sps:$4 sm:$0xff]  }
 0x311   :  { %9860 = vmatprep.subr.bf16.mxu1 %v14363_v36  ;;  %v14421_v36 = vld [vmem:[%s20412_s3 + $0x2d8] ss:$40 sps:$4 sm:$0xff]  }
 0x313   :  { %9820 = vmatpush1.bf16.msra.mxu0 %v14376_v3  ;;  %v14444_v3 = vld [vmem:[%s20412_s3 + $0x1684] ss:$40 sps:$4 sm:$0xff]  }
 0x314   :  { %9861 = vmatpush1.bf16.msra.mxu1 %v14361_v4  ;;  %9821 = vmatprep.subr.bf16.mxu0 %v14384_v16  ;;  %v710_v4 = vrot.slane %v672_v47, %v16303_v35  ;;  %v14429_v16 = vld [vmem:[%s20412_s3 + $0x28c] ss:$40 sps:$4 sm:$0xff]  }
 0x315   :  { %9862 = vmatprep.subr.bf16.mxu1 %v14369_v5  ;;  %v14442_v5 = vld [vmem:[%s20412_s3 + $0x1680] ss:$40 sps:$4 sm:$0xff]  }
 0x317   :  { %9822 = vmatpush1.bf16.msra.mxu0 %v14382_v8  ;;  %v714_v8 = vrot.slane %v672_v47, %v16312_v40  ;;  %v14465_v47 = vld [vmem:[%s20412_s3 + $0xaac] ss:$40 sps:$4 sm:$0xff]  }
 0x318   :  { %9863 = vmatpush1.bf16.msra.mxu1 %v14367_v9  ;;  %9823 = vmatprep.subr.bf16.mxu0 %v14390_v42  ;;  %v14427_v9 = vld [vmem:[%s20412_s3 + $0x288] ss:$40 sps:$4 sm:$0xff]   ;;  %v14450_v42 = vld [vmem:[%s20412_s3 + $0x73c] ss:$40 sps:$4 sm:$0xff]  }
 0x319   :  { %9864 = vmatprep.subr.bf16.mxu1 %v14375_v28  ;;  %v4644_v28 = vadd.f32 %v17997_v43, %v710_v4  ;;  %v14441_v43 = vld [vmem:[%s20412_s3 + $0xbec] ss:$40 sps:$4 sm:$0xff]   ;;  %v14474_v4 = vld [vmem:[%s20412_s3 + $0x5fc] ss:$40 sps:$4 sm:$0xff]  }
 0x31b   :  { %9824 = vmatpush1.bf16.msra.mxu0 %v14388_v11  ;;  %v14435_v11 = vld [vmem:[%s20412_s3 + $0xc3c] ss:$40 sps:$4 sm:$0xff]  }
 0x31c   :  { %9865 = vmatpush1.bf16.msra.mxu1 %v14373_v38  ;;  %9825 = vmatprep.subr.bf16.mxu0 %v14396_v14  ;;  %v4646_v38 = vadd.f32 %v18010_v46, %v714_v8  ;;  %v14433_v14 = vld [vmem:[%s20412_s3 + $0xc38] ss:$40 sps:$4 sm:$0xff]   ;;  %v14475_v8 = vld [vmem:[%s20412_s3 + $0xa08] ss:$40 sps:$4 sm:$0xff]  }
 0x31d   :  { %9866 = vmatprep.subr.bf16.mxu1 %v14381_v18  ;;  %v4685_v18 = vadd.f32 %v17999_v44, %v4644_v28  ;;  %v14439_v44 = vld [vmem:[%s20412_s3 + $0xbe8] ss:$40 sps:$4 sm:$0xff]  }
 0x31e   :  { %v14478_v28 = vld [vmem:[%s20412_s3 + $0x5a8] ss:$40 sps:$4 sm:$0xff]  }
 0x31f   :  { %9826 = vmatpush1.bf16.msra.mxu0 %v14394_v19 }
 0x320   :  { %9867 = vmatpush1.bf16.msra.mxu1 %v14379_v20  ;;  %9827 = vmatprep.subr.bf16.mxu0 %v14402_v17  ;;  %v4687_v17 = vadd.f32 %v18012_v48, %v4646_v38  ;;  %v14486_v38 = vld [vmem:[%s20412_s3 + $0x55c] ss:$40 sps:$4 sm:$0xff]  }
 0x321   :  { %9868 = vmatprep.subr.bf16.mxu1 %v14387_v13 }
 0x323   :  { %9828 = vmatpush2.bf16.msra.mxu0 %v14400_v24 }
 0x324   :  { %9869 = vmatpush2.bf16.msra.mxu1 %v14385_v51  ;;  %9829 = vmatprep.subr.bf16.mxu0 %v14408_v58 }
 0x325   :  { %9870 = vmatprep.subr.bf16.mxu1 %v14393_v25  ;;  %v14447_v25 = vld [vmem:[%s20412_s3 + $0xb9c] ss:$40 sps:$4 sm:$0xff]  }
 0x327   :  { %9830 = vmatpush2.bf16.msra.mxu0 %v14406_v60 }
 0x328   :  { %9871 = vmatpush2.bf16.msra.mxu1 %v14391_v26  ;;  %9831 = vmatprep.subr.bf16.mxu0 %v14414_v27 }
 0x329   :  { %9872 = vmatprep.subr.bf16.mxu1 %v14399_v55 }
 0x32b   :  { %9832 = vmatpush2.bf16.msra.mxu0 %v14412_v59 }
 0x32c   :  { %9873 = vmatpush2.bf16.msra.mxu1 %v14397_v34  ;;  %9833 = vmatprep.subr.bf16.mxu0 %v14420_v39  ;;  %v14445_v34 = vld [vmem:[%s20412_s3 + $0xb98] ss:$40 sps:$4 sm:$0xff]  }
 0x32d   :  { %9874 = vmatprep.subr.bf16.mxu1 %v14405_v63  ;;  %v14448_v63 = vld [vmem:[%s20412_s3 + $0x738] ss:$40 sps:$4 sm:$0xff]  }
 0x32f   :  { %9834 = vmatpush2.bf16.msra.mxu0 %v14418_v45  ;;  %v14453_v45 = vld [vmem:[%s20412_s3 + $0xb4c] ss:$40 sps:$4 sm:$0xff]  }
 0x330   :  { %9875 = vmatpush2.bf16.msra.mxu1 %v14403_v49  ;;  %9835 = vmatprep.subr.bf16.mxu0 %v14426_v23  ;;  %v14451_v49 = vld [vmem:[%s20412_s3 + $0xb48] ss:$40 sps:$4 sm:$0xff]  }
 0x331   :  { %9876 = vmatprep.subr.bf16.mxu1 %v14411_v10 }
 0x333   :  { %9836 = vmatpush2.bf16.msra.mxu0 %v14424_v50  ;;  %v14456_v50 = vld [vmem:[%s20412_s3 + $0x6ec] ss:$40 sps:$4 sm:$0xff]  }
 0x334   :  { %9877 = vmatpush2.bf16.msra.mxu1 %v14409_v52  ;;  %9837 = vmatprep.subr.bf16.mxu0 %v14432_v54  ;;  %v14459_v52 = vld [vmem:[%s20412_s3 + $0xafc] ss:$40 sps:$4 sm:$0xff]   ;;  %v14454_v54 = vld [vmem:[%s20412_s3 + $0x6e8] ss:$40 sps:$4 sm:$0xff]  }
 0x335   :  { %9878 = vmatprep.subr.bf16.mxu1 %v14417_v0  ;;  %v14457_v0 = vld [vmem:[%s20412_s3 + $0xaf8] ss:$40 sps:$4 sm:$0xff]  }
 0x337   :  { %9838 = vmatpush2.bf16.msra.mxu0 %v14430_v7  ;;  %v14462_v7 = vld [vmem:[%s20412_s3 + $0x69c] ss:$40 sps:$4 sm:$0xff]  }
 0x338   :  { %9879 = vmatpush2.bf16.msra.mxu1 %v14415_v61  ;;  %9839 = vmatprep.subr.bf16.mxu0 %v14438_v21  ;;  %v14460_v61 = vld [vmem:[%s20412_s3 + $0x698] ss:$40 sps:$4 sm:$0xff]   ;;  %v14463_v21 = vld [vmem:[%s20412_s3 + $0xaa8] ss:$40 sps:$4 sm:$0xff]  }
 0x339   :  { %9880 = vmatprep.subr.bf16.mxu1 %v14423_v1  ;;  %v14468_v1 = vld [vmem:[%s20412_s3 + $0x64c] ss:$40 sps:$4 sm:$0xff]  }
 0x33b   :  { %9840 = vmatpush2.bf16.msra.mxu0 %v14436_v2  ;;  %v14471_v2 = vld [vmem:[%s20412_s3 + $0xa5c] ss:$40 sps:$4 sm:$0xff]  }
 0x33c   :  { %9881 = vmatpush2.bf16.msra.mxu1 %v14421_v36  ;;  %9841 = vmatprep.subr.bf16.mxu0 %v14444_v3  ;;  %v14466_v36 = vld [vmem:[%s20412_s3 + $0x648] ss:$40 sps:$4 sm:$0xff]   ;;  %v14469_v3 = vld [vmem:[%s20412_s3 + $0xa58] ss:$40 sps:$4 sm:$0xff]  }
 0x33d   :  { %9882 = vmatprep.subr.bf16.mxu1 %v14429_v16  ;;  %v14477_v16 = vld [vmem:[%s20412_s3 + $0xa0c] ss:$40 sps:$4 sm:$0xff]  }
 0x33f   :  { %9842 = vmatpush2.bf16.msra.mxu0 %v14442_v5  ;;  %v14472_v5 = vld [vmem:[%s20412_s3 + $0x5f8] ss:$40 sps:$4 sm:$0xff]  }
 0x340   :  { %9883 = vmatpush2.bf16.msra.mxu1 %v14427_v9  ;;  %9893 = vmatprep.subr.bf16.mxu0 %v14450_v42  ;;  %v14480_v9 = vld [vmem:[%s20412_s3 + $0x5ac] ss:$40 sps:$4 sm:$0xff]   ;;  %v14483_v42 = vld [vmem:[%s20412_s3 + $0xebc] ss:$40 sps:$4 sm:$0xff]  }
 0x341   :  { %9934 = vmatprep.subr.bf16.mxu1 %v14435_v11  ;;  %v14481_v11 = vld [vmem:[%s20412_s3 + $0xeb8] ss:$40 sps:$4 sm:$0xff]  }
 0x342   :  { %v4725_v19 = vpop.f32.mrf.mxu0 }
 0x343   :  { %v4766_v20 = vpop.f32.mrf.mxu1  ;;  %v4726_v13 = vadd.f32 %v4725_v19, %v4685_v18  ;;  %9885 = vmatmul.mubr.bf16.vlgmr.msra.gmra.mxu1 %v17774_v6  ;;  %v14484_v18 = vld [vmem:[%s20412_s3 + $0x558] ss:$40 sps:$4 sm:$0xff]   ;;  %v14492_v19 = vld [vmem:[%s20412_s3 + $0x50c] ss:$40 sps:$4 sm:$0xff]  }
 0x344   :  { %9935 = vmatpush1.bf16.msra.mxu1 %v14433_v14  ;;  %9966 = vmatprep.mubr.bf16.mxu1 %v17787_v57  ;;  %v4727_v46 = vpop.f32.mrf.mxu0  ;;  %v14489_v14 = vld [vmem:[%s20412_s3 + $0xe6c] ss:$40 sps:$4 sm:$0xff]  }
 0x345   :  { %v4768_v24 = vpop.f32.mrf.mxu1  ;;  %v4767_v51 = vadd.f32 %v4766_v20, %v4726_v13  ;;  %v4728_v58 = vadd.f32 %v4727_v46, %v4687_v17  ;;  %9936 = vmatprep.subr.bf16.mxu1 %v14441_v43  ;;  %v14487_v43 = vld [vmem:[%s20412_s3 + $0xe68] ss:$40 sps:$4 sm:$0xff]   ;;  %v14495_v20 = vld [vmem:[%s20412_s3 + $0xe1c] ss:$40 sps:$4 sm:$0xff]   ;;  %v14493_v13 = vld [vmem:[%s20412_s3 + $0xe18] ss:$40 sps:$4 sm:$0xff]  }
 0x346   :  { %v4729_v48 = vpop.f32.mrf.mxu0  ;;  %v14490_v17 = vld [vmem:[%s20412_s3 + $0x508] ss:$40 sps:$4 sm:$0xff]   ;;  %v14498_v46 = vld [vmem:[%s20412_s3 + $0x9bc] ss:$40 sps:$4 sm:$0xff]  }
 0x347   :  { %v4770_v60 = vpop.f32.mrf.mxu1  ;;  %v4769_v26 = vadd.f32 %v4768_v24, %v4728_v58  ;;  %v4781_v27 = vmax.f32 %v4767_v51, 0.0  ;;  %v14501_v24 = vld [vmem:[%s20412_s3 + $0xdcc] ss:$40 sps:$4 sm:$0xff]   ;;  %v14499_v51 = vld [vmem:[%s20412_s3 + $0xdc8] ss:$40 sps:$4 sm:$0xff]  }
 0x348   :  { %9937 = vmatpush1.bf16.msra.mxu1 %v14439_v44  ;;  %v4730_v55 = vpop.f32.mrf.mxu0  ;;  %v14496_v44 = vld [vmem:[%s20412_s3 + $0x9b8] ss:$40 sps:$4 sm:$0xff]   ;;  %v14504_v58 = vld [vmem:[%s20412_s3 + $0x96c] ss:$40 sps:$4 sm:$0xff]   ;;  %v14502_v48 = vld [vmem:[%s20412_s3 + $0x968] ss:$40 sps:$4 sm:$0xff]  }
 0x349   :  { %v4771_v59 = vpop.f32.mrf.mxu1  ;;  %v4782_v39 = vmax.f32 %v4769_v26, 0.0  ;;  %9938 = vmatprep.subr.bf16.mxu1 %v14447_v25  ;;  %v18225_v10 = vpack.c.bf16 %v4781_v27, %v4781_v27  ;;  %v14507_v25 = vld [vmem:[%s20412_s3 + $0xd7c] ss:$40 sps:$4 sm:$0xff]   ;;  %v14505_v60 = vld [vmem:[%s20412_s3 + $0xd78] ss:$40 sps:$4 sm:$0xff]  }
 0x34a   :  { %v14510_v26 = vld [vmem:[%s20412_s3 + $0x91c] ss:$40 sps:$4 sm:$0xff]   ;;  %v14513_v27 = vld [vmem:[%s20412_s3 + $0xd2c] ss:$40 sps:$4 sm:$0xff]   ;;  %v14508_v55 = vld [vmem:[%s20412_s3 + $0x918] ss:$40 sps:$4 sm:$0xff]  }
 0x34b   :  { %v18223_v23 = vpack.c.bf16 %v4782_v39, %v4782_v39  ;;  %v14511_v59 = vld [vmem:[%s20412_s3 + $0xd28] ss:$40 sps:$4 sm:$0xff]   ;;  %v14519_v39 = vld [vmem:[%s20412_s3 + $0xcdc] ss:$40 sps:$4 sm:$0xff]  }
 0x34c   :  { %9939 = vmatpush1.bf16.msra.mxu1 %v14445_v34  ;;  %v14516_v34 = vld [vmem:[%s20412_s3 + $0x8cc] ss:$40 sps:$4 sm:$0xff]  }
 0x34d   :  { %9843 = vmatprep.mubr.bf16.mxu0 %v18223_v23  ;;  %9940 = vmatprep.subr.bf16.mxu1 %v14453_v45  ;;  %v14517_v45 = vld [vmem:[%s20412_s3 + $0xcd8] ss:$40 sps:$4 sm:$0xff]  }
 0x34e   :  { %9844 = vmatmul.mubr.bf16.vlgmr.msra.gmra.mxu0 %v18225_v10 }
 0x34f   :  { %9894 = vmatpush1.bf16.msra.mxu0 %v14448_v63  ;;  %9925 = vmatprep.mubr.bf16.mxu0 %v17571_v15  ;;  %v14514_v63 = vld [vmem:[%s20412_s3 + $0x8c8] ss:$40 sps:$4 sm:$0xff]  }
 0x350   :  { %9941 = vmatpush1.bf16.msra.mxu1 %v14451_v49  ;;  %9895 = vmatprep.subr.bf16.mxu0 %v14456_v50  ;;  %v14522_v49 = vld [vmem:[%s20412_s3 + $0x87c] ss:$40 sps:$4 sm:$0xff]   ;;  %v14520_v50 = vld [vmem:[%s20412_s3 + $0x878] ss:$40 sps:$4 sm:$0xff]  }
 0x351   :  { %9942 = vmatprep.subr.bf16.mxu1 %v14459_v52  ;;  %v14525_v52 = vld [vmem:[%s20412_s3 + $0xc8c] ss:$40 sps:$4 sm:$0xff]  }
 0x353   :  { %9896 = vmatpush1.bf16.msra.mxu0 %v14454_v54  ;;  %v14523_v54 = vld [vmem:[%s20412_s3 + $0xc88] ss:$40 sps:$4 sm:$0xff]  }
 0x354   :  { %9943 = vmatpush1.bf16.msra.mxu1 %v14457_v0  ;;  %9897 = vmatprep.subr.bf16.mxu0 %v14462_v7  ;;  %v14528_v0 = vld [vmem:[%s20412_s3 + $0x82c] ss:$40 sps:$4 sm:$0xff]   ;;  %v18380_v7 = vld [vmem:[%s20413_s4] sm:$0xff] }
 0x355   :  { %9944 = vmatprep.subr.bf16.mxu1 %v14465_v47  ;;  %v14531_v47 = vld [vmem:[%s20412_s3 + $0x163c] ss:$40 sps:$4 sm:$0xff]  }
 0x357   :  { %9898 = vmatpush1.bf16.msra.mxu0 %v14460_v61  ;;  %v14526_v61 = vld [vmem:[%s20412_s3 + $0x828] ss:$40 sps:$4 sm:$0xff]  }
 0x358   :  { %9945 = vmatpush1.bf16.msra.mxu1 %v14463_v21  ;;  %9899 = vmatprep.subr.bf16.mxu0 %v14468_v1  ;;  %v5600_v21 = vrot.slane %v18380_v7, %v16303_v35  ;;  %v14529_v1 = vld [vmem:[%s20412_s3 + $0x1638] ss:$40 sps:$4 sm:$0xff]  }
 0x359   :  { %9946 = vmatprep.subr.bf16.mxu1 %v14471_v2  ;;  %v14534_v2 = vld [vmem:[%s20412_s3 + $0x7dc] ss:$40 sps:$4 sm:$0xff]  }
 0x35b   :  { %9900 = vmatpush1.bf16.msra.mxu0 %v14466_v36  ;;  %v5604_v36 = vrot.slane %v18380_v7, %v16312_v40 }
 0x35c   :  { %9947 = vmatpush1.bf16.msra.mxu1 %v14469_v3  ;;  %9901 = vmatprep.subr.bf16.mxu0 %v14474_v4  ;;  %v14532_v3 = vld [vmem:[%s20412_s3 + $0x7d8] ss:$40 sps:$4 sm:$0xff]   ;;  %v14537_v4 = vld [vmem:[%s20412_s3 + $0x15ec] ss:$40 sps:$4 sm:$0xff]  }
 0x35d   :  { %9948 = vmatprep.subr.bf16.mxu1 %v14477_v16 }
 0x35f   :  { %9902 = vmatpush1.bf16.msra.mxu0 %v14472_v5  ;;  %v14535_v5 = vld [vmem:[%s20412_s3 + $0x15e8] ss:$40 sps:$4 sm:$0xff]  }
 0x360   :  { %9949 = vmatpush1.bf16.msra.mxu1 %v14475_v8  ;;  %9903 = vmatprep.subr.bf16.mxu0 %v14480_v9 }
 0x361   :  { %9950 = vmatprep.subr.bf16.mxu1 %v14483_v42 }
 0x363   :  { %9904 = vmatpush1.bf16.msra.mxu0 %v14478_v28  ;;  %v14540_v28 = vld [vmem:[%s20412_s3 + $0x78c] ss:$40 sps:$4 sm:$0xff]  }
 0x364   :  { %9951 = vmatpush2.bf16.msra.mxu1 %v14481_v11  ;;  %9905 = vmatprep.subr.bf16.mxu0 %v14486_v38 }
 0x365   :  { %9952 = vmatprep.subr.bf16.mxu1 %v14489_v14 }
 0x367   :  { %9906 = vmatpush1.bf16.msra.mxu0 %v14484_v18  ;;  %v14538_v18 = vld [vmem:[%s20412_s3 + $0x788] ss:$40 sps:$4 sm:$0xff]  }
 0x368   :  { %9953 = vmatpush2.bf16.msra.mxu1 %v14487_v43  ;;  %9907 = vmatprep.subr.bf16.mxu0 %v14492_v19  ;;  %v14543_v43 = vld [vmem:[%s20412_s3 + $0x159c] ss:$40 sps:$4 sm:$0xff]  }
 0x369   :  { %9954 = vmatprep.subr.bf16.mxu1 %v14495_v20  ;;  %v14541_v20 = vld [vmem:[%s20412_s3 + $0x1598] ss:$40 sps:$4 sm:$0xff]  }
 0x36b   :  { %9908 = vmatpush1.bf16.msra.mxu0 %v14490_v17 }
 0x36c   :  { %9955 = vmatpush2.bf16.msra.mxu1 %v14493_v13  ;;  %9909 = vmatprep.subr.bf16.mxu0 %v14498_v46 }
 0x36d   :  { %9956 = vmatprep.subr.bf16.mxu1 %v14501_v24  ;;  %v14546_v24 = vld [vmem:[%s20412_s3 + $0x113c] ss:$40 sps:$4 sm:$0xff]  }
 0x36f   :  { %9910 = vmatpush2.bf16.msra.mxu0 %v14496_v44 }
 0x370   :  { %9957 = vmatpush2.bf16.msra.mxu1 %v14499_v51  ;;  %9911 = vmatprep.subr.bf16.mxu0 %v14504_v58  ;;  %v14544_v51 = vld [vmem:[%s20412_s3 + $0x1138] ss:$40 sps:$4 sm:$0xff]   ;;  %v14549_v58 = vld [vmem:[%s20412_s3 + $0x154c] ss:$40 sps:$4 sm:$0xff]  }
 0x371   :  { %9958 = vmatprep.subr.bf16.mxu1 %v14507_v25  ;;  %v14547_v25 = vld [vmem:[%s20412_s3 + $0x1548] ss:$40 sps:$4 sm:$0xff]  }
 0x373   :  { %9912 = vmatpush2.bf16.msra.mxu0 %v14502_v48  ;;  %v14552_v48 = vld [vmem:[%s20412_s3 + $0x10ec] ss:$40 sps:$4 sm:$0xff]  }
 0x374   :  { %9959 = vmatpush2.bf16.msra.mxu1 %v14505_v60  ;;  %9913 = vmatprep.subr.bf16.mxu0 %v14510_v26  ;;  %v14555_v60 = vld [vmem:[%s20412_s3 + $0x14fc] ss:$40 sps:$4 sm:$0xff]   ;;  %v14550_v26 = vld [vmem:[%s20412_s3 + $0x10e8] ss:$40 sps:$4 sm:$0xff]  }
 0x375   :  { %9960 = vmatprep.subr.bf16.mxu1 %v14513_v27  ;;  %v14553_v27 = vld [vmem:[%s20412_s3 + $0x14f8] ss:$40 sps:$4 sm:$0xff]  }
 0x377   :  { %9914 = vmatpush2.bf16.msra.mxu0 %v14508_v55  ;;  %v14558_v55 = vld [vmem:[%s20412_s3 + $0x109c] ss:$40 sps:$4 sm:$0xff]  }
 0x378   :  { %9961 = vmatpush2.bf16.msra.mxu1 %v14511_v59  ;;  %9915 = vmatprep.subr.bf16.mxu0 %v14516_v34  ;;  %v14561_v59 = vld [vmem:[%s20412_s3 + $0x14ac] ss:$40 sps:$4 sm:$0xff]   ;;  %v14556_v34 = vld [vmem:[%s20412_s3 + $0x1098] ss:$40 sps:$4 sm:$0xff]  }
 0x379   :  { %9962 = vmatprep.subr.bf16.mxu1 %v14519_v39  ;;  %v14559_v39 = vld [vmem:[%s20412_s3 + $0x14a8] ss:$40 sps:$4 sm:$0xff]  }
 0x37b   :  { %9916 = vmatpush2.bf16.msra.mxu0 %v14514_v63  ;;  %v14564_v63 = vld [vmem:[%s20412_s3 + $0x104c] ss:$40 sps:$4 sm:$0xff]  }
 0x37c   :  { %9963 = vmatpush2.bf16.msra.mxu1 %v14517_v45  ;;  %9917 = vmatprep.subr.bf16.mxu0 %v14522_v49  ;;  %v14567_v45 = vld [vmem:[%s20412_s3 + $0x145c] ss:$40 sps:$4 sm:$0xff]   ;;  %v14562_v49 = vld [vmem:[%s20412_s3 + $0x1048] ss:$40 sps:$4 sm:$0xff]  }
 0x37d   :  { %9964 = vmatprep.subr.bf16.mxu1 %v14525_v52  ;;  %v14570_v52 = vld [vmem:[%s20412_s3 + $0xffc] ss:$40 sps:$4 sm:$0xff]  }
 0x37f   :  { %9918 = vmatpush2.bf16.msra.mxu0 %v14520_v50  ;;  %v14565_v50 = vld [vmem:[%s20412_s3 + $0x1458] ss:$40 sps:$4 sm:$0xff]  }
 0x380   :  { %9965 = vmatpush2.bf16.msra.mxu1 %v14523_v54  ;;  %9919 = vmatprep.subr.bf16.mxu0 %v14528_v0  ;;  %v14573_v54 = vld [vmem:[%s20412_s3 + $0x140c] ss:$40 sps:$4 sm:$0xff]   ;;  %v14568_v0 = vld [vmem:[%s20412_s3 + $0xff8] ss:$40 sps:$4 sm:$0xff]  }
 0x381   :  { %10016 = vmatprep.subr.bf16.mxu1 %v14531_v47  ;;  %v14571_v47 = vld [vmem:[%s20412_s3 + $0x1408] ss:$40 sps:$4 sm:$0xff]  }
 0x382   :  { %v9681_v16 = vpop.f32.mrf.mxu0 }
 0x383   :  { %v9682_v8 = vadd.f32 %v9681_v16, %v5600_v21  ;;  %v9722_v9 = vpop.f32.mrf.mxu1  ;;  %9920 = vmatpush2.bf16.msra.mxu0 %v14526_v61  ;;  %9967 = vmatmul.mubr.bf16.vlgmr.msra.gmra.mxu1 %v17984_v30  ;;  %v14576_v61 = vld [vmem:[%s20412_s3 + $0xfac] ss:$40 sps:$4 sm:$0xff]   ;;  %v14579_v21 = vld [vmem:[%s20412_s3 + $0x18bc] ss:$40 sps:$4 sm:$0xff]   ;;  %v14583_v16 = vld [vmem:[%s20412_s3 + $0x1868] ss:$40 sps:$4 sm:$0xff]  }
 0x384   :  { %10017 = vmatpush1.bf16.msra.mxu1 %v14529_v1  ;;  %10048 = vmatprep.mubr.bf16.mxu1 %v18223_v23  ;;  %v9683_v42 = vpop.f32.mrf.mxu0  ;;  %v14574_v1 = vld [vmem:[%s20412_s3 + $0xfa8] ss:$40 sps:$4 sm:$0xff]  }
 0x385   :  { %v18412_v11 = vadd.f32 %v9722_v9, %v9682_v8  ;;  %v9684_v38 = vadd.f32 %v9683_v42, %v5604_v36  ;;  %v9724_v14 = vpop.f32.mrf.mxu1  ;;  %9921 = vmatprep.subr.bf16.mxu0 %v14534_v2  ;;  %10018 = vmatprep.subr.bf16.mxu1 %v14537_v4  ;;  %v14577_v2 = vld [vmem:[%s20412_s3 + $0x18b8] ss:$40 sps:$4 sm:$0xff]   ;;  %v14582_v36 = vld [vmem:[%s20412_s3 + $0xf5c] ss:$40 sps:$4 sm:$0xff]   ;;  %v14586_v9 = vld [vmem:[%s20412_s3 + $0xf08] ss:$40 sps:$4 sm:$0xff]  }
 0x386   :  { %v9685_v19 = vpop.f32.mrf.mxu0  ;;  %v14580_v4 = vld [vmem:[%s20412_s3 + $0xf58] ss:$40 sps:$4 sm:$0xff]   ;;  %v14591_v8 = vld [vmem:[%s20412_s3 + $0x181c] ss:$40 sps:$4 sm:$0xff]  }
 0x387   :  { %v18423_v17 = vadd.f32 %v9724_v14, %v9684_v38  ;;  %v9726_v13 = vpop.f32.mrf.mxu1  ;;  %9922 = vmatpush2.bf16.msra.mxu0 %v14532_v3  ;;  %v14585_v3 = vld [vmem:[%s20412_s3 + $0x186c] ss:$40 sps:$4 sm:$0xff]   ;;  %v14589_v42 = vld [vmem:[%s20412_s3 + $0x1818] ss:$40 sps:$4 sm:$0xff]   ;;  %v14603_v19 = vld [vmem:[%s20412_s3 + $0x177c] ss:$40 sps:$4 sm:$0xff]  }
 0x388   :  { %10019 = vmatpush1.bf16.msra.mxu1 %v14535_v5  ;;  %v9686_v46 = vpop.f32.mrf.mxu0  ;;  %9923 = vmatprep.subr.bf16.mxu0 %v14540_v28  ;;  %v14588_v5 = vld [vmem:[%s20412_s3 + $0xf0c] ss:$40 sps:$4 sm:$0xff]   ;;  %v14594_v28 = vld [vmem:[%s20412_s3 + $0x13bc] ss:$40 sps:$4 sm:$0xff]   ;;  %v14592_v14 = vld [vmem:[%s20412_s3 + $0x13b8] ss:$40 sps:$4 sm:$0xff]  }
 0x389   :  { %v9727_v44 = vpop.f32.mrf.mxu1  ;;  %10020 = vmatprep.subr.bf16.mxu1 %v14543_v43  ;;  %v14597_v38 = vld [vmem:[%s20412_s3 + $0x17cc] ss:$40 sps:$4 sm:$0xff]   ;;  %v14601_v13 = vld [vmem:[%s20412_s3 + $0x1778] ss:$40 sps:$4 sm:$0xff]   ;;  %v14606_v46 = vld [vmem:[%s20412_s3 + $0x131c] ss:$40 sps:$4 sm:$0xff]  }
 0x38a   :  { %v14600_v43 = vld [vmem:[%s20412_s3 + $0x136c] ss:$40 sps:$4 sm:$0xff]   ;;  %v14604_v44 = vld [vmem:[%s20412_s3 + $0x1318] ss:$40 sps:$4 sm:$0xff]  }
 0x38b   :  { %9924 = vmatpush2.bf16.msra.mxu0 %v14538_v18  ;;  %v14595_v18 = vld [vmem:[%s20412_s3 + $0x17c8] ss:$40 sps:$4 sm:$0xff]  }
 0x38c   :  { %10021 = vmatpush1.bf16.msra.mxu1 %v14541_v20  ;;  %9975 = vmatprep.subr.bf16.mxu0 %v14546_v24  ;;  %v14598_v20 = vld [vmem:[%s20412_s3 + $0x1368] ss:$40 sps:$4 sm:$0xff]   ;;  %v14609_v24 = vld [vmem:[%s20412_s3 + $0x172c] ss:$40 sps:$4 sm:$0xff]  }
 0x38d   :  { %10022 = vmatprep.subr.bf16.mxu1 %v14549_v58  ;;  %v14612_v58 = vld [vmem:[%s20412_s3 + $0x12cc] ss:$40 sps:$4 sm:$0xff]  }
 0x38e   :  { %9926 = vmatmul.mubr.bf16.vlgmr.msra.gmra.mxu0 %v17782_v62 }
 0x38f   :  { %9976 = vmatpush1.bf16.msra.mxu0 %v14544_v51  ;;  %10007 = vmatprep.mubr.bf16.mxu0 %v17824_v22  ;;  %v14607_v51 = vld [vmem:[%s20412_s3 + $0x1728] ss:$40 sps:$4 sm:$0xff]  }
 0x390   :  { %10023 = vmatpush1.bf16.msra.mxu1 %v14547_v25  ;;  %9977 = vmatprep.subr.bf16.mxu0 %v14552_v48  ;;  %v14615_v25 = vld [vmem:[%s20412_s3 + $0x16dc] ss:$40 sps:$4 sm:$0xff]   ;;  %v14610_v48 = vld [vmem:[%s20412_s3 + $0x12c8] ss:$40 sps:$4 sm:$0xff]  }
 0x391   :  { %10024 = vmatprep.subr.bf16.mxu1 %v14555_v60  ;;  %v14613_v60 = vld [vmem:[%s20412_s3 + $0x16d8] ss:$40 sps:$4 sm:$0xff]  }
 0x393   :  { %9978 = vmatpush1.bf16.msra.mxu0 %v14550_v26  ;;  %v14618_v26 = vld [vmem:[%s20412_s3 + $0x127c] ss:$40 sps:$4 sm:$0xff]  }
 0x394   :  { %10025 = vmatpush1.bf16.msra.mxu1 %v14553_v27  ;;  %9979 = vmatprep.subr.bf16.mxu0 %v14558_v55  ;;  %v14621_v27 = vld [vmem:[%s20412_s3 + $0x168c] ss:$40 sps:$4 sm:$0xff]   ;;  %v14616_v55 = vld [vmem:[%s20412_s3 + $0x1278] ss:$40 sps:$4 sm:$0xff]  }
 0x395   :  { %10026 = vmatprep.subr.bf16.mxu1 %v14561_v59  ;;  %v14619_v59 = vld [vmem:[%s20412_s3 + $0x1688] ss:$40 sps:$4 sm:$0xff]  }
 0x397   :  { %9980 = vmatpush1.bf16.msra.mxu0 %v14556_v34  ;;  %v14624_v34 = vld [vmem:[%s20412_s3 + $0x122c] ss:$40 sps:$4 sm:$0xff]  }
 0x398   :  { %10027 = vmatpush1.bf16.msra.mxu1 %v14559_v39  ;;  %9981 = vmatprep.subr.bf16.mxu0 %v14564_v63  ;;  %v14627_v39 = vld [vmem:[%s20412_s3 + $0x744] ss:$40 sps:$4 sm:$0xff]   ;;  %v14622_v63 = vld [vmem:[%s20412_s3 + $0x1228] ss:$40 sps:$4 sm:$0xff]  }
 0x399   :  { %10028 = vmatprep.subr.bf16.mxu1 %v14567_v45  ;;  %v14625_v45 = vld [vmem:[%s20412_s3 + $0x740] ss:$40 sps:$4 sm:$0xff]  }
 0x39b   :  { %9982 = vmatpush1.bf16.msra.mxu0 %v14562_v49  ;;  %v14630_v49 = vld [vmem:[%s20412_s3 + $0x11dc] ss:$40 sps:$4 sm:$0xff]  }
 0x39c   :  { %10029 = vmatpush1.bf16.msra.mxu1 %v14565_v50  ;;  %9983 = vmatprep.subr.bf16.mxu0 %v14570_v52  ;;  %v14633_v50 = vld [vmem:[%s20412_s3 + $0x6f4] ss:$40 sps:$4 sm:$0xff]  }
 0x39d   :  { %10030 = vmatprep.subr.bf16.mxu1 %v14573_v54 }
 0x39f   :  { %9984 = vmatpush1.bf16.msra.mxu0 %v14568_v0 }
 0x3a0   :  { %10031 = vmatpush1.bf16.msra.mxu1 %v14571_v47  ;;  %9985 = vmatprep.subr.bf16.mxu0 %v14576_v61  ;;  %v14628_v47 = vld [vmem:[%s20412_s3 + $0x11d8] ss:$40 sps:$4 sm:$0xff]  }
 0x3a1   :  { %10032 = vmatprep.subr.bf16.mxu1 %v14579_v21  ;;  %v14631_v21 = vld [vmem:[%s20412_s3 + $0x6f0] ss:$40 sps:$4 sm:$0xff]  }
 0x3a3   :  { %9986 = vmatpush1.bf16.msra.mxu0 %v14574_v1 }
 0x3a4   :  { %10033 = vmatpush2.bf16.msra.mxu1 %v14577_v2  ;;  %9987 = vmatprep.subr.bf16.mxu0 %v14582_v36 }
 0x3a5   :  { %10034 = vmatprep.subr.bf16.mxu1 %v14585_v3  ;;  %v14639_v3 = vld [vmem:[%s20412_s3 + $0x6a4] ss:$40 sps:$4 sm:$0xff]  }
 0x3a7   :  { %9988 = vmatpush1.bf16.msra.mxu0 %v14580_v4 }
 0x3a8   :  { %10035 = vmatpush2.bf16.msra.mxu1 %v14583_v16  ;;  %9989 = vmatprep.subr.bf16.mxu0 %v14588_v5 }
 0x3a9   :  { %10036 = vmatprep.subr.bf16.mxu1 %v14591_v8  ;;  %v14634_v8 = vld [vmem:[%s20412_s3 + $0x1188] ss:$40 sps:$4 sm:$0xff]  }
 0x3ab   :  { %9990 = vmatpush1.bf16.msra.mxu0 %v14586_v9 }
 0x3ac   :  { %10037 = vmatpush2.bf16.msra.mxu1 %v14589_v42  ;;  %9991 = vmatprep.subr.bf16.mxu0 %v14594_v28  ;;  %v14642_v42 = vld [vmem:[%s20412_s3 + $0x244] ss:$40 sps:$4 sm:$0xff]  }
 0x3ad   :  { %10038 = vmatprep.subr.bf16.mxu1 %v14597_v38  ;;  %v14645_v38 = vld [vmem:[%s20412_s3 + $0x654] ss:$40 sps:$4 sm:$0xff]  }
 0x3af   :  { %9992 = vmatpush2.bf16.msra.mxu0 %v14592_v14  ;;  %v14640_v14 = vld [vmem:[%s20412_s3 + $0x240] ss:$40 sps:$4 sm:$0xff]  }
 0x3b0   :  { %10039 = vmatpush2.bf16.msra.mxu1 %v14595_v18  ;;  %9993 = vmatprep.subr.bf16.mxu0 %v14600_v43  ;;  %v14643_v18 = vld [vmem:[%s20412_s3 + $0x650] ss:$40 sps:$4 sm:$0xff]   ;;  %v14648_v43 = vld [vmem:[%s20412_s3 + $0x1f4] ss:$40 sps:$4 sm:$0xff]  }
 0x3b1   :  { %10040 = vmatprep.subr.bf16.mxu1 %v14603_v19  ;;  %v14651_v19 = vld [vmem:[%s20412_s3 + $0x604] ss:$40 sps:$4 sm:$0xff]  }
 0x3b3   :  { %9994 = vmatpush2.bf16.msra.mxu0 %v14598_v20  ;;  %v14646_v20 = vld [vmem:[%s20412_s3 + $0x1f0] ss:$40 sps:$4 sm:$0xff]  }
 0x3b4   :  { %10041 = vmatpush2.bf16.msra.mxu1 %v14601_v13  ;;  %9995 = vmatprep.subr.bf16.mxu0 %v14606_v46  ;;  %v14649_v13 = vld [vmem:[%s20412_s3 + $0x600] ss:$40 sps:$4 sm:$0xff]   ;;  %v14654_v46 = vld [vmem:[%s20412_s3 + $0x1a4] ss:$40 sps:$4 sm:$0xff]  }
 0x3b5   :  { %10042 = vmatprep.subr.bf16.mxu1 %v14609_v24  ;;  %v14657_v24 = vld [vmem:[%s20412_s3 + $0x5b4] ss:$40 sps:$4 sm:$0xff]  }
 0x3b7   :  { %9996 = vmatpush2.bf16.msra.mxu0 %v14604_v44  ;;  %v14652_v44 = vld [vmem:[%s20412_s3 + $0x1a0] ss:$40 sps:$4 sm:$0xff]  }
 0x3b8   :  { %10043 = vmatpush2.bf16.msra.mxu1 %v14607_v51  ;;  %9997 = vmatprep.subr.bf16.mxu0 %v14612_v58  ;;  %v14655_v51 = vld [vmem:[%s20412_s3 + $0x5b0] ss:$40 sps:$4 sm:$0xff]   ;;  %v14660_v58 = vld [vmem:[%s20412_s3 + $0x154] ss:$40 sps:$4 sm:$0xff]  }
 0x3b9   :  { %10044 = vmatprep.subr.bf16.mxu1 %v14615_v25  ;;  %v14663_v25 = vld [vmem:[%s20412_s3 + $0x564] ss:$40 sps:$4 sm:$0xff]  }
 0x3bb   :  { %9998 = vmatpush2.bf16.msra.mxu0 %v14610_v48  ;;  %v14658_v48 = vld [vmem:[%s20412_s3 + $0x150] ss:$40 sps:$4 sm:$0xff]  }
 0x3bc   :  { %10045 = vmatpush2.bf16.msra.mxu1 %v14613_v60  ;;  %9999 = vmatprep.subr.bf16.mxu0 %v14618_v26  ;;  %v14661_v60 = vld [vmem:[%s20412_s3 + $0x560] ss:$40 sps:$4 sm:$0xff]   ;;  %v14666_v26 = vld [vmem:[%s20412_s3 + $0x104] ss:$40 sps:$4 sm:$0xff]  }
 0x3bd   :  { %10046 = vmatprep.subr.bf16.mxu1 %v14621_v27  ;;  %v14669_v27 = vld [vmem:[%s20412_s3 + $0x514] ss:$40 sps:$4 sm:$0xff]  }
 0x3bf   :  { %10000 = vmatpush2.bf16.msra.mxu0 %v14616_v55  ;;  %v14664_v55 = vld [vmem:[%s20412_s3 + $0x100] ss:$40 sps:$4 sm:$0xff]  }
 0x3c0   :  { %10047 = vmatpush2.bf16.msra.mxu1 %v14619_v59  ;;  %10001 = vmatprep.subr.bf16.mxu0 %v14624_v34  ;;  %v14667_v59 = vld [vmem:[%s20412_s3 + $0x510] ss:$40 sps:$4 sm:$0xff]   ;;  %v14672_v34 = vld [vmem:[%s20412_s3 + $0xb4] ss:$40 sps:$4 sm:$0xff]  }
 0x3c1   :  { %10098 = vmatprep.subr.bf16.mxu1 %v14627_v39  ;;  %v14675_v39 = vld [vmem:[%s20412_s3 + $0x9c4] ss:$40 sps:$4 sm:$0xff]  }
 0x3c2   :  { %v9763_v52 = vpop.f32.mrf.mxu0 }
 0x3c3   :  { %v9764_v54 = vadd.f32 %v9763_v52, %v18412_v11  ;;  %v9804_v0 = vpop.f32.mrf.mxu1  ;;  %10002 = vmatpush2.bf16.msra.mxu0 %v14622_v63  ;;  %10049 = vmatmul.mubr.bf16.vlgmr.msra.gmra.mxu1 %v18225_v10  ;;  %v14636_v11 = vld [vmem:[%s20412_s3 + $0x118c] ss:$40 sps:$4 sm:$0xff]   ;;  %v14670_v63 = vld [vmem:[%s20412_s3 + $0xb0] ss:$40 sps:$4 sm:$0xff]   ;;  %v14676_v52 = vld [vmem:[%s20412_s3 + $0x60] ss:$40 sps:$4 sm:$0xff]  }
 0x3c4   :  { %10099 = vmatpush1.bf16.msra.mxu1 %v14625_v45  ;;  %10130 = vmatprep.mubr.bf16.mxu1 %v17571_v15  ;;  %v9765_v61 = vpop.f32.mrf.mxu0  ;;  %v14673_v45 = vld [vmem:[%s20412_s3 + $0x9c0] ss:$40 sps:$4 sm:$0xff]  }
 0x3c5   :  { %v18613_v1 = vadd.f32 %v9804_v0, %v9764_v54  ;;  %v9766_v2 = vadd.f32 %v9765_v61, %v18423_v17  ;;  %v9806_v36 = vpop.f32.mrf.mxu1  ;;  %10003 = vmatprep.subr.bf16.mxu0 %v14630_v49  ;;  %10100 = vmatprep.subr.bf16.mxu1 %v14633_v50  ;;  %v14637_v17 = vld [vmem:[%s20412_s3 + $0x6a0] ss:$40 sps:$4 sm:$0xff]   ;;  %v14678_v49 = vld [vmem:[%s20412_s3 + $0x64] ss:$40 sps:$4 sm:$0xff]   ;;  %v14681_v50 = vld [vmem:[%s20412_s3 + $0x974] ss:$40 sps:$4 sm:$0xff]  }
 0x3c6   :  { %v9767_v4 = vpop.f32.mrf.mxu0  ;;  %v14679_v54 = vld [vmem:[%s20412_s3 + $0x970] ss:$40 sps:$4 sm:$0xff]   ;;  %v14684_v0 = vld [vmem:[%s20412_s3 + $0x14] ss:$40 sps:$4 sm:$0xff]  }
 0x3c7   :  { %v18619_v16 = vadd.f32 %v9806_v36, %v9766_v2  ;;  %v9808_v5 = vpop.f32.mrf.mxu1  ;;  %10004 = vmatpush2.bf16.msra.mxu0 %v14628_v47  ;;  %v14687_v47 = vld [vmem:[%s20412_s3 + $0x924] ss:$40 sps:$4 sm:$0xff]   ;;  %v14682_v61 = vld [vmem:[%s20412_s3 + $0x10] ss:$40 sps:$4 sm:$0xff]   ;;  %v14693_v2 = vld [vmem:[%s20412_s3 + $0x8d4] ss:$40 sps:$4 sm:$0xff]  }
 0x3c8   :  { %10101 = vmatpush1.bf16.msra.mxu1 %v14631_v21  ;;  %v9768_v9 = vpop.f32.mrf.mxu0  ;;  %10005 = vmatprep.subr.bf16.mxu0 %v14636_v11  ;;  %v14685_v21 = vld [vmem:[%s20412_s3 + $0x920] ss:$40 sps:$4 sm:$0xff]   ;;  %v14690_v11 = vld [vmem:[%s20412_s3 + $0x4c4] ss:$40 sps:$4 sm:$0xff]   ;;  %v14696_v4 = vld [vmem:[%s20412_s3 + $0x474] ss:$40 sps:$4 sm:$0xff]  }
 0x3c9   :  { %v9809_v28 = vpop.f32.mrf.mxu1  ;;  %10102 = vmatprep.subr.bf16.mxu1 %v14639_v3  ;;  %v14688_v36 = vld [vmem:[%s20412_s3 + $0x4c0] ss:$40 sps:$4 sm:$0xff]   ;;  %v14691_v3 = vld [vmem:[%s20412_s3 + $0x8d0] ss:$40 sps:$4 sm:$0xff]   ;;  %v14699_v5 = vld [vmem:[%s20412_s3 + $0x884] ss:$40 sps:$4 sm:$0xff]  }
 0x3ca   :  { %v14697_v9 = vld [vmem:[%s20412_s3 + $0x880] ss:$40 sps:$4 sm:$0xff]  }
 0x3cb   :  { %10006 = vmatpush2.bf16.msra.mxu0 %v14634_v8  ;;  %v14694_v8 = vld [vmem:[%s20412_s3 + $0x470] ss:$40 sps:$4 sm:$0xff]   ;;  %v14700_v28 = vld [vmem:[%s20412_s3 + $0x420] ss:$40 sps:$4 sm:$0xff]  }
 0x3cc   :  { %10103 = vmatpush1.bf16.msra.mxu1 %v14637_v17  ;;  %10057 = vmatprep.subr.bf16.mxu0 %v14642_v42  ;;  %v14702_v17 = vld [vmem:[%s20412_s3 + $0x424] ss:$40 sps:$4 sm:$0xff]   ;;  %v14705_v42 = vld [vmem:[%s20412_s3 + $0x834] ss:$40 sps:$4 sm:$0xff]  }
 0x3cd   :  { %10104 = vmatprep.subr.bf16.mxu1 %v14645_v38  ;;  %v14703_v38 = vld [vmem:[%s20412_s3 + $0x830] ss:$40 sps:$4 sm:$0xff]  }
 0x3ce   :  { %10008 = vmatmul.mubr.bf16.vlgmr.msra.gmra.mxu0 %v17989_v31 }
 0x3cf   :  { %10058 = vmatpush1.bf16.msra.mxu0 %v14640_v14  ;;  %10089 = vmatprep.mubr.bf16.mxu0 %v17566_v12  ;;  %v14708_v14 = vld [vmem:[%s20412_s3 + $0x3d4] ss:$40 sps:$4 sm:$0xff]  }
 0x3d0   :  { %10105 = vmatpush1.bf16.msra.mxu1 %v14643_v18  ;;  %10059 = vmatprep.subr.bf16.mxu0 %v14648_v43  ;;  %v14711_v18 = vld [vmem:[%s20412_s3 + $0x7e4] ss:$40 sps:$4 sm:$0xff]   ;;  %v14706_v43 = vld [vmem:[%s20412_s3 + $0x3d0] ss:$40 sps:$4 sm:$0xff]  }
 0x3d1   :  { %10106 = vmatprep.subr.bf16.mxu1 %v14651_v19  ;;  %v14709_v19 = vld [vmem:[%s20412_s3 + $0x7e0] ss:$40 sps:$4 sm:$0xff]  }
 0x3d3   :  { %10060 = vmatpush1.bf16.msra.mxu0 %v14646_v20  ;;  %v14714_v20 = vld [vmem:[%s20412_s3 + $0x384] ss:$40 sps:$4 sm:$0xff]  }
 0x3d4   :  { %10107 = vmatpush1.bf16.msra.mxu1 %v14649_v13  ;;  %10061 = vmatprep.subr.bf16.mxu0 %v14654_v46  ;;  %v14717_v13 = vld [vmem:[%s20412_s3 + $0x794] ss:$40 sps:$4 sm:$0xff]   ;;  %v14712_v46 = vld [vmem:[%s20412_s3 + $0x380] ss:$40 sps:$4 sm:$0xff]  }
 0x3d5   :  { %10108 = vmatprep.subr.bf16.mxu1 %v14657_v24  ;;  %v14715_v24 = vld [vmem:[%s20412_s3 + $0x790] ss:$40 sps:$4 sm:$0xff]  }
 0x3d7   :  { %10062 = vmatpush1.bf16.msra.mxu0 %v14652_v44  ;;  %v14720_v44 = vld [vmem:[%s20412_s3 + $0x334] ss:$40 sps:$4 sm:$0xff]  }
 0x3d8   :  { %10109 = vmatpush1.bf16.msra.mxu1 %v14655_v51  ;;  %10063 = vmatprep.subr.bf16.mxu0 %v14660_v58  ;;  %v14723_v51 = vld [vmem:[%s20412_s3 + $0x1144] ss:$40 sps:$4 sm:$0xff]   ;;  %v14718_v58 = vld [vmem:[%s20412_s3 + $0x330] ss:$40 sps:$4 sm:$0xff]  }
 0x3d9   :  { %10110 = vmatprep.subr.bf16.mxu1 %v14663_v25  ;;  %v14721_v25 = vld [vmem:[%s20412_s3 + $0x1140] ss:$40 sps:$4 sm:$0xff]  }
 0x3db   :  { %10064 = vmatpush1.bf16.msra.mxu0 %v14658_v48  ;;  %v14726_v48 = vld [vmem:[%s20412_s3 + $0x2e4] ss:$40 sps:$4 sm:$0xff]  }
 0x3dc   :  { %10111 = vmatpush1.bf16.msra.mxu1 %v14661_v60  ;;  %10065 = vmatprep.subr.bf16.mxu0 %v14666_v26  ;;  %v14729_v60 = vld [vmem:[%s20412_s3 + $0x10f4] ss:$40 sps:$4 sm:$0xff]  }
 0x3dd   :  { %10112 = vmatprep.subr.bf16.mxu1 %v14669_v27  ;;  %v14724_v27 = vld [vmem:[%s20412_s3 + $0x2e0] ss:$40 sps:$4 sm:$0xff]  }
 0x3df   :  { %10066 = vmatpush1.bf16.msra.mxu0 %v14664_v55  ;;  %v14727_v55 = vld [vmem:[%s20412_s3 + $0x10f0] ss:$40 sps:$4 sm:$0xff]  }
 0x3e0   :  { %10113 = vmatpush1.bf16.msra.mxu1 %v14667_v59  ;;  %10067 = vmatprep.subr.bf16.mxu0 %v14672_v34  ;;  %v14732_v59 = vld [vmem:[%s20412_s3 + $0x294] ss:$40 sps:$4 sm:$0xff]  }
 0x3e1   :  { %10114 = vmatprep.subr.bf16.mxu1 %v14675_v39  ;;  %v14735_v39 = vld [vmem:[%s20412_s3 + $0x10a4] ss:$40 sps:$4 sm:$0xff]  }
 0x3e3   :  { %10068 = vmatpush1.bf16.msra.mxu0 %v14670_v63 }
 0x3e4   :  { %10115 = vmatpush2.bf16.msra.mxu1 %v14673_v45  ;;  %10069 = vmatprep.subr.bf16.mxu0 %v14678_v49  ;;  %v14730_v45 = vld [vmem:[%s20412_s3 + $0x290] ss:$40 sps:$4 sm:$0xff]   ;;  %v14733_v49 = vld [vmem:[%s20412_s3 + $0x10a0] ss:$40 sps:$4 sm:$0xff]  }
 0x3e5   :  { %10116 = vmatprep.subr.bf16.mxu1 %v14681_v50  ;;  %v14738_v50 = vld [vmem:[%s20412_s3 + $0xc44] ss:$40 sps:$4 sm:$0xff]  }
 0x3e7   :  { %10070 = vmatpush1.bf16.msra.mxu0 %v14676_v52 }
 0x3e8   :  { %10117 = vmatpush2.bf16.msra.mxu1 %v14679_v54  ;;  %10071 = vmatprep.subr.bf16.mxu0 %v14684_v0  ;;  %v14741_v54 = vld [vmem:[%s20412_s3 + $0x1054] ss:$40 sps:$4 sm:$0xff]   ;;  %v14736_v0 = vld [vmem:[%s20412_s3 + $0xc40] ss:$40 sps:$4 sm:$0xff]  }
 0x3e9   :  { %10118 = vmatprep.subr.bf16.mxu1 %v14687_v47  ;;  %v14739_v47 = vld [vmem:[%s20412_s3 + $0x1050] ss:$40 sps:$4 sm:$0xff]  }
 0x3eb   :  { %10072 = vmatpush1.bf16.msra.mxu0 %v14682_v61  ;;  %v14744_v61 = vld [vmem:[%s20412_s3 + $0xbf4] ss:$40 sps:$4 sm:$0xff]  }
 0x3ec   :  { %10119 = vmatpush2.bf16.msra.mxu1 %v14685_v21  ;;  %10073 = vmatprep.subr.bf16.mxu0 %v14690_v11  ;;  %v14747_v21 = vld [vmem:[%s20412_s3 + $0x1004] ss:$40 sps:$4 sm:$0xff]  }
 0x3ed   :  { %10120 = vmatprep.subr.bf16.mxu1 %v14693_v2 }
 0x3ef   :  { %10074 = vmatpush2.bf16.msra.mxu0 %v14688_v36  ;;  %v14742_v36 = vld [vmem:[%s20412_s3 + $0xbf0] ss:$40 sps:$4 sm:$0xff]  }
 0x3f0   :  { %10121 = vmatpush2.bf16.msra.mxu1 %v14691_v3  ;;  %10075 = vmatprep.subr.bf16.mxu0 %v14696_v4  ;;  %v14745_v4 = vld [vmem:[%s20412_s3 + $0x1000] ss:$40 sps:$4 sm:$0xff]  }
 0x3f1   :  { %10122 = vmatprep.subr.bf16.mxu1 %v14699_v5  ;;  %v14750_v5 = vld [vmem:[%s20412_s3 + $0xba4] ss:$40 sps:$4 sm:$0xff]  }
 0x3f3   :  { %10076 = vmatpush2.bf16.msra.mxu0 %v14694_v8  ;;  %v14753_v8 = vld [vmem:[%s20412_s3 + $0xfb4] ss:$40 sps:$4 sm:$0xff]  }
 0x3f4   :  { %10123 = vmatpush2.bf16.msra.mxu1 %v14697_v9  ;;  %10077 = vmatprep.subr.bf16.mxu0 %v14702_v17  ;;  %v14748_v17 = vld [vmem:[%s20412_s3 + $0xba0] ss:$40 sps:$4 sm:$0xff]  }
 0x3f5   :  { %10124 = vmatprep.subr.bf16.mxu1 %v14705_v42 }
 0x3f7   :  { %10078 = vmatpush2.bf16.msra.mxu0 %v14700_v28  ;;  %v14751_v28 = vld [vmem:[%s20412_s3 + $0xfb0] ss:$40 sps:$4 sm:$0xff]  }
 0x3f8   :  { %10125 = vmatpush2.bf16.msra.mxu1 %v14703_v38  ;;  %10079 = vmatprep.subr.bf16.mxu0 %v14708_v14  ;;  %v14759_v38 = vld [vmem:[%s20412_s3 + $0xf64] ss:$40 sps:$4 sm:$0xff]   ;;  %v14754_v14 = vld [vmem:[%s20412_s3 + $0xb50] ss:$40 sps:$4 sm:$0xff]  }
 0x3f9   :  { %10126 = vmatprep.subr.bf16.mxu1 %v14711_v18  ;;  %v14757_v18 = vld [vmem:[%s20412_s3 + $0xf60] ss:$40 sps:$4 sm:$0xff]  }
 0x3fb   :  { %10080 = vmatpush2.bf16.msra.mxu0 %v14706_v43  ;;  %v14762_v43 = vld [vmem:[%s20412_s3 + $0xb04] ss:$40 sps:$4 sm:$0xff]  }
 0x3fc   :  { %10127 = vmatpush2.bf16.msra.mxu1 %v14709_v19  ;;  %10081 = vmatprep.subr.bf16.mxu0 %v14714_v20  ;;  %v14765_v19 = vld [vmem:[%s20412_s3 + $0xf14] ss:$40 sps:$4 sm:$0xff]   ;;  %v14760_v20 = vld [vmem:[%s20412_s3 + $0xb00] ss:$40 sps:$4 sm:$0xff]  }
 0x3fd   :  { %10128 = vmatprep.subr.bf16.mxu1 %v14717_v13  ;;  %v14763_v13 = vld [vmem:[%s20412_s3 + $0xf10] ss:$40 sps:$4 sm:$0xff]  }
 0x3ff   :  { %10082 = vmatpush2.bf16.msra.mxu0 %v14712_v46  ;;  %v14768_v46 = vld [vmem:[%s20412_s3 + $0xab4] ss:$40 sps:$4 sm:$0xff]  }
 0x400   :  { %10129 = vmatpush2.bf16.msra.mxu1 %v14715_v24  ;;  %10083 = vmatprep.subr.bf16.mxu0 %v14720_v44  ;;  %v14771_v24 = vld [vmem:[%s20412_s3 + $0x13c4] ss:$40 sps:$4 sm:$0xff]   ;;  %v14766_v44 = vld [vmem:[%s20412_s3 + $0xab0] ss:$40 sps:$4 sm:$0xff]  }
 0x401   :  { %10180 = vmatprep.subr.bf16.mxu1 %v14723_v51  ;;  %v14769_v51 = vld [vmem:[%s20412_s3 + $0x13c0] ss:$40 sps:$4 sm:$0xff]  }
 0x403   :  { %v18803_v26 = vpop.f32.mrf.mxu1  ;;  %10084 = vmatpush2.bf16.msra.mxu0 %v14718_v58  ;;  %10131 = vmatmul.mubr.bf16.vlgmr.msra.gmra.mxu1 %v17782_v62  ;;  %v14774_v58 = vld [vmem:[%s20412_s3 + $0xa64] ss:$40 sps:$4 sm:$0xff]  }
 0x404   :  { %10181 = vmatpush1.bf16.msra.mxu1 %v14721_v25  ;;  %10212 = vmatprep.mubr.bf16.mxu1 %v17824_v22  ;;  %v14777_v25 = vld [vmem:[%s20412_s3 + $0x1374] ss:$40 sps:$4 sm:$0xff]  }
 0x405   :  { %v18816_v34 = vpop.f32.mrf.mxu1  ;;  %10085 = vmatprep.subr.bf16.mxu0 %v14726_v48  ;;  %10182 = vmatprep.subr.bf16.mxu1 %v14729_v60  ;;  %v14772_v48 = vld [vmem:[%s20412_s3 + $0xa60] ss:$40 sps:$4 sm:$0xff]   ;;  %v14775_v60 = vld [vmem:[%s20412_s3 + $0x1370] ss:$40 sps:$4 sm:$0xff]  }
 0x407   :  { %v9890_v63 = vpop.f32.mrf.mxu1  ;;  %10086 = vmatpush2.bf16.msra.mxu0 %v14724_v27  ;;  %v14780_v27 = vld [vmem:[%s20412_s3 + $0xa14] ss:$40 sps:$4 sm:$0xff]  }
 0x408   :  { %10183 = vmatpush1.bf16.msra.mxu1 %v14727_v55  ;;  %10087 = vmatprep.subr.bf16.mxu0 %v14732_v59  ;;  %v14783_v55 = vld [vmem:[%s20412_s3 + $0x1324] ss:$40 sps:$4 sm:$0xff]   ;;  %v14778_v59 = vld [vmem:[%s20412_s3 + $0xa10] ss:$40 sps:$4 sm:$0xff]  }
 0x409   :  { %v9891_v52 = vpop.f32.mrf.mxu1  ;;  %10184 = vmatprep.subr.bf16.mxu1 %v14735_v39  ;;  %v14781_v39 = vld [vmem:[%s20412_s3 + $0x1320] ss:$40 sps:$4 sm:$0xff]   ;;  %v14786_v63 = vld [vmem:[%s20412_s3 + $0xec4] ss:$40 sps:$4 sm:$0xff]  }
 0x40a   :  { %v14792_v52 = vld [vmem:[%s20412_s3 + $0xe74] ss:$40 sps:$4 sm:$0xff]  }
 0x40b   :  { %10088 = vmatpush2.bf16.msra.mxu0 %v14730_v45  ;;  %v14789_v45 = vld [vmem:[%s20412_s3 + $0x12d4] ss:$40 sps:$4 sm:$0xff]  }
 0x40c   :  { %10185 = vmatpush1.bf16.msra.mxu1 %v14733_v49  ;;  %10139 = vmatprep.subr.bf16.mxu0 %v14738_v50  ;;  %v14784_v49 = vld [vmem:[%s20412_s3 + $0xec0] ss:$40 sps:$4 sm:$0xff]   ;;  %v14787_v50 = vld [vmem:[%s20412_s3 + $0x12d0] ss:$40 sps:$4 sm:$0xff]  }
 0x40d   :  { %10186 = vmatprep.subr.bf16.mxu1 %v14741_v54  ;;  %v14795_v54 = vld [vmem:[%s20412_s3 + $0x1284] ss:$40 sps:$4 sm:$0xff]  }
 0x40e   :  { %10090 = vmatmul.mubr.bf16.vlgmr.msra.gmra.mxu0 %v17774_v6  ;;  %v9845_v11 = vpop.f32.mrf.mxu0 }
 0x40f   :  { %v18847_v2 = vadd.f32 %v9845_v11, %v18613_v1  ;;  %10140 = vmatpush1.bf16.msra.mxu0 %v14736_v0  ;;  %10171 = vmatprep.mubr.bf16.mxu0 %v17787_v57  ;;  %v14790_v0 = vld [vmem:[%s20412_s3 + $0xe70] ss:$40 sps:$4 sm:$0xff]   ;;  %v14796_v11 = vld [vmem:[%s20412_s3 + $0xe20] ss:$40 sps:$4 sm:$0xff]  }
 0x410   :  { %10187 = vmatpush1.bf16.msra.mxu1 %v14739_v47  ;;  %v9847_v3 = vpop.f32.mrf.mxu0  ;;  %10141 = vmatprep.subr.bf16.mxu0 %v14744_v61  ;;  %v14793_v47 = vld [vmem:[%s20412_s3 + $0x1280] ss:$40 sps:$4 sm:$0xff]   ;;  %v14798_v61 = vld [vmem:[%s20412_s3 + $0xe24] ss:$40 sps:$4 sm:$0xff]  }
 0x411   :  { %v18860_v1 = vadd.f32 %v9847_v3, %v18619_v16  ;;  %10188 = vmatprep.subr.bf16.mxu1 %v14747_v21  ;;  %v14756_v16 = vld [vmem:[%s20412_s3 + $0xb54] ss:$40 sps:$4 sm:$0xff]  }
 0x412   :  { %v9849_v9 = vpop.f32.mrf.mxu0  ;;  %v14801_v21 = vld [vmem:[%s20412_s3 + $0x1234] ss:$40 sps:$4 sm:$0xff]  }
 0x413   :  { %10142 = vmatpush1.bf16.msra.mxu0 %v14742_v36  ;;  %v14799_v36 = vld [vmem:[%s20412_s3 + $0x1230] ss:$40 sps:$4 sm:$0xff]   ;;  %v14804_v3 = vld [vmem:[%s20412_s3 + $0xdd4] ss:$40 sps:$4 sm:$0xff]   ;;  %v14810_v9 = vld [vmem:[%s20412_s3 + $0xd84] ss:$40 sps:$4 sm:$0xff]  }
 0x414   :  { %10189 = vmatpush1.bf16.msra.mxu1 %v14745_v4  ;;  %v9850_v42 = vpop.f32.mrf.mxu0  ;;  %10143 = vmatprep.subr.bf16.mxu0 %v14750_v5  ;;  %v14807_v4 = vld [vmem:[%s20412_s3 + $0x11e4] ss:$40 sps:$4 sm:$0xff]   ;;  %v14802_v5 = vld [vmem:[%s20412_s3 + $0xdd0] ss:$40 sps:$4 sm:$0xff]  }
 0x415   :  { %10190 = vmatprep.subr.bf16.mxu1 %v14753_v8  ;;  %v14805_v8 = vld [vmem:[%s20412_s3 + $0x11e0] ss:$40 sps:$4 sm:$0xff]  }
 0x416   :  { %v14808_v42 = vld [vmem:[%s20412_s3 + $0xd80] ss:$40 sps:$4 sm:$0xff]  }
 0x417   :  { %10144 = vmatpush1.bf16.msra.mxu0 %v14748_v17  ;;  %v14813_v17 = vld [vmem:[%s20412_s3 + $0x1194] ss:$40 sps:$4 sm:$0xff]  }
 0x418   :  { %10191 = vmatpush1.bf16.msra.mxu1 %v14751_v28  ;;  %10145 = vmatprep.subr.bf16.mxu0 %v14756_v16  ;;  %v14811_v28 = vld [vmem:[%s20412_s3 + $0x1190] ss:$40 sps:$4 sm:$0xff]   ;;  %v14816_v16 = vld [vmem:[%s20412_s3 + $0xd34] ss:$40 sps:$4 sm:$0xff]  }
 0x419   :  { %10192 = vmatprep.subr.bf16.mxu1 %v14759_v38  ;;  %v14819_v38 = vld [vmem:[%s20412_s3 + $0x24c] ss:$40 sps:$4 sm:$0xff]  }
 0x41b   :  { %10146 = vmatpush1.bf16.msra.mxu0 %v14754_v14  ;;  %v14814_v14 = vld [vmem:[%s20412_s3 + $0xd30] ss:$40 sps:$4 sm:$0xff]  }
 0x41c   :  { %10193 = vmatpush1.bf16.msra.mxu1 %v14757_v18  ;;  %10147 = vmatprep.subr.bf16.mxu0 %v14762_v43  ;;  %v14817_v18 = vld [vmem:[%s20412_s3 + $0x248] ss:$40 sps:$4 sm:$0xff]   ;;  %v14822_v43 = vld [vmem:[%s20412_s3 + $0xce4] ss:$40 sps:$4 sm:$0xff]  }
 0x41d   :  { %10194 = vmatprep.subr.bf16.mxu1 %v14765_v19  ;;  %v14825_v19 = vld [vmem:[%s20412_s3 + $0x1fc] ss:$40 sps:$4 sm:$0xff]  }
 0x41f   :  { %10148 = vmatpush1.bf16.msra.mxu0 %v14760_v20 }
 0x420   :  { %10195 = vmatpush1.bf16.msra.mxu1 %v14763_v13  ;;  %10149 = vmatprep.subr.bf16.mxu0 %v14768_v46  ;;  %v14820_v13 = vld [vmem:[%s20412_s3 + $0xce0] ss:$40 sps:$4 sm:$0xff]  }
 0x421   :  { %10196 = vmatprep.subr.bf16.mxu1 %v14771_v24  ;;  %v14823_v46 = vld [vmem:[%s20412_s3 + $0x1f8] ss:$40 sps:$4 sm:$0xff]   ;;  %v14828_v24 = vld [vmem:[%s20412_s3 + $0xc94] ss:$40 sps:$4 sm:$0xff]  }
 0x423   :  { %10150 = vmatpush1.bf16.msra.mxu0 %v14766_v44 }
 0x424   :  { %10197 = vmatpush2.bf16.msra.mxu1 %v14769_v51  ;;  %10151 = vmatprep.subr.bf16.mxu0 %v14774_v58  ;;  %v14831_v51 = vld [vmem:[%s20412_s3 + $0x1ac] ss:$40 sps:$4 sm:$0xff]  }
 0x425   :  { %10198 = vmatprep.subr.bf16.mxu1 %v14777_v25  ;;  %v14826_v25 = vld [vmem:[%s20412_s3 + $0xc90] ss:$40 sps:$4 sm:$0xff]  }
 0x427   :  { %10152 = vmatpush1.bf16.msra.mxu0 %v14772_v48  ;;  %v14829_v48 = vld [vmem:[%s20412_s3 + $0x1a8] ss:$40 sps:$4 sm:$0xff]  }
 0x428   :  { %10199 = vmatpush2.bf16.msra.mxu1 %v14775_v60  ;;  %10153 = vmatprep.subr.bf16.mxu0 %v14780_v27  ;;  %v14834_v60 = vld [vmem:[%s20412_s3 + $0x1644] ss:$40 sps:$4 sm:$0xff]   ;;  %v5608_v27 = vrot.slane %v18380_v7, %v685_v32  ;;  %v14835_v32 = vld [vmem:[%s20412_s3 + $0x158] ss:$40 sps:$4 sm:$0xff]  }
 0x429   :  { %10200 = vmatprep.subr.bf16.mxu1 %v14783_v55 }
 0x42b   :  { %10154 = vmatpush1.bf16.msra.mxu0 %v14778_v59  ;;  %v14837_v59 = vld [vmem:[%s20412_s3 + $0x15c] ss:$40 sps:$4 sm:$0xff]  }
 0x42c   :  { %10201 = vmatpush2.bf16.msra.mxu1 %v14781_v39  ;;  %10155 = vmatprep.subr.bf16.mxu0 %v14786_v63  ;;  %v5612_v39 = vrot.slane %v18380_v7, %v689_v41  ;;  %v14832_v63 = vld [vmem:[%s20412_s3 + $0x1640] ss:$40 sps:$4 sm:$0xff]   ;;  %v14843_v41 = vld [vmem:[%s20412_s3 + $0x10c] ss:$40 sps:$4 sm:$0xff]  }
 0x42d   :  { %10202 = vmatprep.subr.bf16.mxu1 %v14789_v45  ;;  %v14840_v45 = vld [vmem:[%s20412_s3 + $0x15f4] ss:$40 sps:$4 sm:$0xff]  }
 0x42f   :  { %10156 = vmatpush2.bf16.msra.mxu0 %v14784_v49  ;;  %v9887_v49 = vadd.f32 %v18803_v26, %v5608_v27  ;;  %v14841_v26 = vld [vmem:[%s20412_s3 + $0x108] ss:$40 sps:$4 sm:$0xff]   ;;  %v14885_v27 = vld [vmem:[%s20412_s3 + $0x3dc] ss:$40 sps:$4 sm:$0xff]  }
 0x430   :  { %10203 = vmatpush2.bf16.msra.mxu1 %v14787_v50  ;;  %10157 = vmatprep.subr.bf16.mxu0 %v14792_v52  ;;  %v9889_v50 = vadd.f32 %v18816_v34, %v5612_v39  ;;  %v14888_v39 = vld [vmem:[%s20412_s3 + $0x1874] ss:$40 sps:$4 sm:$0xff]  }
 0x431   :  { %10204 = vmatprep.subr.bf16.mxu1 %v14795_v54  ;;  %v14838_v54 = vld [vmem:[%s20412_s3 + $0x15f0] ss:$40 sps:$4 sm:$0xff]  }
 0x433   :  { %10158 = vmatpush2.bf16.msra.mxu0 %v14790_v0 }
 0x434   :  { %10205 = vmatpush2.bf16.msra.mxu1 %v14793_v47  ;;  %10159 = vmatprep.subr.bf16.mxu0 %v14798_v61  ;;  %v14846_v47 = vld [vmem:[%s20412_s3 + $0x15a4] ss:$40 sps:$4 sm:$0xff]  }
 0x435   :  { %10206 = vmatprep.subr.bf16.mxu1 %v14801_v21  ;;  %v14849_v61 = vld [vmem:[%s20412_s3 + $0xbc] ss:$40 sps:$4 sm:$0xff]  }
 0x437   :  { %10160 = vmatpush2.bf16.msra.mxu0 %v14796_v11 }
 0x438   :  { %10207 = vmatpush2.bf16.msra.mxu1 %v14799_v36  ;;  %10161 = vmatprep.subr.bf16.mxu0 %v14804_v3  ;;  %v14844_v36 = vld [vmem:[%s20412_s3 + $0x15a0] ss:$40 sps:$4 sm:$0xff]  }
 0x439   :  { %10208 = vmatprep.subr.bf16.mxu1 %v14807_v4 }
 0x43b   :  { %10162 = vmatpush2.bf16.msra.mxu0 %v14802_v5  ;;  %v14847_v5 = vld [vmem:[%s20412_s3 + $0xb8] ss:$40 sps:$4 sm:$0xff]  }
 0x43c   :  { %10209 = vmatpush2.bf16.msra.mxu1 %v14805_v8  ;;  %10163 = vmatprep.subr.bf16.mxu0 %v14810_v9  ;;  %v14852_v8 = vld [vmem:[%s20412_s3 + $0x1554] ss:$40 sps:$4 sm:$0xff]  }
 0x43d   :  { %10210 = vmatprep.subr.bf16.mxu1 %v14813_v17  ;;  %v14855_v9 = vld [vmem:[%s20412_s3 + $0x6c] ss:$40 sps:$4 sm:$0xff]   ;;  %v14850_v17 = vld [vmem:[%s20412_s3 + $0x1550] ss:$40 sps:$4 sm:$0xff]  }
 0x43f   :  { %10164 = vmatpush2.bf16.msra.mxu0 %v14808_v42  ;;  %v14853_v42 = vld [vmem:[%s20412_s3 + $0x68] ss:$40 sps:$4 sm:$0xff]  }
 0x440   :  { %10211 = vmatpush2.bf16.msra.mxu1 %v14811_v28  ;;  %10165 = vmatprep.subr.bf16.mxu0 %v14816_v16  ;;  %v14858_v28 = vld [vmem:[%s20412_s3 + $0x1504] ss:$40 sps:$4 sm:$0xff]  }
 0x441   :  { %10262 = vmatprep.subr.bf16.mxu1 %v14819_v38  ;;  %v14861_v16 = vld [vmem:[%s20412_s3 + $0x1c] ss:$40 sps:$4 sm:$0xff]   ;;  %v14856_v38 = vld [vmem:[%s20412_s3 + $0x1500] ss:$40 sps:$4 sm:$0xff]  }
 0x443   :  { %v9968_v20 = vpop.f32.mrf.mxu1  ;;  %10166 = vmatpush2.bf16.msra.mxu0 %v14814_v14  ;;  %10213 = vmatmul.mubr.bf16.vlgmr.msra.gmra.mxu1 %v17989_v31  ;;  %v14859_v14 = vld [vmem:[%s20412_s3 + $0x18] ss:$40 sps:$4 sm:$0xff]  }
 0x444   :  { %10263 = vmatpush1.bf16.msra.mxu1 %v14817_v18  ;;  %10294 = vmatprep.mubr.bf16.mxu1 %v17566_v12  ;;  %v14864_v18 = vld [vmem:[%s20412_s3 + $0x14b4] ss:$40 sps:$4 sm:$0xff]  }
 0x445   :  { %v9970_v44 = vpop.f32.mrf.mxu1  ;;  %10167 = vmatprep.subr.bf16.mxu0 %v14822_v43  ;;  %10264 = vmatprep.subr.bf16.mxu1 %v14825_v19  ;;  %v14867_v43 = vld [vmem:[%s20412_s3 + $0x4cc] ss:$40 sps:$4 sm:$0xff]   ;;  %v14862_v19 = vld [vmem:[%s20412_s3 + $0x14b0] ss:$40 sps:$4 sm:$0xff]  }
 0x447   :  { %v9972_v58 = vpop.f32.mrf.mxu1  ;;  %10168 = vmatpush2.bf16.msra.mxu0 %v14820_v13  ;;  %v14870_v13 = vld [vmem:[%s20412_s3 + $0x1464] ss:$40 sps:$4 sm:$0xff]  }
 0x448   :  { %10265 = vmatpush1.bf16.msra.mxu1 %v14823_v46  ;;  %10169 = vmatprep.subr.bf16.mxu0 %v14828_v24  ;;  %v14873_v46 = vld [vmem:[%s20412_s3 + $0x47c] ss:$40 sps:$4 sm:$0xff]   ;;  %v14868_v24 = vld [vmem:[%s20412_s3 + $0x1460] ss:$40 sps:$4 sm:$0xff]   ;;  %v14879_v58 = vld [vmem:[%s20412_s3 + $0x42c] ss:$40 sps:$4 sm:$0xff]  }
 0x449   :  { %v9973_v55 = vpop.f32.mrf.mxu1  ;;  %10266 = vmatprep.subr.bf16.mxu1 %v14831_v51  ;;  %v14876_v51 = vld [vmem:[%s20412_s3 + $0x1414] ss:$40 sps:$4 sm:$0xff]  }
 0x44a   :  { %v14880_v55 = vld [vmem:[%s20412_s3 + $0x18c0] ss:$40 sps:$4 sm:$0xff]  }
 0x44b   :  { %10170 = vmatpush2.bf16.msra.mxu0 %v14826_v25  ;;  %v14874_v25 = vld [vmem:[%s20412_s3 + $0x1410] ss:$40 sps:$4 sm:$0xff]  }
 0x44c   :  { %10267 = vmatpush1.bf16.msra.mxu1 %v14829_v48  ;;  %10221 = vmatprep.subr.bf16.mxu0 %v14834_v60  ;;  %v14877_v48 = vld [vmem:[%s20412_s3 + $0x428] ss:$40 sps:$4 sm:$0xff]   ;;  %v14882_v60 = vld [vmem:[%s20412_s3 + $0x18c4] ss:$40 sps:$4 sm:$0xff]  }
 0x44d   :  { %10268 = vmatprep.subr.bf16.mxu1 %v14837_v59  ;;  %v14883_v59 = vld [vmem:[%s20412_s3 + $0x3d8] ss:$40 sps:$4 sm:$0xff]  }
 0x44e   :  { %v9927_v7 = vpop.f32.mrf.mxu0  ;;  %10172 = vmatmul.mubr.bf16.vlgmr.msra.gmra.mxu0 %v17984_v30 }
 0x44f   :  { %v9928_v52 = vadd.f32 %v9927_v7, %v9887_v49  ;;  %10222 = vmatpush1.bf16.msra.mxu0 %v14832_v63  ;;  %10253 = vmatprep.mubr.bf16.mxu0 %v18223_v23  ;;  %v14891_v63 = vld [vmem:[%s20412_s3 + $0x38c] ss:$40 sps:$4 sm:$0xff]   ;;  %v14892_v7 = vld [vmem:[%s20412_s3 + $0x1820] ss:$40 sps:$4 sm:$0xff]  }
 0x450   :  { %v9929_v0 = vpop.f32.mrf.mxu0  ;;  %10269 = vmatpush1.bf16.msra.mxu1 %v14835_v32  ;;  %10223 = vmatprep.subr.bf16.mxu0 %v14840_v45  ;;  %v14886_v32 = vld [vmem:[%s20412_s3 + $0x1870] ss:$40 sps:$4 sm:$0xff]   ;;  %v14894_v49 = vld [vmem:[%s20412_s3 + $0x1824] ss:$40 sps:$4 sm:$0xff]  }
 0x451   :  { %v9930_v34 = vadd.f32 %v9929_v0, %v9889_v50  ;;  %10270 = vmatprep.subr.bf16.mxu1 %v14843_v41  ;;  %v19069_v21 = vadd.f32 %v9968_v20, %v9928_v52  ;;  %v14865_v20 = vld [vmem:[%s20412_s3 + $0x4c8] ss:$40 sps:$4 sm:$0xff]   ;;  %v14897_v41 = vld [vmem:[%s20412_s3 + $0x33c] ss:$40 sps:$4 sm:$0xff]   ;;  %v14895_v50 = vld [vmem:[%s20412_s3 + $0x338] ss:$40 sps:$4 sm:$0xff]  }
 0x452   :  { %v9931_v11 = vpop.f32.mrf.mxu0  ;;  %v14889_v45 = vld [vmem:[%s20412_s3 + $0x388] ss:$40 sps:$4 sm:$0xff]   ;;  %v14900_v52 = vld [vmem:[%s20412_s3 + $0x17d4] ss:$40 sps:$4 sm:$0xff]  }
 0x453   :  { %10224 = vmatpush1.bf16.msra.mxu0 %v14838_v54  ;;  %v19074_v3 = vadd.f32 %v9970_v44, %v9930_v34  ;;  %v14871_v44 = vld [vmem:[%s20412_s3 + $0x478] ss:$40 sps:$4 sm:$0xff]   ;;  %v14903_v54 = vld [vmem:[%s20412_s3 + $0x2ec] ss:$40 sps:$4 sm:$0xff]   ;;  %v14909_v34 = vld [vmem:[%s20412_s3 + $0x29c] ss:$40 sps:$4 sm:$0xff]  }
 0x454   :  { %v9932_v4 = vpop.f32.mrf.mxu0  ;;  %10271 = vmatpush1.bf16.msra.mxu1 %v14841_v26  ;;  %10225 = vmatprep.subr.bf16.mxu0 %v14846_v47  ;;  %v14898_v0 = vld [vmem:[%s20412_s3 + $0x17d0] ss:$40 sps:$4 sm:$0xff]   ;;  %v14906_v47 = vld [vmem:[%s20412_s3 + $0x1784] ss:$40 sps:$4 sm:$0xff]  }
 0x455   :  { %10272 = vmatprep.subr.bf16.mxu1 %v14849_v61  ;;  %v14901_v26 = vld [vmem:[%s20412_s3 + $0x2e8] ss:$40 sps:$4 sm:$0xff]   ;;  %v14907_v11 = vld [vmem:[%s20412_s3 + $0x298] ss:$40 sps:$4 sm:$0xff]   ;;  %v14915_v4 = vld [vmem:[%s20412_s3 + $0xc4c] ss:$40 sps:$4 sm:$0xff]  }
 0x456   :  { %v14904_v61 = vld [vmem:[%s20412_s3 + $0x1780] ss:$40 sps:$4 sm:$0xff]  }
 0x457   :  { %10226 = vmatpush1.bf16.msra.mxu0 %v14844_v36  ;;  %v14912_v36 = vld [vmem:[%s20412_s3 + $0x1734] ss:$40 sps:$4 sm:$0xff]  }
 0x458   :  { %10273 = vmatpush1.bf16.msra.mxu1 %v14847_v5  ;;  %10227 = vmatprep.subr.bf16.mxu0 %v14852_v8  ;;  %v14910_v5 = vld [vmem:[%s20412_s3 + $0x1730] ss:$40 sps:$4 sm:$0xff]  }
 0x459   :  { %10274 = vmatprep.subr.bf16.mxu1 %v14855_v9  ;;  %v14913_v8 = vld [vmem:[%s20412_s3 + $0xc48] ss:$40 sps:$4 sm:$0xff]   ;;  %v14918_v9 = vld [vmem:[%s20412_s3 + $0x16e4] ss:$40 sps:$4 sm:$0xff]  }
 0x45b   :  { %10228 = vmatpush1.bf16.msra.mxu0 %v14850_v17  ;;  %v14921_v17 = vld [vmem:[%s20412_s3 + $0xbfc] ss:$40 sps:$4 sm:$0xff]  }
 0x45c   :  { %10275 = vmatpush1.bf16.msra.mxu1 %v14853_v42  ;;  %10229 = vmatprep.subr.bf16.mxu0 %v14858_v28  ;;  %v14916_v28 = vld [vmem:[%s20412_s3 + $0x16e0] ss:$40 sps:$4 sm:$0xff]  }
 0x45d   :  { %10276 = vmatprep.subr.bf16.mxu1 %v14861_v16  ;;  %v14919_v16 = vld [vmem:[%s20412_s3 + $0xbf8] ss:$40 sps:$4 sm:$0xff]  }
 0x45f   :  { %10230 = vmatpush1.bf16.msra.mxu0 %v14856_v38  ;;  %v14924_v38 = vld [vmem:[%s20412_s3 + $0x1694] ss:$40 sps:$4 sm:$0xff]  }
 0x460   :  { %10277 = vmatpush1.bf16.msra.mxu1 %v14859_v14  ;;  %10231 = vmatprep.subr.bf16.mxu0 %v14864_v18  ;;  %v14927_v18 = vld [vmem:[%s20412_s3 + $0xbac] ss:$40 sps:$4 sm:$0xff]  }
 0x461   :  { %10278 = vmatprep.subr.bf16.mxu1 %v14867_v43 }
 0x463   :  { %10232 = vmatpush1.bf16.msra.mxu0 %v14862_v19  ;;  %v14922_v19 = vld [vmem:[%s20412_s3 + $0x1690] ss:$40 sps:$4 sm:$0xff]  }
 0x464   :  { %10279 = vmatpush2.bf16.msra.mxu1 %v14865_v20  ;;  %10233 = vmatprep.subr.bf16.mxu0 %v14870_v13  ;;  %v14925_v20 = vld [vmem:[%s20412_s3 + $0xba8] ss:$40 sps:$4 sm:$0xff]   ;;  %v14930_v13 = vld [vmem:[%s20412_s3 + $0x74c] ss:$40 sps:$4 sm:$0xff]  }
 0x465   :  { %10280 = vmatprep.subr.bf16.mxu1 %v14873_v46 }
 0x467   :  { %10234 = vmatpush1.bf16.msra.mxu0 %v14868_v24  ;;  %v14933_v24 = vld [vmem:[%s20412_s3 + $0xb5c] ss:$40 sps:$4 sm:$0xff]  }
 0x468   :  { %10281 = vmatpush2.bf16.msra.mxu1 %v14871_v44  ;;  %10235 = vmatprep.subr.bf16.mxu0 %v14876_v51  ;;  %v14928_v44 = vld [vmem:[%s20412_s3 + $0x748] ss:$40 sps:$4 sm:$0xff]   ;;  %v14931_v51 = vld [vmem:[%s20412_s3 + $0xb58] ss:$40 sps:$4 sm:$0xff]  }
 0x469   :  { %10282 = vmatprep.subr.bf16.mxu1 %v14879_v58  ;;  %v14936_v58 = vld [vmem:[%s20412_s3 + $0x6fc] ss:$40 sps:$4 sm:$0xff]  }
 0x46b   :  { %10236 = vmatpush1.bf16.msra.mxu0 %v14874_v25  ;;  %v14939_v25 = vld [vmem:[%s20412_s3 + $0xb0c] ss:$40 sps:$4 sm:$0xff]  }
 0x46c   :  { %10283 = vmatpush2.bf16.msra.mxu1 %v14877_v48  ;;  %10237 = vmatprep.subr.bf16.mxu0 %v14882_v60 }
 0x46d   :  { %10284 = vmatprep.subr.bf16.mxu1 %v14885_v27  ;;  %v14934_v27 = vld [vmem:[%s20412_s3 + $0x6f8] ss:$40 sps:$4 sm:$0xff]  }
 0x46f   :  { %10238 = vmatpush2.bf16.msra.mxu0 %v14880_v55 }
 0x470   :  { %10285 = vmatpush2.bf16.msra.mxu1 %v14883_v59  ;;  %10239 = vmatprep.subr.bf16.mxu0 %v14888_v39  ;;  %v14937_v59 = vld [vmem:[%s20412_s3 + $0xb08] ss:$40 sps:$4 sm:$0xff]   ;;  %v14942_v39 = vld [vmem:[%s20412_s3 + $0x6ac] ss:$40 sps:$4 sm:$0xff]  }
 0x471   :  { %10286 = vmatprep.subr.bf16.mxu1 %v14891_v63 }
 0x473   :  { %10240 = vmatpush2.bf16.msra.mxu0 %v14886_v32  ;;  %v14945_v32 = vld [vmem:[%s20412_s3 + $0xabc] ss:$40 sps:$4 sm:$0xff]  }
 0x474   :  { %10287 = vmatpush2.bf16.msra.mxu1 %v14889_v45  ;;  %10241 = vmatprep.subr.bf16.mxu0 %v14894_v49 }
 0x475   :  { %10288 = vmatprep.subr.bf16.mxu1 %v14897_v41  ;;  %v14940_v41 = vld [vmem:[%s20412_s3 + $0x6a8] ss:$40 sps:$4 sm:$0xff]  }
 0x477   :  { %10242 = vmatpush2.bf16.msra.mxu0 %v14892_v7 }
 0x478   :  { %10289 = vmatpush2.bf16.msra.mxu1 %v14895_v50  ;;  %10243 = vmatprep.subr.bf16.mxu0 %v14900_v52  ;;  %v14948_v50 = vld [vmem:[%s20412_s3 + $0x65c] ss:$40 sps:$4 sm:$0xff]   ;;  %v14951_v52 = vld [vmem:[%s20412_s3 + $0xa6c] ss:$40 sps:$4 sm:$0xff]  }
 0x479   :  { %10290 = vmatprep.subr.bf16.mxu1 %v14903_v54  ;;  %v14946_v54 = vld [vmem:[%s20412_s3 + $0x658] ss:$40 sps:$4 sm:$0xff]  }
 0x47b   :  { %10244 = vmatpush2.bf16.msra.mxu0 %v14898_v0  ;;  %v14949_v0 = vld [vmem:[%s20412_s3 + $0xa68] ss:$40 sps:$4 sm:$0xff]  }
 0x47c   :  { %10291 = vmatpush2.bf16.msra.mxu1 %v14901_v26  ;;  %10245 = vmatprep.subr.bf16.mxu0 %v14906_v47  ;;  %v14954_v26 = vld [vmem:[%s20412_s3 + $0x60c] ss:$40 sps:$4 sm:$0xff]   ;;  %v14957_v47 = vld [vmem:[%s20412_s3 + $0xa1c] ss:$40 sps:$4 sm:$0xff]  }
 0x47d   :  { %10292 = vmatprep.subr.bf16.mxu1 %v14909_v34  ;;  %v14952_v34 = vld [vmem:[%s20412_s3 + $0x608] ss:$40 sps:$4 sm:$0xff]  }
 0x47f   :  { %10246 = vmatpush2.bf16.msra.mxu0 %v14904_v61  ;;  %v14955_v61 = vld [vmem:[%s20412_s3 + $0xa18] ss:$40 sps:$4 sm:$0xff]  }
 0x480   :  { %10293 = vmatpush2.bf16.msra.mxu1 %v14907_v11  ;;  %10247 = vmatprep.subr.bf16.mxu0 %v14912_v36  ;;  %v14960_v11 = vld [vmem:[%s20412_s3 + $0x5bc] ss:$40 sps:$4 sm:$0xff]   ;;  %v14963_v36 = vld [vmem:[%s20412_s3 + $0xecc] ss:$40 sps:$4 sm:$0xff]  }
 0x481   :  { %10344 = vmatprep.subr.bf16.mxu1 %v14915_v4  ;;  %v14958_v4 = vld [vmem:[%s20412_s3 + $0x5b8] ss:$40 sps:$4 sm:$0xff]  }
 0x483   :  { %v10050_v42 = vpop.f32.mrf.mxu1  ;;  %10248 = vmatpush2.bf16.msra.mxu0 %v14910_v5  ;;  %10295 = vmatmul.mubr.bf16.vlgmr.msra.gmra.mxu1 %v17774_v6  ;;  %v14961_v5 = vld [vmem:[%s20412_s3 + $0xec8] ss:$40 sps:$4 sm:$0xff]  }
 0x484   :  { %10345 = vmatpush1.bf16.msra.mxu1 %v14913_v8  ;;  %10376 = vmatprep.mubr.bf16.mxu1 %v17787_v57  ;;  %v14966_v8 = vld [vmem:[%s20412_s3 + $0x56c] ss:$40 sps:$4 sm:$0xff]  }
 0x485   :  { %v10052_v14 = vpop.f32.mrf.mxu1  ;;  %10249 = vmatprep.subr.bf16.mxu0 %v14918_v9  ;;  %10346 = vmatprep.subr.bf16.mxu1 %v14921_v17  ;;  %v14969_v9 = vld [vmem:[%s20412_s3 + $0xe7c] ss:$40 sps:$4 sm:$0xff]   ;;  %v14964_v17 = vld [vmem:[%s20412_s3 + $0x568] ss:$40 sps:$4 sm:$0xff]  }
 0x487   :  { %v10054_v43 = vpop.f32.mrf.mxu1  ;;  %10250 = vmatpush2.bf16.msra.mxu0 %v14916_v28  ;;  %v14972_v28 = vld [vmem:[%s20412_s3 + $0x51c] ss:$40 sps:$4 sm:$0xff]  }
 0x488   :  { %10347 = vmatpush1.bf16.msra.mxu1 %v14919_v16  ;;  %10251 = vmatprep.subr.bf16.mxu0 %v14924_v38  ;;  %v14975_v16 = vld [vmem:[%s20412_s3 + $0xe2c] ss:$40 sps:$4 sm:$0xff]   ;;  %v14970_v38 = vld [vmem:[%s20412_s3 + $0x518] ss:$40 sps:$4 sm:$0xff]   ;;  %v14981_v43 = vld [vmem:[%s20412_s3 + $0xddc] ss:$40 sps:$4 sm:$0xff]  }
 0x489   :  { %v10055_v46 = vpop.f32.mrf.mxu1  ;;  %10348 = vmatprep.subr.bf16.mxu1 %v14927_v18  ;;  %v14978_v18 = vld [vmem:[%s20412_s3 + $0x9cc] ss:$40 sps:$4 sm:$0xff]  }
 0x48a   :  { %v14987_v46 = vld [vmem:[%s20412_s3 + $0xd8c] ss:$40 sps:$4 sm:$0xff]  }
 0x48b   :  { %10252 = vmatpush2.bf16.msra.mxu0 %v14922_v19  ;;  %v14976_v19 = vld [vmem:[%s20412_s3 + $0x9c8] ss:$40 sps:$4 sm:$0xff]  }
 0x48c   :  { %10349 = vmatpush1.bf16.msra.mxu1 %v14925_v20  ;;  %10303 = vmatprep.subr.bf16.mxu0 %v14930_v13  ;;  %v14979_v20 = vld [vmem:[%s20412_s3 + $0xdd8] ss:$40 sps:$4 sm:$0xff]   ;;  %v14984_v13 = vld [vmem:[%s20412_s3 + $0x97c] ss:$40 sps:$4 sm:$0xff]  }
 0x48d   :  { %10350 = vmatprep.subr.bf16.mxu1 %v14933_v24  ;;  %v14982_v24 = vld [vmem:[%s20412_s3 + $0x978] ss:$40 sps:$4 sm:$0xff]  }
 0x48e   :  { %v10009_v48 = vpop.f32.mrf.mxu0  ;;  %10254 = vmatmul.mubr.bf16.vlgmr.msra.gmra.mxu0 %v18225_v10 }
 0x48f   :  { %v10010_v60 = vadd.f32 %v10009_v48, %v19069_v21  ;;  %10304 = vmatpush1.bf16.msra.mxu0 %v14928_v44  ;;  %10335 = vmatprep.mubr.bf16.mxu0 %v17571_v15  ;;  %v14985_v44 = vld [vmem:[%s20412_s3 + $0xd88] ss:$40 sps:$4 sm:$0xff]   ;;  %v14991_v48 = vld [vmem:[%s20412_s3 + $0xd38] ss:$40 sps:$4 sm:$0xff]  }
 0x490   :  { %v10011_v55 = vpop.f32.mrf.mxu0  ;;  %10351 = vmatpush1.bf16.msra.mxu1 %v14931_v51  ;;  %10305 = vmatprep.subr.bf16.mxu0 %v14936_v58  ;;  %v14990_v51 = vld [vmem:[%s20412_s3 + $0x92c] ss:$40 sps:$4 sm:$0xff]   ;;  %v14993_v58 = vld [vmem:[%s20412_s3 + $0xd3c] ss:$40 sps:$4 sm:$0xff]  }
 0x491   :  { %v19267_v63 = vadd.f32 %v10050_v42, %v10010_v60  ;;  %v10012_v21 = vadd.f32 %v10011_v55, %v19074_v3  ;;  %10352 = vmatprep.subr.bf16.mxu1 %v14939_v25  ;;  %v14943_v3 = vld [vmem:[%s20412_s3 + $0xab8] ss:$40 sps:$4 sm:$0xff]   ;;  %v14988_v25 = vld [vmem:[%s20412_s3 + $0x928] ss:$40 sps:$4 sm:$0xff]   ;;  %v14996_v60 = vld [vmem:[%s20412_s3 + $0x8dc] ss:$40 sps:$4 sm:$0xff]  }
 0x492   :  { %v10013_v45 = vpop.f32.mrf.mxu0  ;;  %v14967_v42 = vld [vmem:[%s20412_s3 + $0xe78] ss:$40 sps:$4 sm:$0xff]  }
 0x493   :  { %v19273_v49 = vadd.f32 %v10052_v14, %v10012_v21  ;;  %10306 = vmatpush1.bf16.msra.mxu0 %v14934_v27  ;;  %v14973_v14 = vld [vmem:[%s20412_s3 + $0xe28] ss:$40 sps:$4 sm:$0xff]   ;;  %v14999_v27 = vld [vmem:[%s20412_s3 + $0xcec] ss:$40 sps:$4 sm:$0xff]   ;;  %v14994_v55 = vld [vmem:[%s20412_s3 + $0x8d8] ss:$40 sps:$4 sm:$0xff]  }
 0x494   :  { %v10014_v7 = vpop.f32.mrf.mxu0  ;;  %10353 = vmatpush1.bf16.msra.mxu1 %v14937_v59  ;;  %10307 = vmatprep.subr.bf16.mxu0 %v14942_v39  ;;  %v14997_v59 = vld [vmem:[%s20412_s3 + $0xce8] ss:$40 sps:$4 sm:$0xff]   ;;  %v15002_v39 = vld [vmem:[%s20412_s3 + $0x88c] ss:$40 sps:$4 sm:$0xff]   ;;  %v15005_v21 = vld [vmem:[%s20412_s3 + $0xc9c] ss:$40 sps:$4 sm:$0xff]  }
 0x495   :  { %10354 = vmatprep.subr.bf16.mxu1 %v14945_v32  ;;  %v15000_v32 = vld [vmem:[%s20412_s3 + $0x888] ss:$40 sps:$4 sm:$0xff]   ;;  %v15003_v45 = vld [vmem:[%s20412_s3 + $0xc98] ss:$40 sps:$4 sm:$0xff]   ;;  %v15011_v7 = vld [vmem:[%s20412_s3 + $0x164c] ss:$40 sps:$4 sm:$0xff]  }
 0x497   :  { %10308 = vmatpush1.bf16.msra.mxu0 %v14940_v41  ;;  %v15008_v41 = vld [vmem:[%s20412_s3 + $0x83c] ss:$40 sps:$4 sm:$0xff]  }
 0x498   :  { %10355 = vmatpush1.bf16.msra.mxu1 %v14943_v3  ;;  %10309 = vmatprep.subr.bf16.mxu0 %v14948_v50  ;;  %v15006_v3 = vld [vmem:[%s20412_s3 + $0x838] ss:$40 sps:$4 sm:$0xff]   ;;  %v15009_v50 = vld [vmem:[%s20412_s3 + $0x1648] ss:$40 sps:$4 sm:$0xff]  }
 0x499   :  { %10356 = vmatprep.subr.bf16.mxu1 %v14951_v52  ;;  %v15014_v52 = vld [vmem:[%s20412_s3 + $0x7ec] ss:$40 sps:$4 sm:$0xff]  }
 0x49b   :  { %10310 = vmatpush1.bf16.msra.mxu0 %v14946_v54  ;;  %v15017_v54 = vld [vmem:[%s20412_s3 + $0x15fc] ss:$40 sps:$4 sm:$0xff]  }
 0x49c   :  { %10357 = vmatpush1.bf16.msra.mxu1 %v14949_v0  ;;  %10311 = vmatprep.subr.bf16.mxu0 %v14954_v26  ;;  %v15012_v26 = vld [vmem:[%s20412_s3 + $0x7e8] ss:$40 sps:$4 sm:$0xff]  }
 0x49d   :  { %10358 = vmatprep.subr.bf16.mxu1 %v14957_v47  ;;  %v15015_v47 = vld [vmem:[%s20412_s3 + $0x15f8] ss:$40 sps:$4 sm:$0xff]  }
 0x49f   :  { %10312 = vmatpush1.bf16.msra.mxu0 %v14952_v34  ;;  %v15020_v34 = vld [vmem:[%s20412_s3 + $0x79c] ss:$40 sps:$4 sm:$0xff]  }
 0x4a0   :  { %10359 = vmatpush1.bf16.msra.mxu1 %v14955_v61  ;;  %10313 = vmatprep.subr.bf16.mxu0 %v14960_v11  ;;  %v15023_v11 = vld [vmem:[%s20412_s3 + $0x15ac] ss:$40 sps:$4 sm:$0xff]  }
 0x4a1   :  { %10360 = vmatprep.subr.bf16.mxu1 %v14963_v36 }
 0x4a3   :  { %10314 = vmatpush1.bf16.msra.mxu0 %v14958_v4  ;;  %v15018_v4 = vld [vmem:[%s20412_s3 + $0x798] ss:$40 sps:$4 sm:$0xff]  }
 0x4a4   :  { %10361 = vmatpush2.bf16.msra.mxu1 %v14961_v5  ;;  %10315 = vmatprep.subr.bf16.mxu0 %v14966_v8  ;;  %v15021_v5 = vld [vmem:[%s20412_s3 + $0x15a8] ss:$40 sps:$4 sm:$0xff]   ;;  %v15026_v8 = vld [vmem:[%s20412_s3 + $0x114c] ss:$40 sps:$4 sm:$0xff]  }
 0x4a5   :  { %10362 = vmatprep.subr.bf16.mxu1 %v14969_v9 }
 0x4a7   :  { %10316 = vmatpush1.bf16.msra.mxu0 %v14964_v17  ;;  %v15029_v17 = vld [vmem:[%s20412_s3 + $0x155c] ss:$40 sps:$4 sm:$0xff]  }
 0x4a8   :  { %10363 = vmatpush2.bf16.msra.mxu1 %v14967_v42  ;;  %10317 = vmatprep.subr.bf16.mxu0 %v14972_v28  ;;  %v15433_v42 = vld [vmem:[%s20413_s4] sm:$0xff] }
 0x4a9   :  { %10364 = vmatprep.subr.bf16.mxu1 %v14975_v16  ;;  %v5616_v28 = vrot.slane %v15433_v42, %v693_v53  ;;  %v15024_v16 = vld [vmem:[%s20412_s3 + $0x1148] ss:$40 sps:$4 sm:$0xff]   ;;  %v15035_v53 = vld [vmem:[%s20412_s3 + $0x150c] ss:$40 sps:$4 sm:$0xff]  }
 0x4ab   :  { %10318 = vmatpush1.bf16.msra.mxu0 %v14970_v38  ;;  %v15027_v38 = vld [vmem:[%s20412_s3 + $0x1558] ss:$40 sps:$4 sm:$0xff]  }
 0x4ac   :  { %10365 = vmatpush2.bf16.msra.mxu1 %v14973_v14  ;;  %10319 = vmatprep.subr.bf16.mxu0 %v14978_v18  ;;  %v15032_v14 = vld [vmem:[%s20412_s3 + $0x10fc] ss:$40 sps:$4 sm:$0xff]   ;;  %v5620_v18 = vrot.slane %v15433_v42, %v697_v56  ;;  %v15033_v56 = vld [vmem:[%s20412_s3 + $0x1508] ss:$40 sps:$4 sm:$0xff]  }
 0x4ad   :  { %10366 = vmatprep.subr.bf16.mxu1 %v14981_v43  ;;  %v15080_v42 = vld [vmem:[%s20412_s3 + $0x137c] ss:$40 sps:$4 sm:$0xff]  }
 0x4af   :  { %10320 = vmatpush2.bf16.msra.mxu0 %v14976_v19 }
 0x4b0   :  { %10367 = vmatpush2.bf16.msra.mxu1 %v14979_v20  ;;  %10321 = vmatprep.subr.bf16.mxu0 %v14984_v13  ;;  %v15030_v20 = vld [vmem:[%s20412_s3 + $0x10f8] ss:$40 sps:$4 sm:$0xff]  }
 0x4b1   :  { %10368 = vmatprep.subr.bf16.mxu1 %v14987_v46  ;;  %v15038_v46 = vld [vmem:[%s20412_s3 + $0x10ac] ss:$40 sps:$4 sm:$0xff]  }
 0x4b3   :  { %10322 = vmatpush2.bf16.msra.mxu0 %v14982_v24 }
 0x4b4   :  { %10369 = vmatpush2.bf16.msra.mxu1 %v14985_v44  ;;  %10323 = vmatprep.subr.bf16.mxu0 %v14990_v51  ;;  %v15041_v44 = vld [vmem:[%s20412_s3 + $0x14bc] ss:$40 sps:$4 sm:$0xff]  }
 0x4b5   :  { %10370 = vmatprep.subr.bf16.mxu1 %v14993_v58 }
 0x4b7   :  { %10324 = vmatpush2.bf16.msra.mxu0 %v14988_v25  ;;  %v15036_v25 = vld [vmem:[%s20412_s3 + $0x10a8] ss:$40 sps:$4 sm:$0xff]  }
 0x4b8   :  { %10371 = vmatpush2.bf16.msra.mxu1 %v14991_v48  ;;  %10325 = vmatprep.subr.bf16.mxu0 %v14996_v60 }
 0x4b9   :  { %10372 = vmatprep.subr.bf16.mxu1 %v14999_v27  ;;  %v15039_v27 = vld [vmem:[%s20412_s3 + $0x14b8] ss:$40 sps:$4 sm:$0xff]  }
 0x4bb   :  { %10326 = vmatpush2.bf16.msra.mxu0 %v14994_v55  ;;  %v15044_v55 = vld [vmem:[%s20412_s3 + $0x105c] ss:$40 sps:$4 sm:$0xff]  }
 0x4bc   :  { %10373 = vmatpush2.bf16.msra.mxu1 %v14997_v59  ;;  %10327 = vmatprep.subr.bf16.mxu0 %v15002_v39  ;;  %v15047_v59 = vld [vmem:[%s20412_s3 + $0x146c] ss:$40 sps:$4 sm:$0xff]   ;;  %v15042_v39 = vld [vmem:[%s20412_s3 + $0x1058] ss:$40 sps:$4 sm:$0xff]  }
 0x4bd   :  { %10374 = vmatprep.subr.bf16.mxu1 %v15005_v21  ;;  %v15045_v21 = vld [vmem:[%s20412_s3 + $0x1468] ss:$40 sps:$4 sm:$0xff]  }
 0x4bf   :  { %10328 = vmatpush2.bf16.msra.mxu0 %v15000_v32  ;;  %v15050_v32 = vld [vmem:[%s20412_s3 + $0x100c] ss:$40 sps:$4 sm:$0xff]  }
 0x4c0   :  { %10375 = vmatpush2.bf16.msra.mxu1 %v15003_v45  ;;  %10329 = vmatprep.subr.bf16.mxu0 %v15008_v41  ;;  %v15053_v45 = vld [vmem:[%s20412_s3 + $0x141c] ss:$40 sps:$4 sm:$0xff]   ;;  %v15048_v41 = vld [vmem:[%s20412_s3 + $0x1008] ss:$40 sps:$4 sm:$0xff]  }
 0x4c1   :  { %10426 = vmatprep.subr.bf16.mxu1 %v15011_v7  ;;  %v15051_v7 = vld [vmem:[%s20412_s3 + $0x1418] ss:$40 sps:$4 sm:$0xff]  }
 0x4c3   :  { %v10132_v0 = vpop.f32.mrf.mxu1  ;;  %10330 = vmatpush2.bf16.msra.mxu0 %v15006_v3  ;;  %10377 = vmatmul.mubr.bf16.vlgmr.msra.gmra.mxu1 %v17984_v30  ;;  %v15056_v3 = vld [vmem:[%s20412_s3 + $0xfbc] ss:$40 sps:$4 sm:$0xff]  }
 0x4c4   :  { %10427 = vmatpush1.bf16.msra.mxu1 %v15009_v50  ;;  %10458 = vmatprep.mubr.bf16.mxu1 %v18223_v23  ;;  %v15059_v50 = vld [vmem:[%s20412_s3 + $0x18cc] ss:$40 sps:$4 sm:$0xff]  }
 0x4c5   :  { %v10134_v61 = vpop.f32.mrf.mxu1  ;;  %10331 = vmatprep.subr.bf16.mxu0 %v15014_v52  ;;  %10428 = vmatprep.subr.bf16.mxu1 %v15017_v54  ;;  %v15054_v52 = vld [vmem:[%s20412_s3 + $0xfb8] ss:$40 sps:$4 sm:$0xff]   ;;  %v15057_v54 = vld [vmem:[%s20412_s3 + $0x18c8] ss:$40 sps:$4 sm:$0xff]  }
 0x4c7   :  { %v10136_v36 = vpop.f32.mrf.mxu1  ;;  %10332 = vmatpush2.bf16.msra.mxu0 %v15012_v26  ;;  %v15065_v26 = vld [vmem:[%s20412_s3 + $0x187c] ss:$40 sps:$4 sm:$0xff]  }
 0x4c8   :  { %10429 = vmatpush1.bf16.msra.mxu1 %v15015_v47  ;;  %10333 = vmatprep.subr.bf16.mxu0 %v15020_v34  ;;  %v15060_v47 = vld [vmem:[%s20412_s3 + $0xf68] ss:$40 sps:$4 sm:$0xff]   ;;  %v15063_v34 = vld [vmem:[%s20412_s3 + $0x1878] ss:$40 sps:$4 sm:$0xff]  }
 0x4c9   :  { %v10137_v9 = vpop.f32.mrf.mxu1  ;;  %10430 = vmatprep.subr.bf16.mxu1 %v15023_v11  ;;  %v15071_v11 = vld [vmem:[%s20412_s3 + $0x182c] ss:$40 sps:$4 sm:$0xff]   ;;  %v15066_v36 = vld [vmem:[%s20412_s3 + $0xf18] ss:$40 sps:$4 sm:$0xff]  }
 0x4ca   :  { %v15072_v9 = vld [vmem:[%s20412_s3 + $0x13c8] ss:$40 sps:$4 sm:$0xff]  }
 0x4cb   :  { %10334 = vmatpush2.bf16.msra.mxu0 %v15018_v4  ;;  %v15069_v4 = vld [vmem:[%s20412_s3 + $0x1828] ss:$40 sps:$4 sm:$0xff]  }
 0x4cc   :  { %10431 = vmatpush1.bf16.msra.mxu1 %v15021_v5  ;;  %10385 = vmatprep.subr.bf16.mxu0 %v15026_v8  ;;  %v15074_v5 = vld [vmem:[%s20412_s3 + $0x13cc] ss:$40 sps:$4 sm:$0xff]   ;;  %v15077_v8 = vld [vmem:[%s20412_s3 + $0x17dc] ss:$40 sps:$4 sm:$0xff]  }
 0x4cd   :  { %10432 = vmatprep.subr.bf16.mxu1 %v15029_v17  ;;  %v15075_v17 = vld [vmem:[%s20412_s3 + $0x17d8] ss:$40 sps:$4 sm:$0xff]  }
 0x4ce   :  { %v10091_v43 = vpop.f32.mrf.mxu0  ;;  %10336 = vmatmul.mubr.bf16.vlgmr.msra.gmra.mxu0 %v17782_v62 }
 0x4cf   :  { %v10092_v19 = vadd.f32 %v10091_v43, %v5616_v28  ;;  %10386 = vmatpush1.bf16.msra.mxu0 %v15024_v16  ;;  %10417 = vmatprep.mubr.bf16.mxu0 %v17824_v22  ;;  %v15083_v28 = vld [vmem:[%s20412_s3 + $0x178c] ss:$40 sps:$4 sm:$0xff]   ;;  %v15078_v16 = vld [vmem:[%s20412_s3 + $0x1378] ss:$40 sps:$4 sm:$0xff]  }
 0x4d0   :  { %v10093_v13 = vpop.f32.mrf.mxu0  ;;  %10433 = vmatpush1.bf16.msra.mxu1 %v15027_v38  ;;  %10387 = vmatprep.subr.bf16.mxu0 %v15032_v14  ;;  %v15081_v38 = vld [vmem:[%s20412_s3 + $0x1788] ss:$40 sps:$4 sm:$0xff]   ;;  %v15086_v14 = vld [vmem:[%s20412_s3 + $0x132c] ss:$40 sps:$4 sm:$0xff]   ;;  %v15087_v43 = vld [vmem:[%s20412_s3 + $0x1738] ss:$40 sps:$4 sm:$0xff]  }
 0x4d1   :  { %v10094_v24 = vadd.f32 %v10093_v13, %v5620_v18  ;;  %10434 = vmatprep.subr.bf16.mxu1 %v15035_v53  ;;  %v19478_v51 = vadd.f32 %v10132_v0, %v10092_v19  ;;  %v15062_v0 = vld [vmem:[%s20412_s3 + $0xf6c] ss:$40 sps:$4 sm:$0xff]   ;;  %v15089_v18 = vld [vmem:[%s20412_s3 + $0x173c] ss:$40 sps:$4 sm:$0xff]   ;;  %v15084_v53 = vld [vmem:[%s20412_s3 + $0x1328] ss:$40 sps:$4 sm:$0xff]  }
 0x4d2   :  { %v10095_v58 = vpop.f32.mrf.mxu0  ;;  %v15092_v19 = vld [vmem:[%s20412_s3 + $0x12dc] ss:$40 sps:$4 sm:$0xff]   ;;  %v15090_v13 = vld [vmem:[%s20412_s3 + $0x12d8] ss:$40 sps:$4 sm:$0xff]  }
 0x4d3   :  { %10388 = vmatpush1.bf16.msra.mxu0 %v15030_v20  ;;  %v19483_v48 = vadd.f32 %v10134_v61, %v10094_v24  ;;  %v15068_v61 = vld [vmem:[%s20412_s3 + $0xf1c] ss:$40 sps:$4 sm:$0xff]   ;;  %v15095_v20 = vld [vmem:[%s20412_s3 + $0x16ec] ss:$40 sps:$4 sm:$0xff]   ;;  %v15099_v58 = vld [vmem:[%s20412_s3 + $0x1698] ss:$40 sps:$4 sm:$0xff]  }
 0x4d4   :  { %v10096_v60 = vpop.f32.mrf.mxu0  ;;  %10435 = vmatpush1.bf16.msra.mxu1 %v15033_v56  ;;  %10389 = vmatprep.subr.bf16.mxu0 %v15038_v46  ;;  %v15093_v56 = vld [vmem:[%s20412_s3 + $0x16e8] ss:$40 sps:$4 sm:$0xff]   ;;  %v15098_v46 = vld [vmem:[%s20412_s3 + $0x128c] ss:$40 sps:$4 sm:$0xff]   ;;  %v15101_v24 = vld [vmem:[%s20412_s3 + $0x169c] ss:$40 sps:$4 sm:$0xff]  }
 0x4d5   :  { %10436 = vmatprep.subr.bf16.mxu1 %v15041_v44  ;;  %v15096_v44 = vld [vmem:[%s20412_s3 + $0x1288] ss:$40 sps:$4 sm:$0xff]   ;;  %v15107_v60 = vld [vmem:[%s20412_s3 + $0x754] ss:$40 sps:$4 sm:$0xff]  }
 0x4d7   :  { %10390 = vmatpush1.bf16.msra.mxu0 %v15036_v25  ;;  %v15104_v25 = vld [vmem:[%s20412_s3 + $0x123c] ss:$40 sps:$4 sm:$0xff]  }
 0x4d8   :  { %10437 = vmatpush1.bf16.msra.mxu1 %v15039_v27  ;;  %10391 = vmatprep.subr.bf16.mxu0 %v15044_v55  ;;  %v15102_v27 = vld [vmem:[%s20412_s3 + $0x1238] ss:$40 sps:$4 sm:$0xff]  }
 0x4d9   :  { %10438 = vmatprep.subr.bf16.mxu1 %v15047_v59  ;;  %v15105_v55 = vld [vmem:[%s20412_s3 + $0x750] ss:$40 sps:$4 sm:$0xff]   ;;  %v15110_v59 = vld [vmem:[%s20412_s3 + $0x11ec] ss:$40 sps:$4 sm:$0xff]  }
 0x4db   :  { %10392 = vmatpush1.bf16.msra.mxu0 %v15042_v39  ;;  %v15108_v39 = vld [vmem:[%s20412_s3 + $0x11e8] ss:$40 sps:$4 sm:$0xff]  }
 0x4dc   :  { %10439 = vmatpush1.bf16.msra.mxu1 %v15045_v21  ;;  %10393 = vmatprep.subr.bf16.mxu0 %v15050_v32  ;;  %v15113_v21 = vld [vmem:[%s20412_s3 + $0x704] ss:$40 sps:$4 sm:$0xff]   ;;  %v15111_v32 = vld [vmem:[%s20412_s3 + $0x700] ss:$40 sps:$4 sm:$0xff]  }
 0x4dd   :  { %10440 = vmatprep.subr.bf16.mxu1 %v15053_v45 }
 0x4df   :  { %10394 = vmatpush1.bf16.msra.mxu0 %v15048_v41  ;;  %v15116_v41 = vld [vmem:[%s20412_s3 + $0x119c] ss:$40 sps:$4 sm:$0xff]  }
 0x4e0   :  { %10441 = vmatpush1.bf16.msra.mxu1 %v15051_v7  ;;  %10395 = vmatprep.subr.bf16.mxu0 %v15056_v3  ;;  %v15114_v3 = vld [vmem:[%s20412_s3 + $0x1198] ss:$40 sps:$4 sm:$0xff]  }
 0x4e1   :  { %10442 = vmatprep.subr.bf16.mxu1 %v15059_v50  ;;  %v15119_v50 = vld [vmem:[%s20412_s3 + $0x6b4] ss:$40 sps:$4 sm:$0xff]  }
 0x4e3   :  { %10396 = vmatpush1.bf16.msra.mxu0 %v15054_v52  ;;  %v15117_v52 = vld [vmem:[%s20412_s3 + $0x6b0] ss:$40 sps:$4 sm:$0xff]  }
 0x4e4   :  { %10443 = vmatpush2.bf16.msra.mxu1 %v15057_v54  ;;  %10397 = vmatprep.subr.bf16.mxu0 %v15062_v0  ;;  %v15122_v54 = vld [vmem:[%s20412_s3 + $0x254] ss:$40 sps:$4 sm:$0xff]  }
 0x4e5   :  { %10444 = vmatprep.subr.bf16.mxu1 %v15065_v26  ;;  %v15120_v26 = vld [vmem:[%s20412_s3 + $0x250] ss:$40 sps:$4 sm:$0xff]  }
 0x4e7   :  { %10398 = vmatpush1.bf16.msra.mxu0 %v15060_v47  ;;  %v15125_v47 = vld [vmem:[%s20412_s3 + $0x664] ss:$40 sps:$4 sm:$0xff]  }
 0x4e8   :  { %10445 = vmatpush2.bf16.msra.mxu1 %v15063_v34  ;;  %10399 = vmatprep.subr.bf16.mxu0 %v15068_v61  ;;  %v15123_v34 = vld [vmem:[%s20412_s3 + $0x660] ss:$40 sps:$4 sm:$0xff]   ;;  %v15128_v61 = vld [vmem:[%s20412_s3 + $0x204] ss:$40 sps:$4 sm:$0xff]  }
 0x4e9   :  { %10446 = vmatprep.subr.bf16.mxu1 %v15071_v11  ;;  %v15126_v11 = vld [vmem:[%s20412_s3 + $0x200] ss:$40 sps:$4 sm:$0xff]  }
 0x4eb   :  { %10400 = vmatpush1.bf16.msra.mxu0 %v15066_v36  ;;  %v15131_v36 = vld [vmem:[%s20412_s3 + $0x614] ss:$40 sps:$4 sm:$0xff]  }
 0x4ec   :  { %10447 = vmatpush2.bf16.msra.mxu1 %v15069_v4  ;;  %10401 = vmatprep.subr.bf16.mxu0 %v15074_v5  ;;  %v15129_v5 = vld [vmem:[%s20412_s3 + $0x610] ss:$40 sps:$4 sm:$0xff]  }
 0x4ed   :  { %10448 = vmatprep.subr.bf16.mxu1 %v15077_v8 }
 0x4ef   :  { %10402 = vmatpush2.bf16.msra.mxu0 %v15072_v9 }
 0x4f0   :  { %10449 = vmatpush2.bf16.msra.mxu1 %v15075_v17  ;;  %10403 = vmatprep.subr.bf16.mxu0 %v15080_v42  ;;  %v15134_v17 = vld [vmem:[%s20412_s3 + $0x1b4] ss:$40 sps:$4 sm:$0xff]  }
 0x4f1   :  { %10450 = vmatprep.subr.bf16.mxu1 %v15083_v28  ;;  %v15137_v28 = vld [vmem:[%s20412_s3 + $0x5c4] ss:$40 sps:$4 sm:$0xff]  }
 0x4f3   :  { %10404 = vmatpush2.bf16.msra.mxu0 %v15078_v16 }
 0x4f4   :  { %10451 = vmatpush2.bf16.msra.mxu1 %v15081_v38  ;;  %10405 = vmatprep.subr.bf16.mxu0 %v15086_v14 }
 0x4f5   :  { %10452 = vmatprep.subr.bf16.mxu1 %v15089_v18  ;;  %v15140_v18 = vld [vmem:[%s20412_s3 + $0x164] ss:$40 sps:$4 sm:$0xff]  }
 0x4f7   :  { %10406 = vmatpush2.bf16.msra.mxu0 %v15084_v53  ;;  %v15143_v53 = vld [vmem:[%s20412_s3 + $0x574] ss:$40 sps:$4 sm:$0xff]  }
 0x4f8   :  { %10453 = vmatpush2.bf16.msra.mxu1 %v15087_v43  ;;  %10407 = vmatprep.subr.bf16.mxu0 %v15092_v19  ;;  %v15138_v43 = vld [vmem:[%s20412_s3 + $0x160] ss:$40 sps:$4 sm:$0xff]   ;;  %v15141_v19 = vld [vmem:[%s20412_s3 + $0x570] ss:$40 sps:$4 sm:$0xff]  }
 0x4f9   :  { %10454 = vmatprep.subr.bf16.mxu1 %v15095_v20  ;;  %v15146_v20 = vld [vmem:[%s20412_s3 + $0x114] ss:$40 sps:$4 sm:$0xff]  }
 0x4fb   :  { %10408 = vmatpush2.bf16.msra.mxu0 %v15090_v13  ;;  %v15149_v13 = vld [vmem:[%s20412_s3 + $0x524] ss:$40 sps:$4 sm:$0xff]  }
 0x4fc   :  { %10455 = vmatpush2.bf16.msra.mxu1 %v15093_v56  ;;  %10409 = vmatprep.subr.bf16.mxu0 %v15098_v46  ;;  %v15144_v56 = vld [vmem:[%s20412_s3 + $0x110] ss:$40 sps:$4 sm:$0xff]   ;;  %v15147_v46 = vld [vmem:[%s20412_s3 + $0x520] ss:$40 sps:$4 sm:$0xff]  }
 0x4fd   :  { %10456 = vmatprep.subr.bf16.mxu1 %v15101_v24  ;;  %v15152_v24 = vld [vmem:[%s20412_s3 + $0xc4] ss:$40 sps:$4 sm:$0xff]  }
 0x4ff   :  { %10410 = vmatpush2.bf16.msra.mxu0 %v15096_v44  ;;  %v15155_v44 = vld [vmem:[%s20412_s3 + $0x9d4] ss:$40 sps:$4 sm:$0xff]  }
 0x500   :  { %10457 = vmatpush2.bf16.msra.mxu1 %v15099_v58  ;;  %10411 = vmatprep.subr.bf16.mxu0 %v15104_v25  ;;  %v15150_v58 = vld [vmem:[%s20412_s3 + $0xc0] ss:$40 sps:$4 sm:$0xff]   ;;  %v15153_v25 = vld [vmem:[%s20412_s3 + $0x9d0] ss:$40 sps:$4 sm:$0xff]  }
 0x501   :  { %10508 = vmatprep.subr.bf16.mxu1 %v15107_v60  ;;  %v15158_v60 = vld [vmem:[%s20412_s3 + $0x74] ss:$40 sps:$4 sm:$0xff]  }
 0x503   :  { %v10214_v45 = vpop.f32.mrf.mxu1  ;;  %10412 = vmatpush2.bf16.msra.mxu0 %v15102_v27  ;;  %10459 = vmatmul.mubr.bf16.vlgmr.msra.gmra.mxu1 %v18225_v10  ;;  %v15161_v27 = vld [vmem:[%s20412_s3 + $0x984] ss:$40 sps:$4 sm:$0xff]  }
 0x504   :  { %10509 = vmatpush1.bf16.msra.mxu1 %v15105_v55  ;;  %10540 = vmatprep.mubr.bf16.mxu1 %v17571_v15  ;;  %v15156_v55 = vld [vmem:[%s20412_s3 + $0x70] ss:$40 sps:$4 sm:$0xff]  }
 0x505   :  { %v10216_v7 = vpop.f32.mrf.mxu1  ;;  %10413 = vmatprep.subr.bf16.mxu0 %v15110_v59  ;;  %10510 = vmatprep.subr.bf16.mxu1 %v15113_v21  ;;  %v15159_v59 = vld [vmem:[%s20412_s3 + $0x980] ss:$40 sps:$4 sm:$0xff]   ;;  %v15167_v21 = vld [vmem:[%s20412_s3 + $0x934] ss:$40 sps:$4 sm:$0xff]  }
 0x507   :  { %v10218_v15 = vpop.f32.mrf.mxu1  ;;  %10414 = vmatpush2.bf16.msra.mxu0 %v15108_v39  ;;  %v15164_v39 = vld [vmem:[%s20412_s3 + $0x24] ss:$40 sps:$4 sm:$0xff]  }
 0x508   :  { %10511 = vmatpush1.bf16.msra.mxu1 %v15111_v32  ;;  %10415 = vmatprep.subr.bf16.mxu0 %v15116_v41  ;;  %v15162_v32 = vld [vmem:[%s20412_s3 + $0x20] ss:$40 sps:$4 sm:$0xff]   ;;  %v15170_v41 = vld [vmem:[%s20412_s3 + $0x4d4] ss:$40 sps:$4 sm:$0xff]  }
 0x509   :  { %v10219_v0 = vpop.f32.mrf.mxu1  ;;  %10512 = vmatprep.subr.bf16.mxu1 %v15119_v50  ;;  %v15171_v50 = vld [vmem:[%s20412_s3 + $0x8e0] ss:$40 sps:$4 sm:$0xff]   ;;  %v15179_v15 = vld [vmem:[%s20412_s3 + $0x894] ss:$40 sps:$4 sm:$0xff]  }
 0x50a   :  { %v15177_v0 = vld [vmem:[%s20412_s3 + $0x890] ss:$40 sps:$4 sm:$0xff]  }
 0x50b   :  { %10416 = vmatpush2.bf16.msra.mxu0 %v15114_v3  ;;  %v15168_v3 = vld [vmem:[%s20412_s3 + $0x4d0] ss:$40 sps:$4 sm:$0xff]  }
 0x50c   :  { %10513 = vmatpush1.bf16.msra.mxu1 %v15117_v52  ;;  %10467 = vmatprep.subr.bf16.mxu0 %v15122_v54  ;;  %v15176_v52 = vld [vmem:[%s20412_s3 + $0x484] ss:$40 sps:$4 sm:$0xff]   ;;  %v15174_v54 = vld [vmem:[%s20412_s3 + $0x480] ss:$40 sps:$4 sm:$0xff]  }
 0x50d   :  { %10514 = vmatprep.subr.bf16.mxu1 %v15125_v47  ;;  %v15185_v47 = vld [vmem:[%s20412_s3 + $0x844] ss:$40 sps:$4 sm:$0xff]  }
 0x50e   :  { %v10173_v4 = vpop.f32.mrf.mxu0  ;;  %10418 = vmatmul.mubr.bf16.vlgmr.msra.gmra.mxu0 %v17989_v31 }
 0x50f   :  { %v10174_v8 = vadd.f32 %v10173_v4, %v19478_v51  ;;  %10468 = vmatpush1.bf16.msra.mxu0 %v15120_v26  ;;  %10499 = vmatprep.mubr.bf16.mxu0 %v17566_v12  ;;  %v15132_v12 = vld [vmem:[%s20412_s3 + $0x1b0] ss:$40 sps:$4 sm:$0xff]   ;;  %v15182_v26 = vld [vmem:[%s20412_s3 + $0x434] ss:$40 sps:$4 sm:$0xff]   ;;  %v15186_v4 = vld [vmem:[%s20412_s3 + $0x3e0] ss:$40 sps:$4 sm:$0xff]  }
 0x510   :  { %v10175_v9 = vpop.f32.mrf.mxu0  ;;  %10515 = vmatpush1.bf16.msra.mxu1 %v15123_v34  ;;  %10469 = vmatprep.subr.bf16.mxu0 %v15128_v61  ;;  %v15180_v34 = vld [vmem:[%s20412_s3 + $0x430] ss:$40 sps:$4 sm:$0xff]   ;;  %v15183_v61 = vld [vmem:[%s20412_s3 + $0x840] ss:$40 sps:$4 sm:$0xff]  }
 0x511   :  { %v10176_v42 = vadd.f32 %v10175_v9, %v19483_v48  ;;  %10516 = vmatprep.subr.bf16.mxu1 %v15131_v36  ;;  %v19680_v16 = vadd.f32 %v10214_v45, %v10174_v8  ;;  %v15135_v48 = vld [vmem:[%s20412_s3 + $0x5c0] ss:$40 sps:$4 sm:$0xff]   ;;  %v15165_v45 = vld [vmem:[%s20412_s3 + $0x930] ss:$40 sps:$4 sm:$0xff]   ;;  %v15191_v36 = vld [vmem:[%s20412_s3 + $0x7f4] ss:$40 sps:$4 sm:$0xff]  }
 0x512   :  { %v10177_v51 = vpop.f32.mrf.mxu0  ;;  %v15194_v8 = vld [vmem:[%s20412_s3 + $0x394] ss:$40 sps:$4 sm:$0xff]   ;;  %v15197_v9 = vld [vmem:[%s20412_s3 + $0x7a4] ss:$40 sps:$4 sm:$0xff]  }
 0x513   :  { %10470 = vmatpush1.bf16.msra.mxu0 %v15126_v11  ;;  %v19685_v38 = vadd.f32 %v10216_v7, %v10176_v42  ;;  %v15173_v7 = vld [vmem:[%s20412_s3 + $0x8e4] ss:$40 sps:$4 sm:$0xff]   ;;  %v15195_v42 = vld [vmem:[%s20412_s3 + $0x7a0] ss:$40 sps:$4 sm:$0xff]   ;;  %v15203_v51 = vld [vmem:[%s20412_s3 + $0x1154] ss:$40 sps:$4 sm:$0xff]  }
 0x514   :  { %v10178_v14 = vpop.f32.mrf.mxu0  ;;  %10517 = vmatpush1.bf16.msra.mxu1 %v15129_v5  ;;  %10471 = vmatprep.subr.bf16.mxu0 %v15134_v17  ;;  %v15188_v11 = vld [vmem:[%s20412_s3 + $0x3e4] ss:$40 sps:$4 sm:$0xff]   ;;  %v15189_v5 = vld [vmem:[%s20412_s3 + $0x7f0] ss:$40 sps:$4 sm:$0xff]  }
 0x515   :  { %10518 = vmatprep.subr.bf16.mxu1 %v15137_v28  ;;  %v15192_v17 = vld [vmem:[%s20412_s3 + $0x390] ss:$40 sps:$4 sm:$0xff]   ;;  %v15200_v28 = vld [vmem:[%s20412_s3 + $0x344] ss:$40 sps:$4 sm:$0xff]  }
 0x516   :  { %v15201_v14 = vld [vmem:[%s20412_s3 + $0x1150] ss:$40 sps:$4 sm:$0xff]  }
 0x517   :  { %10472 = vmatpush1.bf16.msra.mxu0 %v15132_v12  ;;  %v15198_v12 = vld [vmem:[%s20412_s3 + $0x340] ss:$40 sps:$4 sm:$0xff]  }
 0x518   :  { %10519 = vmatpush1.bf16.msra.mxu1 %v15135_v48  ;;  %10473 = vmatprep.subr.bf16.mxu0 %v15140_v18  ;;  %v15206_v48 = vld [vmem:[%s20412_s3 + $0x2f4] ss:$40 sps:$4 sm:$0xff]   ;;  %v15204_v18 = vld [vmem:[%s20412_s3 + $0x2f0] ss:$40 sps:$4 sm:$0xff]  }
 0x519   :  { %10520 = vmatprep.subr.bf16.mxu1 %v15143_v53  ;;  %v15209_v53 = vld [vmem:[%s20412_s3 + $0x1104] ss:$40 sps:$4 sm:$0xff]  }
 0x51b   :  { %10474 = vmatpush1.bf16.msra.mxu0 %v15138_v43  ;;  %v15207_v43 = vld [vmem:[%s20412_s3 + $0x1100] ss:$40 sps:$4 sm:$0xff]  }
 0x51c   :  { %10521 = vmatpush1.bf16.msra.mxu1 %v15141_v19  ;;  %10475 = vmatprep.subr.bf16.mxu0 %v15146_v20  ;;  %v15212_v20 = vld [vmem:[%s20412_s3 + $0x2a4] ss:$40 sps:$4 sm:$0xff]  }
 0x51d   :  { %10522 = vmatprep.subr.bf16.mxu1 %v15149_v13 }
 0x51f   :  { %10476 = vmatpush1.bf16.msra.mxu0 %v15144_v56  ;;  %v15210_v56 = vld [vmem:[%s20412_s3 + $0x2a0] ss:$40 sps:$4 sm:$0xff]  }
 0x520   :  { %10523 = vmatpush1.bf16.msra.mxu1 %v15147_v46  ;;  %10477 = vmatprep.subr.bf16.mxu0 %v15152_v24  ;;  %v15215_v46 = vld [vmem:[%s20412_s3 + $0x10b4] ss:$40 sps:$4 sm:$0xff]  }
 0x521   :  { %10524 = vmatprep.subr.bf16.mxu1 %v15155_v44  ;;  %v15218_v24 = vld [vmem:[%s20412_s3 + $0xc54] ss:$40 sps:$4 sm:$0xff]  }
 0x523   :  { %10478 = vmatpush1.bf16.msra.mxu0 %v15150_v58  ;;  %v15216_v58 = vld [vmem:[%s20412_s3 + $0xc50] ss:$40 sps:$4 sm:$0xff]  }
 0x524   :  { %10525 = vmatpush2.bf16.msra.mxu1 %v15153_v25  ;;  %10479 = vmatprep.subr.bf16.mxu0 %v15158_v60  ;;  %v15221_v25 = vld [vmem:[%s20412_s3 + $0x1064] ss:$40 sps:$4 sm:$0xff]   ;;  %v15219_v60 = vld [vmem:[%s20412_s3 + $0x1060] ss:$40 sps:$4 sm:$0xff]  }
 0x525   :  { %10526 = vmatprep.subr.bf16.mxu1 %v15161_v27  ;;  %v15224_v27 = vld [vmem:[%s20412_s3 + $0xc04] ss:$40 sps:$4 sm:$0xff]  }
 0x527   :  { %10480 = vmatpush1.bf16.msra.mxu0 %v15156_v55  ;;  %v15227_v55 = vld [vmem:[%s20412_s3 + $0x1014] ss:$40 sps:$4 sm:$0xff]  }
 0x528   :  { %10527 = vmatpush2.bf16.msra.mxu1 %v15159_v59  ;;  %10481 = vmatprep.subr.bf16.mxu0 %v15164_v39  ;;  %v15222_v39 = vld [vmem:[%s20412_s3 + $0xc00] ss:$40 sps:$4 sm:$0xff]  }
 0x529   :  { %10528 = vmatprep.subr.bf16.mxu1 %v15167_v21 }
 0x52b   :  { %10482 = vmatpush1.bf16.msra.mxu0 %v15162_v32 }
 0x52c   :  { %10529 = vmatpush2.bf16.msra.mxu1 %v15165_v45  ;;  %10483 = vmatprep.subr.bf16.mxu0 %v15170_v41  ;;  %v15225_v45 = vld [vmem:[%s20412_s3 + $0x1010] ss:$40 sps:$4 sm:$0xff]  }
 0x52d   :  { %10530 = vmatprep.subr.bf16.mxu1 %v15173_v7  ;;  %v15228_v7 = vld [vmem:[%s20412_s3 + $0xbb0] ss:$40 sps:$4 sm:$0xff]  }
 0x52f   :  { %10484 = vmatpush2.bf16.msra.mxu0 %v15168_v3 }
 0x530   :  { %10531 = vmatpush2.bf16.msra.mxu1 %v15171_v50  ;;  %10485 = vmatprep.subr.bf16.mxu0 %v15176_v52  ;;  %v15231_v50 = vld [vmem:[%s20412_s3 + $0xfc0] ss:$40 sps:$4 sm:$0xff]   ;;  %v15239_v52 = vld [vmem:[%s20412_s3 + $0xf74] ss:$40 sps:$4 sm:$0xff]  }
 0x531   :  { %10532 = vmatprep.subr.bf16.mxu1 %v15179_v15  ;;  %v15234_v15 = vld [vmem:[%s20412_s3 + $0xb60] ss:$40 sps:$4 sm:$0xff]  }
 0x533   :  { %10486 = vmatpush2.bf16.msra.mxu0 %v15174_v54  ;;  %v15237_v54 = vld [vmem:[%s20412_s3 + $0xf70] ss:$40 sps:$4 sm:$0xff]  }
 0x534   :  { %10533 = vmatpush2.bf16.msra.mxu1 %v15177_v0  ;;  %10487 = vmatprep.subr.bf16.mxu0 %v15182_v26  ;;  %v15242_v0 = vld [vmem:[%s20412_s3 + $0xb14] ss:$40 sps:$4 sm:$0xff]   ;;  %v15245_v26 = vld [vmem:[%s20412_s3 + $0xf24] ss:$40 sps:$4 sm:$0xff]  }
 0x535   :  { %10534 = vmatprep.subr.bf16.mxu1 %v15185_v47  ;;  %v15240_v47 = vld [vmem:[%s20412_s3 + $0xb10] ss:$40 sps:$4 sm:$0xff]  }
 0x537   :  { %10488 = vmatpush2.bf16.msra.mxu0 %v15180_v34  ;;  %v15243_v34 = vld [vmem:[%s20412_s3 + $0xf20] ss:$40 sps:$4 sm:$0xff]  }
 0x538   :  { %10535 = vmatpush2.bf16.msra.mxu1 %v15183_v61  ;;  %10489 = vmatprep.subr.bf16.mxu0 %v15188_v11  ;;  %v15248_v61 = vld [vmem:[%s20412_s3 + $0xac4] ss:$40 sps:$4 sm:$0xff]   ;;  %v15251_v11 = vld [vmem:[%s20412_s3 + $0x13d4] ss:$40 sps:$4 sm:$0xff]  }
 0x539   :  { %10536 = vmatprep.subr.bf16.mxu1 %v15191_v36  ;;  %v15246_v36 = vld [vmem:[%s20412_s3 + $0xac0] ss:$40 sps:$4 sm:$0xff]  }
 0x53b   :  { %10490 = vmatpush2.bf16.msra.mxu0 %v15186_v4  ;;  %v15249_v4 = vld [vmem:[%s20412_s3 + $0x13d0] ss:$40 sps:$4 sm:$0xff]  }
 0x53c   :  { %10537 = vmatpush2.bf16.msra.mxu1 %v15189_v5  ;;  %10491 = vmatprep.subr.bf16.mxu0 %v15194_v8  ;;  %v15254_v5 = vld [vmem:[%s20412_s3 + $0xa74] ss:$40 sps:$4 sm:$0xff]   ;;  %v15257_v8 = vld [vmem:[%s20412_s3 + $0x1384] ss:$40 sps:$4 sm:$0xff]  }
 0x53d   :  { %10538 = vmatprep.subr.bf16.mxu1 %v15197_v9  ;;  %v15252_v9 = vld [vmem:[%s20412_s3 + $0xa70] ss:$40 sps:$4 sm:$0xff]  }
 0x53f   :  { %10492 = vmatpush2.bf16.msra.mxu0 %v15192_v17  ;;  %v15255_v17 = vld [vmem:[%s20412_s3 + $0x1380] ss:$40 sps:$4 sm:$0xff]  }
 0x540   :  { %10539 = vmatpush2.bf16.msra.mxu1 %v15195_v42  ;;  %10493 = vmatprep.subr.bf16.mxu0 %v15200_v28  ;;  %v15260_v42 = vld [vmem:[%s20412_s3 + $0xa24] ss:$40 sps:$4 sm:$0xff]   ;;  %v15263_v28 = vld [vmem:[%s20412_s3 + $0x1334] ss:$40 sps:$4 sm:$0xff]  }
 0x541   :  { %10590 = vmatprep.subr.bf16.mxu1 %v15203_v51  ;;  %v15258_v51 = vld [vmem:[%s20412_s3 + $0xa20] ss:$40 sps:$4 sm:$0xff]  }
 0x543   :  { %v19834_v19 = vpop.f32.mrf.mxu1  ;;  %10494 = vmatpush2.bf16.msra.mxu0 %v15198_v12  ;;  %10541 = vmatmul.mubr.bf16.vlgmr.msra.gmra.mxu1 %v17782_v62  ;;  %v15213_v62 = vld [vmem:[%s20412_s3 + $0x10b0] ss:$40 sps:$4 sm:$0xff]  }
 0x544   :  { %10591 = vmatpush1.bf16.msra.mxu1 %v15201_v14  ;;  %10622 = vmatprep.mubr.bf16.mxu1 %v17824_v22  ;;  %v15261_v12 = vld [vmem:[%s20412_s3 + $0x1330] ss:$40 sps:$4 sm:$0xff]   ;;  %v15266_v14 = vld [vmem:[%s20412_s3 + $0xed4] ss:$40 sps:$4 sm:$0xff]  }
 0x545   :  { %v19841_v13 = vpop.f32.mrf.mxu1  ;;  %10495 = vmatprep.subr.bf16.mxu0 %v15206_v48  ;;  %10592 = vmatprep.subr.bf16.mxu1 %v15209_v53  ;;  %v15269_v48 = vld [vmem:[%s20412_s3 + $0x12e4] ss:$40 sps:$4 sm:$0xff]   ;;  %v15267_v53 = vld [vmem:[%s20412_s3 + $0x12e0] ss:$40 sps:$4 sm:$0xff]  }
 0x547   :  { %v10300_v22 = vpop.f32.mrf.mxu1  ;;  %10496 = vmatpush2.bf16.msra.mxu0 %v15204_v18  ;;  %v15264_v18 = vld [vmem:[%s20412_s3 + $0xed0] ss:$40 sps:$4 sm:$0xff]  }
 0x548   :  { %10593 = vmatpush1.bf16.msra.mxu1 %v15207_v43  ;;  %10497 = vmatprep.subr.bf16.mxu0 %v15212_v20  ;;  %v15272_v43 = vld [vmem:[%s20412_s3 + $0xe84] ss:$40 sps:$4 sm:$0xff]   ;;  %v15275_v20 = vld [vmem:[%s20412_s3 + $0x1294] ss:$40 sps:$4 sm:$0xff]  }
 0x549   :  { %v10301_v44 = vpop.f32.mrf.mxu1  ;;  %10594 = vmatprep.subr.bf16.mxu1 %v15215_v46  ;;  %v15273_v46 = vld [vmem:[%s20412_s3 + $0x1290] ss:$40 sps:$4 sm:$0xff]   ;;  %v15281_v22 = vld [vmem:[%s20412_s3 + $0x1244] ss:$40 sps:$4 sm:$0xff]  }
 0x54a   :  { %v15279_v44 = vld [vmem:[%s20412_s3 + $0x1240] ss:$40 sps:$4 sm:$0xff]  }
 0x54b   :  { %10498 = vmatpush2.bf16.msra.mxu0 %v15210_v56  ;;  %v15270_v56 = vld [vmem:[%s20412_s3 + $0xe80] ss:$40 sps:$4 sm:$0xff]  }
 0x54c   :  { %10595 = vmatpush1.bf16.msra.mxu1 %v15213_v62  ;;  %10549 = vmatprep.subr.bf16.mxu0 %v15218_v24  ;;  %v15278_v62 = vld [vmem:[%s20412_s3 + $0xe34] ss:$40 sps:$4 sm:$0xff]   ;;  %v15276_v24 = vld [vmem:[%s20412_s3 + $0xe30] ss:$40 sps:$4 sm:$0xff]  }
 0x54d   :  { %10596 = vmatprep.subr.bf16.mxu1 %v15221_v25  ;;  %v15287_v25 = vld [vmem:[%s20412_s3 + $0x11f4] ss:$40 sps:$4 sm:$0xff]  }
 0x54e   :  { %v10255_v59 = vpop.f32.mrf.mxu0  ;;  %10500 = vmatmul.mubr.bf16.vlgmr.msra.gmra.mxu0 %v17774_v6  ;;  %v15230_v6 = vld [vmem:[%s20412_s3 + $0xbb4] ss:$40 sps:$4 sm:$0xff]  }
 0x54f   :  { %v19875_v21 = vadd.f32 %v10255_v59, %v19680_v16  ;;  %10550 = vmatpush1.bf16.msra.mxu0 %v15216_v58  ;;  %10581 = vmatprep.mubr.bf16.mxu0 %v17787_v57  ;;  %v15233_v16 = vld [vmem:[%s20412_s3 + $0xfc4] ss:$40 sps:$4 sm:$0xff]  }
 0x550   :  { %v10257_v32 = vpop.f32.mrf.mxu0  ;;  %10597 = vmatpush1.bf16.msra.mxu1 %v15219_v60  ;;  %10551 = vmatprep.subr.bf16.mxu0 %v15224_v27  ;;  %v15284_v58 = vld [vmem:[%s20412_s3 + $0xde4] ss:$40 sps:$4 sm:$0xff]   ;;  %v15282_v60 = vld [vmem:[%s20412_s3 + $0xde0] ss:$40 sps:$4 sm:$0xff]   ;;  %v15285_v27 = vld [vmem:[%s20412_s3 + $0x11f0] ss:$40 sps:$4 sm:$0xff]  }
 0x551   :  { %v19885_v41 = vadd.f32 %v10257_v32, %v19685_v38  ;;  %10598 = vmatprep.subr.bf16.mxu1 %v15227_v55  ;;  %v15236_v38 = vld [vmem:[%s20412_s3 + $0xb64] ss:$40 sps:$4 sm:$0xff]   ;;  %v15290_v55 = vld [vmem:[%s20412_s3 + $0xd94] ss:$40 sps:$4 sm:$0xff]   ;;  %v15291_v32 = vld [vmem:[%s20412_s3 + $0x11a0] ss:$40 sps:$4 sm:$0xff]  }
 0x552   :  { %v10259_v57 = vpop.f32.mrf.mxu0  ;;  %v15293_v59 = vld [vmem:[%s20412_s3 + $0x11a4] ss:$40 sps:$4 sm:$0xff]  }
 0x553   :  { %10552 = vmatpush1.bf16.msra.mxu0 %v15222_v39  ;;  %v15288_v39 = vld [vmem:[%s20412_s3 + $0xd90] ss:$40 sps:$4 sm:$0xff]   ;;  %v15294_v57 = vld [vmem:[%s20412_s3 + $0xd40] ss:$40 sps:$4 sm:$0xff]  }
 0x554   :  { %v10260_v3 = vpop.f32.mrf.mxu0  ;;  %10599 = vmatpush1.bf16.msra.mxu1 %v15225_v45  ;;  %10553 = vmatprep.subr.bf16.mxu0 %v15230_v6  ;;  %v15296_v45 = vld [vmem:[%s20412_s3 + $0xd44] ss:$40 sps:$4 sm:$0xff]   ;;  %v15297_v6 = vld [vmem:[%s20414_s5 + $0x78] sm:$0xff]  }
 0x555   :  { %10600 = vmatprep.subr.bf16.mxu1 %v15233_v16  ;;  %v10673_v16 = vmax.f32 %v18860_v1, 0.0  ;;  %v15301_v3 = vld [vmem:[%s20412_s3 + $0xcf4] ss:$40 sps:$4 sm:$0xff]  }
 0x556   :  { %v15302_v1 = vld [vmem:[%s20414_s5 + $0x70] sm:$0xff]  }
 0x557   :  { %10554 = vmatpush1.bf16.msra.mxu0 %v15228_v7  ;;  %v15298_v7 = vld [vmem:[%s20414_s5 + $0x38] sm:$0xff]  }
 0x558   :  { %10601 = vmatpush1.bf16.msra.mxu1 %v15231_v50  ;;  %10555 = vmatprep.subr.bf16.mxu0 %v15236_v38  ;;  %v10683_v50 = vpack.c.bf16 %v10673_v16, %v10673_v16 }
 0x559   :  { %10602 = vmatprep.subr.bf16.mxu1 %v15239_v52  ;;  %v15299_v52 = vld [vmem:[%s20412_s3 + $0xcf0] ss:$40 sps:$4 sm:$0xff]  }
 0x55b   :  { %10556 = vmatpush1.bf16.msra.mxu0 %v15234_v15  ;;  %v15303_v15 = vld [vmem:[%s20414_s5 + $0x30] sm:$0xff]  }
 0x55c   :  { %10603 = vmatpush1.bf16.msra.mxu1 %v15237_v54  ;;  %10557 = vmatprep.subr.bf16.mxu0 %v15242_v0  ;;  %v15306_v54 = vld [vmem:[%s20412_s3 + $0xca4] ss:$40 sps:$4 sm:$0xff]  }
 0x55d   :  { %10604 = vmatprep.subr.bf16.mxu1 %v15245_v26 }
 0x55f   :  { %10558 = vmatpush1.bf16.msra.mxu0 %v15240_v47  ;;  %v15304_v47 = vld [vmem:[%s20412_s3 + $0xca0] ss:$40 sps:$4 sm:$0xff]  }
 0x560   :  { %10605 = vmatpush1.bf16.msra.mxu1 %v15243_v34  ;;  %10559 = vmatprep.subr.bf16.mxu0 %v15248_v61  ;;  %v15308_v34 = vld [vmem:[%s20414_s5 + $0x28] sm:$0xff]   ;;  %v15311_v61 = vld [vmem:[%s20412_s3 + $0x1654] ss:$40 sps:$4 sm:$0xff]  }
 0x561   :  { %10606 = vmatprep.subr.bf16.mxu1 %v15251_v11  ;;  %v15434_v11 = vld [vmem:[%s20413_s4] sm:$0xff] }
 0x563   :  { %10560 = vmatpush1.bf16.msra.mxu0 %v15246_v36  ;;  %v5624_v36 = vrot.slane %v15434_v11, %v701_v37  ;;  %v15313_v37 = vld [vmem:[%s20414_s5 + $0x20] sm:$0xff]  }
 0x564   :  { %10607 = vmatpush2.bf16.msra.mxu1 %v15249_v4  ;;  %10561 = vmatprep.subr.bf16.mxu0 %v15254_v5  ;;  %v15312_v5 = vld [vmem:[%s20414_s5 + $0x60] sm:$0xff]  }
 0x565   :  { %10608 = vmatprep.subr.bf16.mxu1 %v15257_v8  ;;  %v5628_v8 = vrot.slane %v15434_v11, %v705_v33  ;;  %v15362_v11 = vld [vmem:[%s20414_s5 + $0xd0] sm:$0xff]  }
 0x567   :  { %10562 = vmatpush1.bf16.msra.mxu0 %v15252_v9  ;;  %v15309_v9 = vld [vmem:[%s20412_s3 + $0x1650] ss:$40 sps:$4 sm:$0xff]  }
 0x568   :  { %10609 = vmatpush2.bf16.msra.mxu1 %v15255_v17  ;;  %10563 = vmatprep.subr.bf16.mxu0 %v15260_v42  ;;  %v15316_v17 = vld [vmem:[%s20412_s3 + $0x1604] ss:$40 sps:$4 sm:$0xff]   ;;  %v10297_v42 = vadd.f32 %v19834_v19, %v5624_v36  ;;  %v15318_v19 = vld [vmem:[%s20414_s5 + $0x18] sm:$0xff]  }
 0x569   :  { %10610 = vmatprep.subr.bf16.mxu1 %v15263_v28  ;;  %v10299_v28 = vadd.f32 %v19841_v13, %v5628_v8  ;;  %v15359_v36 = vld [vmem:[%s20412_s3 + $0x1830] ss:$40 sps:$4 sm:$0xff]   ;;  %v15367_v8 = vld [vmem:[%s20414_s5 + $0xc8] sm:$0xff]  }
 0x56b   :  { %10564 = vmatpush1.bf16.msra.mxu0 %v15258_v51 }
 0x56c   :  { %10611 = vmatpush2.bf16.msra.mxu1 %v15261_v12  ;;  %10565 = vmatprep.subr.bf16.mxu0 %v15266_v14  ;;  %v15314_v12 = vld [vmem:[%s20412_s3 + $0x1600] ss:$40 sps:$4 sm:$0xff]  }
 0x56d   :  { %10612 = vmatprep.subr.bf16.mxu1 %v15269_v48 }
 0x56f   :  { %10566 = vmatpush2.bf16.msra.mxu0 %v15264_v18 }
 0x570   :  { %10613 = vmatpush2.bf16.msra.mxu1 %v15267_v53  ;;  %10567 = vmatprep.subr.bf16.mxu0 %v15272_v43  ;;  %v15319_v53 = vld [vmem:[%s20412_s3 + $0x15b0] ss:$40 sps:$4 sm:$0xff]  }
 0x571   :  { %10614 = vmatprep.subr.bf16.mxu1 %v15275_v20 }
 0x573   :  { %10568 = vmatpush2.bf16.msra.mxu0 %v15270_v56  ;;  %v15323_v56 = vld [vmem:[%s20414_s5 + $0x10] sm:$0xff]  }
 0x574   :  { %10615 = vmatpush2.bf16.msra.mxu1 %v15273_v46  ;;  %10569 = vmatprep.subr.bf16.mxu0 %v15278_v62  ;;  %v15326_v46 = vld [vmem:[%s20412_s3 + $0x1564] ss:$40 sps:$4 sm:$0xff]  }
 0x575   :  { %10616 = vmatprep.subr.bf16.mxu1 %v15281_v22  ;;  %v15327_v62 = vld [vmem:[%s20414_s5 + $0x48] sm:$0xff]  }
 0x576   :  { %v15324_v22 = vld [vmem:[%s20412_s3 + $0x1560] ss:$40 sps:$4 sm:$0xff]  }
 0x577   :  { %10570 = vmatpush2.bf16.msra.mxu0 %v15276_v24  ;;  %v15328_v24 = vld [vmem:[%s20414_s5 + $0x8] sm:$0xff]  }
 0x578   :  { %10617 = vmatpush2.bf16.msra.mxu1 %v15279_v44  ;;  %10571 = vmatprep.subr.bf16.mxu0 %v15284_v58  ;;  %v15331_v44 = vld [vmem:[%s20412_s3 + $0x1514] ss:$40 sps:$4 sm:$0xff]   ;;  %v15332_v58 = vld [vmem:[%s20414_s5 + $0x40] sm:$0xff]  }
 0x579   :  { %10618 = vmatprep.subr.bf16.mxu1 %v15287_v25  ;;  %v15329_v25 = vld [vmem:[%s20412_s3 + $0x1510] ss:$40 sps:$4 sm:$0xff]  }
 0x57b   :  { %10572 = vmatpush2.bf16.msra.mxu0 %v15282_v60  ;;  %v15333_v60 = vld [vmem:[%s20414_s5] sm:$0xff]  }
 0x57c   :  { %10619 = vmatpush2.bf16.msra.mxu1 %v15285_v27  ;;  %10573 = vmatprep.subr.bf16.mxu0 %v15290_v55  ;;  %v15336_v27 = vld [vmem:[%s20412_s3 + $0x14c4] ss:$40 sps:$4 sm:$0xff]   ;;  %v10672_v55 = vmax.f32 %v18847_v2, 0.0  ;;  %v15341_v2 = vld [vmem:[%s20412_s3 + $0x1474] ss:$40 sps:$4 sm:$0xff]  }
 0x57d   :  { %10620 = vmatprep.subr.bf16.mxu1 %v15293_v59  ;;  %v15337_v59 = vld [vmem:[%s20414_s5 + $0xf8] sm:$0xff]  }
 0x57f   :  { %10574 = vmatpush2.bf16.msra.mxu0 %v15288_v39  ;;  %v10675_v39 = vmax.f32 %v19273_v49, 0.0  ;;  %v15342_v49 = vld [vmem:[%s20414_s5 + $0xf0] sm:$0xff]  }
 0x580   :  { %10621 = vmatpush2.bf16.msra.mxu1 %v15291_v32  ;;  %10575 = vmatprep.subr.bf16.mxu0 %v15296_v45  ;;  %v15334_v32 = vld [vmem:[%s20412_s3 + $0x14c0] ss:$40 sps:$4 sm:$0xff]   ;;  %v15338_v45 = vld [vmem:[%s20414_s5 + $0xb8] sm:$0xff]  }
 0x581   :  { %13073 = vmatprep.subr.bf16.mxu1 %v15297_v6  ;;  %v10682_v6 = vpack.c.bf16 %v10672_v55, %v10672_v55  ;;  %v10685_v16 = vpack.c.bf16 %v10675_v39, %v10675_v39  ;;  %v15392_v55 = vld [vmem:[%s20414_s5 + $0x1a0] sm:$0xff]   ;;  %v15395_v39 = vld [vmem:[%s20414_s5 + $0x1d8] sm:$0xff]  }
 0x583   :  { %v10378_v38 = vpop.f32.mrf.mxu1  ;;  %10576 = vmatpush2.bf16.msra.mxu0 %v15294_v57  ;;  %10623 = vmatmul.mubr.bf16.vlgmr.msra.gmra.mxu1 %v17989_v31  ;;  %v15307_v31 = vld [vmem:[%s20414_s5 + $0x68] sm:$0xff]   ;;  %v15339_v57 = vld [vmem:[%s20412_s3 + $0x1470] ss:$40 sps:$4 sm:$0xff]  }
 0x584   :  { %13074 = vmatpush3.bf16.msra.mxu1 %v15298_v7  ;;  %11371 = vmatprep.mubr.bf16.mxu1 %v10683_v50  ;;  %v15343_v7 = vld [vmem:[%s20414_s5 + $0xb0] sm:$0xff]   ;;  %v15344_v50 = vld [vmem:[%s20412_s3 + $0x1420] ss:$40 sps:$4 sm:$0xff]  }
 0x585   :  { %v10380_v0 = vpop.f32.mrf.mxu1  ;;  %10577 = vmatprep.subr.bf16.mxu0 %v15301_v3  ;;  %13075 = vmatprep.subr.bf16.mxu1 %v15302_v1  ;;  %v15346_v3 = vld [vmem:[%s20412_s3 + $0x1424] ss:$40 sps:$4 sm:$0xff]  }
 0x586   :  { %v15347_v1 = vld [vmem:[%s20414_s5 + $0xe8] sm:$0xff]  }
 0x587   :  { %v10382_v26 = vpop.f32.mrf.mxu1  ;;  %10578 = vmatpush2.bf16.msra.mxu0 %v15299_v52  ;;  %v15351_v52 = vld [vmem:[%s20412_s3 + $0x18d4] ss:$40 sps:$4 sm:$0xff]  }
 0x588   :  { %13076 = vmatpush3.bf16.msra.mxu1 %v15303_v15  ;;  %10579 = vmatprep.subr.bf16.mxu0 %v15306_v54  ;;  %v15352_v15 = vld [vmem:[%s20414_s5 + $0xe0] sm:$0xff]   ;;  %v15349_v54 = vld [vmem:[%s20412_s3 + $0x18d0] ss:$40 sps:$4 sm:$0xff]  }
 0x589   :  { %v10383_v4 = vpop.f32.mrf.mxu1  ;;  %13077 = vmatprep.subr.bf16.mxu1 %v15307_v31  ;;  %v15356_v31 = vld [vmem:[%s20412_s3 + $0x1884] ss:$40 sps:$4 sm:$0xff]   ;;  %v15357_v26 = vld [vmem:[%s20414_s5 + $0xd8] sm:$0xff]  }
 0x58a   :  { %v15363_v4 = vld [vmem:[%s20414_s5 + $0x90] sm:$0xff]  }
 0x58b   :  { %10580 = vmatpush2.bf16.msra.mxu0 %v15304_v47  ;;  %v15354_v47 = vld [vmem:[%s20412_s3 + $0x1880] ss:$40 sps:$4 sm:$0xff]  }
 0x58c   :  { %13078 = vmatpush3.bf16.msra.mxu1 %v15308_v34  ;;  %10631 = vmatprep.subr.bf16.mxu0 %v15311_v61  ;;  %v15358_v34 = vld [vmem:[%s20414_s5 + $0x98] sm:$0xff]  }
 0x58d   :  { %13079 = vmatprep.subr.bf16.mxu1 %v15312_v5  ;;  %v15361_v61 = vld [vmem:[%s20412_s3 + $0x1834] ss:$40 sps:$4 sm:$0xff]   ;;  %v15366_v5 = vld [vmem:[%s20412_s3 + $0x17e4] ss:$40 sps:$4 sm:$0xff]  }
 0x58e   :  { %v10337_v33 = vpop.f32.mrf.mxu0  ;;  %10582 = vmatmul.mubr.bf16.vlgmr.msra.gmra.mxu0 %v17984_v30  ;;  %v15321_v30 = vld [vmem:[%s20412_s3 + $0x15b4] ss:$40 sps:$4 sm:$0xff]  }
 0x58f   :  { %v10338_v51 = vadd.f32 %v10337_v33, %v10297_v42  ;;  %10632 = vmatpush1.bf16.msra.mxu0 %v15309_v9  ;;  %10663 = vmatprep.mubr.bf16.mxu0 %v18223_v23  ;;  %v15322_v23 = vld [vmem:[%s20414_s5 + $0x50] sm:$0xff]   ;;  %v15364_v9 = vld [vmem:[%s20412_s3 + $0x17e0] ss:$40 sps:$4 sm:$0xff]  }
 0x590   :  { %v10339_v14 = vpop.f32.mrf.mxu0  ;;  %13080 = vmatpush3.bf16.msra.mxu1 %v15313_v37  ;;  %10633 = vmatprep.subr.bf16.mxu0 %v15316_v17  ;;  %v15368_v37 = vld [vmem:[%s20414_s5 + $0x88] sm:$0xff]   ;;  %v15371_v17 = vld [vmem:[%s20412_s3 + $0x1794] ss:$40 sps:$4 sm:$0xff]   ;;  %v15372_v42 = vld [vmem:[%s20414_s5 + $0xc0] sm:$0xff]  }
 0x591   :  { %v10340_v13 = vadd.f32 %v10339_v14, %v10299_v28  ;;  %13081 = vmatprep.subr.bf16.mxu1 %v15317_v29  ;;  %v20095_v48 = vadd.f32 %v10378_v38, %v10338_v51  ;;  %v15348_v38 = vld [vmem:[%s20414_s5 + $0xa8] sm:$0xff]   ;;  %v15369_v29 = vld [vmem:[%s20412_s3 + $0x1790] ss:$40 sps:$4 sm:$0xff]   ;;  %v15373_v33 = vld [vmem:[%s20414_s5 + $0x80] sm:$0xff]   ;;  %v10674_v51 = vmax.f32 %v19267_v63, 0.0 }
 0x592   :  { %v10341_v18 = vpop.f32.mrf.mxu0  ;;  %v15376_v28 = vld [vmem:[%s20412_s3 + $0x1744] ss:$40 sps:$4 sm:$0xff]   ;;  %v15374_v14 = vld [vmem:[%s20412_s3 + $0x1740] ss:$40 sps:$4 sm:$0xff]   ;;  %v15381_v63 = vld [vmem:[%s20412_s3 + $0x16f4] ss:$40 sps:$4 sm:$0xff]  }
 0x593   :  { %10634 = vmatpush1.bf16.msra.mxu0 %v15314_v12  ;;  %v20100_v43 = vadd.f32 %v10380_v0, %v10340_v13  ;;  %v15353_v0 = vld [vmem:[%s20414_s5 + $0xa0] sm:$0xff]   ;;  %v15377_v12 = vld [vmem:[%s20414_s5 + $0x1f8] sm:$0xff]   ;;  %v15382_v13 = vld [vmem:[%s20414_s5 + $0x1f0] sm:$0xff]  }
 0x594   :  { %v10342_v20 = vpop.f32.mrf.mxu0  ;;  %13082 = vmatpush3.bf16.msra.mxu1 %v15318_v19  ;;  %10635 = vmatprep.subr.bf16.mxu0 %v15321_v30  ;;  %v15378_v19 = vld [vmem:[%s20414_s5 + $0x1b8] sm:$0xff]   ;;  %v10684_v30 = vpack.c.bf16 %v10674_v51, %v10674_v51  ;;  %v15417_v51 = vld [vmem:[%s20414_s5 + $0x270] sm:$0xff]  }
 0x595   :  { %13083 = vmatprep.subr.bf16.mxu1 %v15322_v23  ;;  %v15379_v18 = vld [vmem:[%s20412_s3 + $0x16f0] ss:$40 sps:$4 sm:$0xff]   ;;  %v15386_v20 = vld [vmem:[%s20412_s3 + $0x16a4] ss:$40 sps:$4 sm:$0xff]  }
 0x597   :  { %10636 = vmatpush1.bf16.msra.mxu0 %v15319_v53  ;;  %v15383_v53 = vld [vmem:[%s20414_s5 + $0x1b0] sm:$0xff]  }
 0x598   :  { %13084 = vmatpush3.bf16.msra.mxu1 %v15323_v56  ;;  %10637 = vmatprep.subr.bf16.mxu0 %v15326_v46  ;;  %v15387_v46 = vld [vmem:[%s20414_s5 + $0x1e8] sm:$0xff]  }
 0x599   :  { %13085 = vmatprep.subr.bf16.mxu1 %v15327_v62 }
 0x59b   :  { %10638 = vmatpush1.bf16.msra.mxu0 %v15324_v22  ;;  %v15384_v22 = vld [vmem:[%s20412_s3 + $0x16a0] ss:$40 sps:$4 sm:$0xff]  }
 0x59c   :  { %13086 = vmatpush3.bf16.msra.mxu1 %v15328_v24  ;;  %10639 = vmatprep.subr.bf16.mxu0 %v15331_v44  ;;  %v15388_v24 = vld [vmem:[%s20414_s5 + $0x1a8] sm:$0xff]   ;;  %v15389_v44 = vld [vmem:[%s20414_s5 + $0x178] sm:$0xff]  }
 0x59d   :  { %13087 = vmatprep.subr.bf16.mxu1 %v15332_v58  ;;  %v10677_v58 = vmax.f32 %v19885_v41, 0.0  ;;  %v15393_v41 = vld [vmem:[%s20414_s5 + $0x170] sm:$0xff]  }
 0x59f   :  { %10640 = vmatpush1.bf16.msra.mxu0 %v15329_v25 }
 0x5a0   :  { %13088 = vmatpush3.bf16.msra.mxu1 %v15333_v60  ;;  %10641 = vmatprep.subr.bf16.mxu0 %v15336_v27  ;;  %v15391_v60 = vld [vmem:[%s20414_s5 + $0x1e0] sm:$0xff]   ;;  %v15390_v27 = vld [vmem:[%s20414_s5 + $0x138] sm:$0xff]  }
 0x5a1   :  { %13095 = vmatprep.subr.bf16.mxu1 %v15337_v59  ;;  %v10687_v59 = vpack.c.bf16 %v10677_v58, %v10677_v58  ;;  %v15427_v58 = vld [vmem:[%s20414_s5 + $0x248] sm:$0xff]  }
 0x5a3   :  { %10642 = vmatpush1.bf16.msra.mxu0 %v15334_v32  ;;  %11372 = vmatmul.mubr.bf16.vlgmr.msra.gmra.mxu1 %v10682_v6 }
 0x5a4   :  { %13096 = vmatpush3.bf16.msra.mxu1 %v15338_v45  ;;  %11411 = vmatprep.mubr.bf16.mxu1 %v10685_v16  ;;  %v15394_v45 = vld [vmem:[%s20414_s5 + $0x130] sm:$0xff]  }
 0x5a5   :  { %10643 = vmatprep.subr.bf16.mxu0 %v15341_v2  ;;  %13097 = vmatprep.subr.bf16.mxu1 %v15342_v49  ;;  %v15396_v2 = vld [vmem:[%s20414_s5 + $0x198] sm:$0xff]   ;;  %v15397_v49 = vld [vmem:[%s20414_s5 + $0x168] sm:$0xff]  }
 0x5a7   :  { %10644 = vmatpush1.bf16.msra.mxu0 %v15339_v57 }
 0x5a8   :  { %13098 = vmatpush3.bf16.msra.mxu1 %v15343_v7  ;;  %10645 = vmatprep.subr.bf16.mxu0 %v15346_v3  ;;  %v15398_v3 = vld [vmem:[%s20414_s5 + $0x128] sm:$0xff]  }
 0x5a9   :  { %13099 = vmatprep.subr.bf16.mxu1 %v15347_v1 }
 0x5ab   :  { %10646 = vmatpush1.bf16.msra.mxu0 %v15344_v50  ;;  %v15400_v50 = vld [vmem:[%s20414_s5 + $0x190] sm:$0xff]  }
 0x5ac   :  { %13100 = vmatpush3.bf16.msra.mxu1 %v15348_v38  ;;  %10647 = vmatprep.subr.bf16.mxu0 %v15351_v52 }
 0x5ad   :  { %13101 = vmatprep.subr.bf16.mxu1 %v15352_v15  ;;  %v15403_v15 = vld [vmem:[%s20414_s5 + $0x1c8] sm:$0xff]  }
 0x5af   :  { %10648 = vmatpush2.bf16.msra.mxu0 %v15349_v54 }
 0x5b0   :  { %13102 = vmatpush3.bf16.msra.mxu1 %v15353_v0  ;;  %10649 = vmatprep.subr.bf16.mxu0 %v15356_v31  ;;  %v15402_v0 = vld [vmem:[%s20414_s5 + $0x120] sm:$0xff]   ;;  %v15404_v31 = vld [vmem:[%s20414_s5 + $0x188] sm:$0xff]  }
 0x5b1   :  { %13103 = vmatprep.subr.bf16.mxu1 %v15357_v26 }
 0x5b3   :  { %10650 = vmatpush2.bf16.msra.mxu0 %v15354_v47  ;;  %v15407_v47 = vld [vmem:[%s20414_s5 + $0x1c0] sm:$0xff]  }
 0x5b4   :  { %13104 = vmatpush3.bf16.msra.mxu1 %v15358_v34  ;;  %10651 = vmatprep.subr.bf16.mxu0 %v15361_v61  ;;  %v15406_v34 = vld [vmem:[%s20414_s5 + $0x118] sm:$0xff]   ;;  %v15408_v61 = vld [vmem:[%s20414_s5 + $0x180] sm:$0xff]  }
 0x5b5   :  { %13105 = vmatprep.subr.bf16.mxu1 %v15362_v11  ;;  %v15409_v11 = vld [vmem:[%s20414_s5 + $0x150] sm:$0xff]  }
 0x5b7   :  { %10652 = vmatpush2.bf16.msra.mxu0 %v15359_v36 }
 0x5b8   :  { %13106 = vmatpush3.bf16.msra.mxu1 %v15363_v4  ;;  %10653 = vmatprep.subr.bf16.mxu0 %v15366_v5  ;;  %v15410_v4 = vld [vmem:[%s20414_s5 + $0x110] sm:$0xff]   ;;  %v15411_v5 = vld [vmem:[%s20414_s5 + $0x148] sm:$0xff]  }
 0x5b9   :  { %13107 = vmatprep.subr.bf16.mxu1 %v15367_v8 }
 0x5bb   :  { %10654 = vmatpush2.bf16.msra.mxu0 %v15364_v9  ;;  %v15412_v9 = vld [vmem:[%s20414_s5 + $0x108] sm:$0xff]  }
 0x5bc   :  { %13108 = vmatpush3.bf16.msra.mxu1 %v15368_v37  ;;  %10655 = vmatprep.subr.bf16.mxu0 %v15371_v17  ;;  %v15413_v37 = vld [vmem:[%s20414_s5 + $0x140] sm:$0xff]  }
 0x5bd   :  { %13109 = vmatprep.subr.bf16.mxu1 %v15372_v42  ;;  %v15414_v17 = vld [vmem:[%s20414_s5 + $0x100] sm:$0xff]   ;;  %v10676_v42 = vmax.f32 %v19875_v21, 0.0  ;;  %v15418_v21 = vld [vmem:[%s20414_s5 + $0x230] sm:$0xff]  }
 0x5bf   :  { %10656 = vmatpush2.bf16.msra.mxu0 %v15369_v29  ;;  %v15415_v29 = vld [vmem:[%s20414_s5 + $0x278] sm:$0xff]  }
 0x5c0   :  { %13110 = vmatpush3.bf16.msra.mxu1 %v15373_v33  ;;  %10657 = vmatprep.subr.bf16.mxu0 %v15376_v28  ;;  %v15416_v33 = vld [vmem:[%s20414_s5 + $0x238] sm:$0xff]   ;;  %v10686_v28 = vpack.c.bf16 %v10676_v42, %v10676_v42 }
 0x5c1   :  { %13139 = vmatprep.subr.bf16.mxu1 %v15377_v12  ;;  %v15419_v12 = vld [vmem:[%s20414_s5 + $0x268] sm:$0xff]  }
 0x5c3   :  { %v20246_v23 = vpop.f32.mrf.mxu1  ;;  %10658 = vmatpush2.bf16.msra.mxu0 %v15374_v14  ;;  %11412 = vmatmul.mubr.bf16.vlgmr.msra.gmra.mxu1 %v10684_v30  ;;  %v15420_v14 = vld [vmem:[%s20414_s5 + $0x228] sm:$0xff]   ;;  %v15422_v30 = vld [vmem:[%s20414_s5 + $0x220] sm:$0xff]  }
 0x5c4   :  { %13140 = vmatpush3.bf16.msra.mxu1 %v15378_v19  ;;  %10659 = vmatprep.subr.bf16.mxu0 %v15381_v63  ;;  %v15421_v19 = vld [vmem:[%s20414_s5 + $0x260] sm:$0xff]  }
 0x5c5   :  { %v10462_v56 = vpop.f32.mrf.mxu1  ;;  %13141 = vmatprep.subr.bf16.mxu1 %v15382_v13 }
 0x5c7   :  { %v10464_v62 = vpop.f32.mrf.mxu1  ;;  %10660 = vmatpush2.bf16.msra.mxu0 %v15379_v18 }
 0x5c8   :  { %13142 = vmatpush3.bf16.msra.mxu1 %v15383_v53  ;;  %10661 = vmatprep.subr.bf16.mxu0 %v15386_v20  ;;  %v15424_v53 = vld [vmem:[%s20414_s5 + $0x218] sm:$0xff]   ;;  %v5594_v20 = vld [vmem:[%s20413_s4 + $0x8] sm:$0x3]  ;;  %v15426_v62 = vld [vmem:[%s20414_s5 + $0x210] sm:$0xff]  }
 0x5c9   :  { %v10465_v25 = vpop.f32.mrf.mxu1  ;;  %13143 = vmatprep.subr.bf16.mxu1 %v15387_v46  ;;  %v15425_v46 = vld [vmem:[%s20414_s5 + $0x250] sm:$0xff]  }
 0x5cb   :  { %10662 = vmatpush2.bf16.msra.mxu0 %v15384_v22  ;;  %v5632_v22 = vrot.slane %v5594_v20, %v16303_v35 }
 0x5cc   :  { %13144 = vmatpush3.bf16.msra.mxu1 %v15388_v24  ;;  %13117 = vmatprep.subr.bf16.mxu0 %v15389_v44  ;;  %v5636_v24 = vrot.slane %v5594_v20, %v16312_v40  ;;  %v15429_v40 = vld [vmem:[%s20414_s5 + $0x240] sm:$0xff]  }
 0x5cd   :  { %13145 = vmatprep.subr.bf16.mxu1 %v15391_v60  ;;  %v15428_v60 = vld [vmem:[%s20414_s5 + $0x208] sm:$0xff]  }
 0x5ce   :  { %v10419_v32 = vpop.f32.mrf.mxu0  ;;  %10664 = vmatmul.mubr.bf16.vlgmr.msra.gmra.mxu0 %v18225_v10  ;;  %v15399_v10 = vld [vmem:[%s20414_s5 + $0x1d0] sm:$0xff]  }
 0x5cf   :  { %13118 = vmatpush3.bf16.msra.mxu0 %v15390_v27  ;;  %11451 = vmatprep.mubr.bf16.mxu0 %v10687_v59  ;;  %v10420_v38 = vadd.f32 %v10419_v32, %v20095_v48  ;;  %v15405_v48 = vld [vmem:[%s20414_s5 + $0x158] sm:$0xff]  }
 0x5d0   :  { %v10421_v6 = vpop.f32.mrf.mxu0  ;;  %13146 = vmatpush3.bf16.msra.mxu1 %v15392_v55  ;;  %13119 = vmatprep.subr.bf16.mxu0 %v15393_v41 }
 0x5d1   :  { %v10422_v16 = vadd.f32 %v10421_v6, %v20100_v43  ;;  %13147 = vmatprep.subr.bf16.mxu1 %v15395_v39  ;;  %v15401_v43 = vld [vmem:[%s20414_s5 + $0x160] sm:$0xff]   ;;  %v10461_v26 = vadd.f32 %v20246_v23, %v10420_v38  ;;  %v15423_v23 = vld [vmem:[%s20414_s5 + $0x258] sm:$0xff]  }
 0x5d2   :  { %v10423_v57 = vpop.f32.mrf.mxu0  ;;  %v15430_v39 = vld [vmem:[%s20414_s5 + $0x200] sm:$0xff]  }
 0x5d3   :  { %v10463_v7 = vadd.f32 %v10462_v56, %v10422_v16  ;;  %13120 = vmatpush3.bf16.msra.mxu0 %v15394_v45  ;;  %v10678_v36 = vmax.f32 %v10461_v26, 0.0 }
 0x5d4   :  { %v10424_v1 = vpop.f32.mrf.mxu0  ;;  %13148 = vmatpush3.bf16.msra.mxu1 %v15396_v2  ;;  %13121 = vmatprep.subr.bf16.mxu0 %v15397_v49 }
 0x5d5   :  { %v10679_v52 = vmax.f32 %v10463_v7, 0.0  ;;  %13149 = vmatprep.subr.bf16.mxu1 %v15399_v10  ;;  %v10688_v8 = vpack.c.bf16 %v10678_v36, %v10678_v36 }
 0x5d7   :  { %v10689_v54 = vpack.c.bf16 %v10679_v52, %v10679_v52  ;;  %13122 = vmatpush3.bf16.msra.mxu0 %v15398_v3 }
 0x5d8   :  { %13150 = vmatpush3.bf16.msra.mxu1 %v15400_v50  ;;  %13123 = vmatprep.subr.bf16.mxu0 %v15401_v43 }
 0x5d9   :  { %11491 = vmatprep.mubr.bf16.mxu1 %v10689_v54  ;;  %13151 = vmatprep.subr.bf16.mxu1 %v15403_v15 }
 0x5db   :  { %13124 = vmatpush3.bf16.msra.mxu0 %v15402_v0 }
 0x5dc   :  { %13152 = vmatpush3.bf16.msra.mxu1 %v15404_v31  ;;  %13125 = vmatprep.subr.bf16.mxu0 %v15405_v48  ;;  %v12992_v31 = vld [vmem:[%s20415_s6] ss:$0 sm:$0xff] }
 0x5dd   :  { %13153 = vmatprep.subr.bf16.mxu1 %v15407_v47 }
 0x5df   :  { %13126 = vmatpush3.bf16.msra.mxu0 %v15406_v34 }
 0x5e0   :  { %13154 = vmatpush3.bf16.msra.mxu1 %v15408_v61  ;;  %13127 = vmatprep.subr.bf16.mxu0 %v15409_v11 }
 0x5e3   :  { %13128 = vmatpush3.bf16.msra.mxu0 %v15410_v4  ;;  %11492 = vmatmul.mubr.bf16.vlgmr.msra.gmra.mxu1 %v10688_v8 }
 0x5e4   :  { %13129 = vmatprep.subr.bf16.mxu0 %v15411_v5 }
 0x5e7   :  { %13130 = vmatpush3.bf16.msra.mxu0 %v15412_v9 }
 0x5e8   :  { %13131 = vmatprep.subr.bf16.mxu0 %v15413_v37 }
 0x5eb   :  { %13132 = vmatpush3.bf16.msra.mxu0 %v15414_v17 }
 0x5ec   :  { %13161 = vmatprep.subr.bf16.mxu0 %v15415_v29 }
 0x5ee   :  { %11452 = vmatmul.mubr.bf16.vlgmr.msra.gmra.mxu0 %v10686_v28 }
 0x5ef   :  { %13162 = vmatpush3.bf16.msra.mxu0 %v15416_v33 }
 0x5f0   :  { %13163 = vmatprep.subr.bf16.mxu0 %v15417_v51 }
 0x5f3   :  { %13164 = vmatpush3.bf16.msra.mxu0 %v15418_v21 }
 0x5f4   :  { %13165 = vmatprep.subr.bf16.mxu0 %v15419_v12 }
 0x5f7   :  { %13166 = vmatpush3.bf16.msra.mxu0 %v15420_v14 }
 0x5f8   :  { %13167 = vmatprep.subr.bf16.mxu0 %v15421_v19 }
 0x5fb   :  { %13168 = vmatpush3.bf16.msra.mxu0 %v15422_v30 }
 0x5fc   :  { %13169 = vmatprep.subr.bf16.mxu0 %v15423_v23 }
 0x5ff   :  { %13170 = vmatpush3.bf16.msra.mxu0 %v15424_v53 }
 0x600   :  { %13171 = vmatprep.subr.bf16.mxu0 %v15425_v46 }
 0x603   :  { %v10542_v63 = vpop.f32.mrf.mxu1  ;;  %13172 = vmatpush3.bf16.msra.mxu0 %v15426_v62 }
 0x604   :  { %13173 = vmatprep.subr.bf16.mxu0 %v15427_v58 }
 0x605   :  { %v10544_v13 = vpop.f32.mrf.mxu1 }
 0x607   :  { %v10546_v18 = vpop.f32.mrf.mxu1  ;;  %13174 = vmatpush3.bf16.msra.mxu0 %v15428_v60 }
 0x608   :  { %13175 = vmatprep.subr.bf16.mxu0 %v15429_v40 }
 0x609   :  { %v10547_v56 = vpop.f32.mrf.mxu1 }
 0x60b   :  { %13176 = vmatpush3.bf16.msra.mxu0 %v15430_v39 }
 0x60e   :  { %v10501_v44 = vpop.f32.mrf.mxu0 }
 0x60f   :  { %v10502_v25 = vadd.f32 %v10501_v44, %v5632_v22 }
 0x610   :  { %v10503_v27 = vpop.f32.mrf.mxu0 }
 0x611   :  { %v10504_v55 = vadd.f32 %v10503_v27, %v5636_v24  ;;  %v10543_v41 = vadd.f32 %v10542_v63, %v10502_v25 }
 0x612   :  { %v10505_v35 = vpop.f32.mrf.mxu0 }
 0x613   :  { %v10545_v59 = vadd.f32 %v10544_v13, %v10504_v55 }
 0x614   :  { %v10506_v32 = vpop.f32.mrf.mxu0 }
 0x643   :  { %v10624_v45 = vpop.f32.mrf.mxu1 }
 0x645   :  { %v10626_v6 = vpop.f32.mrf.mxu1 }
 0x647   :  { %v10628_v2 = vpop.f32.mrf.mxu1 }
 0x649   :  { %v10629_v49 = vpop.f32.mrf.mxu1 }
 0x64e   :  { %v10583_v16 = vpop.f32.mrf.mxu0 }
 0x64f   :  { %v10584_v10 = vadd.f32 %v10583_v16, %v10543_v41 }
 0x650   :  { %v10585_v57 = vpop.f32.mrf.mxu0 }
 0x651   :  { %v10586_v7 = vadd.f32 %v10585_v57, %v10545_v59  ;;  %v10625_v3 = vadd.f32 %v10624_v45, %v10584_v10 }
 0x652   :  { %v10587_v1 = vpop.f32.mrf.mxu0 }
 0x653   :  { %v10627_v50 = vadd.f32 %v10626_v6, %v10586_v7 }
 0x654   :  { %v10588_v43 = vpop.f32.mrf.mxu0 }
 0x663   :  { %v13089_v38 = vpop.f32.mrf.mxu1 }
 0x665   :  { %v13090_v52 = vpop.f32.mrf.mxu1 }
 0x666   :  { %v13091_v15 = vadd.f32 %v13090_v52, %v13089_v38 }
 0x667   :  { %v13092_v54 = vpop.f32.mrf.mxu1 }
 0x668   :  { %v11374_v47 = vadd.f32 %v13091_v15, %v12992_v31 }
 0x669   :  { %v13093_v0 = vpop.f32.mrf.mxu1 }
 0x683   :  { %v13111_v48 = vpop.f32.mrf.mxu1 }
 0x685   :  { %v13112_v26 = vpop.f32.mrf.mxu1 }
 0x686   :  { %v13113_v34 = vadd.f32 %v13112_v26, %v13111_v48 }
 0x687   :  { %v13114_v61 = vpop.f32.mrf.mxu1 }
 0x688   :  { %v11414_v11 = vadd.f32 %v13113_v34, %v11374_v47 }
 0x689   :  { %v13115_v36 = vpop.f32.mrf.mxu1 }
 0x68e   :  { %v10665_v4 = vpop.f32.mrf.mxu0 }
 0x68f   :  { %v10666_v5 = vadd.f32 %v10665_v4, %v10625_v3 }
 0x690   :  { %v10667_v8 = vpop.f32.mrf.mxu0 }
 0x691   :  { %v10668_v9 = vadd.f32 %v10667_v8, %v10627_v50  ;;  %v10680_v37 = vmax.f32 %v10666_v5, 0.0 }
 0x692   :  { %v10669_v17 = vpop.f32.mrf.mxu0 }
 0x693   :  { %v10681_v42 = vmax.f32 %v10668_v9, 0.0  ;;  %v10690_v28 = vpack.c.bf16 %v10680_v37, %v10680_v37 }
 0x694   :  { %v10670_v29 = vpop.f32.mrf.mxu0 }
 0x695   :  { %v10691_v33 = vpack.c.bf16 %v10681_v42, %v10681_v42 }
 0x697   :  { %11531 = vmatprep.mubr.bf16.mxu0 %v10691_v33 }
 0x698   :  { %11532 = vmatmul.mubr.bf16.vlgmr.msra.gmra.mxu0 %v10690_v28 }
 0x6a3   :  { %v13155_v51 = vpop.f32.mrf.mxu1 }
 0x6a5   :  { %v13156_v21 = vpop.f32.mrf.mxu1 }
 0x6a6   :  { %v13157_v12 = vadd.f32 %v13156_v21, %v13155_v51 }
 0x6a7   :  { %v13158_v14 = vpop.f32.mrf.mxu1 }
 0x6a9   :  { %v13159_v19 = vpop.f32.mrf.mxu1 }
 0x6ae   :  { %v13133_v63 = vpop.f32.mrf.mxu0 }
 0x6b0   :  { %v13134_v30 = vpop.f32.mrf.mxu0 }
 0x6b1   :  { %v13135_v13 = vadd.f32 %v13134_v30, %v13133_v63 }
 0x6b2   :  { %v13136_v23 = vpop.f32.mrf.mxu0 }
 0x6b3   :  { %v11454_v18 = vadd.f32 %v13135_v13, %v11414_v11 }
 0x6b4   :  { %v13137_v53 = vpop.f32.mrf.mxu0 }
 0x6b5   :  { %v11494_v20 = vadd.f32 %v13157_v12, %v11454_v18 }
 0x758   :  { %v13177_v56 = vpop.f32.mrf.mxu0 }
 0x75a   :  { %v13178_v46 = vpop.f32.mrf.mxu0 }
 0x75b   :  { %v13179_v62 = vadd.f32 %v13178_v46, %v13177_v56 }
 0x75c   :  { %v13180_v22 = vpop.f32.mrf.mxu0 }
 0x75d   :  { %v11534_v24 = vadd.f32 %v13179_v62, %v11494_v20 }
 0x75e   :  { %v13181_v44 = vpop.f32.mrf.mxu0 }
 0x75f   :  { %11539 = vst [vmem:[%s20416_s7] sm:$0xff] %v11534_v24 }

</bundles_post_ra>
